<compile_context>
chip_gen: v6e
topology: v6e:2x2x1
jax: 0.10.0
libtpu: 0.0.40
codegen_flags: <defaults>
</compile_context>

<pallas_src>
import functools
import math

import jax
import jax.numpy as jnp
from jax.experimental import pallas as pl
from jax.experimental.pallas import tpu as pltpu

# Flip to jnp.bfloat16 for higher MXU throughput (small numeric drift vs f32).
MM_DTYPE = jnp.float32

N_BLOCK_PARAMS = 9                                   # w1,b1,w2,b2,tw,tb,wa,w3,b3
N_WEIGHT_ARRAYS = 5 * N_BLOCK_PARAMS + 4 * 2 + 2     # 5 blocks, 2 down + 2 up samples, final


def _dot(a, b):
    return jnp.dot(a.astype(MM_DTYPE), b.astype(MM_DTYPE),
                   preferred_element_type=jnp.float32)


# ----------------------------------------------------------------------------
# In-kernel building blocks (all operate on channels-last (L, C) values)
# ----------------------------------------------------------------------------
def _conv3_same(parts, w_ref, bias, scr):
    """Conv1d(k=3, padding=1, stride=1).

    `parts` is [(value, channel_offset), ...]; the channel-concatenation of the
    parts is the conv input (skip concats folded in via weight splitting).
    w_ref has shape (3, Cin_total, Cout).  Shifted taps come from a zero-padded
    copy of the input staged in VMEM scratch (contiguous sublane slices), so
    there are no (L, L) selection matmuls and no O(L^2) footprint.
    """
    acc = None
    for x, off in parts:
        L, c = x.shape
        scr[0:1, 0:c] = jnp.zeros((1, c), jnp.float32)           # x[-1] = 0
        scr[L + 1:L + 2, 0:c] = jnp.zeros((1, c), jnp.float32)   # x[L]  = 0
        scr[1:L + 1, 0:c] = x
        for k in range(3):
            tap = scr[k:k + L, 0:c]                              # x[l + k - 1]
            term = _dot(tap, w_ref[k, off:off + c, :])
            acc = term if acc is None else acc + term
    if bias is not None:
        acc = acc + bias
    return acc


def _unet_block(parts, p, t_row, scr):
    """UNetBlock: relu(conv1) -> relu(conv2) -> + time_fc(t) -> spatial attn -> 1x1 conv."""
    w1, b1, w2, b2, tw, tb, wa, w3, b3 = p
    h = jnp.maximum(_conv3_same(parts, w1, b1[...], scr), 0.0)
    h = jnp.maximum(_conv3_same([(h, 0)], w2, b2[...], scr), 0.0)
    h = h + (_dot(t_row, tw[...]) + tb[...])                     # broadcast over L
    a = 1.0 / (1.0 + jnp.exp(-_conv3_same([(h, 0)], wa, None, scr)))  # sigmoid(conv)
    return _dot(h * a, w3[...]) + b3[...]                        # 1x1 conv


def _downsample(x, p, scr):
    """Conv1d(k=3, stride=2, padding=1): y[l] = sum_k x[2l + k - 1] @ W_k + b."""
    w, b = p
    L, C = x.shape
    Lo = L // 2
    scr[0:1, 0:C] = jnp.zeros((1, C), jnp.float32)               # x[-1] = 0
    scr[1:L + 1, 0:C] = x
    acc = None
    for k in range(3):
        tap = scr[pl.ds(k, Lo, stride=2), :]                     # strided sublane read
        tap = tap[:, 0:C]
        term = _dot(tap, w[k])
        acc = term if acc is None else acc + term
    return acc + b[...]


def _upsample(parts, p, scr):
    """ConvTranspose1d(k=2, stride=2): out[2l + k] = x[l] @ W_k + b (non-overlapping)."""
    w, b = p                                                     # (2, Cin_total, Cout)
    L = parts[0][0].shape[0]
    Co = w.shape[2]
    for k in range(2):
        acc = None
        for x, off in parts:
            c = x.shape[1]
            term = _dot(x, w[k, off:off + c, :])
            acc = term if acc is None else acc + term
        acc = acc + b[...]
        for l in range(L):                                       # interleave rows
            scr[2 * l + k:2 * l + k + 1, 0:Co] = acc[l:l + 1, :]
    return scr[0:2 * L, 0:Co]


# ----------------------------------------------------------------------------
# Fused kernel (one grid step == one batch element)
# ----------------------------------------------------------------------------
def unet_kernel(*refs):
    x_ref, temb_ref = refs[0], refs[1]
    wrefs = refs[2:2 + N_WEIGHT_ARRAYS]
    out_ref = refs[2 + N_WEIGHT_ARRAYS]
    scr = refs[3 + N_WEIGHT_ARRAYS]

    it = iter(wrefs)

    def take(n):
        return tuple(next(it) for _ in range(n))

    blk_d0, samp_d1 = take(9), take(2)
    blk_d2, samp_d3 = take(9), take(2)
    blk_mid = take(9)
    samp_u0, blk_u1 = take(2), take(9)
    samp_u2, blk_u3 = take(2), take(9)
    final_w, final_b = take(2)

    x = x_ref[0]             # (L, C_in), channels-last
    t_row = temb_ref[0]      # (1, T)

    # encoder --------------------------------------------------------------
    s0 = _unet_block([(x, 0)], blk_d0, t_row, scr)               # (L,   64)
    h1 = _downsample(s0, samp_d1, scr)                           # (L/2, 64)
    s2 = _unet_block([(h1, 0)], blk_d2, t_row, scr)              # (L/2, 128)
    h3 = _downsample(s2, samp_d3, scr)                           # (L/4, 128)

    # middle ---------------------------------------------------------------
    m = _unet_block([(h3, 0)], blk_mid, t_row, scr)              # (L/4, 128)

    # decoder: torch.cat([l, skip], dim=channels) folded into split weights --
    u = _upsample([(m, 0), (h3, 128)], samp_u0, scr)             # (L/2, 128)
    u = _unet_block([(u, 0), (s2, 128)], blk_u1, t_row, scr)     # (L/2, 64)
    u = _upsample([(u, 0), (h1, 64)], samp_u2, scr)              # (L,   64)
    u = _unet_block([(u, 0), (s0, 64)], blk_u3, t_row, scr)      # (L,   64)

    # final 1x1 conv (attention maps are intermediates and are not emitted)
    out_ref[0] = _dot(u, final_w[...]) + final_b[...]


# ----------------------------------------------------------------------------
# Host-side wrapper
# ----------------------------------------------------------------------------
def timestep_embedding(t, dim, max_period=10000):
    half = dim // 2
    freqs = jnp.exp(-math.log(max_period) * jnp.arange(half, dtype=jnp.float32) / half)
    args = t[:, None].astype(jnp.float32) * freqs[None]
    emb = jnp.concatenate([jnp.cos(args), jnp.sin(args)], axis=-1)
    if dim % 2:
        emb = jnp.concatenate([emb, jnp.zeros_like(emb[:, :1])], axis=-1)
    return emb


def _flatten_params(params):
    def blk(p):
        return [p["w1"], p["b1"], p["w2"], p["b2"], p["tw"], p["tb"],
                p["wa"], p["w3"], p["b3"]]

    leaves = []
    leaves += blk(params["down0"])
    leaves += [params["down1"]["w"], params["down1"]["b"]]
    leaves += blk(params["down2"])
    leaves += [params["down3"]["w"], params["down3"]["b"]]
    leaves += blk(params["middle"])
    leaves += [params["up0"]["w"], params["up0"]["b"]]
    leaves += blk(params["up1"])
    leaves += [params["up2"]["w"], params["up2"]["b"]]
    leaves += blk(params["up3"])
    leaves += [params["final"]["w"], params["final"]["b"]]
    assert len(leaves) == N_WEIGHT_ARRAYS
    return leaves


def unet_forward(params, x, t, *, time_embed_dim):
    """x: (B, L, C_in) channels-last; returns (B, L, C_out)."""
    B, L, Cin = x.shape
    if L % 4 != 0:
        raise ValueError("sequence length must be divisible by 4 (two stride-2 downsamples)")
    t_emb = timestep_embedding(t, time_embed_dim)[:, None, :]   # (B, 1, T), static T
    leaves = _flatten_params(params)
    out_ch = params["final"]["w"].shape[1]
    T = t_emb.shape[2]

    def full_spec(a):
        nd = a.ndim
        return pl.BlockSpec(a.shape, lambda b, _nd=nd: (0,) * _nd)

    in_specs = ([pl.BlockSpec((1, L, Cin), lambda b: (b, 0, 0)),
                 pl.BlockSpec((1, 1, T), lambda b: (b, 0, 0))]
                + [full_spec(a) for a in leaves])

    return pl.pallas_call(
        unet_kernel,
        out_shape=jax.ShapeDtypeStruct((B, L, out_ch), jnp.float32),
        grid=(B,),
        in_specs=in_specs,
        out_specs=pl.BlockSpec((1, L, out_ch), lambda b: (b, 0, 0)),
        # one reusable padded staging buffer (max channel width per conv part is 128)
        scratch_shapes=[pltpu.VMEM((L + 2, 128), jnp.float32)],
        compiler_params=pltpu.CompilerParams(
            dimension_semantics=("parallel",)),
    )(x, t_emb, *leaves)


# ----------------------------------------------------------------------------
# Deterministic synthetic parameters
# ----------------------------------------------------------------------------
def init_unet_block(key, cin, cout, tdim, scale=0.05):
    ks = jax.random.split(key, 9)
    return dict(
        w1=jax.random.normal(ks[0], (3, cin, cout), jnp.float32) * scale,
        b1=jax.random.normal(ks[1], (1, cout), jnp.float32) * scale,
        w2=jax.random.normal(ks[2], (3, cout, cout), jnp.float32) * scale,
        b2=jax.random.normal(ks[3], (1, cout), jnp.float32) * scale,
        tw=jax.random.normal(ks[4], (tdim, cout), jnp.float32) * scale,
        tb=jax.random.normal(ks[5], (1, cout), jnp.float32) * scale,
        wa=jax.random.normal(ks[6], (3, cout, cout), jnp.float32) * scale,
        w3=jax.random.normal(ks[7], (cout, cout), jnp.float32) * scale,
        b3=jax.random.normal(ks[8], (1, cout), jnp.float32) * scale,
    )


def init_conv(key, shape_w, cout, scale=0.05):
    kw, kb = jax.random.split(key)
    return dict(w=jax.random.normal(kw, shape_w, jnp.float32) * scale,
                b=jax.random.normal(kb, (1, cout), jnp.float32) * scale)


def init_unet(key, in_ch, out_ch, tdim):
    ks = jax.random.split(key, 10)
    return dict(
        down0=init_unet_block(ks[0], in_ch, 64, tdim),
        down1=init_conv(ks[1], (3, 64, 64), 64),          # Downsample(64)
        down2=init_unet_block(ks[2], 64, 128, tdim),
        down3=init_conv(ks[3], (3, 128, 128), 128),       # Downsample(128)
        middle=init_unet_block(ks[4], 128, 128, tdim),
        up0=init_conv(ks[5], (2, 256, 128), 128),         # Upsample(256)
        up1=init_unet_block(ks[6], 256, 64, tdim),
        up2=init_conv(ks[7], (2, 128, 64), 64),           # Upsample(128)
        up3=init_unet_block(ks[8], 128, 64, tdim),
        final=init_conv(ks[9], (64, out_ch), out_ch),     # Conv1d(64, out_ch, 1)
    )


if __name__ == "__main__":
    in_ch, out_ch, tdim = 4, 4, 32
    B, L = 2, 16
    key = jax.random.PRNGKey(0)
    kx, kp = jax.random.split(key)
    x = jax.random.normal(kx, (B, L, in_ch), jnp.float32)
    t = jnp.array([1.0, 25.0], jnp.float32)

    params = init_unet(kp, in_ch, out_ch, tdim)
    fwd = jax.jit(functools.partial(unet_forward, time_embed_dim=tdim))
    out = fwd(params, x, t)
    jax.block_until_ready(out)
    assert out.shape == (B, L, out_ch), out.shape
    assert bool(jnp.all(jnp.isfinite(out)))
    print("KERNEL_OK")
</pallas_src>

<mosaic_0001>
module attributes {stable_mosaic.version = 11 : i64} {
  func.func @unet_kernel(%arg0: i32, %arg1: memref<1x16x4xf32, #tpu.memory_space<vmem>>, %arg2: memref<1x1x32xf32, #tpu.memory_space<vmem>>, %arg3: memref<3x4x64xf32, #tpu.memory_space<vmem>>, %arg4: memref<1x64xf32, #tpu.memory_space<vmem>>, %arg5: memref<3x64x64xf32, #tpu.memory_space<vmem>>, %arg6: memref<1x64xf32, #tpu.memory_space<vmem>>, %arg7: memref<32x64xf32, #tpu.memory_space<vmem>>, %arg8: memref<1x64xf32, #tpu.memory_space<vmem>>, %arg9: memref<3x64x64xf32, #tpu.memory_space<vmem>>, %arg10: memref<64x64xf32, #tpu.memory_space<vmem>>, %arg11: memref<1x64xf32, #tpu.memory_space<vmem>>, %arg12: memref<3x64x64xf32, #tpu.memory_space<vmem>>, %arg13: memref<1x64xf32, #tpu.memory_space<vmem>>, %arg14: memref<3x64x128xf32, #tpu.memory_space<vmem>>, %arg15: memref<1x128xf32, #tpu.memory_space<vmem>>, %arg16: memref<3x128x128xf32, #tpu.memory_space<vmem>>, %arg17: memref<1x128xf32, #tpu.memory_space<vmem>>, %arg18: memref<32x128xf32, #tpu.memory_space<vmem>>, %arg19: memref<1x128xf32, #tpu.memory_space<vmem>>, %arg20: memref<3x128x128xf32, #tpu.memory_space<vmem>>, %arg21: memref<128x128xf32, #tpu.memory_space<vmem>>, %arg22: memref<1x128xf32, #tpu.memory_space<vmem>>, %arg23: memref<3x128x128xf32, #tpu.memory_space<vmem>>, %arg24: memref<1x128xf32, #tpu.memory_space<vmem>>, %arg25: memref<3x128x128xf32, #tpu.memory_space<vmem>>, %arg26: memref<1x128xf32, #tpu.memory_space<vmem>>, %arg27: memref<3x128x128xf32, #tpu.memory_space<vmem>>, %arg28: memref<1x128xf32, #tpu.memory_space<vmem>>, %arg29: memref<32x128xf32, #tpu.memory_space<vmem>>, %arg30: memref<1x128xf32, #tpu.memory_space<vmem>>, %arg31: memref<3x128x128xf32, #tpu.memory_space<vmem>>, %arg32: memref<128x128xf32, #tpu.memory_space<vmem>>, %arg33: memref<1x128xf32, #tpu.memory_space<vmem>>, %arg34: memref<2x256x128xf32, #tpu.memory_space<vmem>>, %arg35: memref<1x128xf32, #tpu.memory_space<vmem>>, %arg36: memref<3x256x64xf32, #tpu.memory_space<vmem>>, %arg37: memref<1x64xf32, #tpu.memory_space<vmem>>, %arg38: memref<3x64x64xf32, #tpu.memory_space<vmem>>, %arg39: memref<1x64xf32, #tpu.memory_space<vmem>>, %arg40: memref<32x64xf32, #tpu.memory_space<vmem>>, %arg41: memref<1x64xf32, #tpu.memory_space<vmem>>, %arg42: memref<3x64x64xf32, #tpu.memory_space<vmem>>, %arg43: memref<64x64xf32, #tpu.memory_space<vmem>>, %arg44: memref<1x64xf32, #tpu.memory_space<vmem>>, %arg45: memref<2x128x64xf32, #tpu.memory_space<vmem>>, %arg46: memref<1x64xf32, #tpu.memory_space<vmem>>, %arg47: memref<3x128x64xf32, #tpu.memory_space<vmem>>, %arg48: memref<1x64xf32, #tpu.memory_space<vmem>>, %arg49: memref<3x64x64xf32, #tpu.memory_space<vmem>>, %arg50: memref<1x64xf32, #tpu.memory_space<vmem>>, %arg51: memref<32x64xf32, #tpu.memory_space<vmem>>, %arg52: memref<1x64xf32, #tpu.memory_space<vmem>>, %arg53: memref<3x64x64xf32, #tpu.memory_space<vmem>>, %arg54: memref<64x64xf32, #tpu.memory_space<vmem>>, %arg55: memref<1x64xf32, #tpu.memory_space<vmem>>, %arg56: memref<64x4xf32, #tpu.memory_space<vmem>>, %arg57: memref<1x4xf32, #tpu.memory_space<vmem>>, %arg58: memref<1x16x4xf32, #tpu.memory_space<vmem>>, %arg59: memref<18x128xf32, #tpu.memory_space<vmem>>) attributes {dimension_semantics = [#tpu.dimension_semantics<parallel>], iteration_bounds = array<i64: 2>, scalar_prefetch = 0 : i64, scratch_operands = 1 : i64, tpu.core_type = #tpu.core_type<tc>, window_params = [{transform_indices = @transform_0, window_bounds = array<i64: 1, 16, 4>}, {transform_indices = @transform_1, window_bounds = array<i64: 1, 1, 32>}, {pipeline_mode = #tpu.pipeline_mode<synchronous>, transform_indices = @transform_2, window_bounds = array<i64: 3, 4, 64>}, {pipeline_mode = #tpu.pipeline_mode<synchronous>, transform_indices = @transform_3, window_bounds = array<i64: 1, 64>}, {pipeline_mode = #tpu.pipeline_mode<synchronous>, transform_indices = @transform_4, window_bounds = array<i64: 3, 64, 64>}, {pipeline_mode = #tpu.pipeline_mode<synchronous>, transform_indices = @transform_5, window_bounds = array<i64: 1, 64>}, {pipeline_mode = #tpu.pipeline_mode<synchronous>, transform_indices = @transform_6, window_bounds = array<i64: 32, 64>}, {pipeline_mode = #tpu.pipeline_mode<synchronous>, transform_indices = @transform_7, window_bounds = array<i64: 1, 64>}, {pipeline_mode = #tpu.pipeline_mode<synchronous>, transform_indices = @transform_8, window_bounds = array<i64: 3, 64, 64>}, {pipeline_mode = #tpu.pipeline_mode<synchronous>, transform_indices = @transform_9, window_bounds = array<i64: 64, 64>}, {pipeline_mode = #tpu.pipeline_mode<synchronous>, transform_indices = @transform_10, window_bounds = array<i64: 1, 64>}, {pipeline_mode = #tpu.pipeline_mode<synchronous>, transform_indices = @transform_11, window_bounds = array<i64: 3, 64, 64>}, {pipeline_mode = #tpu.pipeline_mode<synchronous>, transform_indices = @transform_12, window_bounds = array<i64: 1, 64>}, {pipeline_mode = #tpu.pipeline_mode<synchronous>, transform_indices = @transform_13, window_bounds = array<i64: 3, 64, 128>}, {pipeline_mode = #tpu.pipeline_mode<synchronous>, transform_indices = @transform_14, window_bounds = array<i64: 1, 128>}, {pipeline_mode = #tpu.pipeline_mode<synchronous>, transform_indices = @transform_15, window_bounds = array<i64: 3, 128, 128>}, {pipeline_mode = #tpu.pipeline_mode<synchronous>, transform_indices = @transform_16, window_bounds = array<i64: 1, 128>}, {pipeline_mode = #tpu.pipeline_mode<synchronous>, transform_indices = @transform_17, window_bounds = array<i64: 32, 128>}, {pipeline_mode = #tpu.pipeline_mode<synchronous>, transform_indices = @transform_18, window_bounds = array<i64: 1, 128>}, {pipeline_mode = #tpu.pipeline_mode<synchronous>, transform_indices = @transform_19, window_bounds = array<i64: 3, 128, 128>}, {pipeline_mode = #tpu.pipeline_mode<synchronous>, transform_indices = @transform_20, window_bounds = array<i64: 128, 128>}, {pipeline_mode = #tpu.pipeline_mode<synchronous>, transform_indices = @transform_21, window_bounds = array<i64: 1, 128>}, {pipeline_mode = #tpu.pipeline_mode<synchronous>, transform_indices = @transform_22, window_bounds = array<i64: 3, 128, 128>}, {pipeline_mode = #tpu.pipeline_mode<synchronous>, transform_indices = @transform_23, window_bounds = array<i64: 1, 128>}, {pipeline_mode = #tpu.pipeline_mode<synchronous>, transform_indices = @transform_24, window_bounds = array<i64: 3, 128, 128>}, {pipeline_mode = #tpu.pipeline_mode<synchronous>, transform_indices = @transform_25, window_bounds = array<i64: 1, 128>}, {pipeline_mode = #tpu.pipeline_mode<synchronous>, transform_indices = @transform_26, window_bounds = array<i64: 3, 128, 128>}, {pipeline_mode = #tpu.pipeline_mode<synchronous>, transform_indices = @transform_27, window_bounds = array<i64: 1, 128>}, {pipeline_mode = #tpu.pipeline_mode<synchronous>, transform_indices = @transform_28, window_bounds = array<i64: 32, 128>}, {pipeline_mode = #tpu.pipeline_mode<synchronous>, transform_indices = @transform_29, window_bounds = array<i64: 1, 128>}, {pipeline_mode = #tpu.pipeline_mode<synchronous>, transform_indices = @transform_30, window_bounds = array<i64: 3, 128, 128>}, {pipeline_mode = #tpu.pipeline_mode<synchronous>, transform_indices = @transform_31, window_bounds = array<i64: 128, 128>}, {pipeline_mode = #tpu.pipeline_mode<synchronous>, transform_indices = @transform_32, window_bounds = array<i64: 1, 128>}, {pipeline_mode = #tpu.pipeline_mode<synchronous>, transform_indices = @transform_33, window_bounds = array<i64: 2, 256, 128>}, {pipeline_mode = #tpu.pipeline_mode<synchronous>, transform_indices = @transform_34, window_bounds = array<i64: 1, 128>}, {pipeline_mode = #tpu.pipeline_mode<synchronous>, transform_indices = @transform_35, window_bounds = array<i64: 3, 256, 64>}, {pipeline_mode = #tpu.pipeline_mode<synchronous>, transform_indices = @transform_36, window_bounds = array<i64: 1, 64>}, {pipeline_mode = #tpu.pipeline_mode<synchronous>, transform_indices = @transform_37, window_bounds = array<i64: 3, 64, 64>}, {pipeline_mode = #tpu.pipeline_mode<synchronous>, transform_indices = @transform_38, window_bounds = array<i64: 1, 64>}, {pipeline_mode = #tpu.pipeline_mode<synchronous>, transform_indices = @transform_39, window_bounds = array<i64: 32, 64>}, {pipeline_mode = #tpu.pipeline_mode<synchronous>, transform_indices = @transform_40, window_bounds = array<i64: 1, 64>}, {pipeline_mode = #tpu.pipeline_mode<synchronous>, transform_indices = @transform_41, window_bounds = array<i64: 3, 64, 64>}, {pipeline_mode = #tpu.pipeline_mode<synchronous>, transform_indices = @transform_42, window_bounds = array<i64: 64, 64>}, {pipeline_mode = #tpu.pipeline_mode<synchronous>, transform_indices = @transform_43, window_bounds = array<i64: 1, 64>}, {pipeline_mode = #tpu.pipeline_mode<synchronous>, transform_indices = @transform_44, window_bounds = array<i64: 2, 128, 64>}, {pipeline_mode = #tpu.pipeline_mode<synchronous>, transform_indices = @transform_45, window_bounds = array<i64: 1, 64>}, {pipeline_mode = #tpu.pipeline_mode<synchronous>, transform_indices = @transform_46, window_bounds = array<i64: 3, 128, 64>}, {pipeline_mode = #tpu.pipeline_mode<synchronous>, transform_indices = @transform_47, window_bounds = array<i64: 1, 64>}, {pipeline_mode = #tpu.pipeline_mode<synchronous>, transform_indices = @transform_48, window_bounds = array<i64: 3, 64, 64>}, {pipeline_mode = #tpu.pipeline_mode<synchronous>, transform_indices = @transform_49, window_bounds = array<i64: 1, 64>}, {pipeline_mode = #tpu.pipeline_mode<synchronous>, transform_indices = @transform_50, window_bounds = array<i64: 32, 64>}, {pipeline_mode = #tpu.pipeline_mode<synchronous>, transform_indices = @transform_51, window_bounds = array<i64: 1, 64>}, {pipeline_mode = #tpu.pipeline_mode<synchronous>, transform_indices = @transform_52, window_bounds = array<i64: 3, 64, 64>}, {pipeline_mode = #tpu.pipeline_mode<synchronous>, transform_indices = @transform_53, window_bounds = array<i64: 64, 64>}, {pipeline_mode = #tpu.pipeline_mode<synchronous>, transform_indices = @transform_54, window_bounds = array<i64: 1, 64>}, {pipeline_mode = #tpu.pipeline_mode<synchronous>, transform_indices = @transform_55, window_bounds = array<i64: 64, 4>}, {pipeline_mode = #tpu.pipeline_mode<synchronous>, transform_indices = @transform_56, window_bounds = array<i64: 1, 4>}, {transform_indices = @transform_57, window_bounds = array<i64: 1, 16, 4>}]} {
    %c0 = arith.constant 0 : index
    %c0_0 = arith.constant 0 : index
    %c0_1 = arith.constant 0 : index
    %0 = vector.load %arg1[%c0, %c0_0, %c0_1] : memref<1x16x4xf32, #tpu.memory_space<vmem>>, vector<1x16x4xf32>
    %1 = vector.shape_cast %0 : vector<1x16x4xf32> to vector<16x4xf32>
    %c0_2 = arith.constant 0 : index
    %c0_3 = arith.constant 0 : index
    %c0_4 = arith.constant 0 : index
    %2 = vector.load %arg2[%c0_2, %c0_3, %c0_4] : memref<1x1x32xf32, #tpu.memory_space<vmem>>, vector<1x1x32xf32>
    %3 = vector.shape_cast %2 : vector<1x1x32xf32> to vector<1x32xf32>
    %c0_5 = arith.constant 0 : index
    %c0_6 = arith.constant 0 : index
    %4 = vector.load %arg4[%c0_5, %c0_6] : memref<1x64xf32, #tpu.memory_space<vmem>>, vector<1x64xf32>
    %cst = arith.constant 0.000000e+00 : f32
    %5 = vector.broadcast %cst : f32 to vector<1x4xf32>
    %c0_7 = arith.constant 0 : index
    %c0_8 = arith.constant 0 : index
    %6 = vector.load %arg59[%c0_7, %c0_8] : memref<18x128xf32, #tpu.memory_space<vmem>>, vector<1x4xf32>
    tpu.vector_store %arg59[%c0_7, %c0_8], %5 {strides = array<i32>} : memref<18x128xf32, #tpu.memory_space<vmem>>, vector<1x4xf32>,
    %cst_9 = arith.constant 0.000000e+00 : f32
    %7 = vector.broadcast %cst_9 : f32 to vector<1x4xf32>
    %c17 = arith.constant 17 : index
    %c0_10 = arith.constant 0 : index
    %8 = vector.load %arg59[%c17, %c0_10] : memref<18x128xf32, #tpu.memory_space<vmem>>, vector<1x4xf32>
    tpu.vector_store %arg59[%c17, %c0_10], %7 {strides = array<i32>} : memref<18x128xf32, #tpu.memory_space<vmem>>, vector<1x4xf32>,
    %c1 = arith.constant 1 : index
    %c0_11 = arith.constant 0 : index
    %9 = vector.load %arg59[%c1, %c0_11] : memref<18x128xf32, #tpu.memory_space<vmem>>, vector<16x4xf32>
    tpu.vector_store %arg59[%c1, %c0_11], %1 {strides = array<i32>} : memref<18x128xf32, #tpu.memory_space<vmem>>, vector<16x4xf32>,
    %c0_12 = arith.constant 0 : index
    %c0_13 = arith.constant 0 : index
    %10 = vector.load %arg59[%c0_12, %c0_13] : memref<18x128xf32, #tpu.memory_space<vmem>>, vector<16x4xf32>
    %c0_14 = arith.constant 0 : index
    %c0_15 = arith.constant 0 : index
    %c0_16 = arith.constant 0 : index
    %11 = vector.load %arg3[%c0_14, %c0_15, %c0_16] : memref<3x4x64xf32, #tpu.memory_space<vmem>>, vector<1x4x64xf32>
    %12 = vector.shape_cast %11 : vector<1x4x64xf32> to vector<4x64xf32>
    %cst_17 = arith.constant dense<0.000000e+00> : vector<16x64xf32>
    %13 = tpu.matmul %10, %12, %cst_17 {dimension_numbers = #tpu.dot_dimension_numbers<[1], [0], [0], [1], [0, 0, 1, 1], [], []>} : vector<16x4xf32>, vector<4x64xf32>, vector<16x64xf32> -> vector<16x64xf32>
    %c1_18 = arith.constant 1 : index
    %c0_19 = arith.constant 0 : index
    %14 = vector.load %arg59[%c1_18, %c0_19] : memref<18x128xf32, #tpu.memory_space<vmem>>, vector<16x4xf32>
    %c1_20 = arith.constant 1 : index
    %c0_21 = arith.constant 0 : index
    %c0_22 = arith.constant 0 : index
    %15 = vector.load %arg3[%c1_20, %c0_21, %c0_22] : memref<3x4x64xf32, #tpu.memory_space<vmem>>, vector<1x4x64xf32>
    %16 = vector.shape_cast %15 : vector<1x4x64xf32> to vector<4x64xf32>
    %cst_23 = arith.constant dense<0.000000e+00> : vector<16x64xf32>
    %17 = tpu.matmul %14, %16, %cst_23 {dimension_numbers = #tpu.dot_dimension_numbers<[1], [0], [0], [1], [0, 0, 1, 1], [], []>} : vector<16x4xf32>, vector<4x64xf32>, vector<16x64xf32> -> vector<16x64xf32>
    %18 = arith.addf %13, %17 : vector<16x64xf32>
    %c2 = arith.constant 2 : index
    %c0_24 = arith.constant 0 : index
    %19 = vector.load %arg59[%c2, %c0_24] : memref<18x128xf32, #tpu.memory_space<vmem>>, vector<16x4xf32>
    %c2_25 = arith.constant 2 : index
    %c0_26 = arith.constant 0 : index
    %c0_27 = arith.constant 0 : index
    %20 = vector.load %arg3[%c2_25, %c0_26, %c0_27] : memref<3x4x64xf32, #tpu.memory_space<vmem>>, vector<1x4x64xf32>
    %21 = vector.shape_cast %20 : vector<1x4x64xf32> to vector<4x64xf32>
    %cst_28 = arith.constant dense<0.000000e+00> : vector<16x64xf32>
    %22 = tpu.matmul %19, %21, %cst_28 {dimension_numbers = #tpu.dot_dimension_numbers<[1], [0], [0], [1], [0, 0, 1, 1], [], []>} : vector<16x4xf32>, vector<4x64xf32>, vector<16x64xf32> -> vector<16x64xf32>
    %23 = arith.addf %18, %22 : vector<16x64xf32>
    %24 = vector.broadcast %4 : vector<1x64xf32> to vector<16x64xf32>
    %25 = arith.addf %23, %24 : vector<16x64xf32>
    %cst_29 = arith.constant 0.000000e+00 : f32
    %26 = vector.broadcast %cst_29 : f32 to vector<16x64xf32>
    %27 = arith.maximumf %25, %26 : vector<16x64xf32>
    %c0_30 = arith.constant 0 : index
    %c0_31 = arith.constant 0 : index
    %28 = vector.load %arg6[%c0_30, %c0_31] : memref<1x64xf32, #tpu.memory_space<vmem>>, vector<1x64xf32>
    %cst_32 = arith.constant 0.000000e+00 : f32
    %29 = vector.broadcast %cst_32 : f32 to vector<1x64xf32>
    %c0_33 = arith.constant 0 : index
    %c0_34 = arith.constant 0 : index
    %30 = vector.load %arg59[%c0_33, %c0_34] : memref<18x128xf32, #tpu.memory_space<vmem>>, vector<1x64xf32>
    tpu.vector_store %arg59[%c0_33, %c0_34], %29 {strides = array<i32>} : memref<18x128xf32, #tpu.memory_space<vmem>>, vector<1x64xf32>,
    %cst_35 = arith.constant 0.000000e+00 : f32
    %31 = vector.broadcast %cst_35 : f32 to vector<1x64xf32>
    %c17_36 = arith.constant 17 : index
    %c0_37 = arith.constant 0 : index
    %32 = vector.load %arg59[%c17_36, %c0_37] : memref<18x128xf32, #tpu.memory_space<vmem>>, vector<1x64xf32>
    tpu.vector_store %arg59[%c17_36, %c0_37], %31 {strides = array<i32>} : memref<18x128xf32, #tpu.memory_space<vmem>>, vector<1x64xf32>,
    %c1_38 = arith.constant 1 : index
    %c0_39 = arith.constant 0 : index
    %33 = vector.load %arg59[%c1_38, %c0_39] : memref<18x128xf32, #tpu.memory_space<vmem>>, vector<16x64xf32>
    tpu.vector_store %arg59[%c1_38, %c0_39], %27 {strides = array<i32>} : memref<18x128xf32, #tpu.memory_space<vmem>>, vector<16x64xf32>,
    %c0_40 = arith.constant 0 : index
    %c0_41 = arith.constant 0 : index
    %34 = vector.load %arg59[%c0_40, %c0_41] : memref<18x128xf32, #tpu.memory_space<vmem>>, vector<16x64xf32>
    %c0_42 = arith.constant 0 : index
    %c0_43 = arith.constant 0 : index
    %c0_44 = arith.constant 0 : index
    %35 = vector.load %arg5[%c0_42, %c0_43, %c0_44] : memref<3x64x64xf32, #tpu.memory_space<vmem>>, vector<1x64x64xf32>
    %36 = vector.shape_cast %35 : vector<1x64x64xf32> to vector<64x64xf32>
    %cst_45 = arith.constant dense<0.000000e+00> : vector<16x64xf32>
    %37 = tpu.matmul %34, %36, %cst_45 {dimension_numbers = #tpu.dot_dimension_numbers<[1], [0], [0], [1], [0, 0, 1, 1], [], []>} : vector<16x64xf32>, vector<64x64xf32>, vector<16x64xf32> -> vector<16x64xf32>
    %c1_46 = arith.constant 1 : index
    %c0_47 = arith.constant 0 : index
    %38 = vector.load %arg59[%c1_46, %c0_47] : memref<18x128xf32, #tpu.memory_space<vmem>>, vector<16x64xf32>
    %c1_48 = arith.constant 1 : index
    %c0_49 = arith.constant 0 : index
    %c0_50 = arith.constant 0 : index
    %39 = vector.load %arg5[%c1_48, %c0_49, %c0_50] : memref<3x64x64xf32, #tpu.memory_space<vmem>>, vector<1x64x64xf32>
    %40 = vector.shape_cast %39 : vector<1x64x64xf32> to vector<64x64xf32>
    %cst_51 = arith.constant dense<0.000000e+00> : vector<16x64xf32>
    %41 = tpu.matmul %38, %40, %cst_51 {dimension_numbers = #tpu.dot_dimension_numbers<[1], [0], [0], [1], [0, 0, 1, 1], [], []>} : vector<16x64xf32>, vector<64x64xf32>, vector<16x64xf32> -> vector<16x64xf32>
    %42 = arith.addf %37, %41 : vector<16x64xf32>
    %c2_52 = arith.constant 2 : index
    %c0_53 = arith.constant 0 : index
    %43 = vector.load %arg59[%c2_52, %c0_53] : memref<18x128xf32, #tpu.memory_space<vmem>>, vector<16x64xf32>
    %c2_54 = arith.constant 2 : index
    %c0_55 = arith.constant 0 : index
    %c0_56 = arith.constant 0 : index
    %44 = vector.load %arg5[%c2_54, %c0_55, %c0_56] : memref<3x64x64xf32, #tpu.memory_space<vmem>>, vector<1x64x64xf32>
    %45 = vector.shape_cast %44 : vector<1x64x64xf32> to vector<64x64xf32>
    %cst_57 = arith.constant dense<0.000000e+00> : vector<16x64xf32>
    %46 = tpu.matmul %43, %45, %cst_57 {dimension_numbers = #tpu.dot_dimension_numbers<[1], [0], [0], [1], [0, 0, 1, 1], [], []>} : vector<16x64xf32>, vector<64x64xf32>, vector<16x64xf32> -> vector<16x64xf32>
    %47 = arith.addf %42, %46 : vector<16x64xf32>
    %48 = vector.broadcast %28 : vector<1x64xf32> to vector<16x64xf32>
    %49 = arith.addf %47, %48 : vector<16x64xf32>
    %cst_58 = arith.constant 0.000000e+00 : f32
    %50 = vector.broadcast %cst_58 : f32 to vector<16x64xf32>
    %51 = arith.maximumf %49, %50 : vector<16x64xf32>
    %c0_59 = arith.constant 0 : index
    %c0_60 = arith.constant 0 : index
    %52 = vector.load %arg7[%c0_59, %c0_60] : memref<32x64xf32, #tpu.memory_space<vmem>>, vector<32x64xf32>
    %cst_61 = arith.constant dense<0.000000e+00> : vector<1x64xf32>
    %53 = tpu.matmul %3, %52, %cst_61 {dimension_numbers = #tpu.dot_dimension_numbers<[1], [0], [0], [1], [0, 0, 1, 1], [], []>} : vector<1x32xf32>, vector<32x64xf32>, vector<1x64xf32> -> vector<1x64xf32>
    %c0_62 = arith.constant 0 : index
    %c0_63 = arith.constant 0 : index
    %54 = vector.load %arg8[%c0_62, %c0_63] : memref<1x64xf32, #tpu.memory_space<vmem>>, vector<1x64xf32>
    %55 = arith.addf %53, %54 : vector<1x64xf32>
    %56 = vector.broadcast %55 : vector<1x64xf32> to vector<16x64xf32>
    %57 = arith.addf %51, %56 : vector<16x64xf32>
    %cst_64 = arith.constant 0.000000e+00 : f32
    %58 = vector.broadcast %cst_64 : f32 to vector<1x64xf32>
    %c0_65 = arith.constant 0 : index
    %c0_66 = arith.constant 0 : index
    %59 = vector.load %arg59[%c0_65, %c0_66] : memref<18x128xf32, #tpu.memory_space<vmem>>, vector<1x64xf32>
    tpu.vector_store %arg59[%c0_65, %c0_66], %58 {strides = array<i32>} : memref<18x128xf32, #tpu.memory_space<vmem>>, vector<1x64xf32>,
    %cst_67 = arith.constant 0.000000e+00 : f32
    %60 = vector.broadcast %cst_67 : f32 to vector<1x64xf32>
    %c17_68 = arith.constant 17 : index
    %c0_69 = arith.constant 0 : index
    %61 = vector.load %arg59[%c17_68, %c0_69] : memref<18x128xf32, #tpu.memory_space<vmem>>, vector<1x64xf32>
    tpu.vector_store %arg59[%c17_68, %c0_69], %60 {strides = array<i32>} : memref<18x128xf32, #tpu.memory_space<vmem>>, vector<1x64xf32>,
    %c1_70 = arith.constant 1 : index
    %c0_71 = arith.constant 0 : index
    %62 = vector.load %arg59[%c1_70, %c0_71] : memref<18x128xf32, #tpu.memory_space<vmem>>, vector<16x64xf32>
    tpu.vector_store %arg59[%c1_70, %c0_71], %57 {strides = array<i32>} : memref<18x128xf32, #tpu.memory_space<vmem>>, vector<16x64xf32>,
    %c0_72 = arith.constant 0 : index
    %c0_73 = arith.constant 0 : index
    %63 = vector.load %arg59[%c0_72, %c0_73] : memref<18x128xf32, #tpu.memory_space<vmem>>, vector<16x64xf32>
    %c0_74 = arith.constant 0 : index
    %c0_75 = arith.constant 0 : index
    %c0_76 = arith.constant 0 : index
    %64 = vector.load %arg9[%c0_74, %c0_75, %c0_76] : memref<3x64x64xf32, #tpu.memory_space<vmem>>, vector<1x64x64xf32>
    %65 = vector.shape_cast %64 : vector<1x64x64xf32> to vector<64x64xf32>
    %cst_77 = arith.constant dense<0.000000e+00> : vector<16x64xf32>
    %66 = tpu.matmul %63, %65, %cst_77 {dimension_numbers = #tpu.dot_dimension_numbers<[1], [0], [0], [1], [0, 0, 1, 1], [], []>} : vector<16x64xf32>, vector<64x64xf32>, vector<16x64xf32> -> vector<16x64xf32>
    %c1_78 = arith.constant 1 : index
    %c0_79 = arith.constant 0 : index
    %67 = vector.load %arg59[%c1_78, %c0_79] : memref<18x128xf32, #tpu.memory_space<vmem>>, vector<16x64xf32>
    %c1_80 = arith.constant 1 : index
    %c0_81 = arith.constant 0 : index
    %c0_82 = arith.constant 0 : index
    %68 = vector.load %arg9[%c1_80, %c0_81, %c0_82] : memref<3x64x64xf32, #tpu.memory_space<vmem>>, vector<1x64x64xf32>
    %69 = vector.shape_cast %68 : vector<1x64x64xf32> to vector<64x64xf32>
    %cst_83 = arith.constant dense<0.000000e+00> : vector<16x64xf32>
    %70 = tpu.matmul %67, %69, %cst_83 {dimension_numbers = #tpu.dot_dimension_numbers<[1], [0], [0], [1], [0, 0, 1, 1], [], []>} : vector<16x64xf32>, vector<64x64xf32>, vector<16x64xf32> -> vector<16x64xf32>
    %71 = arith.addf %66, %70 : vector<16x64xf32>
    %c2_84 = arith.constant 2 : index
    %c0_85 = arith.constant 0 : index
    %72 = vector.load %arg59[%c2_84, %c0_85] : memref<18x128xf32, #tpu.memory_space<vmem>>, vector<16x64xf32>
    %c2_86 = arith.constant 2 : index
    %c0_87 = arith.constant 0 : index
    %c0_88 = arith.constant 0 : index
    %73 = vector.load %arg9[%c2_86, %c0_87, %c0_88] : memref<3x64x64xf32, #tpu.memory_space<vmem>>, vector<1x64x64xf32>
    %74 = vector.shape_cast %73 : vector<1x64x64xf32> to vector<64x64xf32>
    %cst_89 = arith.constant dense<0.000000e+00> : vector<16x64xf32>
    %75 = tpu.matmul %72, %74, %cst_89 {dimension_numbers = #tpu.dot_dimension_numbers<[1], [0], [0], [1], [0, 0, 1, 1], [], []>} : vector<16x64xf32>, vector<64x64xf32>, vector<16x64xf32> -> vector<16x64xf32>
    %76 = arith.addf %71, %75 : vector<16x64xf32>
    %cst_90 = arith.constant 0.000000e+00 : f32
    %77 = vector.broadcast %cst_90 : f32 to vector<16x64xf32>
    %78 = arith.subf %77, %76 : vector<16x64xf32>
    %79 = math.exp %78 : vector<16x64xf32>
    %cst_91 = arith.constant 1.000000e+00 : f32
    %80 = vector.broadcast %cst_91 : f32 to vector<16x64xf32>
    %81 = arith.addf %80, %79 : vector<16x64xf32>
    %cst_92 = arith.constant 1.000000e+00 : f32
    %82 = vector.broadcast %cst_92 : f32 to vector<16x64xf32>
    %83 = arith.divf %82, %81 : vector<16x64xf32>
    %84 = arith.mulf %57, %83 : vector<16x64xf32>
    %c0_93 = arith.constant 0 : index
    %c0_94 = arith.constant 0 : index
    %85 = vector.load %arg10[%c0_93, %c0_94] : memref<64x64xf32, #tpu.memory_space<vmem>>, vector<64x64xf32>
    %cst_95 = arith.constant dense<0.000000e+00> : vector<16x64xf32>
    %86 = tpu.matmul %84, %85, %cst_95 {dimension_numbers = #tpu.dot_dimension_numbers<[1], [0], [0], [1], [0, 0, 1, 1], [], []>} : vector<16x64xf32>, vector<64x64xf32>, vector<16x64xf32> -> vector<16x64xf32>
    %c0_96 = arith.constant 0 : index
    %c0_97 = arith.constant 0 : index
    %87 = vector.load %arg11[%c0_96, %c0_97] : memref<1x64xf32, #tpu.memory_space<vmem>>, vector<1x64xf32>
    %88 = vector.broadcast %87 : vector<1x64xf32> to vector<16x64xf32>
    %89 = arith.addf %86, %88 : vector<16x64xf32>
    %cst_98 = arith.constant 0.000000e+00 : f32
    %90 = vector.broadcast %cst_98 : f32 to vector<1x64xf32>
    %c0_99 = arith.constant 0 : index
    %c0_100 = arith.constant 0 : index
    %91 = vector.load %arg59[%c0_99, %c0_100] : memref<18x128xf32, #tpu.memory_space<vmem>>, vector<1x64xf32>
    tpu.vector_store %arg59[%c0_99, %c0_100], %90 {strides = array<i32>} : memref<18x128xf32, #tpu.memory_space<vmem>>, vector<1x64xf32>,
    %c1_101 = arith.constant 1 : index
    %c0_102 = arith.constant 0 : index
    %92 = vector.load %arg59[%c1_101, %c0_102] : memref<18x128xf32, #tpu.memory_space<vmem>>, vector<16x64xf32>
    tpu.vector_store %arg59[%c1_101, %c0_102], %89 {strides = array<i32>} : memref<18x128xf32, #tpu.memory_space<vmem>>, vector<16x64xf32>,
    %c0_103 = arith.constant 0 : index
    %c0_104 = arith.constant 0 : index
    %93 = tpu.strided_load %arg59[%c0_103, %c0_104] {strides = array<i32: 2, 1>} : memref<18x128xf32, #tpu.memory_space<vmem>>, vector<8x128xf32>
    %94 = vector.extract_strided_slice %93 {offsets = [0, 0], sizes = [8, 64], strides = [1, 1]} : vector<8x128xf32> to vector<8x64xf32>
    %c0_105 = arith.constant 0 : index
    %c0_106 = arith.constant 0 : index
    %c0_107 = arith.constant 0 : index
    %95 = vector.load %arg12[%c0_105, %c0_106, %c0_107] : memref<3x64x64xf32, #tpu.memory_space<vmem>>, vector<1x64x64xf32>
    %96 = vector.shape_cast %95 : vector<1x64x64xf32> to vector<64x64xf32>
    %cst_108 = arith.constant dense<0.000000e+00> : vector<8x64xf32>
    %97 = tpu.matmul %94, %96, %cst_108 {dimension_numbers = #tpu.dot_dimension_numbers<[1], [0], [0], [1], [0, 0, 1, 1], [], []>} : vector<8x64xf32>, vector<64x64xf32>, vector<8x64xf32> -> vector<8x64xf32>
    %c1_109 = arith.constant 1 : index
    %c0_110 = arith.constant 0 : index
    %98 = tpu.strided_load %arg59[%c1_109, %c0_110] {strides = array<i32: 2, 1>} : memref<18x128xf32, #tpu.memory_space<vmem>>, vector<8x128xf32>
    %99 = vector.extract_strided_slice %98 {offsets = [0, 0], sizes = [8, 64], strides = [1, 1]} : vector<8x128xf32> to vector<8x64xf32>
    %c1_111 = arith.constant 1 : index
    %c0_112 = arith.constant 0 : index
    %c0_113 = arith.constant 0 : index
    %100 = vector.load %arg12[%c1_111, %c0_112, %c0_113] : memref<3x64x64xf32, #tpu.memory_space<vmem>>, vector<1x64x64xf32>
    %101 = vector.shape_cast %100 : vector<1x64x64xf32> to vector<64x64xf32>
    %cst_114 = arith.constant dense<0.000000e+00> : vector<8x64xf32>
    %102 = tpu.matmul %99, %101, %cst_114 {dimension_numbers = #tpu.dot_dimension_numbers<[1], [0], [0], [1], [0, 0, 1, 1], [], []>} : vector<8x64xf32>, vector<64x64xf32>, vector<8x64xf32> -> vector<8x64xf32>
    %103 = arith.addf %97, %102 : vector<8x64xf32>
    %c2_115 = arith.constant 2 : index
    %c0_116 = arith.constant 0 : index
    %104 = tpu.strided_load %arg59[%c2_115, %c0_116] {strides = array<i32: 2, 1>} : memref<18x128xf32, #tpu.memory_space<vmem>>, vector<8x128xf32>
    %105 = vector.extract_strided_slice %104 {offsets = [0, 0], sizes = [8, 64], strides = [1, 1]} : vector<8x128xf32> to vector<8x64xf32>
    %c2_117 = arith.constant 2 : index
    %c0_118 = arith.constant 0 : index
    %c0_119 = arith.constant 0 : index
    %106 = vector.load %arg12[%c2_117, %c0_118, %c0_119] : memref<3x64x64xf32, #tpu.memory_space<vmem>>, vector<1x64x64xf32>
    %107 = vector.shape_cast %106 : vector<1x64x64xf32> to vector<64x64xf32>
    %cst_120 = arith.constant dense<0.000000e+00> : vector<8x64xf32>
    %108 = tpu.matmul %105, %107, %cst_120 {dimension_numbers = #tpu.dot_dimension_numbers<[1], [0], [0], [1], [0, 0, 1, 1], [], []>} : vector<8x64xf32>, vector<64x64xf32>, vector<8x64xf32> -> vector<8x64xf32>
    %109 = arith.addf %103, %108 : vector<8x64xf32>
    %c0_121 = arith.constant 0 : index
    %c0_122 = arith.constant 0 : index
    %110 = vector.load %arg13[%c0_121, %c0_122] : memref<1x64xf32, #tpu.memory_space<vmem>>, vector<1x64xf32>
    %111 = vector.broadcast %110 : vector<1x64xf32> to vector<8x64xf32>
    %112 = arith.addf %109, %111 : vector<8x64xf32>
    %c0_123 = arith.constant 0 : index
    %c0_124 = arith.constant 0 : index
    %113 = vector.load %arg15[%c0_123, %c0_124] : memref<1x128xf32, #tpu.memory_space<vmem>>, vector<1x128xf32>
    %cst_125 = arith.constant 0.000000e+00 : f32
    %114 = vector.broadcast %cst_125 : f32 to vector<1x64xf32>
    %c0_126 = arith.constant 0 : index
    %c0_127 = arith.constant 0 : index
    %115 = vector.load %arg59[%c0_126, %c0_127] : memref<18x128xf32, #tpu.memory_space<vmem>>, vector<1x64xf32>
    tpu.vector_store %arg59[%c0_126, %c0_127], %114 {strides = array<i32>} : memref<18x128xf32, #tpu.memory_space<vmem>>, vector<1x64xf32>,
    %cst_128 = arith.constant 0.000000e+00 : f32
    %116 = vector.broadcast %cst_128 : f32 to vector<1x64xf32>
    %c9 = arith.constant 9 : index
    %c0_129 = arith.constant 0 : index
    %117 = vector.load %arg59[%c9, %c0_129] : memref<18x128xf32, #tpu.memory_space<vmem>>, vector<1x64xf32>
    tpu.vector_store %arg59[%c9, %c0_129], %116 {strides = array<i32>} : memref<18x128xf32, #tpu.memory_space<vmem>>, vector<1x64xf32>,
    %c1_130 = arith.constant 1 : index
    %c0_131 = arith.constant 0 : index
    %118 = vector.load %arg59[%c1_130, %c0_131] : memref<18x128xf32, #tpu.memory_space<vmem>>, vector<8x64xf32>
    tpu.vector_store %arg59[%c1_130, %c0_131], %112 {strides = array<i32>} : memref<18x128xf32, #tpu.memory_space<vmem>>, vector<8x64xf32>,
    %c0_132 = arith.constant 0 : index
    %c0_133 = arith.constant 0 : index
    %119 = vector.load %arg59[%c0_132, %c0_133] : memref<18x128xf32, #tpu.memory_space<vmem>>, vector<8x64xf32>
    %c0_134 = arith.constant 0 : index
    %c0_135 = arith.constant 0 : index
    %c0_136 = arith.constant 0 : index
    %120 = vector.load %arg14[%c0_134, %c0_135, %c0_136] : memref<3x64x128xf32, #tpu.memory_space<vmem>>, vector<1x64x128xf32>
    %121 = vector.shape_cast %120 : vector<1x64x128xf32> to vector<64x128xf32>
    %cst_137 = arith.constant dense<0.000000e+00> : vector<8x128xf32>
    %122 = tpu.matmul %119, %121, %cst_137 {dimension_numbers = #tpu.dot_dimension_numbers<[1], [0], [0], [1], [0, 0, 1, 1], [], []>} : vector<8x64xf32>, vector<64x128xf32>, vector<8x128xf32> -> vector<8x128xf32>
    %c1_138 = arith.constant 1 : index
    %c0_139 = arith.constant 0 : index
    %123 = vector.load %arg59[%c1_138, %c0_139] : memref<18x128xf32, #tpu.memory_space<vmem>>, vector<8x64xf32>
    %c1_140 = arith.constant 1 : index
    %c0_141 = arith.constant 0 : index
    %c0_142 = arith.constant 0 : index
    %124 = vector.load %arg14[%c1_140, %c0_141, %c0_142] : memref<3x64x128xf32, #tpu.memory_space<vmem>>, vector<1x64x128xf32>
    %125 = vector.shape_cast %124 : vector<1x64x128xf32> to vector<64x128xf32>
    %cst_143 = arith.constant dense<0.000000e+00> : vector<8x128xf32>
    %126 = tpu.matmul %123, %125, %cst_143 {dimension_numbers = #tpu.dot_dimension_numbers<[1], [0], [0], [1], [0, 0, 1, 1], [], []>} : vector<8x64xf32>, vector<64x128xf32>, vector<8x128xf32> -> vector<8x128xf32>
    %127 = arith.addf %122, %126 : vector<8x128xf32>
    %c2_144 = arith.constant 2 : index
    %c0_145 = arith.constant 0 : index
    %128 = vector.load %arg59[%c2_144, %c0_145] : memref<18x128xf32, #tpu.memory_space<vmem>>, vector<8x64xf32>
    %c2_146 = arith.constant 2 : index
    %c0_147 = arith.constant 0 : index
    %c0_148 = arith.constant 0 : index
    %129 = vector.load %arg14[%c2_146, %c0_147, %c0_148] : memref<3x64x128xf32, #tpu.memory_space<vmem>>, vector<1x64x128xf32>
    %130 = vector.shape_cast %129 : vector<1x64x128xf32> to vector<64x128xf32>
    %cst_149 = arith.constant dense<0.000000e+00> : vector<8x128xf32>
    %131 = tpu.matmul %128, %130, %cst_149 {dimension_numbers = #tpu.dot_dimension_numbers<[1], [0], [0], [1], [0, 0, 1, 1], [], []>} : vector<8x64xf32>, vector<64x128xf32>, vector<8x128xf32> -> vector<8x128xf32>
    %132 = arith.addf %127, %131 : vector<8x128xf32>
    %133 = vector.broadcast %113 : vector<1x128xf32> to vector<8x128xf32>
    %134 = arith.addf %132, %133 : vector<8x128xf32>
    %cst_150 = arith.constant 0.000000e+00 : f32
    %135 = vector.broadcast %cst_150 : f32 to vector<8x128xf32>
    %136 = arith.maximumf %134, %135 : vector<8x128xf32>
    %c0_151 = arith.constant 0 : index
    %c0_152 = arith.constant 0 : index
    %137 = vector.load %arg17[%c0_151, %c0_152] : memref<1x128xf32, #tpu.memory_space<vmem>>, vector<1x128xf32>
    %cst_153 = arith.constant 0.000000e+00 : f32
    %138 = vector.broadcast %cst_153 : f32 to vector<1x128xf32>
    %c0_154 = arith.constant 0 : index
    %c0_155 = arith.constant 0 : index
    %139 = vector.load %arg59[%c0_154, %c0_155] : memref<18x128xf32, #tpu.memory_space<vmem>>, vector<1x128xf32>
    tpu.vector_store %arg59[%c0_154, %c0_155], %138 {strides = array<i32>} : memref<18x128xf32, #tpu.memory_space<vmem>>, vector<1x128xf32>,
    %cst_156 = arith.constant 0.000000e+00 : f32
    %140 = vector.broadcast %cst_156 : f32 to vector<1x128xf32>
    %c9_157 = arith.constant 9 : index
    %c0_158 = arith.constant 0 : index
    %141 = vector.load %arg59[%c9_157, %c0_158] : memref<18x128xf32, #tpu.memory_space<vmem>>, vector<1x128xf32>
    tpu.vector_store %arg59[%c9_157, %c0_158], %140 {strides = array<i32>} : memref<18x128xf32, #tpu.memory_space<vmem>>, vector<1x128xf32>,
    %c1_159 = arith.constant 1 : index
    %c0_160 = arith.constant 0 : index
    %142 = vector.load %arg59[%c1_159, %c0_160] : memref<18x128xf32, #tpu.memory_space<vmem>>, vector<8x128xf32>
    tpu.vector_store %arg59[%c1_159, %c0_160], %136 {strides = array<i32>} : memref<18x128xf32, #tpu.memory_space<vmem>>, vector<8x128xf32>,
    %c0_161 = arith.constant 0 : index
    %c0_162 = arith.constant 0 : index
    %143 = vector.load %arg59[%c0_161, %c0_162] : memref<18x128xf32, #tpu.memory_space<vmem>>, vector<8x128xf32>
    %c0_163 = arith.constant 0 : index
    %c0_164 = arith.constant 0 : index
    %c0_165 = arith.constant 0 : index
    %144 = vector.load %arg16[%c0_163, %c0_164, %c0_165] : memref<3x128x128xf32, #tpu.memory_space<vmem>>, vector<1x128x128xf32>
    %145 = vector.shape_cast %144 : vector<1x128x128xf32> to vector<128x128xf32>
    %cst_166 = arith.constant dense<0.000000e+00> : vector<8x128xf32>
    %146 = tpu.matmul %143, %145, %cst_166 {dimension_numbers = #tpu.dot_dimension_numbers<[1], [0], [0], [1], [0, 0, 1, 1], [], []>} : vector<8x128xf32>, vector<128x128xf32>, vector<8x128xf32> -> vector<8x128xf32>
    %c1_167 = arith.constant 1 : index
    %c0_168 = arith.constant 0 : index
    %147 = vector.load %arg59[%c1_167, %c0_168] : memref<18x128xf32, #tpu.memory_space<vmem>>, vector<8x128xf32>
    %c1_169 = arith.constant 1 : index
    %c0_170 = arith.constant 0 : index
    %c0_171 = arith.constant 0 : index
    %148 = vector.load %arg16[%c1_169, %c0_170, %c0_171] : memref<3x128x128xf32, #tpu.memory_space<vmem>>, vector<1x128x128xf32>
    %149 = vector.shape_cast %148 : vector<1x128x128xf32> to vector<128x128xf32>
    %cst_172 = arith.constant dense<0.000000e+00> : vector<8x128xf32>
    %150 = tpu.matmul %147, %149, %cst_172 {dimension_numbers = #tpu.dot_dimension_numbers<[1], [0], [0], [1], [0, 0, 1, 1], [], []>} : vector<8x128xf32>, vector<128x128xf32>, vector<8x128xf32> -> vector<8x128xf32>
    %151 = arith.addf %146, %150 : vector<8x128xf32>
    %c2_173 = arith.constant 2 : index
    %c0_174 = arith.constant 0 : index
    %152 = vector.load %arg59[%c2_173, %c0_174] : memref<18x128xf32, #tpu.memory_space<vmem>>, vector<8x128xf32>
    %c2_175 = arith.constant 2 : index
    %c0_176 = arith.constant 0 : index
    %c0_177 = arith.constant 0 : index
    %153 = vector.load %arg16[%c2_175, %c0_176, %c0_177] : memref<3x128x128xf32, #tpu.memory_space<vmem>>, vector<1x128x128xf32>
    %154 = vector.shape_cast %153 : vector<1x128x128xf32> to vector<128x128xf32>
    %cst_178 = arith.constant dense<0.000000e+00> : vector<8x128xf32>
    %155 = tpu.matmul %152, %154, %cst_178 {dimension_numbers = #tpu.dot_dimension_numbers<[1], [0], [0], [1], [0, 0, 1, 1], [], []>} : vector<8x128xf32>, vector<128x128xf32>, vector<8x128xf32> -> vector<8x128xf32>
    %156 = arith.addf %151, %155 : vector<8x128xf32>
    %157 = vector.broadcast %137 : vector<1x128xf32> to vector<8x128xf32>
    %158 = arith.addf %156, %157 : vector<8x128xf32>
    %cst_179 = arith.constant 0.000000e+00 : f32
    %159 = vector.broadcast %cst_179 : f32 to vector<8x128xf32>
    %160 = arith.maximumf %158, %159 : vector<8x128xf32>
    %c0_180 = arith.constant 0 : index
    %c0_181 = arith.constant 0 : index
    %161 = vector.load %arg18[%c0_180, %c0_181] : memref<32x128xf32, #tpu.memory_space<vmem>>, vector<32x128xf32>
    %cst_182 = arith.constant dense<0.000000e+00> : vector<1x128xf32>
    %162 = tpu.matmul %3, %161, %cst_182 {dimension_numbers = #tpu.dot_dimension_numbers<[1], [0], [0], [1], [0, 0, 1, 1], [], []>} : vector<1x32xf32>, vector<32x128xf32>, vector<1x128xf32> -> vector<1x128xf32>
    %c0_183 = arith.constant 0 : index
    %c0_184 = arith.constant 0 : index
    %163 = vector.load %arg19[%c0_183, %c0_184] : memref<1x128xf32, #tpu.memory_space<vmem>>, vector<1x128xf32>
    %164 = arith.addf %162, %163 : vector<1x128xf32>
    %165 = vector.broadcast %164 : vector<1x128xf32> to vector<8x128xf32>
    %166 = arith.addf %160, %165 : vector<8x128xf32>
    %cst_185 = arith.constant 0.000000e+00 : f32
    %167 = vector.broadcast %cst_185 : f32 to vector<1x128xf32>
    %c0_186 = arith.constant 0 : index
    %c0_187 = arith.constant 0 : index
    %168 = vector.load %arg59[%c0_186, %c0_187] : memref<18x128xf32, #tpu.memory_space<vmem>>, vector<1x128xf32>
    tpu.vector_store %arg59[%c0_186, %c0_187], %167 {strides = array<i32>} : memref<18x128xf32, #tpu.memory_space<vmem>>, vector<1x128xf32>,
    %cst_188 = arith.constant 0.000000e+00 : f32
    %169 = vector.broadcast %cst_188 : f32 to vector<1x128xf32>
    %c9_189 = arith.constant 9 : index
    %c0_190 = arith.constant 0 : index
    %170 = vector.load %arg59[%c9_189, %c0_190] : memref<18x128xf32, #tpu.memory_space<vmem>>, vector<1x128xf32>
    tpu.vector_store %arg59[%c9_189, %c0_190], %169 {strides = array<i32>} : memref<18x128xf32, #tpu.memory_space<vmem>>, vector<1x128xf32>,
    %c1_191 = arith.constant 1 : index
    %c0_192 = arith.constant 0 : index
    %171 = vector.load %arg59[%c1_191, %c0_192] : memref<18x128xf32, #tpu.memory_space<vmem>>, vector<8x128xf32>
    tpu.vector_store %arg59[%c1_191, %c0_192], %166 {strides = array<i32>} : memref<18x128xf32, #tpu.memory_space<vmem>>, vector<8x128xf32>,
    %c0_193 = arith.constant 0 : index
    %c0_194 = arith.constant 0 : index
    %172 = vector.load %arg59[%c0_193, %c0_194] : memref<18x128xf32, #tpu.memory_space<vmem>>, vector<8x128xf32>
    %c0_195 = arith.constant 0 : index
    %c0_196 = arith.constant 0 : index
    %c0_197 = arith.constant 0 : index
    %173 = vector.load %arg20[%c0_195, %c0_196, %c0_197] : memref<3x128x128xf32, #tpu.memory_space<vmem>>, vector<1x128x128xf32>
    %174 = vector.shape_cast %173 : vector<1x128x128xf32> to vector<128x128xf32>
    %cst_198 = arith.constant dense<0.000000e+00> : vector<8x128xf32>
    %175 = tpu.matmul %172, %174, %cst_198 {dimension_numbers = #tpu.dot_dimension_numbers<[1], [0], [0], [1], [0, 0, 1, 1], [], []>} : vector<8x128xf32>, vector<128x128xf32>, vector<8x128xf32> -> vector<8x128xf32>
    %c1_199 = arith.constant 1 : index
    %c0_200 = arith.constant 0 : index
    %176 = vector.load %arg59[%c1_199, %c0_200] : memref<18x128xf32, #tpu.memory_space<vmem>>, vector<8x128xf32>
    %c1_201 = arith.constant 1 : index
    %c0_202 = arith.constant 0 : index
    %c0_203 = arith.constant 0 : index
    %177 = vector.load %arg20[%c1_201, %c0_202, %c0_203] : memref<3x128x128xf32, #tpu.memory_space<vmem>>, vector<1x128x128xf32>
    %178 = vector.shape_cast %177 : vector<1x128x128xf32> to vector<128x128xf32>
    %cst_204 = arith.constant dense<0.000000e+00> : vector<8x128xf32>
    %179 = tpu.matmul %176, %178, %cst_204 {dimension_numbers = #tpu.dot_dimension_numbers<[1], [0], [0], [1], [0, 0, 1, 1], [], []>} : vector<8x128xf32>, vector<128x128xf32>, vector<8x128xf32> -> vector<8x128xf32>
    %180 = arith.addf %175, %179 : vector<8x128xf32>
    %c2_205 = arith.constant 2 : index
    %c0_206 = arith.constant 0 : index
    %181 = vector.load %arg59[%c2_205, %c0_206] : memref<18x128xf32, #tpu.memory_space<vmem>>, vector<8x128xf32>
    %c2_207 = arith.constant 2 : index
    %c0_208 = arith.constant 0 : index
    %c0_209 = arith.constant 0 : index
    %182 = vector.load %arg20[%c2_207, %c0_208, %c0_209] : memref<3x128x128xf32, #tpu.memory_space<vmem>>, vector<1x128x128xf32>
    %183 = vector.shape_cast %182 : vector<1x128x128xf32> to vector<128x128xf32>
    %cst_210 = arith.constant dense<0.000000e+00> : vector<8x128xf32>
    %184 = tpu.matmul %181, %183, %cst_210 {dimension_numbers = #tpu.dot_dimension_numbers<[1], [0], [0], [1], [0, 0, 1, 1], [], []>} : vector<8x128xf32>, vector<128x128xf32>, vector<8x128xf32> -> vector<8x128xf32>
    %185 = arith.addf %180, %184 : vector<8x128xf32>
    %cst_211 = arith.constant 0.000000e+00 : f32
    %186 = vector.broadcast %cst_211 : f32 to vector<8x128xf32>
    %187 = arith.subf %186, %185 : vector<8x128xf32>
    %188 = math.exp %187 : vector<8x128xf32>
    %cst_212 = arith.constant 1.000000e+00 : f32
    %189 = vector.broadcast %cst_212 : f32 to vector<8x128xf32>
    %190 = arith.addf %189, %188 : vector<8x128xf32>
    %cst_213 = arith.constant 1.000000e+00 : f32
    %191 = vector.broadcast %cst_213 : f32 to vector<8x128xf32>
    %192 = arith.divf %191, %190 : vector<8x128xf32>
    %193 = arith.mulf %166, %192 : vector<8x128xf32>
    %c0_214 = arith.constant 0 : index
    %c0_215 = arith.constant 0 : index
    %194 = vector.load %arg21[%c0_214, %c0_215] : memref<128x128xf32, #tpu.memory_space<vmem>>, vector<128x128xf32>
    %cst_216 = arith.constant dense<0.000000e+00> : vector<8x128xf32>
    %195 = tpu.matmul %193, %194, %cst_216 {dimension_numbers = #tpu.dot_dimension_numbers<[1], [0], [0], [1], [0, 0, 1, 1], [], []>} : vector<8x128xf32>, vector<128x128xf32>, vector<8x128xf32> -> vector<8x128xf32>
    %c0_217 = arith.constant 0 : index
    %c0_218 = arith.constant 0 : index
    %196 = vector.load %arg22[%c0_217, %c0_218] : memref<1x128xf32, #tpu.memory_space<vmem>>, vector<1x128xf32>
    %197 = vector.broadcast %196 : vector<1x128xf32> to vector<8x128xf32>
    %198 = arith.addf %195, %197 : vector<8x128xf32>
    %cst_219 = arith.constant 0.000000e+00 : f32
    %199 = vector.broadcast %cst_219 : f32 to vector<1x128xf32>
    %c0_220 = arith.constant 0 : index
    %c0_221 = arith.constant 0 : index
    %200 = vector.load %arg59[%c0_220, %c0_221] : memref<18x128xf32, #tpu.memory_space<vmem>>, vector<1x128xf32>
    tpu.vector_store %arg59[%c0_220, %c0_221], %199 {strides = array<i32>} : memref<18x128xf32, #tpu.memory_space<vmem>>, vector<1x128xf32>,
    %c1_222 = arith.constant 1 : index
    %c0_223 = arith.constant 0 : index
    %201 = vector.load %arg59[%c1_222, %c0_223] : memref<18x128xf32, #tpu.memory_space<vmem>>, vector<8x128xf32>
    tpu.vector_store %arg59[%c1_222, %c0_223], %198 {strides = array<i32>} : memref<18x128xf32, #tpu.memory_space<vmem>>, vector<8x128xf32>,
    %c0_224 = arith.constant 0 : index
    %c0_225 = arith.constant 0 : index
    %202 = tpu.strided_load %arg59[%c0_224, %c0_225] {strides = array<i32: 2, 1>} : memref<18x128xf32, #tpu.memory_space<vmem>>, vector<4x128xf32>
    %c0_226 = arith.constant 0 : index
    %c0_227 = arith.constant 0 : index
    %c0_228 = arith.constant 0 : index
    %203 = vector.load %arg23[%c0_226, %c0_227, %c0_228] : memref<3x128x128xf32, #tpu.memory_space<vmem>>, vector<1x128x128xf32>
    %204 = vector.shape_cast %203 : vector<1x128x128xf32> to vector<128x128xf32>
    %cst_229 = arith.constant dense<0.000000e+00> : vector<4x128xf32>
    %205 = tpu.matmul %202, %204, %cst_229 {dimension_numbers = #tpu.dot_dimension_numbers<[1], [0], [0], [1], [0, 0, 1, 1], [], []>} : vector<4x128xf32>, vector<128x128xf32>, vector<4x128xf32> -> vector<4x128xf32>
    %c1_230 = arith.constant 1 : index
    %c0_231 = arith.constant 0 : index
    %206 = tpu.strided_load %arg59[%c1_230, %c0_231] {strides = array<i32: 2, 1>} : memref<18x128xf32, #tpu.memory_space<vmem>>, vector<4x128xf32>
    %c1_232 = arith.constant 1 : index
    %c0_233 = arith.constant 0 : index
    %c0_234 = arith.constant 0 : index
    %207 = vector.load %arg23[%c1_232, %c0_233, %c0_234] : memref<3x128x128xf32, #tpu.memory_space<vmem>>, vector<1x128x128xf32>
    %208 = vector.shape_cast %207 : vector<1x128x128xf32> to vector<128x128xf32>
    %cst_235 = arith.constant dense<0.000000e+00> : vector<4x128xf32>
    %209 = tpu.matmul %206, %208, %cst_235 {dimension_numbers = #tpu.dot_dimension_numbers<[1], [0], [0], [1], [0, 0, 1, 1], [], []>} : vector<4x128xf32>, vector<128x128xf32>, vector<4x128xf32> -> vector<4x128xf32>
    %210 = arith.addf %205, %209 : vector<4x128xf32>
    %c2_236 = arith.constant 2 : index
    %c0_237 = arith.constant 0 : index
    %211 = tpu.strided_load %arg59[%c2_236, %c0_237] {strides = array<i32: 2, 1>} : memref<18x128xf32, #tpu.memory_space<vmem>>, vector<4x128xf32>
    %c2_238 = arith.constant 2 : index
    %c0_239 = arith.constant 0 : index
    %c0_240 = arith.constant 0 : index
    %212 = vector.load %arg23[%c2_238, %c0_239, %c0_240] : memref<3x128x128xf32, #tpu.memory_space<vmem>>, vector<1x128x128xf32>
    %213 = vector.shape_cast %212 : vector<1x128x128xf32> to vector<128x128xf32>
    %cst_241 = arith.constant dense<0.000000e+00> : vector<4x128xf32>
    %214 = tpu.matmul %211, %213, %cst_241 {dimension_numbers = #tpu.dot_dimension_numbers<[1], [0], [0], [1], [0, 0, 1, 1], [], []>} : vector<4x128xf32>, vector<128x128xf32>, vector<4x128xf32> -> vector<4x128xf32>
    %215 = arith.addf %210, %214 : vector<4x128xf32>
    %c0_242 = arith.constant 0 : index
    %c0_243 = arith.constant 0 : index
    %216 = vector.load %arg24[%c0_242, %c0_243] : memref<1x128xf32, #tpu.memory_space<vmem>>, vector<1x128xf32>
    %217 = vector.broadcast %216 : vector<1x128xf32> to vector<4x128xf32>
    %218 = arith.addf %215, %217 : vector<4x128xf32>
    %c0_244 = arith.constant 0 : index
    %c0_245 = arith.constant 0 : index
    %219 = vector.load %arg26[%c0_244, %c0_245] : memref<1x128xf32, #tpu.memory_space<vmem>>, vector<1x128xf32>
    %cst_246 = arith.constant 0.000000e+00 : f32
    %220 = vector.broadcast %cst_246 : f32 to vector<1x128xf32>
    %c0_247 = arith.constant 0 : index
    %c0_248 = arith.constant 0 : index
    %221 = vector.load %arg59[%c0_247, %c0_248] : memref<18x128xf32, #tpu.memory_space<vmem>>, vector<1x128xf32>
    tpu.vector_store %arg59[%c0_247, %c0_248], %220 {strides = array<i32>} : memref<18x128xf32, #tpu.memory_space<vmem>>, vector<1x128xf32>,
    %cst_249 = arith.constant 0.000000e+00 : f32
    %222 = vector.broadcast %cst_249 : f32 to vector<1x128xf32>
    %c5 = arith.constant 5 : index
    %c0_250 = arith.constant 0 : index
    %223 = vector.load %arg59[%c5, %c0_250] : memref<18x128xf32, #tpu.memory_space<vmem>>, vector<1x128xf32>
    tpu.vector_store %arg59[%c5, %c0_250], %222 {strides = array<i32>} : memref<18x128xf32, #tpu.memory_space<vmem>>, vector<1x128xf32>,
    %c1_251 = arith.constant 1 : index
    %c0_252 = arith.constant 0 : index
    %224 = vector.load %arg59[%c1_251, %c0_252] : memref<18x128xf32, #tpu.memory_space<vmem>>, vector<4x128xf32>
    tpu.vector_store %arg59[%c1_251, %c0_252], %218 {strides = array<i32>} : memref<18x128xf32, #tpu.memory_space<vmem>>, vector<4x128xf32>,
    %c0_253 = arith.constant 0 : index
    %c0_254 = arith.constant 0 : index
    %225 = vector.load %arg59[%c0_253, %c0_254] : memref<18x128xf32, #tpu.memory_space<vmem>>, vector<4x128xf32>
    %c0_255 = arith.constant 0 : index
    %c0_256 = arith.constant 0 : index
    %c0_257 = arith.constant 0 : index
    %226 = vector.load %arg25[%c0_255, %c0_256, %c0_257] : memref<3x128x128xf32, #tpu.memory_space<vmem>>, vector<1x128x128xf32>
    %227 = vector.shape_cast %226 : vector<1x128x128xf32> to vector<128x128xf32>
    %cst_258 = arith.constant dense<0.000000e+00> : vector<4x128xf32>
    %228 = tpu.matmul %225, %227, %cst_258 {dimension_numbers = #tpu.dot_dimension_numbers<[1], [0], [0], [1], [0, 0, 1, 1], [], []>} : vector<4x128xf32>, vector<128x128xf32>, vector<4x128xf32> -> vector<4x128xf32>
    %c1_259 = arith.constant 1 : index
    %c0_260 = arith.constant 0 : index
    %229 = vector.load %arg59[%c1_259, %c0_260] : memref<18x128xf32, #tpu.memory_space<vmem>>, vector<4x128xf32>
    %c1_261 = arith.constant 1 : index
    %c0_262 = arith.constant 0 : index
    %c0_263 = arith.constant 0 : index
    %230 = vector.load %arg25[%c1_261, %c0_262, %c0_263] : memref<3x128x128xf32, #tpu.memory_space<vmem>>, vector<1x128x128xf32>
    %231 = vector.shape_cast %230 : vector<1x128x128xf32> to vector<128x128xf32>
    %cst_264 = arith.constant dense<0.000000e+00> : vector<4x128xf32>
    %232 = tpu.matmul %229, %231, %cst_264 {dimension_numbers = #tpu.dot_dimension_numbers<[1], [0], [0], [1], [0, 0, 1, 1], [], []>} : vector<4x128xf32>, vector<128x128xf32>, vector<4x128xf32> -> vector<4x128xf32>
    %233 = arith.addf %228, %232 : vector<4x128xf32>
    %c2_265 = arith.constant 2 : index
    %c0_266 = arith.constant 0 : index
    %234 = vector.load %arg59[%c2_265, %c0_266] : memref<18x128xf32, #tpu.memory_space<vmem>>, vector<4x128xf32>
    %c2_267 = arith.constant 2 : index
    %c0_268 = arith.constant 0 : index
    %c0_269 = arith.constant 0 : index
    %235 = vector.load %arg25[%c2_267, %c0_268, %c0_269] : memref<3x128x128xf32, #tpu.memory_space<vmem>>, vector<1x128x128xf32>
    %236 = vector.shape_cast %235 : vector<1x128x128xf32> to vector<128x128xf32>
    %cst_270 = arith.constant dense<0.000000e+00> : vector<4x128xf32>
    %237 = tpu.matmul %234, %236, %cst_270 {dimension_numbers = #tpu.dot_dimension_numbers<[1], [0], [0], [1], [0, 0, 1, 1], [], []>} : vector<4x128xf32>, vector<128x128xf32>, vector<4x128xf32> -> vector<4x128xf32>
    %238 = arith.addf %233, %237 : vector<4x128xf32>
    %239 = vector.broadcast %219 : vector<1x128xf32> to vector<4x128xf32>
    %240 = arith.addf %238, %239 : vector<4x128xf32>
    %cst_271 = arith.constant 0.000000e+00 : f32
    %241 = vector.broadcast %cst_271 : f32 to vector<4x128xf32>
    %242 = arith.maximumf %240, %241 : vector<4x128xf32>
    %c0_272 = arith.constant 0 : index
    %c0_273 = arith.constant 0 : index
    %243 = vector.load %arg28[%c0_272, %c0_273] : memref<1x128xf32, #tpu.memory_space<vmem>>, vector<1x128xf32>
    %cst_274 = arith.constant 0.000000e+00 : f32
    %244 = vector.broadcast %cst_274 : f32 to vector<1x128xf32>
    %c0_275 = arith.constant 0 : index
    %c0_276 = arith.constant 0 : index
    %245 = vector.load %arg59[%c0_275, %c0_276] : memref<18x128xf32, #tpu.memory_space<vmem>>, vector<1x128xf32>
    tpu.vector_store %arg59[%c0_275, %c0_276], %244 {strides = array<i32>} : memref<18x128xf32, #tpu.memory_space<vmem>>, vector<1x128xf32>,
    %cst_277 = arith.constant 0.000000e+00 : f32
    %246 = vector.broadcast %cst_277 : f32 to vector<1x128xf32>
    %c5_278 = arith.constant 5 : index
    %c0_279 = arith.constant 0 : index
    %247 = vector.load %arg59[%c5_278, %c0_279] : memref<18x128xf32, #tpu.memory_space<vmem>>, vector<1x128xf32>
    tpu.vector_store %arg59[%c5_278, %c0_279], %246 {strides = array<i32>} : memref<18x128xf32, #tpu.memory_space<vmem>>, vector<1x128xf32>,
    %c1_280 = arith.constant 1 : index
    %c0_281 = arith.constant 0 : index
    %248 = vector.load %arg59[%c1_280, %c0_281] : memref<18x128xf32, #tpu.memory_space<vmem>>, vector<4x128xf32>
    tpu.vector_store %arg59[%c1_280, %c0_281], %242 {strides = array<i32>} : memref<18x128xf32, #tpu.memory_space<vmem>>, vector<4x128xf32>,
    %c0_282 = arith.constant 0 : index
    %c0_283 = arith.constant 0 : index
    %249 = vector.load %arg59[%c0_282, %c0_283] : memref<18x128xf32, #tpu.memory_space<vmem>>, vector<4x128xf32>
    %c0_284 = arith.constant 0 : index
    %c0_285 = arith.constant 0 : index
    %c0_286 = arith.constant 0 : index
    %250 = vector.load %arg27[%c0_284, %c0_285, %c0_286] : memref<3x128x128xf32, #tpu.memory_space<vmem>>, vector<1x128x128xf32>
    %251 = vector.shape_cast %250 : vector<1x128x128xf32> to vector<128x128xf32>
    %cst_287 = arith.constant dense<0.000000e+00> : vector<4x128xf32>
    %252 = tpu.matmul %249, %251, %cst_287 {dimension_numbers = #tpu.dot_dimension_numbers<[1], [0], [0], [1], [0, 0, 1, 1], [], []>} : vector<4x128xf32>, vector<128x128xf32>, vector<4x128xf32> -> vector<4x128xf32>
    %c1_288 = arith.constant 1 : index
    %c0_289 = arith.constant 0 : index
    %253 = vector.load %arg59[%c1_288, %c0_289] : memref<18x128xf32, #tpu.memory_space<vmem>>, vector<4x128xf32>
    %c1_290 = arith.constant 1 : index
    %c0_291 = arith.constant 0 : index
    %c0_292 = arith.constant 0 : index
    %254 = vector.load %arg27[%c1_290, %c0_291, %c0_292] : memref<3x128x128xf32, #tpu.memory_space<vmem>>, vector<1x128x128xf32>
    %255 = vector.shape_cast %254 : vector<1x128x128xf32> to vector<128x128xf32>
    %cst_293 = arith.constant dense<0.000000e+00> : vector<4x128xf32>
    %256 = tpu.matmul %253, %255, %cst_293 {dimension_numbers = #tpu.dot_dimension_numbers<[1], [0], [0], [1], [0, 0, 1, 1], [], []>} : vector<4x128xf32>, vector<128x128xf32>, vector<4x128xf32> -> vector<4x128xf32>
    %257 = arith.addf %252, %256 : vector<4x128xf32>
    %c2_294 = arith.constant 2 : index
    %c0_295 = arith.constant 0 : index
    %258 = vector.load %arg59[%c2_294, %c0_295] : memref<18x128xf32, #tpu.memory_space<vmem>>, vector<4x128xf32>
    %c2_296 = arith.constant 2 : index
    %c0_297 = arith.constant 0 : index
    %c0_298 = arith.constant 0 : index
    %259 = vector.load %arg27[%c2_296, %c0_297, %c0_298] : memref<3x128x128xf32, #tpu.memory_space<vmem>>, vector<1x128x128xf32>
    %260 = vector.shape_cast %259 : vector<1x128x128xf32> to vector<128x128xf32>
    %cst_299 = arith.constant dense<0.000000e+00> : vector<4x128xf32>
    %261 = tpu.matmul %258, %260, %cst_299 {dimension_numbers = #tpu.dot_dimension_numbers<[1], [0], [0], [1], [0, 0, 1, 1], [], []>} : vector<4x128xf32>, vector<128x128xf32>, vector<4x128xf32> -> vector<4x128xf32>
    %262 = arith.addf %257, %261 : vector<4x128xf32>
    %263 = vector.broadcast %243 : vector<1x128xf32> to vector<4x128xf32>
    %264 = arith.addf %262, %263 : vector<4x128xf32>
    %cst_300 = arith.constant 0.000000e+00 : f32
    %265 = vector.broadcast %cst_300 : f32 to vector<4x128xf32>
    %266 = arith.maximumf %264, %265 : vector<4x128xf32>
    %c0_301 = arith.constant 0 : index
    %c0_302 = arith.constant 0 : index
    %267 = vector.load %arg29[%c0_301, %c0_302] : memref<32x128xf32, #tpu.memory_space<vmem>>, vector<32x128xf32>
    %cst_303 = arith.constant dense<0.000000e+00> : vector<1x128xf32>
    %268 = tpu.matmul %3, %267, %cst_303 {dimension_numbers = #tpu.dot_dimension_numbers<[1], [0], [0], [1], [0, 0, 1, 1], [], []>} : vector<1x32xf32>, vector<32x128xf32>, vector<1x128xf32> -> vector<1x128xf32>
    %c0_304 = arith.constant 0 : index
    %c0_305 = arith.constant 0 : index
    %269 = vector.load %arg30[%c0_304, %c0_305] : memref<1x128xf32, #tpu.memory_space<vmem>>, vector<1x128xf32>
    %270 = arith.addf %268, %269 : vector<1x128xf32>
    %271 = vector.broadcast %270 : vector<1x128xf32> to vector<4x128xf32>
    %272 = arith.addf %266, %271 : vector<4x128xf32>
    %cst_306 = arith.constant 0.000000e+00 : f32
    %273 = vector.broadcast %cst_306 : f32 to vector<1x128xf32>
    %c0_307 = arith.constant 0 : index
    %c0_308 = arith.constant 0 : index
    %274 = vector.load %arg59[%c0_307, %c0_308] : memref<18x128xf32, #tpu.memory_space<vmem>>, vector<1x128xf32>
    tpu.vector_store %arg59[%c0_307, %c0_308], %273 {strides = array<i32>} : memref<18x128xf32, #tpu.memory_space<vmem>>, vector<1x128xf32>,
    %cst_309 = arith.constant 0.000000e+00 : f32
    %275 = vector.broadcast %cst_309 : f32 to vector<1x128xf32>
    %c5_310 = arith.constant 5 : index
    %c0_311 = arith.constant 0 : index
    %276 = vector.load %arg59[%c5_310, %c0_311] : memref<18x128xf32, #tpu.memory_space<vmem>>, vector<1x128xf32>
    tpu.vector_store %arg59[%c5_310, %c0_311], %275 {strides = array<i32>} : memref<18x128xf32, #tpu.memory_space<vmem>>, vector<1x128xf32>,
    %c1_312 = arith.constant 1 : index
    %c0_313 = arith.constant 0 : index
    %277 = vector.load %arg59[%c1_312, %c0_313] : memref<18x128xf32, #tpu.memory_space<vmem>>, vector<4x128xf32>
    tpu.vector_store %arg59[%c1_312, %c0_313], %272 {strides = array<i32>} : memref<18x128xf32, #tpu.memory_space<vmem>>, vector<4x128xf32>,
    %c0_314 = arith.constant 0 : index
    %c0_315 = arith.constant 0 : index
    %278 = vector.load %arg59[%c0_314, %c0_315] : memref<18x128xf32, #tpu.memory_space<vmem>>, vector<4x128xf32>
    %c0_316 = arith.constant 0 : index
    %c0_317 = arith.constant 0 : index
    %c0_318 = arith.constant 0 : index
    %279 = vector.load %arg31[%c0_316, %c0_317, %c0_318] : memref<3x128x128xf32, #tpu.memory_space<vmem>>, vector<1x128x128xf32>
    %280 = vector.shape_cast %279 : vector<1x128x128xf32> to vector<128x128xf32>
    %cst_319 = arith.constant dense<0.000000e+00> : vector<4x128xf32>
    %281 = tpu.matmul %278, %280, %cst_319 {dimension_numbers = #tpu.dot_dimension_numbers<[1], [0], [0], [1], [0, 0, 1, 1], [], []>} : vector<4x128xf32>, vector<128x128xf32>, vector<4x128xf32> -> vector<4x128xf32>
    %c1_320 = arith.constant 1 : index
    %c0_321 = arith.constant 0 : index
    %282 = vector.load %arg59[%c1_320, %c0_321] : memref<18x128xf32, #tpu.memory_space<vmem>>, vector<4x128xf32>
    %c1_322 = arith.constant 1 : index
    %c0_323 = arith.constant 0 : index
    %c0_324 = arith.constant 0 : index
    %283 = vector.load %arg31[%c1_322, %c0_323, %c0_324] : memref<3x128x128xf32, #tpu.memory_space<vmem>>, vector<1x128x128xf32>
    %284 = vector.shape_cast %283 : vector<1x128x128xf32> to vector<128x128xf32>
    %cst_325 = arith.constant dense<0.000000e+00> : vector<4x128xf32>
    %285 = tpu.matmul %282, %284, %cst_325 {dimension_numbers = #tpu.dot_dimension_numbers<[1], [0], [0], [1], [0, 0, 1, 1], [], []>} : vector<4x128xf32>, vector<128x128xf32>, vector<4x128xf32> -> vector<4x128xf32>
    %286 = arith.addf %281, %285 : vector<4x128xf32>
    %c2_326 = arith.constant 2 : index
    %c0_327 = arith.constant 0 : index
    %287 = vector.load %arg59[%c2_326, %c0_327] : memref<18x128xf32, #tpu.memory_space<vmem>>, vector<4x128xf32>
    %c2_328 = arith.constant 2 : index
    %c0_329 = arith.constant 0 : index
    %c0_330 = arith.constant 0 : index
    %288 = vector.load %arg31[%c2_328, %c0_329, %c0_330] : memref<3x128x128xf32, #tpu.memory_space<vmem>>, vector<1x128x128xf32>
    %289 = vector.shape_cast %288 : vector<1x128x128xf32> to vector<128x128xf32>
    %cst_331 = arith.constant dense<0.000000e+00> : vector<4x128xf32>
    %290 = tpu.matmul %287, %289, %cst_331 {dimension_numbers = #tpu.dot_dimension_numbers<[1], [0], [0], [1], [0, 0, 1, 1], [], []>} : vector<4x128xf32>, vector<128x128xf32>, vector<4x128xf32> -> vector<4x128xf32>
    %291 = arith.addf %286, %290 : vector<4x128xf32>
    %cst_332 = arith.constant 0.000000e+00 : f32
    %292 = vector.broadcast %cst_332 : f32 to vector<4x128xf32>
    %293 = arith.subf %292, %291 : vector<4x128xf32>
    %294 = math.exp %293 : vector<4x128xf32>
    %cst_333 = arith.constant 1.000000e+00 : f32
    %295 = vector.broadcast %cst_333 : f32 to vector<4x128xf32>
    %296 = arith.addf %295, %294 : vector<4x128xf32>
    %cst_334 = arith.constant 1.000000e+00 : f32
    %297 = vector.broadcast %cst_334 : f32 to vector<4x128xf32>
    %298 = arith.divf %297, %296 : vector<4x128xf32>
    %299 = arith.mulf %272, %298 : vector<4x128xf32>
    %c0_335 = arith.constant 0 : index
    %c0_336 = arith.constant 0 : index
    %300 = vector.load %arg32[%c0_335, %c0_336] : memref<128x128xf32, #tpu.memory_space<vmem>>, vector<128x128xf32>
    %cst_337 = arith.constant dense<0.000000e+00> : vector<4x128xf32>
    %301 = tpu.matmul %299, %300, %cst_337 {dimension_numbers = #tpu.dot_dimension_numbers<[1], [0], [0], [1], [0, 0, 1, 1], [], []>} : vector<4x128xf32>, vector<128x128xf32>, vector<4x128xf32> -> vector<4x128xf32>
    %c0_338 = arith.constant 0 : index
    %c0_339 = arith.constant 0 : index
    %302 = vector.load %arg33[%c0_338, %c0_339] : memref<1x128xf32, #tpu.memory_space<vmem>>, vector<1x128xf32>
    %303 = vector.broadcast %302 : vector<1x128xf32> to vector<4x128xf32>
    %304 = arith.addf %301, %303 : vector<4x128xf32>
    %c0_340 = arith.constant 0 : index
    %c0_341 = arith.constant 0 : index
    %c0_342 = arith.constant 0 : index
    %305 = vector.load %arg34[%c0_340, %c0_341, %c0_342] : memref<2x256x128xf32, #tpu.memory_space<vmem>>, vector<1x128x128xf32>
    %306 = vector.shape_cast %305 : vector<1x128x128xf32> to vector<128x128xf32>
    %cst_343 = arith.constant dense<0.000000e+00> : vector<4x128xf32>
    %307 = tpu.matmul %304, %306, %cst_343 {dimension_numbers = #tpu.dot_dimension_numbers<[1], [0], [0], [1], [0, 0, 1, 1], [], []>} : vector<4x128xf32>, vector<128x128xf32>, vector<4x128xf32> -> vector<4x128xf32>
    %c0_344 = arith.constant 0 : index
    %c128 = arith.constant 128 : index
    %c0_345 = arith.constant 0 : index
    %308 = vector.load %arg34[%c0_344, %c128, %c0_345] : memref<2x256x128xf32, #tpu.memory_space<vmem>>, vector<1x128x128xf32>
    %309 = vector.shape_cast %308 : vector<1x128x128xf32> to vector<128x128xf32>
    %cst_346 = arith.constant dense<0.000000e+00> : vector<4x128xf32>
    %310 = tpu.matmul %218, %309, %cst_346 {dimension_numbers = #tpu.dot_dimension_numbers<[1], [0], [0], [1], [0, 0, 1, 1], [], []>} : vector<4x128xf32>, vector<128x128xf32>, vector<4x128xf32> -> vector<4x128xf32>
    %311 = arith.addf %307, %310 : vector<4x128xf32>
    %c0_347 = arith.constant 0 : index
    %c0_348 = arith.constant 0 : index
    %312 = vector.load %arg35[%c0_347, %c0_348] : memref<1x128xf32, #tpu.memory_space<vmem>>, vector<1x128xf32>
    %313 = vector.broadcast %312 : vector<1x128xf32> to vector<4x128xf32>
    %314 = arith.addf %311, %313 : vector<4x128xf32>
    %315 = vector.extract_strided_slice %314 {offsets = [0, 0], sizes = [1, 128], strides = [1, 1]} : vector<4x128xf32> to vector<1x128xf32>
    %c0_349 = arith.constant 0 : index
    %c0_350 = arith.constant 0 : index
    %316 = vector.load %arg59[%c0_349, %c0_350] : memref<18x128xf32, #tpu.memory_space<vmem>>, vector<1x128xf32>
    tpu.vector_store %arg59[%c0_349, %c0_350], %315 {strides = array<i32>} : memref<18x128xf32, #tpu.memory_space<vmem>>, vector<1x128xf32>,
    %317 = vector.extract_strided_slice %314 {offsets = [1, 0], sizes = [1, 128], strides = [1, 1]} : vector<4x128xf32> to vector<1x128xf32>
    %c2_351 = arith.constant 2 : index
    %c0_352 = arith.constant 0 : index
    %318 = vector.load %arg59[%c2_351, %c0_352] : memref<18x128xf32, #tpu.memory_space<vmem>>, vector<1x128xf32>
    tpu.vector_store %arg59[%c2_351, %c0_352], %317 {strides = array<i32>} : memref<18x128xf32, #tpu.memory_space<vmem>>, vector<1x128xf32>,
    %319 = vector.extract_strided_slice %314 {offsets = [2, 0], sizes = [1, 128], strides = [1, 1]} : vector<4x128xf32> to vector<1x128xf32>
    %c4 = arith.constant 4 : index
    %c0_353 = arith.constant 0 : index
    %320 = vector.load %arg59[%c4, %c0_353] : memref<18x128xf32, #tpu.memory_space<vmem>>, vector<1x128xf32>
    tpu.vector_store %arg59[%c4, %c0_353], %319 {strides = array<i32>} : memref<18x128xf32, #tpu.memory_space<vmem>>, vector<1x128xf32>,
    %321 = vector.extract_strided_slice %314 {offsets = [3, 0], sizes = [1, 128], strides = [1, 1]} : vector<4x128xf32> to vector<1x128xf32>
    %c6 = arith.constant 6 : index
    %c0_354 = arith.constant 0 : index
    %322 = vector.load %arg59[%c6, %c0_354] : memref<18x128xf32, #tpu.memory_space<vmem>>, vector<1x128xf32>
    tpu.vector_store %arg59[%c6, %c0_354], %321 {strides = array<i32>} : memref<18x128xf32, #tpu.memory_space<vmem>>, vector<1x128xf32>,
    %c1_355 = arith.constant 1 : index
    %c0_356 = arith.constant 0 : index
    %c0_357 = arith.constant 0 : index
    %323 = vector.load %arg34[%c1_355, %c0_356, %c0_357] : memref<2x256x128xf32, #tpu.memory_space<vmem>>, vector<1x128x128xf32>
    %324 = vector.shape_cast %323 : vector<1x128x128xf32> to vector<128x128xf32>
    %cst_358 = arith.constant dense<0.000000e+00> : vector<4x128xf32>
    %325 = tpu.matmul %304, %324, %cst_358 {dimension_numbers = #tpu.dot_dimension_numbers<[1], [0], [0], [1], [0, 0, 1, 1], [], []>} : vector<4x128xf32>, vector<128x128xf32>, vector<4x128xf32> -> vector<4x128xf32>
    %c1_359 = arith.constant 1 : index
    %c128_360 = arith.constant 128 : index
    %c0_361 = arith.constant 0 : index
    %326 = vector.load %arg34[%c1_359, %c128_360, %c0_361] : memref<2x256x128xf32, #tpu.memory_space<vmem>>, vector<1x128x128xf32>
    %327 = vector.shape_cast %326 : vector<1x128x128xf32> to vector<128x128xf32>
    %cst_362 = arith.constant dense<0.000000e+00> : vector<4x128xf32>
    %328 = tpu.matmul %218, %327, %cst_362 {dimension_numbers = #tpu.dot_dimension_numbers<[1], [0], [0], [1], [0, 0, 1, 1], [], []>} : vector<4x128xf32>, vector<128x128xf32>, vector<4x128xf32> -> vector<4x128xf32>
    %329 = arith.addf %325, %328 : vector<4x128xf32>
    %c0_363 = arith.constant 0 : index
    %c0_364 = arith.constant 0 : index
    %330 = vector.load %arg35[%c0_363, %c0_364] : memref<1x128xf32, #tpu.memory_space<vmem>>, vector<1x128xf32>
    %331 = vector.broadcast %330 : vector<1x128xf32> to vector<4x128xf32>
    %332 = arith.addf %329, %331 : vector<4x128xf32>
    %333 = vector.extract_strided_slice %332 {offsets = [0, 0], sizes = [1, 128], strides = [1, 1]} : vector<4x128xf32> to vector<1x128xf32>
    %c1_365 = arith.constant 1 : index
    %c0_366 = arith.constant 0 : index
    %334 = vector.load %arg59[%c1_365, %c0_366] : memref<18x128xf32, #tpu.memory_space<vmem>>, vector<1x128xf32>
    tpu.vector_store %arg59[%c1_365, %c0_366], %333 {strides = array<i32>} : memref<18x128xf32, #tpu.memory_space<vmem>>, vector<1x128xf32>,
    %335 = vector.extract_strided_slice %332 {offsets = [1, 0], sizes = [1, 128], strides = [1, 1]} : vector<4x128xf32> to vector<1x128xf32>
    %c3 = arith.constant 3 : index
    %c0_367 = arith.constant 0 : index
    %336 = vector.load %arg59[%c3, %c0_367] : memref<18x128xf32, #tpu.memory_space<vmem>>, vector<1x128xf32>
    tpu.vector_store %arg59[%c3, %c0_367], %335 {strides = array<i32>} : memref<18x128xf32, #tpu.memory_space<vmem>>, vector<1x128xf32>,
    %337 = vector.extract_strided_slice %332 {offsets = [2, 0], sizes = [1, 128], strides = [1, 1]} : vector<4x128xf32> to vector<1x128xf32>
    %c5_368 = arith.constant 5 : index
    %c0_369 = arith.constant 0 : index
    %338 = vector.load %arg59[%c5_368, %c0_369] : memref<18x128xf32, #tpu.memory_space<vmem>>, vector<1x128xf32>
    tpu.vector_store %arg59[%c5_368, %c0_369], %337 {strides = array<i32>} : memref<18x128xf32, #tpu.memory_space<vmem>>, vector<1x128xf32>,
    %339 = vector.extract_strided_slice %332 {offsets = [3, 0], sizes = [1, 128], strides = [1, 1]} : vector<4x128xf32> to vector<1x128xf32>
    %c7 = arith.constant 7 : index
    %c0_370 = arith.constant 0 : index
    %340 = vector.load %arg59[%c7, %c0_370] : memref<18x128xf32, #tpu.memory_space<vmem>>, vector<1x128xf32>
    tpu.vector_store %arg59[%c7, %c0_370], %339 {strides = array<i32>} : memref<18x128xf32, #tpu.memory_space<vmem>>, vector<1x128xf32>,
    %c0_371 = arith.constant 0 : index
    %c0_372 = arith.constant 0 : index
    %341 = vector.load %arg59[%c0_371, %c0_372] : memref<18x128xf32, #tpu.memory_space<vmem>>, vector<8x128xf32>
    %c0_373 = arith.constant 0 : index
    %c0_374 = arith.constant 0 : index
    %342 = vector.load %arg37[%c0_373, %c0_374] : memref<1x64xf32, #tpu.memory_space<vmem>>, vector<1x64xf32>
    %cst_375 = arith.constant 0.000000e+00 : f32
    %343 = vector.broadcast %cst_375 : f32 to vector<1x128xf32>
    %c0_376 = arith.constant 0 : index
    %c0_377 = arith.constant 0 : index
    %344 = vector.load %arg59[%c0_376, %c0_377] : memref<18x128xf32, #tpu.memory_space<vmem>>, vector<1x128xf32>
    tpu.vector_store %arg59[%c0_376, %c0_377], %343 {strides = array<i32>} : memref<18x128xf32, #tpu.memory_space<vmem>>, vector<1x128xf32>,
    %cst_378 = arith.constant 0.000000e+00 : f32
    %345 = vector.broadcast %cst_378 : f32 to vector<1x128xf32>
    %c9_379 = arith.constant 9 : index
    %c0_380 = arith.constant 0 : index
    %346 = vector.load %arg59[%c9_379, %c0_380] : memref<18x128xf32, #tpu.memory_space<vmem>>, vector<1x128xf32>
    tpu.vector_store %arg59[%c9_379, %c0_380], %345 {strides = array<i32>} : memref<18x128xf32, #tpu.memory_space<vmem>>, vector<1x128xf32>,
    %c1_381 = arith.constant 1 : index
    %c0_382 = arith.constant 0 : index
    %347 = vector.load %arg59[%c1_381, %c0_382] : memref<18x128xf32, #tpu.memory_space<vmem>>, vector<8x128xf32>
    tpu.vector_store %arg59[%c1_381, %c0_382], %341 {strides = array<i32>} : memref<18x128xf32, #tpu.memory_space<vmem>>, vector<8x128xf32>,
    %c0_383 = arith.constant 0 : index
    %c0_384 = arith.constant 0 : index
    %348 = vector.load %arg59[%c0_383, %c0_384] : memref<18x128xf32, #tpu.memory_space<vmem>>, vector<8x128xf32>
    %c0_385 = arith.constant 0 : index
    %c0_386 = arith.constant 0 : index
    %c0_387 = arith.constant 0 : index
    %349 = vector.load %arg36[%c0_385, %c0_386, %c0_387] : memref<3x256x64xf32, #tpu.memory_space<vmem>>, vector<1x128x64xf32>
    %350 = vector.shape_cast %349 : vector<1x128x64xf32> to vector<128x64xf32>
    %cst_388 = arith.constant dense<0.000000e+00> : vector<8x64xf32>
    %351 = tpu.matmul %348, %350, %cst_388 {dimension_numbers = #tpu.dot_dimension_numbers<[1], [0], [0], [1], [0, 0, 1, 1], [], []>} : vector<8x128xf32>, vector<128x64xf32>, vector<8x64xf32> -> vector<8x64xf32>
    %c1_389 = arith.constant 1 : index
    %c0_390 = arith.constant 0 : index
    %352 = vector.load %arg59[%c1_389, %c0_390] : memref<18x128xf32, #tpu.memory_space<vmem>>, vector<8x128xf32>
    %c1_391 = arith.constant 1 : index
    %c0_392 = arith.constant 0 : index
    %c0_393 = arith.constant 0 : index
    %353 = vector.load %arg36[%c1_391, %c0_392, %c0_393] : memref<3x256x64xf32, #tpu.memory_space<vmem>>, vector<1x128x64xf32>
    %354 = vector.shape_cast %353 : vector<1x128x64xf32> to vector<128x64xf32>
    %cst_394 = arith.constant dense<0.000000e+00> : vector<8x64xf32>
    %355 = tpu.matmul %352, %354, %cst_394 {dimension_numbers = #tpu.dot_dimension_numbers<[1], [0], [0], [1], [0, 0, 1, 1], [], []>} : vector<8x128xf32>, vector<128x64xf32>, vector<8x64xf32> -> vector<8x64xf32>
    %356 = arith.addf %351, %355 : vector<8x64xf32>
    %c2_395 = arith.constant 2 : index
    %c0_396 = arith.constant 0 : index
    %357 = vector.load %arg59[%c2_395, %c0_396] : memref<18x128xf32, #tpu.memory_space<vmem>>, vector<8x128xf32>
    %c2_397 = arith.constant 2 : index
    %c0_398 = arith.constant 0 : index
    %c0_399 = arith.constant 0 : index
    %358 = vector.load %arg36[%c2_397, %c0_398, %c0_399] : memref<3x256x64xf32, #tpu.memory_space<vmem>>, vector<1x128x64xf32>
    %359 = vector.shape_cast %358 : vector<1x128x64xf32> to vector<128x64xf32>
    %cst_400 = arith.constant dense<0.000000e+00> : vector<8x64xf32>
    %360 = tpu.matmul %357, %359, %cst_400 {dimension_numbers = #tpu.dot_dimension_numbers<[1], [0], [0], [1], [0, 0, 1, 1], [], []>} : vector<8x128xf32>, vector<128x64xf32>, vector<8x64xf32> -> vector<8x64xf32>
    %361 = arith.addf %356, %360 : vector<8x64xf32>
    %cst_401 = arith.constant 0.000000e+00 : f32
    %362 = vector.broadcast %cst_401 : f32 to vector<1x128xf32>
    %c0_402 = arith.constant 0 : index
    %c0_403 = arith.constant 0 : index
    %363 = vector.load %arg59[%c0_402, %c0_403] : memref<18x128xf32, #tpu.memory_space<vmem>>, vector<1x128xf32>
    tpu.vector_store %arg59[%c0_402, %c0_403], %362 {strides = array<i32>} : memref<18x128xf32, #tpu.memory_space<vmem>>, vector<1x128xf32>,
    %cst_404 = arith.constant 0.000000e+00 : f32
    %364 = vector.broadcast %cst_404 : f32 to vector<1x128xf32>
    %c9_405 = arith.constant 9 : index
    %c0_406 = arith.constant 0 : index
    %365 = vector.load %arg59[%c9_405, %c0_406] : memref<18x128xf32, #tpu.memory_space<vmem>>, vector<1x128xf32>
    tpu.vector_store %arg59[%c9_405, %c0_406], %364 {strides = array<i32>} : memref<18x128xf32, #tpu.memory_space<vmem>>, vector<1x128xf32>,
    %c1_407 = arith.constant 1 : index
    %c0_408 = arith.constant 0 : index
    %366 = vector.load %arg59[%c1_407, %c0_408] : memref<18x128xf32, #tpu.memory_space<vmem>>, vector<8x128xf32>
    tpu.vector_store %arg59[%c1_407, %c0_408], %198 {strides = array<i32>} : memref<18x128xf32, #tpu.memory_space<vmem>>, vector<8x128xf32>,
    %c0_409 = arith.constant 0 : index
    %c0_410 = arith.constant 0 : index
    %367 = vector.load %arg59[%c0_409, %c0_410] : memref<18x128xf32, #tpu.memory_space<vmem>>, vector<8x128xf32>
    %c0_411 = arith.constant 0 : index
    %c128_412 = arith.constant 128 : index
    %c0_413 = arith.constant 0 : index
    %368 = vector.load %arg36[%c0_411, %c128_412, %c0_413] : memref<3x256x64xf32, #tpu.memory_space<vmem>>, vector<1x128x64xf32>
    %369 = vector.shape_cast %368 : vector<1x128x64xf32> to vector<128x64xf32>
    %cst_414 = arith.constant dense<0.000000e+00> : vector<8x64xf32>
    %370 = tpu.matmul %367, %369, %cst_414 {dimension_numbers = #tpu.dot_dimension_numbers<[1], [0], [0], [1], [0, 0, 1, 1], [], []>} : vector<8x128xf32>, vector<128x64xf32>, vector<8x64xf32> -> vector<8x64xf32>
    %371 = arith.addf %361, %370 : vector<8x64xf32>
    %c1_415 = arith.constant 1 : index
    %c0_416 = arith.constant 0 : index
    %372 = vector.load %arg59[%c1_415, %c0_416] : memref<18x128xf32, #tpu.memory_space<vmem>>, vector<8x128xf32>
    %c1_417 = arith.constant 1 : index
    %c128_418 = arith.constant 128 : index
    %c0_419 = arith.constant 0 : index
    %373 = vector.load %arg36[%c1_417, %c128_418, %c0_419] : memref<3x256x64xf32, #tpu.memory_space<vmem>>, vector<1x128x64xf32>
    %374 = vector.shape_cast %373 : vector<1x128x64xf32> to vector<128x64xf32>
    %cst_420 = arith.constant dense<0.000000e+00> : vector<8x64xf32>
    %375 = tpu.matmul %372, %374, %cst_420 {dimension_numbers = #tpu.dot_dimension_numbers<[1], [0], [0], [1], [0, 0, 1, 1], [], []>} : vector<8x128xf32>, vector<128x64xf32>, vector<8x64xf32> -> vector<8x64xf32>
    %376 = arith.addf %371, %375 : vector<8x64xf32>
    %c2_421 = arith.constant 2 : index
    %c0_422 = arith.constant 0 : index
    %377 = vector.load %arg59[%c2_421, %c0_422] : memref<18x128xf32, #tpu.memory_space<vmem>>, vector<8x128xf32>
    %c2_423 = arith.constant 2 : index
    %c128_424 = arith.constant 128 : index
    %c0_425 = arith.constant 0 : index
    %378 = vector.load %arg36[%c2_423, %c128_424, %c0_425] : memref<3x256x64xf32, #tpu.memory_space<vmem>>, vector<1x128x64xf32>
    %379 = vector.shape_cast %378 : vector<1x128x64xf32> to vector<128x64xf32>
    %cst_426 = arith.constant dense<0.000000e+00> : vector<8x64xf32>
    %380 = tpu.matmul %377, %379, %cst_426 {dimension_numbers = #tpu.dot_dimension_numbers<[1], [0], [0], [1], [0, 0, 1, 1], [], []>} : vector<8x128xf32>, vector<128x64xf32>, vector<8x64xf32> -> vector<8x64xf32>
    %381 = arith.addf %376, %380 : vector<8x64xf32>
    %382 = vector.broadcast %342 : vector<1x64xf32> to vector<8x64xf32>
    %383 = arith.addf %381, %382 : vector<8x64xf32>
    %cst_427 = arith.constant 0.000000e+00 : f32
    %384 = vector.broadcast %cst_427 : f32 to vector<8x64xf32>
    %385 = arith.maximumf %383, %384 : vector<8x64xf32>
    %c0_428 = arith.constant 0 : index
    %c0_429 = arith.constant 0 : index
    %386 = vector.load %arg39[%c0_428, %c0_429] : memref<1x64xf32, #tpu.memory_space<vmem>>, vector<1x64xf32>
    %cst_430 = arith.constant 0.000000e+00 : f32
    %387 = vector.broadcast %cst_430 : f32 to vector<1x64xf32>
    %c0_431 = arith.constant 0 : index
    %c0_432 = arith.constant 0 : index
    %388 = vector.load %arg59[%c0_431, %c0_432] : memref<18x128xf32, #tpu.memory_space<vmem>>, vector<1x64xf32>
    tpu.vector_store %arg59[%c0_431, %c0_432], %387 {strides = array<i32>} : memref<18x128xf32, #tpu.memory_space<vmem>>, vector<1x64xf32>,
    %cst_433 = arith.constant 0.000000e+00 : f32
    %389 = vector.broadcast %cst_433 : f32 to vector<1x64xf32>
    %c9_434 = arith.constant 9 : index
    %c0_435 = arith.constant 0 : index
    %390 = vector.load %arg59[%c9_434, %c0_435] : memref<18x128xf32, #tpu.memory_space<vmem>>, vector<1x64xf32>
    tpu.vector_store %arg59[%c9_434, %c0_435], %389 {strides = array<i32>} : memref<18x128xf32, #tpu.memory_space<vmem>>, vector<1x64xf32>,
    %c1_436 = arith.constant 1 : index
    %c0_437 = arith.constant 0 : index
    %391 = vector.load %arg59[%c1_436, %c0_437] : memref<18x128xf32, #tpu.memory_space<vmem>>, vector<8x64xf32>
    tpu.vector_store %arg59[%c1_436, %c0_437], %385 {strides = array<i32>} : memref<18x128xf32, #tpu.memory_space<vmem>>, vector<8x64xf32>,
    %c0_438 = arith.constant 0 : index
    %c0_439 = arith.constant 0 : index
    %392 = vector.load %arg59[%c0_438, %c0_439] : memref<18x128xf32, #tpu.memory_space<vmem>>, vector<8x64xf32>
    %c0_440 = arith.constant 0 : index
    %c0_441 = arith.constant 0 : index
    %c0_442 = arith.constant 0 : index
    %393 = vector.load %arg38[%c0_440, %c0_441, %c0_442] : memref<3x64x64xf32, #tpu.memory_space<vmem>>, vector<1x64x64xf32>
    %394 = vector.shape_cast %393 : vector<1x64x64xf32> to vector<64x64xf32>
    %cst_443 = arith.constant dense<0.000000e+00> : vector<8x64xf32>
    %395 = tpu.matmul %392, %394, %cst_443 {dimension_numbers = #tpu.dot_dimension_numbers<[1], [0], [0], [1], [0, 0, 1, 1], [], []>} : vector<8x64xf32>, vector<64x64xf32>, vector<8x64xf32> -> vector<8x64xf32>
    %c1_444 = arith.constant 1 : index
    %c0_445 = arith.constant 0 : index
    %396 = vector.load %arg59[%c1_444, %c0_445] : memref<18x128xf32, #tpu.memory_space<vmem>>, vector<8x64xf32>
    %c1_446 = arith.constant 1 : index
    %c0_447 = arith.constant 0 : index
    %c0_448 = arith.constant 0 : index
    %397 = vector.load %arg38[%c1_446, %c0_447, %c0_448] : memref<3x64x64xf32, #tpu.memory_space<vmem>>, vector<1x64x64xf32>
    %398 = vector.shape_cast %397 : vector<1x64x64xf32> to vector<64x64xf32>
    %cst_449 = arith.constant dense<0.000000e+00> : vector<8x64xf32>
    %399 = tpu.matmul %396, %398, %cst_449 {dimension_numbers = #tpu.dot_dimension_numbers<[1], [0], [0], [1], [0, 0, 1, 1], [], []>} : vector<8x64xf32>, vector<64x64xf32>, vector<8x64xf32> -> vector<8x64xf32>
    %400 = arith.addf %395, %399 : vector<8x64xf32>
    %c2_450 = arith.constant 2 : index
    %c0_451 = arith.constant 0 : index
    %401 = vector.load %arg59[%c2_450, %c0_451] : memref<18x128xf32, #tpu.memory_space<vmem>>, vector<8x64xf32>
    %c2_452 = arith.constant 2 : index
    %c0_453 = arith.constant 0 : index
    %c0_454 = arith.constant 0 : index
    %402 = vector.load %arg38[%c2_452, %c0_453, %c0_454] : memref<3x64x64xf32, #tpu.memory_space<vmem>>, vector<1x64x64xf32>
    %403 = vector.shape_cast %402 : vector<1x64x64xf32> to vector<64x64xf32>
    %cst_455 = arith.constant dense<0.000000e+00> : vector<8x64xf32>
    %404 = tpu.matmul %401, %403, %cst_455 {dimension_numbers = #tpu.dot_dimension_numbers<[1], [0], [0], [1], [0, 0, 1, 1], [], []>} : vector<8x64xf32>, vector<64x64xf32>, vector<8x64xf32> -> vector<8x64xf32>
    %405 = arith.addf %400, %404 : vector<8x64xf32>
    %406 = vector.broadcast %386 : vector<1x64xf32> to vector<8x64xf32>
    %407 = arith.addf %405, %406 : vector<8x64xf32>
    %cst_456 = arith.constant 0.000000e+00 : f32
    %408 = vector.broadcast %cst_456 : f32 to vector<8x64xf32>
    %409 = arith.maximumf %407, %408 : vector<8x64xf32>
    %c0_457 = arith.constant 0 : index
    %c0_458 = arith.constant 0 : index
    %410 = vector.load %arg40[%c0_457, %c0_458] : memref<32x64xf32, #tpu.memory_space<vmem>>, vector<32x64xf32>
    %cst_459 = arith.constant dense<0.000000e+00> : vector<1x64xf32>
    %411 = tpu.matmul %3, %410, %cst_459 {dimension_numbers = #tpu.dot_dimension_numbers<[1], [0], [0], [1], [0, 0, 1, 1], [], []>} : vector<1x32xf32>, vector<32x64xf32>, vector<1x64xf32> -> vector<1x64xf32>
    %c0_460 = arith.constant 0 : index
    %c0_461 = arith.constant 0 : index
    %412 = vector.load %arg41[%c0_460, %c0_461] : memref<1x64xf32, #tpu.memory_space<vmem>>, vector<1x64xf32>
    %413 = arith.addf %411, %412 : vector<1x64xf32>
    %414 = vector.broadcast %413 : vector<1x64xf32> to vector<8x64xf32>
    %415 = arith.addf %409, %414 : vector<8x64xf32>
    %cst_462 = arith.constant 0.000000e+00 : f32
    %416 = vector.broadcast %cst_462 : f32 to vector<1x64xf32>
    %c0_463 = arith.constant 0 : index
    %c0_464 = arith.constant 0 : index
    %417 = vector.load %arg59[%c0_463, %c0_464] : memref<18x128xf32, #tpu.memory_space<vmem>>, vector<1x64xf32>
    tpu.vector_store %arg59[%c0_463, %c0_464], %416 {strides = array<i32>} : memref<18x128xf32, #tpu.memory_space<vmem>>, vector<1x64xf32>,
    %cst_465 = arith.constant 0.000000e+00 : f32
    %418 = vector.broadcast %cst_465 : f32 to vector<1x64xf32>
    %c9_466 = arith.constant 9 : index
    %c0_467 = arith.constant 0 : index
    %419 = vector.load %arg59[%c9_466, %c0_467] : memref<18x128xf32, #tpu.memory_space<vmem>>, vector<1x64xf32>
    tpu.vector_store %arg59[%c9_466, %c0_467], %418 {strides = array<i32>} : memref<18x128xf32, #tpu.memory_space<vmem>>, vector<1x64xf32>,
    %c1_468 = arith.constant 1 : index
    %c0_469 = arith.constant 0 : index
    %420 = vector.load %arg59[%c1_468, %c0_469] : memref<18x128xf32, #tpu.memory_space<vmem>>, vector<8x64xf32>
    tpu.vector_store %arg59[%c1_468, %c0_469], %415 {strides = array<i32>} : memref<18x128xf32, #tpu.memory_space<vmem>>, vector<8x64xf32>,
    %c0_470 = arith.constant 0 : index
    %c0_471 = arith.constant 0 : index
    %421 = vector.load %arg59[%c0_470, %c0_471] : memref<18x128xf32, #tpu.memory_space<vmem>>, vector<8x64xf32>
    %c0_472 = arith.constant 0 : index
    %c0_473 = arith.constant 0 : index
    %c0_474 = arith.constant 0 : index
    %422 = vector.load %arg42[%c0_472, %c0_473, %c0_474] : memref<3x64x64xf32, #tpu.memory_space<vmem>>, vector<1x64x64xf32>
    %423 = vector.shape_cast %422 : vector<1x64x64xf32> to vector<64x64xf32>
    %cst_475 = arith.constant dense<0.000000e+00> : vector<8x64xf32>
    %424 = tpu.matmul %421, %423, %cst_475 {dimension_numbers = #tpu.dot_dimension_numbers<[1], [0], [0], [1], [0, 0, 1, 1], [], []>} : vector<8x64xf32>, vector<64x64xf32>, vector<8x64xf32> -> vector<8x64xf32>
    %c1_476 = arith.constant 1 : index
    %c0_477 = arith.constant 0 : index
    %425 = vector.load %arg59[%c1_476, %c0_477] : memref<18x128xf32, #tpu.memory_space<vmem>>, vector<8x64xf32>
    %c1_478 = arith.constant 1 : index
    %c0_479 = arith.constant 0 : index
    %c0_480 = arith.constant 0 : index
    %426 = vector.load %arg42[%c1_478, %c0_479, %c0_480] : memref<3x64x64xf32, #tpu.memory_space<vmem>>, vector<1x64x64xf32>
    %427 = vector.shape_cast %426 : vector<1x64x64xf32> to vector<64x64xf32>
    %cst_481 = arith.constant dense<0.000000e+00> : vector<8x64xf32>
    %428 = tpu.matmul %425, %427, %cst_481 {dimension_numbers = #tpu.dot_dimension_numbers<[1], [0], [0], [1], [0, 0, 1, 1], [], []>} : vector<8x64xf32>, vector<64x64xf32>, vector<8x64xf32> -> vector<8x64xf32>
    %429 = arith.addf %424, %428 : vector<8x64xf32>
    %c2_482 = arith.constant 2 : index
    %c0_483 = arith.constant 0 : index
    %430 = vector.load %arg59[%c2_482, %c0_483] : memref<18x128xf32, #tpu.memory_space<vmem>>, vector<8x64xf32>
    %c2_484 = arith.constant 2 : index
    %c0_485 = arith.constant 0 : index
    %c0_486 = arith.constant 0 : index
    %431 = vector.load %arg42[%c2_484, %c0_485, %c0_486] : memref<3x64x64xf32, #tpu.memory_space<vmem>>, vector<1x64x64xf32>
    %432 = vector.shape_cast %431 : vector<1x64x64xf32> to vector<64x64xf32>
    %cst_487 = arith.constant dense<0.000000e+00> : vector<8x64xf32>
    %433 = tpu.matmul %430, %432, %cst_487 {dimension_numbers = #tpu.dot_dimension_numbers<[1], [0], [0], [1], [0, 0, 1, 1], [], []>} : vector<8x64xf32>, vector<64x64xf32>, vector<8x64xf32> -> vector<8x64xf32>
    %434 = arith.addf %429, %433 : vector<8x64xf32>
    %cst_488 = arith.constant 0.000000e+00 : f32
    %435 = vector.broadcast %cst_488 : f32 to vector<8x64xf32>
    %436 = arith.subf %435, %434 : vector<8x64xf32>
    %437 = math.exp %436 : vector<8x64xf32>
    %cst_489 = arith.constant 1.000000e+00 : f32
    %438 = vector.broadcast %cst_489 : f32 to vector<8x64xf32>
    %439 = arith.addf %438, %437 : vector<8x64xf32>
    %cst_490 = arith.constant 1.000000e+00 : f32
    %440 = vector.broadcast %cst_490 : f32 to vector<8x64xf32>
    %441 = arith.divf %440, %439 : vector<8x64xf32>
    %442 = arith.mulf %415, %441 : vector<8x64xf32>
    %c0_491 = arith.constant 0 : index
    %c0_492 = arith.constant 0 : index
    %443 = vector.load %arg43[%c0_491, %c0_492] : memref<64x64xf32, #tpu.memory_space<vmem>>, vector<64x64xf32>
    %cst_493 = arith.constant dense<0.000000e+00> : vector<8x64xf32>
    %444 = tpu.matmul %442, %443, %cst_493 {dimension_numbers = #tpu.dot_dimension_numbers<[1], [0], [0], [1], [0, 0, 1, 1], [], []>} : vector<8x64xf32>, vector<64x64xf32>, vector<8x64xf32> -> vector<8x64xf32>
    %c0_494 = arith.constant 0 : index
    %c0_495 = arith.constant 0 : index
    %445 = vector.load %arg44[%c0_494, %c0_495] : memref<1x64xf32, #tpu.memory_space<vmem>>, vector<1x64xf32>
    %446 = vector.broadcast %445 : vector<1x64xf32> to vector<8x64xf32>
    %447 = arith.addf %444, %446 : vector<8x64xf32>
    %c0_496 = arith.constant 0 : index
    %c0_497 = arith.constant 0 : index
    %c0_498 = arith.constant 0 : index
    %448 = vector.load %arg45[%c0_496, %c0_497, %c0_498] : memref<2x128x64xf32, #tpu.memory_space<vmem>>, vector<1x64x64xf32>
    %449 = vector.shape_cast %448 : vector<1x64x64xf32> to vector<64x64xf32>
    %cst_499 = arith.constant dense<0.000000e+00> : vector<8x64xf32>
    %450 = tpu.matmul %447, %449, %cst_499 {dimension_numbers = #tpu.dot_dimension_numbers<[1], [0], [0], [1], [0, 0, 1, 1], [], []>} : vector<8x64xf32>, vector<64x64xf32>, vector<8x64xf32> -> vector<8x64xf32>
    %c0_500 = arith.constant 0 : index
    %c64 = arith.constant 64 : index
    %c0_501 = arith.constant 0 : index
    %451 = vector.load %arg45[%c0_500, %c64, %c0_501] : memref<2x128x64xf32, #tpu.memory_space<vmem>>, vector<1x64x64xf32>
    %452 = vector.shape_cast %451 : vector<1x64x64xf32> to vector<64x64xf32>
    %cst_502 = arith.constant dense<0.000000e+00> : vector<8x64xf32>
    %453 = tpu.matmul %112, %452, %cst_502 {dimension_numbers = #tpu.dot_dimension_numbers<[1], [0], [0], [1], [0, 0, 1, 1], [], []>} : vector<8x64xf32>, vector<64x64xf32>, vector<8x64xf32> -> vector<8x64xf32>
    %454 = arith.addf %450, %453 : vector<8x64xf32>
    %c0_503 = arith.constant 0 : index
    %c0_504 = arith.constant 0 : index
    %455 = vector.load %arg46[%c0_503, %c0_504] : memref<1x64xf32, #tpu.memory_space<vmem>>, vector<1x64xf32>
    %456 = vector.broadcast %455 : vector<1x64xf32> to vector<8x64xf32>
    %457 = arith.addf %454, %456 : vector<8x64xf32>
    %458 = vector.extract_strided_slice %457 {offsets = [0, 0], sizes = [1, 64], strides = [1, 1]} : vector<8x64xf32> to vector<1x64xf32>
    %c0_505 = arith.constant 0 : index
    %c0_506 = arith.constant 0 : index
    %459 = vector.load %arg59[%c0_505, %c0_506] : memref<18x128xf32, #tpu.memory_space<vmem>>, vector<1x64xf32>
    tpu.vector_store %arg59[%c0_505, %c0_506], %458 {strides = array<i32>} : memref<18x128xf32, #tpu.memory_space<vmem>>, vector<1x64xf32>,
    %460 = vector.extract_strided_slice %457 {offsets = [1, 0], sizes = [1, 64], strides = [1, 1]} : vector<8x64xf32> to vector<1x64xf32>
    %c2_507 = arith.constant 2 : index
    %c0_508 = arith.constant 0 : index
    %461 = vector.load %arg59[%c2_507, %c0_508] : memref<18x128xf32, #tpu.memory_space<vmem>>, vector<1x64xf32>
    tpu.vector_store %arg59[%c2_507, %c0_508], %460 {strides = array<i32>} : memref<18x128xf32, #tpu.memory_space<vmem>>, vector<1x64xf32>,
    %462 = vector.extract_strided_slice %457 {offsets = [2, 0], sizes = [1, 64], strides = [1, 1]} : vector<8x64xf32> to vector<1x64xf32>
    %c4_509 = arith.constant 4 : index
    %c0_510 = arith.constant 0 : index
    %463 = vector.load %arg59[%c4_509, %c0_510] : memref<18x128xf32, #tpu.memory_space<vmem>>, vector<1x64xf32>
    tpu.vector_store %arg59[%c4_509, %c0_510], %462 {strides = array<i32>} : memref<18x128xf32, #tpu.memory_space<vmem>>, vector<1x64xf32>,
    %464 = vector.extract_strided_slice %457 {offsets = [3, 0], sizes = [1, 64], strides = [1, 1]} : vector<8x64xf32> to vector<1x64xf32>
    %c6_511 = arith.constant 6 : index
    %c0_512 = arith.constant 0 : index
    %465 = vector.load %arg59[%c6_511, %c0_512] : memref<18x128xf32, #tpu.memory_space<vmem>>, vector<1x64xf32>
    tpu.vector_store %arg59[%c6_511, %c0_512], %464 {strides = array<i32>} : memref<18x128xf32, #tpu.memory_space<vmem>>, vector<1x64xf32>,
    %466 = vector.extract_strided_slice %457 {offsets = [4, 0], sizes = [1, 64], strides = [1, 1]} : vector<8x64xf32> to vector<1x64xf32>
    %c8 = arith.constant 8 : index
    %c0_513 = arith.constant 0 : index
    %467 = vector.load %arg59[%c8, %c0_513] : memref<18x128xf32, #tpu.memory_space<vmem>>, vector<1x64xf32>
    tpu.vector_store %arg59[%c8, %c0_513], %466 {strides = array<i32>} : memref<18x128xf32, #tpu.memory_space<vmem>>, vector<1x64xf32>,
    %468 = vector.extract_strided_slice %457 {offsets = [5, 0], sizes = [1, 64], strides = [1, 1]} : vector<8x64xf32> to vector<1x64xf32>
    %c10 = arith.constant 10 : index
    %c0_514 = arith.constant 0 : index
    %469 = vector.load %arg59[%c10, %c0_514] : memref<18x128xf32, #tpu.memory_space<vmem>>, vector<1x64xf32>
    tpu.vector_store %arg59[%c10, %c0_514], %468 {strides = array<i32>} : memref<18x128xf32, #tpu.memory_space<vmem>>, vector<1x64xf32>,
    %470 = vector.extract_strided_slice %457 {offsets = [6, 0], sizes = [1, 64], strides = [1, 1]} : vector<8x64xf32> to vector<1x64xf32>
    %c12 = arith.constant 12 : index
    %c0_515 = arith.constant 0 : index
    %471 = vector.load %arg59[%c12, %c0_515] : memref<18x128xf32, #tpu.memory_space<vmem>>, vector<1x64xf32>
    tpu.vector_store %arg59[%c12, %c0_515], %470 {strides = array<i32>} : memref<18x128xf32, #tpu.memory_space<vmem>>, vector<1x64xf32>,
    %472 = vector.extract_strided_slice %457 {offsets = [7, 0], sizes = [1, 64], strides = [1, 1]} : vector<8x64xf32> to vector<1x64xf32>
    %c14 = arith.constant 14 : index
    %c0_516 = arith.constant 0 : index
    %473 = vector.load %arg59[%c14, %c0_516] : memref<18x128xf32, #tpu.memory_space<vmem>>, vector<1x64xf32>
    tpu.vector_store %arg59[%c14, %c0_516], %472 {strides = array<i32>} : memref<18x128xf32, #tpu.memory_space<vmem>>, vector<1x64xf32>,
    %c1_517 = arith.constant 1 : index
    %c0_518 = arith.constant 0 : index
    %c0_519 = arith.constant 0 : index
    %474 = vector.load %arg45[%c1_517, %c0_518, %c0_519] : memref<2x128x64xf32, #tpu.memory_space<vmem>>, vector<1x64x64xf32>
    %475 = vector.shape_cast %474 : vector<1x64x64xf32> to vector<64x64xf32>
    %cst_520 = arith.constant dense<0.000000e+00> : vector<8x64xf32>
    %476 = tpu.matmul %447, %475, %cst_520 {dimension_numbers = #tpu.dot_dimension_numbers<[1], [0], [0], [1], [0, 0, 1, 1], [], []>} : vector<8x64xf32>, vector<64x64xf32>, vector<8x64xf32> -> vector<8x64xf32>
    %c1_521 = arith.constant 1 : index
    %c64_522 = arith.constant 64 : index
    %c0_523 = arith.constant 0 : index
    %477 = vector.load %arg45[%c1_521, %c64_522, %c0_523] : memref<2x128x64xf32, #tpu.memory_space<vmem>>, vector<1x64x64xf32>
    %478 = vector.shape_cast %477 : vector<1x64x64xf32> to vector<64x64xf32>
    %cst_524 = arith.constant dense<0.000000e+00> : vector<8x64xf32>
    %479 = tpu.matmul %112, %478, %cst_524 {dimension_numbers = #tpu.dot_dimension_numbers<[1], [0], [0], [1], [0, 0, 1, 1], [], []>} : vector<8x64xf32>, vector<64x64xf32>, vector<8x64xf32> -> vector<8x64xf32>
    %480 = arith.addf %476, %479 : vector<8x64xf32>
    %c0_525 = arith.constant 0 : index
    %c0_526 = arith.constant 0 : index
    %481 = vector.load %arg46[%c0_525, %c0_526] : memref<1x64xf32, #tpu.memory_space<vmem>>, vector<1x64xf32>
    %482 = vector.broadcast %481 : vector<1x64xf32> to vector<8x64xf32>
    %483 = arith.addf %480, %482 : vector<8x64xf32>
    %484 = vector.extract_strided_slice %483 {offsets = [0, 0], sizes = [1, 64], strides = [1, 1]} : vector<8x64xf32> to vector<1x64xf32>
    %c1_527 = arith.constant 1 : index
    %c0_528 = arith.constant 0 : index
    %485 = vector.load %arg59[%c1_527, %c0_528] : memref<18x128xf32, #tpu.memory_space<vmem>>, vector<1x64xf32>
    tpu.vector_store %arg59[%c1_527, %c0_528], %484 {strides = array<i32>} : memref<18x128xf32, #tpu.memory_space<vmem>>, vector<1x64xf32>,
    %486 = vector.extract_strided_slice %483 {offsets = [1, 0], sizes = [1, 64], strides = [1, 1]} : vector<8x64xf32> to vector<1x64xf32>
    %c3_529 = arith.constant 3 : index
    %c0_530 = arith.constant 0 : index
    %487 = vector.load %arg59[%c3_529, %c0_530] : memref<18x128xf32, #tpu.memory_space<vmem>>, vector<1x64xf32>
    tpu.vector_store %arg59[%c3_529, %c0_530], %486 {strides = array<i32>} : memref<18x128xf32, #tpu.memory_space<vmem>>, vector<1x64xf32>,
    %488 = vector.extract_strided_slice %483 {offsets = [2, 0], sizes = [1, 64], strides = [1, 1]} : vector<8x64xf32> to vector<1x64xf32>
    %c5_531 = arith.constant 5 : index
    %c0_532 = arith.constant 0 : index
    %489 = vector.load %arg59[%c5_531, %c0_532] : memref<18x128xf32, #tpu.memory_space<vmem>>, vector<1x64xf32>
    tpu.vector_store %arg59[%c5_531, %c0_532], %488 {strides = array<i32>} : memref<18x128xf32, #tpu.memory_space<vmem>>, vector<1x64xf32>,
    %490 = vector.extract_strided_slice %483 {offsets = [3, 0], sizes = [1, 64], strides = [1, 1]} : vector<8x64xf32> to vector<1x64xf32>
    %c7_533 = arith.constant 7 : index
    %c0_534 = arith.constant 0 : index
    %491 = vector.load %arg59[%c7_533, %c0_534] : memref<18x128xf32, #tpu.memory_space<vmem>>, vector<1x64xf32>
    tpu.vector_store %arg59[%c7_533, %c0_534], %490 {strides = array<i32>} : memref<18x128xf32, #tpu.memory_space<vmem>>, vector<1x64xf32>,
    %492 = vector.extract_strided_slice %483 {offsets = [4, 0], sizes = [1, 64], strides = [1, 1]} : vector<8x64xf32> to vector<1x64xf32>
    %c9_535 = arith.constant 9 : index
    %c0_536 = arith.constant 0 : index
    %493 = vector.load %arg59[%c9_535, %c0_536] : memref<18x128xf32, #tpu.memory_space<vmem>>, vector<1x64xf32>
    tpu.vector_store %arg59[%c9_535, %c0_536], %492 {strides = array<i32>} : memref<18x128xf32, #tpu.memory_space<vmem>>, vector<1x64xf32>,
    %494 = vector.extract_strided_slice %483 {offsets = [5, 0], sizes = [1, 64], strides = [1, 1]} : vector<8x64xf32> to vector<1x64xf32>
    %c11 = arith.constant 11 : index
    %c0_537 = arith.constant 0 : index
    %495 = vector.load %arg59[%c11, %c0_537] : memref<18x128xf32, #tpu.memory_space<vmem>>, vector<1x64xf32>
    tpu.vector_store %arg59[%c11, %c0_537], %494 {strides = array<i32>} : memref<18x128xf32, #tpu.memory_space<vmem>>, vector<1x64xf32>,
    %496 = vector.extract_strided_slice %483 {offsets = [6, 0], sizes = [1, 64], strides = [1, 1]} : vector<8x64xf32> to vector<1x64xf32>
    %c13 = arith.constant 13 : index
    %c0_538 = arith.constant 0 : index
    %497 = vector.load %arg59[%c13, %c0_538] : memref<18x128xf32, #tpu.memory_space<vmem>>, vector<1x64xf32>
    tpu.vector_store %arg59[%c13, %c0_538], %496 {strides = array<i32>} : memref<18x128xf32, #tpu.memory_space<vmem>>, vector<1x64xf32>,
    %498 = vector.extract_strided_slice %483 {offsets = [7, 0], sizes = [1, 64], strides = [1, 1]} : vector<8x64xf32> to vector<1x64xf32>
    %c15 = arith.constant 15 : index
    %c0_539 = arith.constant 0 : index
    %499 = vector.load %arg59[%c15, %c0_539] : memref<18x128xf32, #tpu.memory_space<vmem>>, vector<1x64xf32>
    tpu.vector_store %arg59[%c15, %c0_539], %498 {strides = array<i32>} : memref<18x128xf32, #tpu.memory_space<vmem>>, vector<1x64xf32>,
    %c0_540 = arith.constant 0 : index
    %c0_541 = arith.constant 0 : index
    %500 = vector.load %arg59[%c0_540, %c0_541] : memref<18x128xf32, #tpu.memory_space<vmem>>, vector<16x64xf32>
    %c0_542 = arith.constant 0 : index
    %c0_543 = arith.constant 0 : index
    %501 = vector.load %arg48[%c0_542, %c0_543] : memref<1x64xf32, #tpu.memory_space<vmem>>, vector<1x64xf32>
    %cst_544 = arith.constant 0.000000e+00 : f32
    %502 = vector.broadcast %cst_544 : f32 to vector<1x64xf32>
    %c0_545 = arith.constant 0 : index
    %c0_546 = arith.constant 0 : index
    %503 = vector.load %arg59[%c0_545, %c0_546] : memref<18x128xf32, #tpu.memory_space<vmem>>, vector<1x64xf32>
    tpu.vector_store %arg59[%c0_545, %c0_546], %502 {strides = array<i32>} : memref<18x128xf32, #tpu.memory_space<vmem>>, vector<1x64xf32>,
    %cst_547 = arith.constant 0.000000e+00 : f32
    %504 = vector.broadcast %cst_547 : f32 to vector<1x64xf32>
    %c17_548 = arith.constant 17 : index
    %c0_549 = arith.constant 0 : index
    %505 = vector.load %arg59[%c17_548, %c0_549] : memref<18x128xf32, #tpu.memory_space<vmem>>, vector<1x64xf32>
    tpu.vector_store %arg59[%c17_548, %c0_549], %504 {strides = array<i32>} : memref<18x128xf32, #tpu.memory_space<vmem>>, vector<1x64xf32>,
    %c1_550 = arith.constant 1 : index
    %c0_551 = arith.constant 0 : index
    %506 = vector.load %arg59[%c1_550, %c0_551] : memref<18x128xf32, #tpu.memory_space<vmem>>, vector<16x64xf32>
    tpu.vector_store %arg59[%c1_550, %c0_551], %500 {strides = array<i32>} : memref<18x128xf32, #tpu.memory_space<vmem>>, vector<16x64xf32>,
    %c0_552 = arith.constant 0 : index
    %c0_553 = arith.constant 0 : index
    %507 = vector.load %arg59[%c0_552, %c0_553] : memref<18x128xf32, #tpu.memory_space<vmem>>, vector<16x64xf32>
    %c0_554 = arith.constant 0 : index
    %c0_555 = arith.constant 0 : index
    %c0_556 = arith.constant 0 : index
    %508 = vector.load %arg47[%c0_554, %c0_555, %c0_556] : memref<3x128x64xf32, #tpu.memory_space<vmem>>, vector<1x64x64xf32>
    %509 = vector.shape_cast %508 : vector<1x64x64xf32> to vector<64x64xf32>
    %cst_557 = arith.constant dense<0.000000e+00> : vector<16x64xf32>
    %510 = tpu.matmul %507, %509, %cst_557 {dimension_numbers = #tpu.dot_dimension_numbers<[1], [0], [0], [1], [0, 0, 1, 1], [], []>} : vector<16x64xf32>, vector<64x64xf32>, vector<16x64xf32> -> vector<16x64xf32>
    %c1_558 = arith.constant 1 : index
    %c0_559 = arith.constant 0 : index
    %511 = vector.load %arg59[%c1_558, %c0_559] : memref<18x128xf32, #tpu.memory_space<vmem>>, vector<16x64xf32>
    %c1_560 = arith.constant 1 : index
    %c0_561 = arith.constant 0 : index
    %c0_562 = arith.constant 0 : index
    %512 = vector.load %arg47[%c1_560, %c0_561, %c0_562] : memref<3x128x64xf32, #tpu.memory_space<vmem>>, vector<1x64x64xf32>
    %513 = vector.shape_cast %512 : vector<1x64x64xf32> to vector<64x64xf32>
    %cst_563 = arith.constant dense<0.000000e+00> : vector<16x64xf32>
    %514 = tpu.matmul %511, %513, %cst_563 {dimension_numbers = #tpu.dot_dimension_numbers<[1], [0], [0], [1], [0, 0, 1, 1], [], []>} : vector<16x64xf32>, vector<64x64xf32>, vector<16x64xf32> -> vector<16x64xf32>
    %515 = arith.addf %510, %514 : vector<16x64xf32>
    %c2_564 = arith.constant 2 : index
    %c0_565 = arith.constant 0 : index
    %516 = vector.load %arg59[%c2_564, %c0_565] : memref<18x128xf32, #tpu.memory_space<vmem>>, vector<16x64xf32>
    %c2_566 = arith.constant 2 : index
    %c0_567 = arith.constant 0 : index
    %c0_568 = arith.constant 0 : index
    %517 = vector.load %arg47[%c2_566, %c0_567, %c0_568] : memref<3x128x64xf32, #tpu.memory_space<vmem>>, vector<1x64x64xf32>
    %518 = vector.shape_cast %517 : vector<1x64x64xf32> to vector<64x64xf32>
    %cst_569 = arith.constant dense<0.000000e+00> : vector<16x64xf32>
    %519 = tpu.matmul %516, %518, %cst_569 {dimension_numbers = #tpu.dot_dimension_numbers<[1], [0], [0], [1], [0, 0, 1, 1], [], []>} : vector<16x64xf32>, vector<64x64xf32>, vector<16x64xf32> -> vector<16x64xf32>
    %520 = arith.addf %515, %519 : vector<16x64xf32>
    %cst_570 = arith.constant 0.000000e+00 : f32
    %521 = vector.broadcast %cst_570 : f32 to vector<1x64xf32>
    %c0_571 = arith.constant 0 : index
    %c0_572 = arith.constant 0 : index
    %522 = vector.load %arg59[%c0_571, %c0_572] : memref<18x128xf32, #tpu.memory_space<vmem>>, vector<1x64xf32>
    tpu.vector_store %arg59[%c0_571, %c0_572], %521 {strides = array<i32>} : memref<18x128xf32, #tpu.memory_space<vmem>>, vector<1x64xf32>,
    %cst_573 = arith.constant 0.000000e+00 : f32
    %523 = vector.broadcast %cst_573 : f32 to vector<1x64xf32>
    %c17_574 = arith.constant 17 : index
    %c0_575 = arith.constant 0 : index
    %524 = vector.load %arg59[%c17_574, %c0_575] : memref<18x128xf32, #tpu.memory_space<vmem>>, vector<1x64xf32>
    tpu.vector_store %arg59[%c17_574, %c0_575], %523 {strides = array<i32>} : memref<18x128xf32, #tpu.memory_space<vmem>>, vector<1x64xf32>,
    %c1_576 = arith.constant 1 : index
    %c0_577 = arith.constant 0 : index
    %525 = vector.load %arg59[%c1_576, %c0_577] : memref<18x128xf32, #tpu.memory_space<vmem>>, vector<16x64xf32>
    tpu.vector_store %arg59[%c1_576, %c0_577], %89 {strides = array<i32>} : memref<18x128xf32, #tpu.memory_space<vmem>>, vector<16x64xf32>,
    %c0_578 = arith.constant 0 : index
    %c0_579 = arith.constant 0 : index
    %526 = vector.load %arg59[%c0_578, %c0_579] : memref<18x128xf32, #tpu.memory_space<vmem>>, vector<16x64xf32>
    %c0_580 = arith.constant 0 : index
    %c64_581 = arith.constant 64 : index
    %c0_582 = arith.constant 0 : index
    %527 = vector.load %arg47[%c0_580, %c64_581, %c0_582] : memref<3x128x64xf32, #tpu.memory_space<vmem>>, vector<1x64x64xf32>
    %528 = vector.shape_cast %527 : vector<1x64x64xf32> to vector<64x64xf32>
    %cst_583 = arith.constant dense<0.000000e+00> : vector<16x64xf32>
    %529 = tpu.matmul %526, %528, %cst_583 {dimension_numbers = #tpu.dot_dimension_numbers<[1], [0], [0], [1], [0, 0, 1, 1], [], []>} : vector<16x64xf32>, vector<64x64xf32>, vector<16x64xf32> -> vector<16x64xf32>
    %530 = arith.addf %520, %529 : vector<16x64xf32>
    %c1_584 = arith.constant 1 : index
    %c0_585 = arith.constant 0 : index
    %531 = vector.load %arg59[%c1_584, %c0_585] : memref<18x128xf32, #tpu.memory_space<vmem>>, vector<16x64xf32>
    %c1_586 = arith.constant 1 : index
    %c64_587 = arith.constant 64 : index
    %c0_588 = arith.constant 0 : index
    %532 = vector.load %arg47[%c1_586, %c64_587, %c0_588] : memref<3x128x64xf32, #tpu.memory_space<vmem>>, vector<1x64x64xf32>
    %533 = vector.shape_cast %532 : vector<1x64x64xf32> to vector<64x64xf32>
    %cst_589 = arith.constant dense<0.000000e+00> : vector<16x64xf32>
    %534 = tpu.matmul %531, %533, %cst_589 {dimension_numbers = #tpu.dot_dimension_numbers<[1], [0], [0], [1], [0, 0, 1, 1], [], []>} : vector<16x64xf32>, vector<64x64xf32>, vector<16x64xf32> -> vector<16x64xf32>
    %535 = arith.addf %530, %534 : vector<16x64xf32>
    %c2_590 = arith.constant 2 : index
    %c0_591 = arith.constant 0 : index
    %536 = vector.load %arg59[%c2_590, %c0_591] : memref<18x128xf32, #tpu.memory_space<vmem>>, vector<16x64xf32>
    %c2_592 = arith.constant 2 : index
    %c64_593 = arith.constant 64 : index
    %c0_594 = arith.constant 0 : index
    %537 = vector.load %arg47[%c2_592, %c64_593, %c0_594] : memref<3x128x64xf32, #tpu.memory_space<vmem>>, vector<1x64x64xf32>
    %538 = vector.shape_cast %537 : vector<1x64x64xf32> to vector<64x64xf32>
    %cst_595 = arith.constant dense<0.000000e+00> : vector<16x64xf32>
    %539 = tpu.matmul %536, %538, %cst_595 {dimension_numbers = #tpu.dot_dimension_numbers<[1], [0], [0], [1], [0, 0, 1, 1], [], []>} : vector<16x64xf32>, vector<64x64xf32>, vector<16x64xf32> -> vector<16x64xf32>
    %540 = arith.addf %535, %539 : vector<16x64xf32>
    %541 = vector.broadcast %501 : vector<1x64xf32> to vector<16x64xf32>
    %542 = arith.addf %540, %541 : vector<16x64xf32>
    %cst_596 = arith.constant 0.000000e+00 : f32
    %543 = vector.broadcast %cst_596 : f32 to vector<16x64xf32>
    %544 = arith.maximumf %542, %543 : vector<16x64xf32>
    %c0_597 = arith.constant 0 : index
    %c0_598 = arith.constant 0 : index
    %545 = vector.load %arg50[%c0_597, %c0_598] : memref<1x64xf32, #tpu.memory_space<vmem>>, vector<1x64xf32>
    %cst_599 = arith.constant 0.000000e+00 : f32
    %546 = vector.broadcast %cst_599 : f32 to vector<1x64xf32>
    %c0_600 = arith.constant 0 : index
    %c0_601 = arith.constant 0 : index
    %547 = vector.load %arg59[%c0_600, %c0_601] : memref<18x128xf32, #tpu.memory_space<vmem>>, vector<1x64xf32>
    tpu.vector_store %arg59[%c0_600, %c0_601], %546 {strides = array<i32>} : memref<18x128xf32, #tpu.memory_space<vmem>>, vector<1x64xf32>,
    %cst_602 = arith.constant 0.000000e+00 : f32
    %548 = vector.broadcast %cst_602 : f32 to vector<1x64xf32>
    %c17_603 = arith.constant 17 : index
    %c0_604 = arith.constant 0 : index
    %549 = vector.load %arg59[%c17_603, %c0_604] : memref<18x128xf32, #tpu.memory_space<vmem>>, vector<1x64xf32>
    tpu.vector_store %arg59[%c17_603, %c0_604], %548 {strides = array<i32>} : memref<18x128xf32, #tpu.memory_space<vmem>>, vector<1x64xf32>,
    %c1_605 = arith.constant 1 : index
    %c0_606 = arith.constant 0 : index
    %550 = vector.load %arg59[%c1_605, %c0_606] : memref<18x128xf32, #tpu.memory_space<vmem>>, vector<16x64xf32>
    tpu.vector_store %arg59[%c1_605, %c0_606], %544 {strides = array<i32>} : memref<18x128xf32, #tpu.memory_space<vmem>>, vector<16x64xf32>,
    %c0_607 = arith.constant 0 : index
    %c0_608 = arith.constant 0 : index
    %551 = vector.load %arg59[%c0_607, %c0_608] : memref<18x128xf32, #tpu.memory_space<vmem>>, vector<16x64xf32>
    %c0_609 = arith.constant 0 : index
    %c0_610 = arith.constant 0 : index
    %c0_611 = arith.constant 0 : index
    %552 = vector.load %arg49[%c0_609, %c0_610, %c0_611] : memref<3x64x64xf32, #tpu.memory_space<vmem>>, vector<1x64x64xf32>
    %553 = vector.shape_cast %552 : vector<1x64x64xf32> to vector<64x64xf32>
    %cst_612 = arith.constant dense<0.000000e+00> : vector<16x64xf32>
    %554 = tpu.matmul %551, %553, %cst_612 {dimension_numbers = #tpu.dot_dimension_numbers<[1], [0], [0], [1], [0, 0, 1, 1], [], []>} : vector<16x64xf32>, vector<64x64xf32>, vector<16x64xf32> -> vector<16x64xf32>
    %c1_613 = arith.constant 1 : index
    %c0_614 = arith.constant 0 : index
    %555 = vector.load %arg59[%c1_613, %c0_614] : memref<18x128xf32, #tpu.memory_space<vmem>>, vector<16x64xf32>
    %c1_615 = arith.constant 1 : index
    %c0_616 = arith.constant 0 : index
    %c0_617 = arith.constant 0 : index
    %556 = vector.load %arg49[%c1_615, %c0_616, %c0_617] : memref<3x64x64xf32, #tpu.memory_space<vmem>>, vector<1x64x64xf32>
    %557 = vector.shape_cast %556 : vector<1x64x64xf32> to vector<64x64xf32>
    %cst_618 = arith.constant dense<0.000000e+00> : vector<16x64xf32>
    %558 = tpu.matmul %555, %557, %cst_618 {dimension_numbers = #tpu.dot_dimension_numbers<[1], [0], [0], [1], [0, 0, 1, 1], [], []>} : vector<16x64xf32>, vector<64x64xf32>, vector<16x64xf32> -> vector<16x64xf32>
    %559 = arith.addf %554, %558 : vector<16x64xf32>
    %c2_619 = arith.constant 2 : index
    %c0_620 = arith.constant 0 : index
    %560 = vector.load %arg59[%c2_619, %c0_620] : memref<18x128xf32, #tpu.memory_space<vmem>>, vector<16x64xf32>
    %c2_621 = arith.constant 2 : index
    %c0_622 = arith.constant 0 : index
    %c0_623 = arith.constant 0 : index
    %561 = vector.load %arg49[%c2_621, %c0_622, %c0_623] : memref<3x64x64xf32, #tpu.memory_space<vmem>>, vector<1x64x64xf32>
    %562 = vector.shape_cast %561 : vector<1x64x64xf32> to vector<64x64xf32>
    %cst_624 = arith.constant dense<0.000000e+00> : vector<16x64xf32>
    %563 = tpu.matmul %560, %562, %cst_624 {dimension_numbers = #tpu.dot_dimension_numbers<[1], [0], [0], [1], [0, 0, 1, 1], [], []>} : vector<16x64xf32>, vector<64x64xf32>, vector<16x64xf32> -> vector<16x64xf32>
    %564 = arith.addf %559, %563 : vector<16x64xf32>
    %565 = vector.broadcast %545 : vector<1x64xf32> to vector<16x64xf32>
    %566 = arith.addf %564, %565 : vector<16x64xf32>
    %cst_625 = arith.constant 0.000000e+00 : f32
    %567 = vector.broadcast %cst_625 : f32 to vector<16x64xf32>
    %568 = arith.maximumf %566, %567 : vector<16x64xf32>
    %c0_626 = arith.constant 0 : index
    %c0_627 = arith.constant 0 : index
    %569 = vector.load %arg51[%c0_626, %c0_627] : memref<32x64xf32, #tpu.memory_space<vmem>>, vector<32x64xf32>
    %cst_628 = arith.constant dense<0.000000e+00> : vector<1x64xf32>
    %570 = tpu.matmul %3, %569, %cst_628 {dimension_numbers = #tpu.dot_dimension_numbers<[1], [0], [0], [1], [0, 0, 1, 1], [], []>} : vector<1x32xf32>, vector<32x64xf32>, vector<1x64xf32> -> vector<1x64xf32>
    %c0_629 = arith.constant 0 : index
    %c0_630 = arith.constant 0 : index
    %571 = vector.load %arg52[%c0_629, %c0_630] : memref<1x64xf32, #tpu.memory_space<vmem>>, vector<1x64xf32>
    %572 = arith.addf %570, %571 : vector<1x64xf32>
    %573 = vector.broadcast %572 : vector<1x64xf32> to vector<16x64xf32>
    %574 = arith.addf %568, %573 : vector<16x64xf32>
    %cst_631 = arith.constant 0.000000e+00 : f32
    %575 = vector.broadcast %cst_631 : f32 to vector<1x64xf32>
    %c0_632 = arith.constant 0 : index
    %c0_633 = arith.constant 0 : index
    %576 = vector.load %arg59[%c0_632, %c0_633] : memref<18x128xf32, #tpu.memory_space<vmem>>, vector<1x64xf32>
    tpu.vector_store %arg59[%c0_632, %c0_633], %575 {strides = array<i32>} : memref<18x128xf32, #tpu.memory_space<vmem>>, vector<1x64xf32>,
    %cst_634 = arith.constant 0.000000e+00 : f32
    %577 = vector.broadcast %cst_634 : f32 to vector<1x64xf32>
    %c17_635 = arith.constant 17 : index
    %c0_636 = arith.constant 0 : index
    %578 = vector.load %arg59[%c17_635, %c0_636] : memref<18x128xf32, #tpu.memory_space<vmem>>, vector<1x64xf32>
    tpu.vector_store %arg59[%c17_635, %c0_636], %577 {strides = array<i32>} : memref<18x128xf32, #tpu.memory_space<vmem>>, vector<1x64xf32>,
    %c1_637 = arith.constant 1 : index
    %c0_638 = arith.constant 0 : index
    %579 = vector.load %arg59[%c1_637, %c0_638] : memref<18x128xf32, #tpu.memory_space<vmem>>, vector<16x64xf32>
    tpu.vector_store %arg59[%c1_637, %c0_638], %574 {strides = array<i32>} : memref<18x128xf32, #tpu.memory_space<vmem>>, vector<16x64xf32>,
    %c0_639 = arith.constant 0 : index
    %c0_640 = arith.constant 0 : index
    %580 = vector.load %arg59[%c0_639, %c0_640] : memref<18x128xf32, #tpu.memory_space<vmem>>, vector<16x64xf32>
    %c0_641 = arith.constant 0 : index
    %c0_642 = arith.constant 0 : index
    %c0_643 = arith.constant 0 : index
    %581 = vector.load %arg53[%c0_641, %c0_642, %c0_643] : memref<3x64x64xf32, #tpu.memory_space<vmem>>, vector<1x64x64xf32>
    %582 = vector.shape_cast %581 : vector<1x64x64xf32> to vector<64x64xf32>
    %cst_644 = arith.constant dense<0.000000e+00> : vector<16x64xf32>
    %583 = tpu.matmul %580, %582, %cst_644 {dimension_numbers = #tpu.dot_dimension_numbers<[1], [0], [0], [1], [0, 0, 1, 1], [], []>} : vector<16x64xf32>, vector<64x64xf32>, vector<16x64xf32> -> vector<16x64xf32>
    %c1_645 = arith.constant 1 : index
    %c0_646 = arith.constant 0 : index
    %584 = vector.load %arg59[%c1_645, %c0_646] : memref<18x128xf32, #tpu.memory_space<vmem>>, vector<16x64xf32>
    %c1_647 = arith.constant 1 : index
    %c0_648 = arith.constant 0 : index
    %c0_649 = arith.constant 0 : index
    %585 = vector.load %arg53[%c1_647, %c0_648, %c0_649] : memref<3x64x64xf32, #tpu.memory_space<vmem>>, vector<1x64x64xf32>
    %586 = vector.shape_cast %585 : vector<1x64x64xf32> to vector<64x64xf32>
    %cst_650 = arith.constant dense<0.000000e+00> : vector<16x64xf32>
    %587 = tpu.matmul %584, %586, %cst_650 {dimension_numbers = #tpu.dot_dimension_numbers<[1], [0], [0], [1], [0, 0, 1, 1], [], []>} : vector<16x64xf32>, vector<64x64xf32>, vector<16x64xf32> -> vector<16x64xf32>
    %588 = arith.addf %583, %587 : vector<16x64xf32>
    %c2_651 = arith.constant 2 : index
    %c0_652 = arith.constant 0 : index
    %589 = vector.load %arg59[%c2_651, %c0_652] : memref<18x128xf32, #tpu.memory_space<vmem>>, vector<16x64xf32>
    %c2_653 = arith.constant 2 : index
    %c0_654 = arith.constant 0 : index
    %c0_655 = arith.constant 0 : index
    %590 = vector.load %arg53[%c2_653, %c0_654, %c0_655] : memref<3x64x64xf32, #tpu.memory_space<vmem>>, vector<1x64x64xf32>
    %591 = vector.shape_cast %590 : vector<1x64x64xf32> to vector<64x64xf32>
    %cst_656 = arith.constant dense<0.000000e+00> : vector<16x64xf32>
    %592 = tpu.matmul %589, %591, %cst_656 {dimension_numbers = #tpu.dot_dimension_numbers<[1], [0], [0], [1], [0, 0, 1, 1], [], []>} : vector<16x64xf32>, vector<64x64xf32>, vector<16x64xf32> -> vector<16x64xf32>
    %593 = arith.addf %588, %592 : vector<16x64xf32>
    %cst_657 = arith.constant 0.000000e+00 : f32
    %594 = vector.broadcast %cst_657 : f32 to vector<16x64xf32>
    %595 = arith.subf %594, %593 : vector<16x64xf32>
    %596 = math.exp %595 : vector<16x64xf32>
    %cst_658 = arith.constant 1.000000e+00 : f32
    %597 = vector.broadcast %cst_658 : f32 to vector<16x64xf32>
    %598 = arith.addf %597, %596 : vector<16x64xf32>
    %cst_659 = arith.constant 1.000000e+00 : f32
    %599 = vector.broadcast %cst_659 : f32 to vector<16x64xf32>
    %600 = arith.divf %599, %598 : vector<16x64xf32>
    %601 = arith.mulf %574, %600 : vector<16x64xf32>
    %c0_660 = arith.constant 0 : index
    %c0_661 = arith.constant 0 : index
    %602 = vector.load %arg54[%c0_660, %c0_661] : memref<64x64xf32, #tpu.memory_space<vmem>>, vector<64x64xf32>
    %cst_662 = arith.constant dense<0.000000e+00> : vector<16x64xf32>
    %603 = tpu.matmul %601, %602, %cst_662 {dimension_numbers = #tpu.dot_dimension_numbers<[1], [0], [0], [1], [0, 0, 1, 1], [], []>} : vector<16x64xf32>, vector<64x64xf32>, vector<16x64xf32> -> vector<16x64xf32>
    %c0_663 = arith.constant 0 : index
    %c0_664 = arith.constant 0 : index
    %604 = vector.load %arg55[%c0_663, %c0_664] : memref<1x64xf32, #tpu.memory_space<vmem>>, vector<1x64xf32>
    %605 = vector.broadcast %604 : vector<1x64xf32> to vector<16x64xf32>
    %606 = arith.addf %603, %605 : vector<16x64xf32>
    %c0_665 = arith.constant 0 : index
    %c0_666 = arith.constant 0 : index
    %607 = vector.load %arg56[%c0_665, %c0_666] : memref<64x4xf32, #tpu.memory_space<vmem>>, vector<64x4xf32>
    %cst_667 = arith.constant dense<0.000000e+00> : vector<16x4xf32>
    %608 = tpu.matmul %606, %607, %cst_667 {dimension_numbers = #tpu.dot_dimension_numbers<[1], [0], [0], [1], [0, 0, 1, 1], [], []>} : vector<16x64xf32>, vector<64x4xf32>, vector<16x4xf32> -> vector<16x4xf32>
    %c0_668 = arith.constant 0 : index
    %c0_669 = arith.constant 0 : index
    %609 = vector.load %arg57[%c0_668, %c0_669] : memref<1x4xf32, #tpu.memory_space<vmem>>, vector<1x4xf32>
    %610 = vector.broadcast %609 : vector<1x4xf32> to vector<16x4xf32>
    %611 = arith.addf %608, %610 : vector<16x4xf32>
    %c0_670 = arith.constant 0 : index
    %c0_671 = arith.constant 0 : index
    %c0_672 = arith.constant 0 : index
    %612 = vector.load %arg58[%c0_670, %c0_671, %c0_672] : memref<1x16x4xf32, #tpu.memory_space<vmem>>, vector<1x16x4xf32>
    %613 = vector.shape_cast %612 : vector<1x16x4xf32> to vector<16x4xf32>
    %614 = vector.shape_cast %611 : vector<16x4xf32> to vector<1x16x4xf32>
    tpu.vector_store %arg58[%c0_670, %c0_671, %c0_672], %614 {strides = array<i32>} : memref<1x16x4xf32, #tpu.memory_space<vmem>>, vector<1x16x4xf32>,
    return
  }
  func.func @transform_0(%arg0: i32) -> (i32, i32, i32) {
    %c0_i32 = arith.constant 0 : i32
    %c0_i32_0 = arith.constant 0 : i32
    %c0_i32_1 = arith.constant 0 : i32
    return %arg0, %c0_i32, %c0_i32_0 : i32, i32, i32
  }
  func.func @transform_1(%arg0: i32) -> (i32, i32, i32) {
    %c0_i32 = arith.constant 0 : i32
    %c0_i32_0 = arith.constant 0 : i32
    %c0_i32_1 = arith.constant 0 : i32
    return %arg0, %c0_i32, %c0_i32_0 : i32, i32, i32
  }
  func.func @transform_2(%arg0: i32) -> (i32, i32, i32) {
    %c0_i32 = arith.constant 0 : i32
    %c0_i32_0 = arith.constant 0 : i32
    %c0_i32_1 = arith.constant 0 : i32
    %c0_i32_2 = arith.constant 0 : i32
    return %c0_i32, %c0_i32_0, %c0_i32_1 : i32, i32, i32
  }
  func.func @transform_3(%arg0: i32) -> (i32, i32) {
    %c0_i32 = arith.constant 0 : i32
    %c0_i32_0 = arith.constant 0 : i32
    %c0_i32_1 = arith.constant 0 : i32
    return %c0_i32, %c0_i32_0 : i32, i32
  }
  func.func @transform_4(%arg0: i32) -> (i32, i32, i32) {
    %c0_i32 = arith.constant 0 : i32
    %c0_i32_0 = arith.constant 0 : i32
    %c0_i32_1 = arith.constant 0 : i32
    %c0_i32_2 = arith.constant 0 : i32
    return %c0_i32, %c0_i32_0, %c0_i32_1 : i32, i32, i32
  }
  func.func @transform_5(%arg0: i32) -> (i32, i32) {
    %c0_i32 = arith.constant 0 : i32
    %c0_i32_0 = arith.constant 0 : i32
    %c0_i32_1 = arith.constant 0 : i32
    return %c0_i32, %c0_i32_0 : i32, i32
  }
  func.func @transform_6(%arg0: i32) -> (i32, i32) {
    %c0_i32 = arith.constant 0 : i32
    %c0_i32_0 = arith.constant 0 : i32
    %c0_i32_1 = arith.constant 0 : i32
    return %c0_i32, %c0_i32_0 : i32, i32
  }
  func.func @transform_7(%arg0: i32) -> (i32, i32) {
    %c0_i32 = arith.constant 0 : i32
    %c0_i32_0 = arith.constant 0 : i32
    %c0_i32_1 = arith.constant 0 : i32
    return %c0_i32, %c0_i32_0 : i32, i32
  }
  func.func @transform_8(%arg0: i32) -> (i32, i32, i32) {
    %c0_i32 = arith.constant 0 : i32
    %c0_i32_0 = arith.constant 0 : i32
    %c0_i32_1 = arith.constant 0 : i32
    %c0_i32_2 = arith.constant 0 : i32
    return %c0_i32, %c0_i32_0, %c0_i32_1 : i32, i32, i32
  }
  func.func @transform_9(%arg0: i32) -> (i32, i32) {
    %c0_i32 = arith.constant 0 : i32
    %c0_i32_0 = arith.constant 0 : i32
    %c0_i32_1 = arith.constant 0 : i32
    return %c0_i32, %c0_i32_0 : i32, i32
  }
  func.func @transform_10(%arg0: i32) -> (i32, i32) {
    %c0_i32 = arith.constant 0 : i32
    %c0_i32_0 = arith.constant 0 : i32
    %c0_i32_1 = arith.constant 0 : i32
    return %c0_i32, %c0_i32_0 : i32, i32
  }
  func.func @transform_11(%arg0: i32) -> (i32, i32, i32) {
    %c0_i32 = arith.constant 0 : i32
    %c0_i32_0 = arith.constant 0 : i32
    %c0_i32_1 = arith.constant 0 : i32
    %c0_i32_2 = arith.constant 0 : i32
    return %c0_i32, %c0_i32_0, %c0_i32_1 : i32, i32, i32
  }
  func.func @transform_12(%arg0: i32) -> (i32, i32) {
    %c0_i32 = arith.constant 0 : i32
    %c0_i32_0 = arith.constant 0 : i32
    %c0_i32_1 = arith.constant 0 : i32
    return %c0_i32, %c0_i32_0 : i32, i32
  }
  func.func @transform_13(%arg0: i32) -> (i32, i32, i32) {
    %c0_i32 = arith.constant 0 : i32
    %c0_i32_0 = arith.constant 0 : i32
    %c0_i32_1 = arith.constant 0 : i32
    %c0_i32_2 = arith.constant 0 : i32
    return %c0_i32, %c0_i32_0, %c0_i32_1 : i32, i32, i32
  }
  func.func @transform_14(%arg0: i32) -> (i32, i32) {
    %c0_i32 = arith.constant 0 : i32
    %c0_i32_0 = arith.constant 0 : i32
    %c0_i32_1 = arith.constant 0 : i32
    return %c0_i32, %c0_i32_0 : i32, i32
  }
  func.func @transform_15(%arg0: i32) -> (i32, i32, i32) {
    %c0_i32 = arith.constant 0 : i32
    %c0_i32_0 = arith.constant 0 : i32
    %c0_i32_1 = arith.constant 0 : i32
    %c0_i32_2 = arith.constant 0 : i32
    return %c0_i32, %c0_i32_0, %c0_i32_1 : i32, i32, i32
  }
  func.func @transform_16(%arg0: i32) -> (i32, i32) {
    %c0_i32 = arith.constant 0 : i32
    %c0_i32_0 = arith.constant 0 : i32
    %c0_i32_1 = arith.constant 0 : i32
    return %c0_i32, %c0_i32_0 : i32, i32
  }
  func.func @transform_17(%arg0: i32) -> (i32, i32) {
    %c0_i32 = arith.constant 0 : i32
    %c0_i32_0 = arith.constant 0 : i32
    %c0_i32_1 = arith.constant 0 : i32
    return %c0_i32, %c0_i32_0 : i32, i32
  }
  func.func @transform_18(%arg0: i32) -> (i32, i32) {
    %c0_i32 = arith.constant 0 : i32
    %c0_i32_0 = arith.constant 0 : i32
    %c0_i32_1 = arith.constant 0 : i32
    return %c0_i32, %c0_i32_0 : i32, i32
  }
  func.func @transform_19(%arg0: i32) -> (i32, i32, i32) {
    %c0_i32 = arith.constant 0 : i32
    %c0_i32_0 = arith.constant 0 : i32
    %c0_i32_1 = arith.constant 0 : i32
    %c0_i32_2 = arith.constant 0 : i32
    return %c0_i32, %c0_i32_0, %c0_i32_1 : i32, i32, i32
  }
  func.func @transform_20(%arg0: i32) -> (i32, i32) {
    %c0_i32 = arith.constant 0 : i32
    %c0_i32_0 = arith.constant 0 : i32
    %c0_i32_1 = arith.constant 0 : i32
    return %c0_i32, %c0_i32_0 : i32, i32
  }
  func.func @transform_21(%arg0: i32) -> (i32, i32) {
    %c0_i32 = arith.constant 0 : i32
    %c0_i32_0 = arith.constant 0 : i32
    %c0_i32_1 = arith.constant 0 : i32
    return %c0_i32, %c0_i32_0 : i32, i32
  }
  func.func @transform_22(%arg0: i32) -> (i32, i32, i32) {
    %c0_i32 = arith.constant 0 : i32
    %c0_i32_0 = arith.constant 0 : i32
    %c0_i32_1 = arith.constant 0 : i32
    %c0_i32_2 = arith.constant 0 : i32
    return %c0_i32, %c0_i32_0, %c0_i32_1 : i32, i32, i32
  }
  func.func @transform_23(%arg0: i32) -> (i32, i32) {
    %c0_i32 = arith.constant 0 : i32
    %c0_i32_0 = arith.constant 0 : i32
    %c0_i32_1 = arith.constant 0 : i32
    return %c0_i32, %c0_i32_0 : i32, i32
  }
  func.func @transform_24(%arg0: i32) -> (i32, i32, i32) {
    %c0_i32 = arith.constant 0 : i32
    %c0_i32_0 = arith.constant 0 : i32
    %c0_i32_1 = arith.constant 0 : i32
    %c0_i32_2 = arith.constant 0 : i32
    return %c0_i32, %c0_i32_0, %c0_i32_1 : i32, i32, i32
  }
  func.func @transform_25(%arg0: i32) -> (i32, i32) {
    %c0_i32 = arith.constant 0 : i32
    %c0_i32_0 = arith.constant 0 : i32
    %c0_i32_1 = arith.constant 0 : i32
    return %c0_i32, %c0_i32_0 : i32, i32
  }
  func.func @transform_26(%arg0: i32) -> (i32, i32, i32) {
    %c0_i32 = arith.constant 0 : i32
    %c0_i32_0 = arith.constant 0 : i32
    %c0_i32_1 = arith.constant 0 : i32
    %c0_i32_2 = arith.constant 0 : i32
    return %c0_i32, %c0_i32_0, %c0_i32_1 : i32, i32, i32
  }
  func.func @transform_27(%arg0: i32) -> (i32, i32) {
    %c0_i32 = arith.constant 0 : i32
    %c0_i32_0 = arith.constant 0 : i32
    %c0_i32_1 = arith.constant 0 : i32
    return %c0_i32, %c0_i32_0 : i32, i32
  }
  func.func @transform_28(%arg0: i32) -> (i32, i32) {
    %c0_i32 = arith.constant 0 : i32
    %c0_i32_0 = arith.constant 0 : i32
    %c0_i32_1 = arith.constant 0 : i32
    return %c0_i32, %c0_i32_0 : i32, i32
  }
  func.func @transform_29(%arg0: i32) -> (i32, i32) {
    %c0_i32 = arith.constant 0 : i32
    %c0_i32_0 = arith.constant 0 : i32
    %c0_i32_1 = arith.constant 0 : i32
    return %c0_i32, %c0_i32_0 : i32, i32
  }
  func.func @transform_30(%arg0: i32) -> (i32, i32, i32) {
    %c0_i32 = arith.constant 0 : i32
    %c0_i32_0 = arith.constant 0 : i32
    %c0_i32_1 = arith.constant 0 : i32
    %c0_i32_2 = arith.constant 0 : i32
    return %c0_i32, %c0_i32_0, %c0_i32_1 : i32, i32, i32
  }
  func.func @transform_31(%arg0: i32) -> (i32, i32) {
    %c0_i32 = arith.constant 0 : i32
    %c0_i32_0 = arith.constant 0 : i32
    %c0_i32_1 = arith.constant 0 : i32
    return %c0_i32, %c0_i32_0 : i32, i32
  }
  func.func @transform_32(%arg0: i32) -> (i32, i32) {
    %c0_i32 = arith.constant 0 : i32
    %c0_i32_0 = arith.constant 0 : i32
    %c0_i32_1 = arith.constant 0 : i32
    return %c0_i32, %c0_i32_0 : i32, i32
  }
  func.func @transform_33(%arg0: i32) -> (i32, i32, i32) {
    %c0_i32 = arith.constant 0 : i32
    %c0_i32_0 = arith.constant 0 : i32
    %c0_i32_1 = arith.constant 0 : i32
    %c0_i32_2 = arith.constant 0 : i32
    return %c0_i32, %c0_i32_0, %c0_i32_1 : i32, i32, i32
  }
  func.func @transform_34(%arg0: i32) -> (i32, i32) {
    %c0_i32 = arith.constant 0 : i32
    %c0_i32_0 = arith.constant 0 : i32
    %c0_i32_1 = arith.constant 0 : i32
    return %c0_i32, %c0_i32_0 : i32, i32
  }
  func.func @transform_35(%arg0: i32) -> (i32, i32, i32) {
    %c0_i32 = arith.constant 0 : i32
    %c0_i32_0 = arith.constant 0 : i32
    %c0_i32_1 = arith.constant 0 : i32
    %c0_i32_2 = arith.constant 0 : i32
    return %c0_i32, %c0_i32_0, %c0_i32_1 : i32, i32, i32
  }
  func.func @transform_36(%arg0: i32) -> (i32, i32) {
    %c0_i32 = arith.constant 0 : i32
    %c0_i32_0 = arith.constant 0 : i32
    %c0_i32_1 = arith.constant 0 : i32
    return %c0_i32, %c0_i32_0 : i32, i32
  }
  func.func @transform_37(%arg0: i32) -> (i32, i32, i32) {
    %c0_i32 = arith.constant 0 : i32
    %c0_i32_0 = arith.constant 0 : i32
    %c0_i32_1 = arith.constant 0 : i32
    %c0_i32_2 = arith.constant 0 : i32
    return %c0_i32, %c0_i32_0, %c0_i32_1 : i32, i32, i32
  }
  func.func @transform_38(%arg0: i32) -> (i32, i32) {
    %c0_i32 = arith.constant 0 : i32
    %c0_i32_0 = arith.constant 0 : i32
    %c0_i32_1 = arith.constant 0 : i32
    return %c0_i32, %c0_i32_0 : i32, i32
  }
  func.func @transform_39(%arg0: i32) -> (i32, i32) {
    %c0_i32 = arith.constant 0 : i32
    %c0_i32_0 = arith.constant 0 : i32
    %c0_i32_1 = arith.constant 0 : i32
    return %c0_i32, %c0_i32_0 : i32, i32
  }
  func.func @transform_40(%arg0: i32) -> (i32, i32) {
    %c0_i32 = arith.constant 0 : i32
    %c0_i32_0 = arith.constant 0 : i32
    %c0_i32_1 = arith.constant 0 : i32
    return %c0_i32, %c0_i32_0 : i32, i32
  }
  func.func @transform_41(%arg0: i32) -> (i32, i32, i32) {
    %c0_i32 = arith.constant 0 : i32
    %c0_i32_0 = arith.constant 0 : i32
    %c0_i32_1 = arith.constant 0 : i32
    %c0_i32_2 = arith.constant 0 : i32
    return %c0_i32, %c0_i32_0, %c0_i32_1 : i32, i32, i32
  }
  func.func @transform_42(%arg0: i32) -> (i32, i32) {
    %c0_i32 = arith.constant 0 : i32
    %c0_i32_0 = arith.constant 0 : i32
    %c0_i32_1 = arith.constant 0 : i32
    return %c0_i32, %c0_i32_0 : i32, i32
  }
  func.func @transform_43(%arg0: i32) -> (i32, i32) {
    %c0_i32 = arith.constant 0 : i32
    %c0_i32_0 = arith.constant 0 : i32
    %c0_i32_1 = arith.constant 0 : i32
    return %c0_i32, %c0_i32_0 : i32, i32
  }
  func.func @transform_44(%arg0: i32) -> (i32, i32, i32) {
    %c0_i32 = arith.constant 0 : i32
    %c0_i32_0 = arith.constant 0 : i32
    %c0_i32_1 = arith.constant 0 : i32
    %c0_i32_2 = arith.constant 0 : i32
    return %c0_i32, %c0_i32_0, %c0_i32_1 : i32, i32, i32
  }
  func.func @transform_45(%arg0: i32) -> (i32, i32) {
    %c0_i32 = arith.constant 0 : i32
    %c0_i32_0 = arith.constant 0 : i32
    %c0_i32_1 = arith.constant 0 : i32
    return %c0_i32, %c0_i32_0 : i32, i32
  }
  func.func @transform_46(%arg0: i32) -> (i32, i32, i32) {
    %c0_i32 = arith.constant 0 : i32
    %c0_i32_0 = arith.constant 0 : i32
    %c0_i32_1 = arith.constant 0 : i32
    %c0_i32_2 = arith.constant 0 : i32
    return %c0_i32, %c0_i32_0, %c0_i32_1 : i32, i32, i32
  }
  func.func @transform_47(%arg0: i32) -> (i32, i32) {
    %c0_i32 = arith.constant 0 : i32
    %c0_i32_0 = arith.constant 0 : i32
    %c0_i32_1 = arith.constant 0 : i32
    return %c0_i32, %c0_i32_0 : i32, i32
  }
  func.func @transform_48(%arg0: i32) -> (i32, i32, i32) {
    %c0_i32 = arith.constant 0 : i32
    %c0_i32_0 = arith.constant 0 : i32
    %c0_i32_1 = arith.constant 0 : i32
    %c0_i32_2 = arith.constant 0 : i32
    return %c0_i32, %c0_i32_0, %c0_i32_1 : i32, i32, i32
  }
  func.func @transform_49(%arg0: i32) -> (i32, i32) {
    %c0_i32 = arith.constant 0 : i32
    %c0_i32_0 = arith.constant 0 : i32
    %c0_i32_1 = arith.constant 0 : i32
    return %c0_i32, %c0_i32_0 : i32, i32
  }
  func.func @transform_50(%arg0: i32) -> (i32, i32) {
    %c0_i32 = arith.constant 0 : i32
    %c0_i32_0 = arith.constant 0 : i32
    %c0_i32_1 = arith.constant 0 : i32
    return %c0_i32, %c0_i32_0 : i32, i32
  }
  func.func @transform_51(%arg0: i32) -> (i32, i32) {
    %c0_i32 = arith.constant 0 : i32
    %c0_i32_0 = arith.constant 0 : i32
    %c0_i32_1 = arith.constant 0 : i32
    return %c0_i32, %c0_i32_0 : i32, i32
  }
  func.func @transform_52(%arg0: i32) -> (i32, i32, i32) {
    %c0_i32 = arith.constant 0 : i32
    %c0_i32_0 = arith.constant 0 : i32
    %c0_i32_1 = arith.constant 0 : i32
    %c0_i32_2 = arith.constant 0 : i32
    return %c0_i32, %c0_i32_0, %c0_i32_1 : i32, i32, i32
  }
  func.func @transform_53(%arg0: i32) -> (i32, i32) {
    %c0_i32 = arith.constant 0 : i32
    %c0_i32_0 = arith.constant 0 : i32
    %c0_i32_1 = arith.constant 0 : i32
    return %c0_i32, %c0_i32_0 : i32, i32
  }
  func.func @transform_54(%arg0: i32) -> (i32, i32) {
    %c0_i32 = arith.constant 0 : i32
    %c0_i32_0 = arith.constant 0 : i32
    %c0_i32_1 = arith.constant 0 : i32
    return %c0_i32, %c0_i32_0 : i32, i32
  }
  func.func @transform_55(%arg0: i32) -> (i32, i32) {
    %c0_i32 = arith.constant 0 : i32
    %c0_i32_0 = arith.constant 0 : i32
    %c0_i32_1 = arith.constant 0 : i32
    return %c0_i32, %c0_i32_0 : i32, i32
  }
  func.func @transform_56(%arg0: i32) -> (i32, i32) {
    %c0_i32 = arith.constant 0 : i32
    %c0_i32_0 = arith.constant 0 : i32
    %c0_i32_1 = arith.constant 0 : i32
    return %c0_i32, %c0_i32_0 : i32, i32
  }
  func.func @transform_57(%arg0: i32) -> (i32, i32, i32) {
    %c0_i32 = arith.constant 0 : i32
    %c0_i32_0 = arith.constant 0 : i32
    %c0_i32_1 = arith.constant 0 : i32
    return %arg0, %c0_i32, %c0_i32_0 : i32, i32, i32
  }
}

</mosaic_0001>

<bundles_post_ra>
// kernel: unet_forward.1
= control target key start
LH: loop header
LB: loop body
LE: loop exit
PB: predicated region body
PF: predicated region fallthrough
CT: control target
= control target key end

     0   :  { %s14646_s6 = smov 1   ;;  %s14647_s10 = smov 2   ;;  %s16908_s0 = inlined_call_operand.smem [shape: u32[58], index: -1, kind: input, shape index: {}] }
   0x1   :  { %s14762_s5 = sld [smem:[%s16908_s0]]   ;;  %s14648_s14 = smov 3  }
   0x2   :  { %s14767_s9 = sld [smem:[%s16908_s0 + %s14646_s6]]   ;;  %s14649_s18 = smov 4  }
   0x3   :  { %s14772_s13 = sld [smem:[%s16908_s0 + %s14647_s10]]   ;;  %s14650_s22 = smov 5  }
   0x4   :  { %s14777_s17 = sld [smem:[%s16908_s0 + %s14648_s14]]   ;;  %s14651_s26 = smov 6  }
   0x5   :  { %s14782_s21 = sld [smem:[%s16908_s0 + %s14649_s18]]   ;;  %s14652_s30 = smov 7  }
   0x6   :  { %s14787_s25 = sld [smem:[%s16908_s0 + %s14650_s22]]   ;;  %s14653_s4 = smov 8  }
   0x7   :  { %16922 = sst [smem:[#allocation94_spill]] %s14762_s5  ;;  %s14654_s10 = smov 9  }
   0x8   :  { %16923 = sst [smem:[#allocation95_spill]] %s14767_s9  ;;  %s14655_s15 = smov 10  }
   0x9   :  { %16924 = sst [smem:[#allocation96_spill]] %s14772_s13  ;;  %s14656_s20 = smov 11  }
   0xa   :  { %s14792_s29 = sld [smem:[%s16908_s0 + %s14651_s26]]   ;;  %s14657_s26 = smov 12  }
   0xb   :  { %16925 = sst [smem:[#allocation97_spill]] %s14782_s21  ;;  %s14658_s1 = smov 13  }
   0xc   :  { %s14797_s3 = sld [smem:[%s16908_s0 + %s14652_s30]]   ;;  %s14659_s7 = smov 14  }
   0xd   :  { %s14802_s8 = sld [smem:[%s16908_s0 + %s14653_s4]]   ;;  %s14661_s22 = smov 16  }
   0xe   :  { %s14807_s14 = sld [smem:[%s16908_s0 + %s14654_s10]]   ;;  %s14662_s28 = smov 17  }
   0xf   :  { %s14812_s19 = sld [smem:[%s16908_s0 + %s14655_s15]]   ;;  %s14660_s15 = smov 15  }
  0x10   :  { %16926 = sst [smem:[#allocation98_spill]] %s14792_s29 }
  0x11   :  { %s14817_s24 = sld [smem:[%s16908_s0 + %s14656_s20]]  }
  0x12   :  { %16927 = sst [smem:[#allocation99_spill]] %s14797_s3 }
  0x13   :  { %16928 = sst [smem:[#allocation100_spill]] %s14802_s8 }
  0x14   :  { %s14822_s30 = sld [smem:[%s16908_s0 + %s14657_s26]]  }
  0x15   :  { %16929 = sst [smem:[#allocation101_spill]] %s14812_s19 }
  0x16   :  { %s14827_s6 = sld [smem:[%s16908_s0 + %s14658_s1]]  }
  0x17   :  { %s14832_s12 = sld [smem:[%s16908_s0 + %s14659_s7]]   ;;  %s14663_s7 = smov 18  }
  0x18   :  { %s14837_s20 = sld [smem:[%s16908_s0 + %s14660_s15]]   ;;  %s14664_s15 = smov 19  }
  0x19   :  { %s14842_s27 = sld [smem:[%s16908_s0 + %s14661_s22]]   ;;  %s14665_s22 = smov 20  }
  0x1a   :  { %16930 = sst [smem:[#allocation102_spill]] %s14822_s30 }
  0x1b   :  { %s14847_s4 = sld [smem:[%s16908_s0 + %s14662_s28]]   ;;  %s14666_s28 = smov 21  }
  0x1c   :  { %s14852_s9 = sld [smem:[%s16908_s0 + %s14663_s7]]   ;;  %s14667_s7 = smov 22  }
  0x1d   :  { %16931 = sst [smem:[#allocation103_spill]] %s14832_s12 }
  0x1e   :  { %16932 = sst [smem:[#allocation104_spill]] %s14837_s20 }
  0x1f   :  { %s14857_s20 = sld [smem:[%s16908_s0 + %s14664_s15]]   ;;  %s14668_s15 = smov 23  }
  0x20   :  { %s14862_s5 = sld [smem:[%s16908_s0 + %s14665_s22]]   ;;  %s14669_s22 = smov 24  }
  0x21   :  { %16933 = sst [smem:[#allocation105_spill]] %s14847_s4 }
  0x22   :  { %s14867_s4 = sld [smem:[%s16908_s0 + %s14666_s28]]   ;;  %s14670_s28 = smov 25  }
  0x23   :  { %s14872_s12 = sld [smem:[%s16908_s0 + %s14667_s7]]   ;;  %s14671_s7 = smov 26  }
  0x24   :  { %s14887_s30 = sld [smem:[%s16908_s0 + %s14670_s28]]   ;;  %s14674_s28 = smov 29  }
  0x25   :  { %16934 = sst [smem:[#allocation106_spill]] %s14857_s20 }
  0x26   :  { %16935 = sst [smem:[#allocation107_spill]] %s14862_s5 }
  0x27   :  { %s14877_s20 = sld [smem:[%s16908_s0 + %s14668_s15]]   ;;  %s14672_s15 = smov 27  }
  0x28   :  { %16936 = sst [smem:[#allocation108_spill]] %s14867_s4 }
  0x29   :  { %16937 = sst [smem:[#allocation109_spill]] %s14872_s12 }
  0x2a   :  { %s14882_s5 = sld [smem:[%s16908_s0 + %s14669_s22]]   ;;  %s14673_s22 = smov 28  }
  0x2b   :  { %s14892_s12 = sld [smem:[%s16908_s0 + %s14671_s7]]   ;;  %s14675_s7 = smov 30  }
  0x2c   :  { %s14907_s19 = sld [smem:[%s16908_s0 + %s14674_s28]]   ;;  %s14678_s28 = smov 33  }
  0x2d   :  { %16938 = sst [smem:[#allocation110_spill]] %s14877_s20 }
  0x2e   :  { %s14897_s20 = sld [smem:[%s16908_s0 + %s14672_s15]]   ;;  %s14676_s15 = smov 31  }
  0x2f   :  { %s14917_s8 = sld [smem:[%s16908_s0 + %s14676_s15]]   ;;  %s14680_s15 = smov 35  }
  0x30   :  { %16939 = sst [smem:[#allocation111_spill]] %s14882_s5 }
  0x31   :  { %16940 = sst [smem:[#allocation112_spill]] %s14892_s12 }
  0x32   :  { %s14902_s5 = sld [smem:[%s16908_s0 + %s14673_s22]]   ;;  %s14677_s22 = smov 32  }
  0x33   :  { %s14912_s12 = sld [smem:[%s16908_s0 + %s14675_s7]]   ;;  %s14679_s7 = smov 34  }
  0x34   :  { %s14927_s29 = sld [smem:[%s16908_s0 + %s14678_s28]]   ;;  %s14682_s28 = smov 37  }
  0x35   :  { %s14937_s21 = sld [smem:[%s16908_s0 + %s14680_s15]]   ;;  %s14684_s15 = smov 39  }
  0x38   :  { %16941 = sst [smem:[#allocation113_spill]] %s14902_s5 }
  0x39   :  { %16942 = sst [smem:[#allocation114_spill]] %s14912_s12 }
  0x3a   :  { %s14922_s5 = sld [smem:[%s16908_s0 + %s14677_s22]]   ;;  %s14681_s22 = smov 36  }
  0x3b   :  { %16944 = sst [smem:[#allocation116_spill]] %s14927_s29 }
  0x3c   :  { %s14932_s12 = sld [smem:[%s16908_s0 + %s14679_s7]]   ;;  %s14683_s7 = smov 38  }
  0x3d   :  { %16945 = sst [smem:[#allocation117_spill]] %s14937_s21 }
  0x3e   :  { %s14947_s29 = sld [smem:[%s16908_s0 + %s14682_s28]]   ;;  %s14686_s28 = smov 41  }
  0x3f   :  { %s14952_s13 = sld [smem:[%s16908_s0 + %s14683_s7]]   ;;  %s14687_s7 = smov 42  }
  0x40   :  { %16943 = sst [smem:[#allocation115_spill]] %s14922_s5 }
  0x41   :  { %s14942_s5 = sld [smem:[%s16908_s0 + %s14681_s22]]   ;;  %s14685_s22 = smov 40  }
  0x42   :  { %s14957_s21 = sld [smem:[%s16908_s0 + %s14684_s15]]   ;;  %s14688_s15 = smov 43  }
  0x44   :  { %16947 = sst [smem:[#allocation119_spill]] %s14947_s29 }
  0x45   :  { %16948 = sst [smem:[#allocation120_spill]] %s14952_s13 }
  0x46   :  { %s14967_s29 = sld [smem:[%s16908_s0 + %s14686_s28]]   ;;  %s14690_s28 = smov 45  }
  0x47   :  { %16946 = sst [smem:[#allocation118_spill]] %s14942_s5 }
  0x48   :  { %16949 = sst [smem:[#allocation121_spill]] %s14957_s21 }
  0x49   :  { %s14962_s5 = sld [smem:[%s16908_s0 + %s14685_s22]]   ;;  %s14689_s22 = smov 44  }
  0x4a   :  { %s14972_s13 = sld [smem:[%s16908_s0 + %s14687_s7]]   ;;  %s14691_s7 = smov 46  }
  0x4b   :  { %s14977_s21 = sld [smem:[%s16908_s0 + %s14688_s15]]   ;;  %s14692_s15 = smov 47  }
  0x4c   :  { %16951 = sst [smem:[#allocation123_spill]] %s14967_s29 }
  0x4d   :  { %s14987_s29 = sld [smem:[%s16908_s0 + %s14690_s28]]   ;;  %s14694_s28 = smov 49  }
  0x4f   :  { %16950 = sst [smem:[#allocation122_spill]] %s14962_s5 }
  0x50   :  { %16952 = sst [smem:[#allocation124_spill]] %s14972_s13 }
  0x51   :  { %16953 = sst [smem:[#allocation125_spill]] %s14977_s21 }
  0x52   :  { %s14982_s5 = sld [smem:[%s16908_s0 + %s14689_s22]]   ;;  %s14693_s22 = smov 48  }
  0x53   :  { %16955 = sst [smem:[#allocation127_spill]] %s14987_s29 }
  0x54   :  { %s14992_s13 = sld [smem:[%s16908_s0 + %s14691_s7]]   ;;  %s14695_s7 = smov 50  }
  0x55   :  { %s14997_s21 = sld [smem:[%s16908_s0 + %s14692_s15]]   ;;  %s14696_s15 = smov 51  }
  0x56   :  { %s15007_s29 = sld [smem:[%s16908_s0 + %s14694_s28]]   ;;  %s14698_s28 = smov 53  }
  0x58   :  { %16954 = sst [smem:[#allocation126_spill]] %s14982_s5 }
  0x59   :  { %s15002_s5 = sld [smem:[%s16908_s0 + %s14693_s22]]   ;;  %s14697_s22 = smov 52  }
  0x5a   :  { %16956 = sst [smem:[#allocation128_spill]] %s14992_s13 }
  0x5b   :  { %16957 = sst [smem:[#allocation129_spill]] %s14997_s21 }
  0x5c   :  { %16959 = sst [smem:[#allocation131_spill]] %s15007_s29 }
  0x5d   :  { %s15012_s13 = sld [smem:[%s16908_s0 + %s14695_s7]]   ;;  %s14699_s7 = smov 54  }
  0x5e   :  { %s15017_s21 = sld [smem:[%s16908_s0 + %s14696_s15]]   ;;  %s14700_s15 = smov 55  }
  0x5f   :  { %16958 = sst [smem:[#allocation130_spill]] %s15002_s5 }
  0x60   :  { %s15022_s5 = sld [smem:[%s16908_s0 + %s14697_s22]]   ;;  %s14701_s22 = smov 56  }
  0x61   :  { %s15027_s29 = sld [smem:[%s16908_s0 + %s14698_s28]]   ;;  %s14702_s28 = smov 57  }
  0x63   :  { %16960 = sst [smem:[#allocation132_spill]] %s15012_s13 }
  0x64   :  { %16961 = sst [smem:[#allocation133_spill]] %s15017_s21 }
  0x65   :  { %s15032_s13 = sld [smem:[%s16908_s0 + %s14699_s7]]  }
  0x66   :  { %16962 = sst [smem:[#allocation134_spill]] %s15022_s5 }
  0x67   :  { %16963 = sst [smem:[#allocation135_spill]] %s15027_s29 }
  0x68   :  { %s15037_s21 = sld [smem:[%s16908_s0 + %s14700_s15]]  }
  0x69   :  { %s15042_s5 = sld [smem:[%s16908_s0 + %s14701_s22]]  }
  0x6a   :  { %s15047_s29 = sld [smem:[%s16908_s0 + %s14702_s28]]  }
  0x6b   :  { %120 = vsyncpa [#allocation4], 0 }
  0x6c   :  { %121 = vsyncpa [#allocation6], 0 }
  0x6d   :  { %122 = vsyncpa [#allocation9], 0 }
  0x6e   :  { %123 = vsyncpa [#allocation12], 0 }
  0x6f   :  { %124 = vsyncpa [#allocation15], 0 }
  0x70   :  { %125 = vsyncpa [#allocation18], 0 }
  0x71   :  { %126 = vsyncpa [#allocation21], 0 }
  0x72   :  { %127 = vsyncpa [#allocation24], 0 }
  0x73   :  { %128 = vsyncpa [#allocation27], 0 }
  0x74   :  { %129 = vsyncpa [#allocation30], 0 }
  0x75   :  { %130 = vsyncpa [#allocation33], 0 }
  0x76   :  { %131 = vsyncpa [#allocation36], 0 }
  0x77   :  { %132 = vsyncpa [#allocation39], 0 }
  0x78   :  { %133 = vsyncpa [#allocation42], 0 }
  0x79   :  { %134 = vsyncpa [#allocation45], 0 }
  0x7a   :  { %135 = vsyncpa [#allocation48], 0 }
  0x7b   :  { %136 = vsyncpa [#allocation51], 0 }
  0x7c   :  { %137 = vsyncpa [#allocation54], 0 }
  0x7d   :  { %138 = vsyncpa [#allocation57], 0 }
  0x7e   :  { %139 = vsyncpa [#allocation60], 0 }
  0x7f   :  { %140 = vsyncpa [#allocation63], 0 }
  0x80   :  { %141 = vsyncpa [#allocation66], 0 }
  0x81   :  { %142 = vsyncpa [#allocation69], 0  ;;  %s15049_s0 = smov 0  }
  0x82 LB: > { %s15055_s7 = sadd.s32 4294967295, %s14644_s0   ;;  %p9831_p0 = scmp.ge.s32.totalorder %s14644_s0, 1  ;;  %s14644_s0 = sphi %s15049_s0, %s148_s0  }
  0x83   : > { %p1386_p1 = scmp.lt.s32.totalorder %s14644_s0, 3 }
  0x85   : > { %p15059_p2 = pnand %p9831_p0, %p1386_p1 }
  0x86   : > { %p13228_p3 = scmp.eq.s32.totalorder (!%p15059_p2), %s15055_s7, 0  ;;  %s14703_s11 = smov (!%p15059_p2), [#allocation5]  }
  0x87   : > { %1390 = sbr.rel (%p15059_p2) target bundleno = 648 (0x288), region = 12  ;;  %s1412_s15 = sshll.u32 (!%p15059_p2), %s14703_s11, 4  ;;  %s1413_s15 = int_to_ptr.vmem [resolvable:$true] %s1412_s15 }
  0x88   : > { %s14704_s16 = smov (!%p15059_p2), [#allocation8]   ;;  %s13476_s22 = scalar_lea.vmem (!%p15059_p2), %s1413_s15, 16 }
  0x89   : > { %s1436_s18 = sshll.u32 (!%p15059_p2), %s14704_s16, 4  ;;  %p13477_p4 = scmp.ne.s32.totalorder (!%p15059_p2), %s1413_s15, %s13476_s22  ;;  %s1437_s18 = int_to_ptr.vmem [resolvable:$true] %s1436_s18 }
  0x8a   : > { %s13482_s23 = scalar_lea.vmem (!%p15059_p2), %s1413_s15, 32  ;;  %p13483_p7 = scmp.lt.s32.totalorder (!%p15059_p2), %s1413_s15, %s1413_s15 }
  0x8b   : > { %p13478_p5 = pnand (!%p15059_p2), %p13477_p4, %p13228_p3  ;;  %p13484_p8 = scmp.lt.s32.totalorder (!%p15059_p2), %s13482_s23, %s13476_s22 }
  0x8d   : > { %p13479_p6 = pneg %p13478_p5  ;;  %p13485_p9 = por %p13484_p8, %p13483_p7 }
  0x8f   : > { %p13486_p10 = pnand %p13485_p9, %p13479_p6 }
  0x91   : > { %13489 = shalt.err (!%p13486_p10)
}
  0x92   : > { %13051 = dma.hbm_to_vmem [thread:$0]  (%p13228_p3), %s14777_s17, 16, %s1413_s15, [#allocation6]  }
  0x93   : > { %s13500_s26 = scalar_lea.vmem %s1437_s18, 16  ;;  %s13506_s28 = scalar_lea.vmem %s1437_s18, 32 }
  0x94   : > { %p13501_p11 = scmp.ne.s32.totalorder %s1437_s18, %s13500_s26  ;;  %p13507_p0 = scmp.lt.s32.totalorder %s1437_s18, %s1437_s18 }
  0x95   : > { %p13508_p1 = scmp.lt.s32.totalorder %s13506_s28, %s13500_s26 }
  0x96   : > { %p13502_p12 = pnand %p13501_p11, %p13228_p3 }
  0x97   : > { %p13509_p4 = por %p13508_p1, %p13507_p0 }
  0x98   : > { %p13503_p13 = pneg %p13502_p12 }
  0x9a   : > { %p13510_p5 = pnand %p13509_p4, %p13503_p13 }
  0x9c   : > { %13513 = shalt.err (!%p13510_p5)
}
  0x9d   : > { %13055 = dma.hbm_to_vmem [thread:$0]  (%p13228_p3), %s14787_s25, 16, %s1437_s18, [#allocation9]  }
  0x9e   : > { %s14705_s1 = smov [#allocation11]  }
  0x9f   : > { %s1460_s2 = sshll.u32 %s14705_s1, 4  ;;  %s1461_s2 = int_to_ptr.vmem [resolvable:$true] %s1460_s2 }
  0xa0   : > { %s13524_s11 = scalar_lea.vmem %s1461_s2, 16  ;;  %s13530_s15 = scalar_lea.vmem %s1461_s2, 32 }
  0xa1   : > { %p13525_p6 = scmp.ne.s32.totalorder %s1461_s2, %s13524_s11  ;;  %p13531_p9 = scmp.lt.s32.totalorder %s1461_s2, %s1461_s2 }
  0xa2   : > { %p13532_p10 = scmp.lt.s32.totalorder %s13530_s15, %s13524_s11 }
  0xa3   : > { %p13526_p7 = pnand %p13525_p6, %p13228_p3 }
  0xa4   : > { %p13533_p11 = por %p13532_p10, %p13531_p9 }
  0xa5   : > { %p13527_p8 = pneg %p13526_p7 }
  0xa7   : > { %p13534_p12 = pnand %p13533_p11, %p13527_p8 }
  0xa9   : > { %13537 = shalt.err (!%p13534_p12)
}
  0xaa   : > { %s16965_s3 = sld [smem:[#allocation99_spill]]  ;;  %s14706_s16 = smov [#allocation14]  }
  0xab   : > { %s1483_s18 = sshll.u32 %s14706_s16, 4  ;;  %s14707_s22 = smov [#allocation17]   ;;  %s1484_s18 = int_to_ptr.vmem [resolvable:$true] %s1483_s18 }
  0xac   : > { %s1507_s23 = sshll.u32 %s14707_s22, 4  ;;  %s13548_s26 = scalar_lea.vmem %s1484_s18, 1024  ;;  %s1508_s23 = int_to_ptr.vmem [resolvable:$true] %s1507_s23 }
  0xad   : > { %p13549_p13 = scmp.ne.s32.totalorder %s1484_s18, %s13548_s26  ;;  %p13555_p4 = scmp.lt.s32.totalorder %s1484_s18, %s1484_s18 }
  0xae   : > { %p13556_p5 = scmp.lt.s32.totalorder %s13548_s26, %s13548_s26 }
  0xaf   : > { %p13550_p0 = pnand %p13549_p13, %p13228_p3 }
  0xb0   : > { %13059 = dma.hbm_to_vmem [thread:$0]  (%p13228_p3), %s16965_s3, 16, %s1461_s2, [#allocation12]  }
  0xb1   : > { %p13551_p1 = pneg %p13550_p0  ;;  %p13557_p6 = por %p13556_p5, %p13555_p4 }
  0xb3   : > { %p13558_p7 = pnand %p13557_p6, %p13551_p1 }
  0xb5   : > { %13561 = shalt.err (!%p13558_p7)
}
  0xb6   : > { %s16918_s28 = smov 128   ;;  %s16920_s1 = smov 8  }
  0xb7   : > { %13063 = dma.hbm_to_vmem [thread:$0]  (%p13228_p3), %s14807_s14, 1024, %s1484_s18, [#allocation15], %s16918_s28, %s16918_s28, %s16920_s1  }
  0xb8   : > { %s13572_s2 = scalar_lea.vmem %s1508_s23, 3072  ;;  %p13579_p11 = scmp.lt.s32.totalorder %s1508_s23, %s1508_s23 }
  0xb9   : > { %p13573_p8 = scmp.ne.s32.totalorder %s1508_s23, %s13572_s2  ;;  %p13580_p12 = scmp.lt.s32.totalorder %s13572_s2, %s13572_s2 }
  0xbb   : > { %p13574_p9 = pnand %p13573_p8, %p13228_p3  ;;  %p13581_p13 = por %p13580_p12, %p13579_p11 }
  0xbd   : > { %p13575_p10 = pneg %p13574_p9 }
  0xbf   : > { %p13582_p0 = pnand %p13581_p13, %p13575_p10 }
  0xc1   : > { %13585 = shalt.err (!%p13582_p0)
}
  0xc2   : > { %13067 = dma.hbm_to_vmem [thread:$0]  (%p13228_p3), %s14817_s24, 3072, %s1508_s23, [#allocation18], %s16918_s28, %s16918_s28, %s16920_s1  }
  0xc3   : > { %s14710_s11 = smov [#allocation20]   ;;  %s14711_s16 = smov [#allocation23]  }
  0xc4   : > { %s1531_s15 = sshll.u32 %s14710_s11, 4  ;;  %s1559_s18 = sshll.u32 %s14711_s16, 4  ;;  %s1532_s15 = int_to_ptr.vmem [resolvable:$true] %s1531_s15  ;;  %s1560_s18 = int_to_ptr.vmem [resolvable:$true] %s1559_s18 }
  0xc5   : > { %s13596_s22 = scalar_lea.vmem %s1532_s15, 3072  ;;  %p13603_p6 = scmp.lt.s32.totalorder %s1532_s15, %s1532_s15 }
  0xc6   : > { %p13597_p1 = scmp.ne.s32.totalorder %s1532_s15, %s13596_s22  ;;  %p13604_p7 = scmp.lt.s32.totalorder %s13596_s22, %s13596_s22 }
  0xc8   : > { %p13598_p4 = pnand %p13597_p1, %p13228_p3  ;;  %p13605_p8 = por %p13604_p7, %p13603_p6 }
  0xca   : > { %p13599_p5 = pneg %p13598_p4 }
  0xcc   : > { %p13606_p9 = pnand %p13605_p8, %p13599_p5 }
  0xce   : > { %13609 = shalt.err (!%p13606_p9)
}
  0xcf   : > { %13071 = dma.hbm_to_vmem [thread:$0]  (%p13228_p3), %s14827_s6, 3072, %s1532_s15, [#allocation21], %s16918_s28, %s16918_s28, %s16920_s1  }
  0xd0   : > { %s13620_s23 = scalar_lea.vmem %s1560_s18, 16  ;;  %s13626_s26 = scalar_lea.vmem %s1560_s18, 32 }
  0xd1   : > { %p13621_p10 = scmp.ne.s32.totalorder %s1560_s18, %s13620_s23  ;;  %p13627_p13 = scmp.lt.s32.totalorder %s1560_s18, %s1560_s18 }
  0xd2   : > { %p13628_p0 = scmp.lt.s32.totalorder %s13626_s26, %s13620_s23 }
  0xd3   : > { %p13622_p11 = pnand %p13621_p10, %p13228_p3 }
  0xd4   : > { %p13629_p1 = por %p13628_p0, %p13627_p13 }
  0xd5   : > { %p13623_p12 = pneg %p13622_p11 }
  0xd7   : > { %p13630_p4 = pnand %p13629_p1, %p13623_p12 }
  0xd9   : > { %13633 = shalt.err (!%p13630_p4)
}
  0xda   : > { %13075 = dma.hbm_to_vmem [thread:$0]  (%p13228_p3), %s14842_s27, 16, %s1560_s18, [#allocation24]  }
  0xdb   : > { %s14712_s2 = smov [#allocation26]   ;;  %s14713_s16 = smov [#allocation29]  }
  0xdc   : > { %s1583_s11 = sshll.u32 %s14712_s2, 4  ;;  %s1610_s15 = sshll.u32 %s14713_s16, 4  ;;  %s1584_s11 = int_to_ptr.vmem [resolvable:$true] %s1583_s11  ;;  %s1611_s15 = int_to_ptr.vmem [resolvable:$true] %s1610_s15 }
  0xdd   : > { %s13644_s22 = scalar_lea.vmem %s1584_s11, 16  ;;  %s13650_s23 = scalar_lea.vmem %s1584_s11, 32 }
  0xde   : > { %p13645_p5 = scmp.ne.s32.totalorder %s1584_s11, %s13644_s22  ;;  %p13651_p8 = scmp.lt.s32.totalorder %s1584_s11, %s1584_s11 }
  0xdf   : > { %p13652_p9 = scmp.lt.s32.totalorder %s13650_s23, %s13644_s22 }
  0xe0   : > { %p13646_p6 = pnand %p13645_p5, %p13228_p3 }
  0xe1   : > { %p13653_p10 = por %p13652_p9, %p13651_p8 }
  0xe2   : > { %p13647_p7 = pneg %p13646_p6 }
  0xe4   : > { %p13654_p11 = pnand %p13653_p10, %p13647_p7 }
  0xe6   : > { %13657 = shalt.err (!%p13654_p11)
}
  0xe7   : > { %13079 = dma.hbm_to_vmem [thread:$0]  (%p13228_p3), %s14852_s9, 16, %s1584_s11, [#allocation27]  }
  0xe8   : > { %s13668_s18 = scalar_lea.vmem %s1611_s15, 16  ;;  %s13674_s26 = scalar_lea.vmem %s1611_s15, 32 }
  0xe9   : > { %p13669_p12 = scmp.ne.s32.totalorder %s1611_s15, %s13668_s18  ;;  %p13675_p1 = scmp.lt.s32.totalorder %s1611_s15, %s1611_s15 }
  0xea   : > { %p13676_p4 = scmp.lt.s32.totalorder %s13674_s26, %s13668_s18 }
  0xeb   : > { %p13670_p13 = pnand %p13669_p12, %p13228_p3 }
  0xec   : > { %p13677_p5 = por %p13676_p4, %p13675_p1 }
  0xed   : > { %p13671_p0 = pneg %p13670_p13 }
  0xef   : > { %p13678_p6 = pnand %p13677_p5, %p13671_p0 }
  0xf1   : > { %13681 = shalt.err (!%p13678_p6)
}
  0xf2   : > { %s16966_s4 = sld [smem:[#allocation108_spill]]  ;;  %s14714_s2 = smov [#allocation32]  }
  0xf3   : > { %s1638_s16 = sshll.u32 %s14714_s2, 4  ;;  %s14715_s22 = smov [#allocation35]   ;;  %s1639_s16 = int_to_ptr.vmem [resolvable:$true] %s1638_s16 }
  0xf4   : > { %s1662_s11 = sshll.u32 %s14715_s22, 4  ;;  %s13692_s23 = scalar_lea.vmem %s1639_s16, 16  ;;  %s1663_s11 = int_to_ptr.vmem [resolvable:$true] %s1662_s11 }
  0xf5   : > { %p13693_p7 = scmp.ne.s32.totalorder %s1639_s16, %s13692_s23  ;;  %s13698_s18 = scalar_lea.vmem %s1639_s16, 32 }
  0xf6   : > { %p13699_p10 = scmp.lt.s32.totalorder %s1639_s16, %s1639_s16  ;;  %p13700_p11 = scmp.lt.s32.totalorder %s13698_s18, %s13692_s23 }
  0xf7   : > { %p13694_p8 = pnand %p13693_p7, %p13228_p3 }
  0xf8   : > { %13083 = dma.hbm_to_vmem [thread:$0]  (%p13228_p3), %s16966_s4, 16, %s1611_s15, [#allocation30]  }
  0xf9   : > { %p13695_p9 = pneg %p13694_p8  ;;  %p13701_p12 = por %p13700_p11, %p13699_p10 }
  0xfb   : > { %p13702_p13 = pnand %p13701_p12, %p13695_p9 }
  0xfd   : > { %13705 = shalt.err (!%p13702_p13)
}
  0xfe   : > { %13087 = dma.hbm_to_vmem [thread:$0]  (%p13228_p3), %s14887_s30, 16, %s1639_s16, [#allocation33]  }
  0xff   : > { %s13716_s15 = scalar_lea.vmem %s1663_s11, 16  ;;  %s13722_s26 = scalar_lea.vmem %s1663_s11, 32 }
 0x100   : > { %p13717_p0 = scmp.ne.s32.totalorder %s1663_s11, %s13716_s15  ;;  %p13723_p5 = scmp.lt.s32.totalorder %s1663_s11, %s1663_s11 }
 0x101   : > { %p13724_p6 = scmp.lt.s32.totalorder %s13722_s26, %s13716_s15 }
 0x102   : > { %p13718_p1 = pnand %p13717_p0, %p13228_p3 }
 0x103   : > { %p13725_p7 = por %p13724_p6, %p13723_p5 }
 0x104   : > { %p13719_p4 = pneg %p13718_p1 }
 0x106   : > { %p13726_p8 = pnand %p13725_p7, %p13719_p4 }
 0x108   : > { %13729 = shalt.err (!%p13726_p8)
}
 0x109   : > { %13091 = dma.hbm_to_vmem [thread:$0]  (%p13228_p3), %s14897_s20, 16, %s1663_s11, [#allocation36]  }
 0x10a   : > { %s14716_s2 = smov [#allocation38]   ;;  %s14717_s23 = smov [#allocation41]  }
 0x10b   : > { %s1686_s22 = sshll.u32 %s14716_s2, 4  ;;  %s1709_s16 = sshll.u32 %s14717_s23, 4  ;;  %s1687_s22 = int_to_ptr.vmem [resolvable:$true] %s1686_s22  ;;  %s1710_s16 = int_to_ptr.vmem [resolvable:$true] %s1709_s16 }
 0x10c   : > { %s13740_s18 = scalar_lea.vmem %s1687_s22, 16  ;;  %s13746_s15 = scalar_lea.vmem %s1687_s22, 32 }
 0x10d   : > { %p13741_p9 = scmp.ne.s32.totalorder %s1687_s22, %s13740_s18  ;;  %p13747_p12 = scmp.lt.s32.totalorder %s1687_s22, %s1687_s22 }
 0x10e   : > { %p13748_p13 = scmp.lt.s32.totalorder %s13746_s15, %s13740_s18 }
 0x10f   : > { %p13742_p10 = pnand %p13741_p9, %p13228_p3 }
 0x110   : > { %p13749_p0 = por %p13748_p13, %p13747_p12 }
 0x111   : > { %p13743_p11 = pneg %p13742_p10 }
 0x113   : > { %p13750_p1 = pnand %p13749_p0, %p13743_p11 }
 0x115   : > { %13753 = shalt.err (!%p13750_p1)
}
 0x116   : > { %13095 = dma.hbm_to_vmem [thread:$0]  (%p13228_p3), %s14907_s19, 16, %s1687_s22, [#allocation39]  }
 0x117   : > { %s13764_s11 = scalar_lea.vmem %s1710_s16, 2048  ;;  %p13771_p7 = scmp.lt.s32.totalorder %s1710_s16, %s1710_s16 }
 0x118   : > { %p13765_p4 = scmp.ne.s32.totalorder %s1710_s16, %s13764_s11  ;;  %p13772_p8 = scmp.lt.s32.totalorder %s13764_s11, %s13764_s11 }
 0x11a   : > { %p13766_p5 = pnand %p13765_p4, %p13228_p3  ;;  %p13773_p9 = por %p13772_p8, %p13771_p7 }
 0x11c   : > { %p13767_p6 = pneg %p13766_p5 }
 0x11e   : > { %p13774_p10 = pnand %p13773_p9, %p13767_p6 }
 0x120   : > { %13777 = shalt.err (!%p13774_p10)
}
 0x121   : > { %13099 = dma.hbm_to_vmem [thread:$0]  (%p13228_p3), %s14917_s8, 2048, %s1710_s16, [#allocation42], %s16918_s28, %s16918_s28, %s16920_s1  }
 0x122   : > { %s14718_s26 = smov [#allocation44]   ;;  %s14719_s22 = smov [#allocation47]  }
 0x123   : > { %s1737_s2 = sshll.u32 %s14718_s26, 4  ;;  %s1761_s23 = sshll.u32 %s14719_s22, 4  ;;  %s1738_s2 = int_to_ptr.vmem [resolvable:$true] %s1737_s2  ;;  %s1762_s23 = int_to_ptr.vmem [resolvable:$true] %s1761_s23 }
 0x124   : > { %s13788_s18 = scalar_lea.vmem %s1738_s2, 16  ;;  %s13794_s15 = scalar_lea.vmem %s1738_s2, 32 }
 0x125   : > { %p13789_p11 = scmp.ne.s32.totalorder %s1738_s2, %s13788_s18  ;;  %p13795_p0 = scmp.lt.s32.totalorder %s1738_s2, %s1738_s2 }
 0x126   : > { %p13796_p1 = scmp.lt.s32.totalorder %s13794_s15, %s13788_s18 }
 0x127   : > { %p13790_p12 = pnand %p13789_p11, %p13228_p3 }
 0x128   : > { %p13797_p4 = por %p13796_p1, %p13795_p0 }
 0x129   : > { %p13791_p13 = pneg %p13790_p12 }
 0x12b   : > { %p13798_p5 = pnand %p13797_p4, %p13791_p13 }
 0x12d   : > { %13801 = shalt.err (!%p13798_p5)
}
 0x12e   : > { %13103 = dma.hbm_to_vmem [thread:$0]  (%p13228_p3), %s14932_s12, 16, %s1738_s2, [#allocation45]  }
 0x12f   : > { %s13812_s16 = scalar_lea.vmem %s1762_s23, 3072  ;;  %p13819_p9 = scmp.lt.s32.totalorder %s1762_s23, %s1762_s23 }
 0x130   : > { %p13813_p6 = scmp.ne.s32.totalorder %s1762_s23, %s13812_s16  ;;  %p13820_p10 = scmp.lt.s32.totalorder %s13812_s16, %s13812_s16 }
 0x132   : > { %p13814_p7 = pnand %p13813_p6, %p13228_p3  ;;  %p13821_p11 = por %p13820_p10, %p13819_p9 }
 0x134   : > { %p13815_p8 = pneg %p13814_p7 }
 0x136   : > { %p13822_p12 = pnand %p13821_p11, %p13815_p8 }
 0x138   : > { %13825 = shalt.err (!%p13822_p12)
}
 0x139   : > { %s16967_s11 = sld [smem:[#allocation119_spill]]  ;;  %s14720_s26 = smov [#allocation50]  }
 0x13a   : > { %s1785_s2 = sshll.u32 %s14720_s26, 4  ;;  %s14721_s22 = smov [#allocation53]   ;;  %s1786_s2 = int_to_ptr.vmem [resolvable:$true] %s1785_s2 }
 0x13b   : > { %s1809_s18 = sshll.u32 %s14721_s22, 4  ;;  %s13836_s15 = scalar_lea.vmem %s1786_s2, 512  ;;  %s1810_s18 = int_to_ptr.vmem [resolvable:$true] %s1809_s18 }
 0x13c   : > { %p13837_p13 = scmp.ne.s32.totalorder %s1786_s2, %s13836_s15  ;;  %p13843_p4 = scmp.lt.s32.totalorder %s1786_s2, %s1786_s2 }
 0x13d   : > { %p13844_p5 = scmp.lt.s32.totalorder %s13836_s15, %s13836_s15 }
 0x13e   : > { %p13838_p0 = pnand %p13837_p13, %p13228_p3 }
 0x13f   : > { %13107 = dma.hbm_to_vmem [thread:$0]  (%p13228_p3), %s16967_s11, 3072, %s1762_s23, [#allocation48], %s16918_s28, %s16918_s28, %s16920_s1  }
 0x140   : > { %p13839_p1 = pneg %p13838_p0  ;;  %p13845_p6 = por %p13844_p5, %p13843_p4 }
 0x142   : > { %p13846_p7 = pnand %p13845_p6, %p13839_p1 }
 0x144   : > { %13849 = shalt.err (!%p13846_p7)
}
 0x145   : > { %s16968_s23 = sld [smem:[#allocation121_spill]]  ;;  %s13860_s16 = scalar_lea.vmem %s1810_s18, 3072 }
 0x146   : > { %p13861_p8 = scmp.ne.s32.totalorder %s1810_s18, %s13860_s16  ;;  %p13867_p11 = scmp.lt.s32.totalorder %s1810_s18, %s1810_s18 }
 0x147   : > { %p13868_p12 = scmp.lt.s32.totalorder %s13860_s16, %s13860_s16 }
 0x148   : > { %p13862_p9 = pnand %p13861_p8, %p13228_p3 }
 0x149   : > { %p13869_p13 = por %p13868_p12, %p13867_p11 }
 0x14a   : > { %p13863_p10 = pneg %p13862_p9 }
 0x14b   : > { %13111 = dma.hbm_to_vmem [thread:$0]  (%p13228_p3), %s16968_s23, 512, %s1786_s2, [#allocation51], %s16918_s28, %s16918_s28, %s16920_s1  }
 0x14c   : > { %p13870_p0 = pnand %p13869_p13, %p13863_p10 }
 0x14e   : > { %13873 = shalt.err (!%p13870_p0)
}
 0x14f   : > { %s16969_s11 = sld [smem:[#allocation123_spill]]  ;;  %s14722_s26 = smov [#allocation56]  }
 0x150   : > { %s1840_s2 = sshll.u32 %s14722_s26, 4  ;;  %s14723_s22 = smov [#allocation59]   ;;  %s1841_s2 = int_to_ptr.vmem [resolvable:$true] %s1840_s2 }
 0x151   : > { %s1864_s15 = sshll.u32 %s14723_s22, 4  ;;  %s13884_s23 = scalar_lea.vmem %s1841_s2, 16  ;;  %s1865_s15 = int_to_ptr.vmem [resolvable:$true] %s1864_s15 }
 0x152   : > { %p13885_p1 = scmp.ne.s32.totalorder %s1841_s2, %s13884_s23  ;;  %s13890_s16 = scalar_lea.vmem %s1841_s2, 32 }
 0x153   : > { %p13891_p6 = scmp.lt.s32.totalorder %s1841_s2, %s1841_s2  ;;  %p13892_p7 = scmp.lt.s32.totalorder %s13890_s16, %s13884_s23 }
 0x154   : > { %p13886_p4 = pnand %p13885_p1, %p13228_p3 }
 0x155   : > { %13115 = dma.hbm_to_vmem [thread:$0]  (%p13228_p3), %s16969_s11, 3072, %s1810_s18, [#allocation54], %s16918_s28, %s16918_s28, %s16920_s1  }
 0x156   : > { %p13887_p5 = pneg %p13886_p4  ;;  %p13893_p8 = por %p13892_p7, %p13891_p6 }
 0x158   : > { %p13894_p9 = pnand %p13893_p8, %p13887_p5 }
 0x15a   : > { %13897 = shalt.err (!%p13894_p9)
}
 0x15b   : > { %s16970_s18 = sld [smem:[#allocation127_spill]]  ;;  %s13908_s11 = scalar_lea.vmem %s1865_s15, 3072 }
 0x15c   : > { %p13909_p10 = scmp.ne.s32.totalorder %s1865_s15, %s13908_s11  ;;  %p13915_p13 = scmp.lt.s32.totalorder %s1865_s15, %s1865_s15 }
 0x15d   : > { %p13916_p0 = scmp.lt.s32.totalorder %s13908_s11, %s13908_s11 }
 0x15e   : > { %p13910_p11 = pnand %p13909_p10, %p13228_p3 }
 0x15f   : > { %p13917_p1 = por %p13916_p0, %p13915_p13 }
 0x160   : > { %p13911_p12 = pneg %p13910_p11 }
 0x161   : > { %13119 = dma.hbm_to_vmem [thread:$0]  (%p13228_p3), %s16970_s18, 16, %s1841_s2, [#allocation57]  }
 0x162   : > { %p13918_p4 = pnand %p13917_p1, %p13911_p12 }
 0x164   : > { %13921 = shalt.err (!%p13918_p4)
}
 0x165   : > { %s16971_s26 = sld [smem:[#allocation130_spill]]  ;;  %s14724_s22 = smov [#allocation62]  }
 0x166   : > { %s1888_s2 = sshll.u32 %s14724_s22, 4  ;;  %s14725_s23 = smov [#allocation65]   ;;  %s1889_s2 = int_to_ptr.vmem [resolvable:$true] %s1888_s2 }
 0x167   : > { %s1912_s16 = sshll.u32 %s14725_s23, 4  ;;  %s13932_s18 = scalar_lea.vmem %s1889_s2, 512  ;;  %s1913_s16 = int_to_ptr.vmem [resolvable:$true] %s1912_s16 }
 0x168   : > { %p13933_p5 = scmp.ne.s32.totalorder %s1889_s2, %s13932_s18  ;;  %p13939_p8 = scmp.lt.s32.totalorder %s1889_s2, %s1889_s2 }
 0x169   : > { %p13940_p9 = scmp.lt.s32.totalorder %s13932_s18, %s13932_s18 }
 0x16a   : > { %p13934_p6 = pnand %p13933_p5, %p13228_p3 }
 0x16b   : > { %13123 = dma.hbm_to_vmem [thread:$0]  (%p13228_p3), %s16971_s26, 3072, %s1865_s15, [#allocation60], %s16918_s28, %s16918_s28, %s16920_s1  }
 0x16c   : > { %p13935_p7 = pneg %p13934_p6  ;;  %p13941_p10 = por %p13940_p9, %p13939_p8 }
 0x16e   : > { %p13942_p11 = pnand %p13941_p10, %p13935_p7 }
 0x170   : > { %13945 = shalt.err (!%p13942_p11)
}
 0x171   : > { %s16972_s15 = sld [smem:[#allocation132_spill]]  ;;  %s13956_s11 = scalar_lea.vmem %s1913_s16, 3072 }
 0x172   : > { %p13957_p12 = scmp.ne.s32.totalorder %s1913_s16, %s13956_s11  ;;  %p13963_p1 = scmp.lt.s32.totalorder %s1913_s16, %s1913_s16 }
 0x173   : > { %p13964_p4 = scmp.lt.s32.totalorder %s13956_s11, %s13956_s11 }
 0x174   : > { %p13958_p13 = pnand %p13957_p12, %p13228_p3 }
 0x175   : > { %p13965_p5 = por %p13964_p4, %p13963_p1 }
 0x176   : > { %p13959_p0 = pneg %p13958_p13 }
 0x177   : > { %13127 = dma.hbm_to_vmem [thread:$0]  (%p13228_p3), %s16972_s15, 512, %s1889_s2, [#allocation63], %s16918_s28, %s16918_s28, %s16920_s1  }
 0x178   : > { %p13966_p6 = pnand %p13965_p5, %p13959_p0 }
 0x17a   : > { %13969 = shalt.err (!%p13966_p6)
}
 0x17b   : > { %s16973_s26 = sld [smem:[#allocation134_spill]]  ;;  %s14726_s22 = smov [#allocation68]  }
 0x17c   : > { %s1939_s2 = sshll.u32 %s14726_s22, 4  ;;  %s14727_s23 = smov [#allocation3]   ;;  %s1940_s2 = int_to_ptr.vmem [resolvable:$true] %s1939_s2 }
 0x17d   : > { %s1398_s18 = sshll.u32 %s14727_s23, 4  ;;  %s13980_s15 = scalar_lea.vmem %s1940_s2, 16  ;;  %s1399_s18 = int_to_ptr.vmem [resolvable:$true] %s1398_s18 }
 0x17e   : > { %p13981_p7 = scmp.ne.s32.totalorder %s1940_s2, %s13980_s15  ;;  %s13986_s11 = scalar_lea.vmem %s1940_s2, 32 }
 0x17f   : > { %p13987_p10 = scmp.lt.s32.totalorder %s1940_s2, %s1940_s2  ;;  %p13988_p11 = scmp.lt.s32.totalorder %s13986_s11, %s13980_s15 }
 0x180   : > { %p13982_p8 = pnand %p13981_p7, %p13228_p3 }
 0x181   : > { %13131 = dma.hbm_to_vmem [thread:$0]  (%p13228_p3), %s16973_s26, 3072, %s1913_s16, [#allocation66], %s16918_s28, %s16918_s28, %s16920_s1  }
 0x182   : > { %p13983_p9 = pneg %p13982_p8  ;;  %p13989_p12 = por %p13988_p11, %p13987_p10 }
 0x184   : > { %p13990_p13 = pnand %p13989_p12, %p13983_p9 }
 0x186   : > { %13993 = shalt.err (!%p13990_p13)
}
 0x187   : > { %13135 = dma.hbm_to_vmem [thread:$0]  (%p13228_p3), %s15032_s13, 16, %s1940_s2, [#allocation69]  }
 0x188   : > { %s14004_s16 = scalar_lea.vmem %s1399_s18, 192  ;;  %p14011_p5 = scmp.lt.s32.totalorder %s1399_s18, %s1399_s18 }
 0x189   : > { %p14005_p0 = scmp.ne.s32.totalorder %s1399_s18, %s14004_s16  ;;  %p14012_p6 = scmp.lt.s32.totalorder %s14004_s16, %s14004_s16 }
 0x18b   : > { %p14006_p1 = pnand %p14005_p0, %p13228_p3  ;;  %p14013_p7 = por %p14012_p6, %p14011_p5 }
 0x18d   : > { %p14007_p4 = pneg %p14006_p1 }
 0x18f   : > { %p14014_p8 = pnand %p14013_p7, %p14007_p4 }
 0x191   : > { %14017 = shalt.err (!%p14014_p8)
}
 0x192   : > { %s14728_s26 = smov 64   ;;  %s16974_s22 = sld [smem:[#allocation96_spill]] }
 0x193   : > { %s14729_s23 = smov 4   ;;  %s14730_s15 = smov [#allocation7]  }
 0x194   : > { %s1422_s2 = sshll.u32 %s14730_s15, 4  ;;  %s14731_s11 = smov [#allocation10]   ;;  %s1423_s2 = int_to_ptr.vmem [resolvable:$true] %s1422_s2 }
 0x195   : > { %s1446_s28 = sshll.u32 %s14731_s11, 4  ;;  %s14028_s1 = scalar_lea.vmem %s1423_s2, 3072  ;;  %s1447_s28 = int_to_ptr.vmem [resolvable:$true] %s1446_s28 }
 0x196   : > { %p14029_p9 = scmp.ne.s32.totalorder %s1423_s2, %s14028_s1  ;;  %p14035_p12 = scmp.lt.s32.totalorder %s1423_s2, %s1423_s2 }
 0x197   : > { %p14036_p13 = scmp.lt.s32.totalorder %s14028_s1, %s14028_s1 }
 0x198   : > { %13049 = dma.hbm_to_vmem [thread:$0]  (%p13228_p3), %s16974_s22, 192, %s1399_s18, [#allocation4], %s14728_s26, %s14728_s26, %s14729_s23  }
 0x199   : > { %p14030_p10 = pnand %p14029_p9, %p13228_p3  ;;  %p14037_p0 = por %p14036_p13, %p14035_p12 }
 0x19b   : > { %p14031_p11 = pneg %p14030_p10 }
 0x19d   : > { %p14038_p1 = pnand %p14037_p0, %p14031_p11 }
 0x19f   : > { %14041 = shalt.err (!%p14038_p1)
}
 0x1a0   : > { %s16975_s16 = smov 8   ;;  %s16976_s3 = smov 128  }
 0x1a1   : > { %s16977_s18 = sld [smem:[#allocation97_spill]]  ;;  %s14052_s26 = scalar_lea.vmem %s1447_s28, 512 }
 0x1a2   : > { %p14053_p4 = scmp.ne.s32.totalorder %s1447_s28, %s14052_s26  ;;  %p14059_p7 = scmp.lt.s32.totalorder %s1447_s28, %s1447_s28 }
 0x1a3   : > { %p14060_p8 = scmp.lt.s32.totalorder %s14052_s26, %s14052_s26 }
 0x1a4   : > { %p14054_p5 = pnand %p14053_p4, %p13228_p3 }
 0x1a5   : > { %p14061_p9 = por %p14060_p8, %p14059_p7 }
 0x1a6   : > { %p14055_p6 = pneg %p14054_p5 }
 0x1a7   : > { %13053 = dma.hbm_to_vmem [thread:$0]  (%p13228_p3), %s16977_s18, 3072, %s1423_s2, [#allocation6], %s16976_s3, %s16976_s3, %s16975_s16  }
 0x1a8   : > { %p14062_p10 = pnand %p14061_p9, %p14055_p6 }
 0x1aa   : > { %14065 = shalt.err (!%p14062_p10)
}
 0x1ab   : > { %s16978_s1 = sld [smem:[#allocation98_spill]]  ;;  %s14732_s22 = smov [#allocation13]  }
 0x1ac   : > { %s1470_s23 = sshll.u32 %s14732_s22, 4  ;;  %s14733_s15 = smov [#allocation16]   ;;  %s1471_s23 = int_to_ptr.vmem [resolvable:$true] %s1470_s23 }
 0x1ad   : > { %s1497_s2 = sshll.u32 %s14733_s15, 4  ;;  %s14076_s11 = scalar_lea.vmem %s1471_s23, 3072  ;;  %s1498_s2 = int_to_ptr.vmem [resolvable:$true] %s1497_s2 }
 0x1ae   : > { %p14077_p11 = scmp.ne.s32.totalorder %s1471_s23, %s14076_s11  ;;  %p14083_p0 = scmp.lt.s32.totalorder %s1471_s23, %s1471_s23 }
 0x1af   : > { %p14084_p1 = scmp.lt.s32.totalorder %s14076_s11, %s14076_s11 }
 0x1b0   : > { %p14078_p12 = pnand %p14077_p11, %p13228_p3 }
 0x1b1   : > { %13057 = dma.hbm_to_vmem [thread:$0]  (%p13228_p3), %s16978_s1, 512, %s1447_s28, [#allocation9], %s16976_s3, %s16976_s3, %s16975_s16  }
 0x1b2   : > { %p14079_p13 = pneg %p14078_p12  ;;  %p14085_p4 = por %p14084_p1, %p14083_p0 }
 0x1b4   : > { %p14086_p5 = pnand %p14085_p4, %p14079_p13 }
 0x1b6   : > { %14089 = shalt.err (!%p14086_p5)
}
 0x1b7   : > { %s16979_s28 = sld [smem:[#allocation100_spill]]  ;;  %s14100_s18 = scalar_lea.vmem %s1498_s2, 16 }
 0x1b8   : > { %p14101_p6 = scmp.ne.s32.totalorder %s1498_s2, %s14100_s18  ;;  %s14106_s26 = scalar_lea.vmem %s1498_s2, 32 }
 0x1b9   : > { %p14107_p9 = scmp.lt.s32.totalorder %s1498_s2, %s1498_s2  ;;  %p14108_p10 = scmp.lt.s32.totalorder %s14106_s26, %s14100_s18 }
 0x1ba   : > { %p14102_p7 = pnand %p14101_p6, %p13228_p3 }
 0x1bb   : > { %p14109_p11 = por %p14108_p10, %p14107_p9 }
 0x1bc   : > { %p14103_p8 = pneg %p14102_p7 }
 0x1bd   : > { %13061 = dma.hbm_to_vmem [thread:$0]  (%p13228_p3), %s16979_s28, 3072, %s1471_s23, [#allocation12], %s16976_s3, %s16976_s3, %s16975_s16  }
 0x1be   : > { %p14110_p12 = pnand %p14109_p11, %p14103_p8 }
 0x1c0   : > { %14113 = shalt.err (!%p14110_p12)
}
 0x1c1   : > { %s16980_s1 = sld [smem:[#allocation101_spill]]  ;;  %s14734_s22 = smov [#allocation19]  }
 0x1c2   : > { %s1521_s15 = sshll.u32 %s14734_s22, 4  ;;  %s14735_s23 = smov [#allocation22]   ;;  %s1522_s15 = int_to_ptr.vmem [resolvable:$true] %s1521_s15 }
 0x1c3   : > { %s1545_s11 = sshll.u32 %s14735_s23, 4  ;;  %s14124_s28 = scalar_lea.vmem %s1522_s15, 16  ;;  %s1546_s11 = int_to_ptr.vmem [resolvable:$true] %s1545_s11 }
 0x1c4   : > { %p14125_p13 = scmp.ne.s32.totalorder %s1522_s15, %s14124_s28  ;;  %s14130_s4 = scalar_lea.vmem %s1522_s15, 32 }
 0x1c5   : > { %p14131_p4 = scmp.lt.s32.totalorder %s1522_s15, %s1522_s15  ;;  %p14132_p5 = scmp.lt.s32.totalorder %s14130_s4, %s14124_s28 }
 0x1c6   : > { %p14126_p0 = pnand %p14125_p13, %p13228_p3 }
 0x1c7   : > { %13065 = dma.hbm_to_vmem [thread:$0]  (%p13228_p3), %s16980_s1, 16, %s1498_s2, [#allocation15]  }
 0x1c8   : > { %p14127_p1 = pneg %p14126_p0  ;;  %p14133_p6 = por %p14132_p5, %p14131_p4 }
 0x1ca   : > { %p14134_p7 = pnand %p14133_p6, %p14127_p1 }
 0x1cc   : > { %14137 = shalt.err (!%p14134_p7)
}
 0x1cd   : > { %s16981_s18 = sld [smem:[#allocation102_spill]]  ;;  %s14148_s2 = scalar_lea.vmem %s1546_s11, 16 }
 0x1ce   : > { %p14149_p8 = scmp.ne.s32.totalorder %s1546_s11, %s14148_s2  ;;  %s14154_s26 = scalar_lea.vmem %s1546_s11, 32 }
 0x1cf   : > { %p14155_p11 = scmp.lt.s32.totalorder %s1546_s11, %s1546_s11  ;;  %p14156_p12 = scmp.lt.s32.totalorder %s14154_s26, %s14148_s2 }
 0x1d0   : > { %p14150_p9 = pnand %p14149_p8, %p13228_p3 }
 0x1d1   : > { %p14157_p13 = por %p14156_p12, %p14155_p11 }
 0x1d2   : > { %p14151_p10 = pneg %p14150_p9 }
 0x1d3   : > { %13069 = dma.hbm_to_vmem [thread:$0]  (%p13228_p3), %s16981_s18, 16, %s1522_s15, [#allocation18]  }
 0x1d4   : > { %p14158_p0 = pnand %p14157_p13, %p14151_p10 }
 0x1d6   : > { %14161 = shalt.err (!%p14158_p0)
}
 0x1d7   : > { %s16982_s4 = sld [smem:[#allocation103_spill]]  ;;  %s14736_s1 = smov [#allocation25]  }
 0x1d8   : > { %s1569_s22 = sshll.u32 %s14736_s1, 4  ;;  %s14737_s15 = smov [#allocation28]   ;;  %s1570_s22 = int_to_ptr.vmem [resolvable:$true] %s1569_s22 }
 0x1d9   : > { %s1596_s23 = sshll.u32 %s14737_s15, 4  ;;  %s14172_s28 = scalar_lea.vmem %s1570_s22, 512  ;;  %s1597_s23 = int_to_ptr.vmem [resolvable:$true] %s1596_s23 }
 0x1da   : > { %p14173_p1 = scmp.ne.s32.totalorder %s1570_s22, %s14172_s28  ;;  %p14179_p6 = scmp.lt.s32.totalorder %s1570_s22, %s1570_s22 }
 0x1db   : > { %p14180_p7 = scmp.lt.s32.totalorder %s14172_s28, %s14172_s28 }
 0x1dc   : > { %p14174_p4 = pnand %p14173_p1, %p13228_p3 }
 0x1dd   : > { %13073 = dma.hbm_to_vmem [thread:$0]  (%p13228_p3), %s16982_s4, 16, %s1546_s11, [#allocation21]  }
 0x1de   : > { %p14175_p5 = pneg %p14174_p4  ;;  %p14181_p8 = por %p14180_p7, %p14179_p6 }
 0x1e0   : > { %p14182_p9 = pnand %p14181_p8, %p14175_p5 }
 0x1e2   : > { %14185 = shalt.err (!%p14182_p9)
}
 0x1e3   : > { %s16983_s11 = sld [smem:[#allocation105_spill]]  ;;  %s14196_s18 = scalar_lea.vmem %s1597_s23, 2048 }
 0x1e4   : > { %p14197_p10 = scmp.ne.s32.totalorder %s1597_s23, %s14196_s18  ;;  %p14203_p13 = scmp.lt.s32.totalorder %s1597_s23, %s1597_s23 }
 0x1e5   : > { %p14204_p0 = scmp.lt.s32.totalorder %s14196_s18, %s14196_s18 }
 0x1e6   : > { %p14198_p11 = pnand %p14197_p10, %p13228_p3 }
 0x1e7   : > { %p14205_p1 = por %p14204_p0, %p14203_p13 }
 0x1e8   : > { %p14199_p12 = pneg %p14198_p11 }
 0x1e9   : > { %13077 = dma.hbm_to_vmem [thread:$0]  (%p13228_p3), %s16983_s11, 512, %s1570_s22, [#allocation24], %s16976_s3, %s16976_s3, %s16975_s16  }
 0x1ea   : > { %p14206_p4 = pnand %p14205_p1, %p14199_p12 }
 0x1ec   : > { %14209 = shalt.err (!%p14206_p4)
}
 0x1ed   : > { %s16984_s2 = sld [smem:[#allocation107_spill]]  ;;  %s14738_s26 = smov [#allocation31]  }
 0x1ee   : > { %s1624_s4 = sshll.u32 %s14738_s26, 4  ;;  %s14739_s1 = smov [#allocation34]   ;;  %s1625_s4 = int_to_ptr.vmem [resolvable:$true] %s1624_s4 }
 0x1ef   : > { %s1648_s22 = sshll.u32 %s14739_s1, 4  ;;  %s14220_s15 = scalar_lea.vmem %s1625_s4, 16  ;;  %s1649_s22 = int_to_ptr.vmem [resolvable:$true] %s1648_s22 }
 0x1f0   : > { %p14221_p5 = scmp.ne.s32.totalorder %s1625_s4, %s14220_s15  ;;  %s14226_s28 = scalar_lea.vmem %s1625_s4, 32 }
 0x1f1   : > { %p14227_p8 = scmp.lt.s32.totalorder %s1625_s4, %s1625_s4  ;;  %p14228_p9 = scmp.lt.s32.totalorder %s14226_s28, %s14220_s15 }
 0x1f2   : > { %p14222_p6 = pnand %p14221_p5, %p13228_p3 }
 0x1f3   : > { %13081 = dma.hbm_to_vmem [thread:$0]  (%p13228_p3), %s16984_s2, 2048, %s1597_s23, [#allocation27], %s16976_s3, %s16976_s3, %s16975_s16  }
 0x1f4   : > { %p14223_p7 = pneg %p14222_p6  ;;  %p14229_p10 = por %p14228_p9, %p14227_p8 }
 0x1f6   : > { %p14230_p11 = pnand %p14229_p10, %p14223_p7 }
 0x1f8   : > { %14233 = shalt.err (!%p14230_p11)
}
 0x1f9   : > { %s16985_s11 = sld [smem:[#allocation110_spill]]  ;;  %s14244_s23 = scalar_lea.vmem %s1649_s22, 6144 }
 0x1fa   : > { %p14245_p12 = scmp.ne.s32.totalorder %s1649_s22, %s14244_s23  ;;  %p14251_p1 = scmp.lt.s32.totalorder %s1649_s22, %s1649_s22 }
 0x1fb   : > { %p14252_p4 = scmp.lt.s32.totalorder %s14244_s23, %s14244_s23 }
 0x1fc   : > { %p14246_p13 = pnand %p14245_p12, %p13228_p3 }
 0x1fd   : > { %p14253_p5 = por %p14252_p4, %p14251_p1 }
 0x1fe   : > { %p14247_p0 = pneg %p14246_p13 }
 0x1ff   : > { %13085 = dma.hbm_to_vmem [thread:$0]  (%p13228_p3), %s16985_s11, 16, %s1625_s4, [#allocation30]  }
 0x200   : > { %p14254_p6 = pnand %p14253_p5, %p14247_p0 }
 0x202   : > { %14257 = shalt.err (!%p14254_p6)
}
 0x203   : > { %s16986_s18 = sld [smem:[#allocation112_spill]]  ;;  %s14740_s2 = smov [#allocation37]  }
 0x204   : > { %s1672_s26 = sshll.u32 %s14740_s2, 4  ;;  %s14741_s4 = smov [#allocation40]   ;;  %s1673_s26 = int_to_ptr.vmem [resolvable:$true] %s1672_s26 }
 0x205   : > { %s1696_s1 = sshll.u32 %s14741_s4, 4  ;;  %s14268_s15 = scalar_lea.vmem %s1673_s26, 512  ;;  %s1697_s1 = int_to_ptr.vmem [resolvable:$true] %s1696_s1 }
 0x206   : > { %p14269_p7 = scmp.ne.s32.totalorder %s1673_s26, %s14268_s15  ;;  %p14275_p10 = scmp.lt.s32.totalorder %s1673_s26, %s1673_s26 }
 0x207   : > { %p14276_p11 = scmp.lt.s32.totalorder %s14268_s15, %s14268_s15 }
 0x208   : > { %p14270_p8 = pnand %p14269_p7, %p13228_p3 }
 0x209   : > { %13089 = dma.hbm_to_vmem [thread:$0]  (%p13228_p3), %s16986_s18, 6144, %s1649_s22, [#allocation33], %s16976_s3, %s16976_s3, %s16975_s16  }
 0x20a   : > { %p14271_p9 = pneg %p14270_p8  ;;  %p14277_p12 = por %p14276_p11, %p14275_p10 }
 0x20c   : > { %p14278_p13 = pnand %p14277_p12, %p14271_p9 }
 0x20e   : > { %14281 = shalt.err (!%p14278_p13)
}
 0x20f   : > { %s16987_s22 = sld [smem:[#allocation113_spill]]  ;;  %s14292_s28 = scalar_lea.vmem %s1697_s1, 6144 }
 0x210   : > { %p14293_p0 = scmp.ne.s32.totalorder %s1697_s1, %s14292_s28  ;;  %p14299_p5 = scmp.lt.s32.totalorder %s1697_s1, %s1697_s1 }
 0x211   : > { %p14300_p6 = scmp.lt.s32.totalorder %s14292_s28, %s14292_s28 }
 0x212   : > { %p14294_p1 = pnand %p14293_p0, %p13228_p3 }
 0x213   : > { %p14301_p7 = por %p14300_p6, %p14299_p5 }
 0x214   : > { %p14295_p4 = pneg %p14294_p1 }
 0x215   : > { %13093 = dma.hbm_to_vmem [thread:$0]  (%p13228_p3), %s16987_s22, 512, %s1673_s26, [#allocation36], %s16976_s3, %s16976_s3, %s16975_s16  }
 0x216   : > { %p14302_p8 = pnand %p14301_p7, %p14295_p4 }
 0x218   : > { %14305 = shalt.err (!%p14302_p8)
}
 0x219   : > { %s16988_s11 = sld [smem:[#allocation114_spill]]  ;;  %s14742_s23 = smov [#allocation43]  }
 0x21a   : > { %s1723_s18 = sshll.u32 %s14742_s23, 4  ;;  %s14743_s2 = smov [#allocation46]   ;;  %s1724_s18 = int_to_ptr.vmem [resolvable:$true] %s1723_s18 }
 0x21b   : > { %s1751_s26 = sshll.u32 %s14743_s2, 4  ;;  %s14316_s4 = scalar_lea.vmem %s1724_s18, 16  ;;  %s1752_s26 = int_to_ptr.vmem [resolvable:$true] %s1751_s26 }
 0x21c   : > { %p14317_p9 = scmp.ne.s32.totalorder %s1724_s18, %s14316_s4  ;;  %s14322_s15 = scalar_lea.vmem %s1724_s18, 32 }
 0x21d   : > { %p14323_p12 = scmp.lt.s32.totalorder %s1724_s18, %s1724_s18  ;;  %p14324_p13 = scmp.lt.s32.totalorder %s14322_s15, %s14316_s4 }
 0x21e   : > { %p14318_p10 = pnand %p14317_p9, %p13228_p3 }
 0x21f   : > { %13097 = dma.hbm_to_vmem [thread:$0]  (%p13228_p3), %s16988_s11, 6144, %s1697_s1, [#allocation39], %s16976_s3, %s16976_s3, %s16975_s16  }
 0x220   : > { %p14319_p11 = pneg %p14318_p10  ;;  %p14325_p0 = por %p14324_p13, %p14323_p12 }
 0x222   : > { %p14326_p1 = pnand %p14325_p0, %p14319_p11 }
 0x224   : > { %14329 = shalt.err (!%p14326_p1)
}
 0x225   : > { %s16989_s22 = sld [smem:[#allocation115_spill]]  ;;  %s14340_s1 = scalar_lea.vmem %s1752_s26, 16 }
 0x226   : > { %p14341_p4 = scmp.ne.s32.totalorder %s1752_s26, %s14340_s1  ;;  %s14346_s28 = scalar_lea.vmem %s1752_s26, 32 }
 0x227   : > { %p14347_p7 = scmp.lt.s32.totalorder %s1752_s26, %s1752_s26  ;;  %p14348_p8 = scmp.lt.s32.totalorder %s14346_s28, %s14340_s1 }
 0x228   : > { %p14342_p5 = pnand %p14341_p4, %p13228_p3 }
 0x229   : > { %p14349_p9 = por %p14348_p8, %p14347_p7 }
 0x22a   : > { %p14343_p6 = pneg %p14342_p5 }
 0x22b   : > { %13101 = dma.hbm_to_vmem [thread:$0]  (%p13228_p3), %s16989_s22, 16, %s1724_s18, [#allocation42]  }
 0x22c   : > { %p14350_p10 = pnand %p14349_p9, %p14343_p6 }
 0x22e   : > { %14353 = shalt.err (!%p14350_p10)
}
 0x22f   : > { %s16990_s11 = sld [smem:[#allocation118_spill]]  ;;  %s14744_s23 = smov [#allocation49]  }
 0x230   : > { %s1775_s2 = sshll.u32 %s14744_s23, 4  ;;  %s14745_s18 = smov [#allocation52]   ;;  %s1776_s2 = int_to_ptr.vmem [resolvable:$true] %s1775_s2 }
 0x231   : > { %s1799_s4 = sshll.u32 %s14745_s18, 4  ;;  %s14364_s15 = scalar_lea.vmem %s1776_s2, 16  ;;  %s1800_s4 = int_to_ptr.vmem [resolvable:$true] %s1799_s4 }
 0x232   : > { %p14365_p11 = scmp.ne.s32.totalorder %s1776_s2, %s14364_s15  ;;  %s14370_s22 = scalar_lea.vmem %s1776_s2, 32 }
 0x233   : > { %p14371_p0 = scmp.lt.s32.totalorder %s1776_s2, %s1776_s2  ;;  %p14372_p1 = scmp.lt.s32.totalorder %s14370_s22, %s14364_s15 }
 0x234   : > { %p14366_p12 = pnand %p14365_p11, %p13228_p3 }
 0x235   : > { %13105 = dma.hbm_to_vmem [thread:$0]  (%p13228_p3), %s16990_s11, 16, %s1752_s26, [#allocation45]  }
 0x236   : > { %p14367_p13 = pneg %p14366_p12  ;;  %p14373_p4 = por %p14372_p1, %p14371_p0 }
 0x238   : > { %p14374_p5 = pnand %p14373_p4, %p14367_p13 }
 0x23a   : > { %14377 = shalt.err (!%p14374_p5)
}
 0x23b   : > { %s16991_s1 = sld [smem:[#allocation120_spill]]  ;;  %s14388_s26 = scalar_lea.vmem %s1800_s4, 16 }
 0x23c   : > { %p14389_p6 = scmp.ne.s32.totalorder %s1800_s4, %s14388_s26  ;;  %s14394_s28 = scalar_lea.vmem %s1800_s4, 32 }
 0x23d   : > { %p14395_p9 = scmp.lt.s32.totalorder %s1800_s4, %s1800_s4  ;;  %p14396_p10 = scmp.lt.s32.totalorder %s14394_s28, %s14388_s26 }
 0x23e   : > { %p14390_p7 = pnand %p14389_p6, %p13228_p3 }
 0x23f   : > { %p14397_p11 = por %p14396_p10, %p14395_p9 }
 0x240   : > { %p14391_p8 = pneg %p14390_p7 }
 0x241   : > { %13109 = dma.hbm_to_vmem [thread:$0]  (%p13228_p3), %s16991_s1, 16, %s1776_s2, [#allocation48]  }
 0x242   : > { %p14398_p12 = pnand %p14397_p11, %p14391_p8 }
 0x244   : > { %14401 = shalt.err (!%p14398_p12)
}
 0x245   : > { %s16992_s11 = sld [smem:[#allocation122_spill]]  ;;  %s14746_s23 = smov [#allocation55]  }
 0x246   : > { %s1826_s18 = sshll.u32 %s14746_s23, 4  ;;  %s14747_s2 = smov [#allocation58]   ;;  %s1827_s18 = int_to_ptr.vmem [resolvable:$true] %s1826_s18 }
 0x247   : > { %s1854_s15 = sshll.u32 %s14747_s2, 4  ;;  %s14412_s22 = scalar_lea.vmem %s1827_s18, 16  ;;  %s1855_s15 = int_to_ptr.vmem [resolvable:$true] %s1854_s15 }
 0x248   : > { %p14413_p13 = scmp.ne.s32.totalorder %s1827_s18, %s14412_s22  ;;  %s14418_s1 = scalar_lea.vmem %s1827_s18, 32 }
 0x249   : > { %p14419_p4 = scmp.lt.s32.totalorder %s1827_s18, %s1827_s18  ;;  %p14420_p5 = scmp.lt.s32.totalorder %s14418_s1, %s14412_s22 }
 0x24a   : > { %p14414_p0 = pnand %p14413_p13, %p13228_p3 }
 0x24b   : > { %13113 = dma.hbm_to_vmem [thread:$0]  (%p13228_p3), %s16992_s11, 16, %s1800_s4, [#allocation51]  }
 0x24c   : > { %p14415_p1 = pneg %p14414_p0  ;;  %p14421_p6 = por %p14420_p5, %p14419_p4 }
 0x24e   : > { %p14422_p7 = pnand %p14421_p6, %p14415_p1 }
 0x250   : > { %14425 = shalt.err (!%p14422_p7)
}
 0x251   : > { %s16993_s26 = sld [smem:[#allocation125_spill]]  ;;  %s14436_s4 = scalar_lea.vmem %s1855_s15, 16 }
 0x252   : > { %p14437_p8 = scmp.ne.s32.totalorder %s1855_s15, %s14436_s4  ;;  %s14442_s28 = scalar_lea.vmem %s1855_s15, 32 }
 0x253   : > { %p14443_p11 = scmp.lt.s32.totalorder %s1855_s15, %s1855_s15  ;;  %p14444_p12 = scmp.lt.s32.totalorder %s14442_s28, %s14436_s4 }
 0x254   : > { %p14438_p9 = pnand %p14437_p8, %p13228_p3 }
 0x255   : > { %p14445_p13 = por %p14444_p12, %p14443_p11 }
 0x256   : > { %p14439_p10 = pneg %p14438_p9 }
 0x257   : > { %13117 = dma.hbm_to_vmem [thread:$0]  (%p13228_p3), %s16993_s26, 16, %s1827_s18, [#allocation54]  }
 0x258   : > { %p14446_p0 = pnand %p14445_p13, %p14439_p10 }
 0x25a   : > { %14449 = shalt.err (!%p14446_p0)
}
 0x25b   : > { %s16994_s11 = sld [smem:[#allocation129_spill]]  ;;  %s14748_s23 = smov [#allocation61]  }
 0x25c   : > { %s1878_s2 = sshll.u32 %s14748_s23, 4  ;;  %s14749_s18 = smov [#allocation64]   ;;  %s1879_s2 = int_to_ptr.vmem [resolvable:$true] %s1878_s2 }
 0x25d   : > { %s1902_s22 = sshll.u32 %s14749_s18, 4  ;;  %s14460_s1 = scalar_lea.vmem %s1879_s2, 16  ;;  %s1903_s22 = int_to_ptr.vmem [resolvable:$true] %s1902_s22 }
 0x25e   : > { %p14461_p1 = scmp.ne.s32.totalorder %s1879_s2, %s14460_s1  ;;  %s14466_s26 = scalar_lea.vmem %s1879_s2, 32 }
 0x25f   : > { %p14467_p6 = scmp.lt.s32.totalorder %s1879_s2, %s1879_s2  ;;  %p14468_p7 = scmp.lt.s32.totalorder %s14466_s26, %s14460_s1 }
 0x260   : > { %p14462_p4 = pnand %p14461_p1, %p13228_p3 }
 0x261   : > { %13121 = dma.hbm_to_vmem [thread:$0]  (%p13228_p3), %s16994_s11, 16, %s1855_s15, [#allocation57]  }
 0x262   : > { %p14463_p5 = pneg %p14462_p4  ;;  %p14469_p8 = por %p14468_p7, %p14467_p6 }
 0x264   : > { %p14470_p9 = pnand %p14469_p8, %p14463_p5 }
 0x266   : > { %14473 = shalt.err (!%p14470_p9)
}
 0x267   : > { %s16995_s4 = sld [smem:[#allocation131_spill]]  ;;  %s14484_s15 = scalar_lea.vmem %s1903_s22, 16 }
 0x268   : > { %p14485_p10 = scmp.ne.s32.totalorder %s1903_s22, %s14484_s15  ;;  %s14490_s28 = scalar_lea.vmem %s1903_s22, 32 }
 0x269   : > { %p14491_p13 = scmp.lt.s32.totalorder %s1903_s22, %s1903_s22  ;;  %p14492_p0 = scmp.lt.s32.totalorder %s14490_s28, %s14484_s15 }
 0x26a   : > { %p14486_p11 = pnand %p14485_p10, %p13228_p3 }
 0x26b   : > { %p14493_p1 = por %p14492_p0, %p14491_p13 }
 0x26c   : > { %p14487_p12 = pneg %p14486_p11 }
 0x26d   : > { %13125 = dma.hbm_to_vmem [thread:$0]  (%p13228_p3), %s16995_s4, 16, %s1879_s2, [#allocation60]  }
 0x26e   : > { %p14494_p4 = pnand %p14493_p1, %p14487_p12 }
 0x270   : > { %14497 = shalt.err (!%p14494_p4)
}
 0x271   : > { %s16996_s11 = sld [smem:[#allocation133_spill]]  ;;  %s14750_s23 = smov [#allocation67]  }
 0x272   : > { %s1925_s18 = sshll.u32 %s14750_s23, 4  ;;  %s14751_s2 = smov [#allocation70]   ;;  %s1926_s18 = int_to_ptr.vmem [resolvable:$true] %s1925_s18 }
 0x273   : > { %s1953_s1 = sshll.u32 %s14751_s2, 4  ;;  %s14508_s26 = scalar_lea.vmem %s1926_s18, 1024  ;;  %s1954_s1 = int_to_ptr.vmem [resolvable:$true] %s1953_s1 }
 0x274   : > { %p14509_p5 = scmp.ne.s32.totalorder %s1926_s18, %s14508_s26  ;;  %p14515_p8 = scmp.lt.s32.totalorder %s1926_s18, %s1926_s18 }
 0x275   : > { %p14516_p9 = scmp.lt.s32.totalorder %s14508_s26, %s14508_s26 }
 0x276   : > { %p14510_p6 = pnand %p14509_p5, %p13228_p3 }
 0x277   : > { %13129 = dma.hbm_to_vmem [thread:$0]  (%p13228_p3), %s16996_s11, 16, %s1903_s22, [#allocation63]  }
 0x278   : > { %p14511_p7 = pneg %p14510_p6  ;;  %p14517_p10 = por %p14516_p9, %p14515_p8 }
 0x27a   : > { %p14518_p11 = pnand %p14517_p10, %p14511_p7 }
 0x27c   : > { %14521 = shalt.err (!%p14518_p11)
}
 0x27d   : > { %s16997_s22 = sld [smem:[#allocation135_spill]]  ;;  %s14532_s4 = scalar_lea.vmem %s1954_s1, 16 }
 0x27e   : > { %p14533_p12 = scmp.ne.s32.totalorder %s1954_s1, %s14532_s4  ;;  %s14538_s15 = scalar_lea.vmem %s1954_s1, 32 }
 0x27f   : > { %p14539_p1 = scmp.lt.s32.totalorder %s1954_s1, %s1954_s1  ;;  %p14540_p4 = scmp.lt.s32.totalorder %s14538_s15, %s14532_s4 }
 0x280   : > { %p14534_p13 = pnand %p14533_p12, %p13228_p3 }
 0x281   : > { %p14541_p5 = por %p14540_p4, %p14539_p1 }
 0x282   : > { %p14535_p0 = pneg %p14534_p13 }
 0x283   : > { %13133 = dma.hbm_to_vmem [thread:$0]  (%p13228_p3), %s16997_s22, 1024, %s1926_s18, [#allocation66], %s16976_s3, %s16976_s3, %s16975_s16  }
 0x284   : > { %p14542_p6 = pnand %p14541_p5, %p14535_p0 }
 0x286   : > { %14545 = shalt.err (!%p14542_p6)
}
 0x287   : > { %13137 = dma.hbm_to_vmem [thread:$0]  (%p13228_p3), %s15042_s5, 16, %s1954_s1, [#allocation69]  }
 0x288 PF: > { %1980 = sbr.rel (%p15059_p2) target bundleno = 6473 (0x1949), region = 248  ;;  %p13273_p7 = scmp.eq.s32.totalorder (!%p15059_p2), %s15055_s7, 0 }
 0x28d   : > { %14551 = dma.done.wait (%p13273_p7), [#allocation4], 192  }
 0x28e   : > { %14553 = vsyncadd (%p13273_p7), [#allocation4], 4294967104 }
 0x28f   : > { %14555 = dma.done.wait (%p13273_p7), [#allocation6], 3088  }
 0x290   : > { %14557 = vsyncadd (%p13273_p7), [#allocation6], 4294964208 }
 0x291   : > { %14559 = dma.done.wait (%p13273_p7), [#allocation9], 528  }
 0x292   : > { %14561 = vsyncadd (%p13273_p7), [#allocation9], 4294966768 }
 0x293   : > { %14563 = dma.done.wait (%p13273_p7), [#allocation12], 3088  }
 0x294   : > { %14565 = vsyncadd (%p13273_p7), [#allocation12], 4294964208 }
 0x295   : > { %14567 = dma.done.wait (%p13273_p7), [#allocation15], 1040  }
 0x296   : > { %14569 = vsyncadd (%p13273_p7), [#allocation15], 4294966256 }
 0x297   : > { %14571 = dma.done.wait (%p13273_p7), [#allocation18], 3088  }
 0x298   : > { %14573 = vsyncadd (%p13273_p7), [#allocation18], 4294964208 }
 0x299   : > { %14575 = dma.done.wait (%p13273_p7), [#allocation21], 3088  }
 0x29a   : > { %14577 = vsyncadd (%p13273_p7), [#allocation21], 4294964208 }
 0x29b   : > { %14579 = dma.done.wait (%p13273_p7), [#allocation24], 528  }
 0x29c   : > { %14581 = vsyncadd (%p13273_p7), [#allocation24], 4294966768 }
 0x29d   : > { %14583 = dma.done.wait (%p13273_p7), [#allocation27], 2064  }
 0x29e   : > { %14585 = vsyncadd (%p13273_p7), [#allocation27], 4294965232 }
 0x29f   : > { %14587 = dma.done.wait (%p13273_p7), [#allocation30], 32  }
 0x2a0   : > { %14589 = vsyncadd (%p13273_p7), [#allocation30], 4294967264 }
 0x2a1   : > { %14591 = dma.done.wait (%p13273_p7), [#allocation33], 6160  }
 0x2a2   : > { %14593 = vsyncadd (%p13273_p7), [#allocation33], 4294961136 }
 0x2a3   : > { %14595 = dma.done.wait (%p13273_p7), [#allocation36], 528  }
 0x2a4   : > { %14597 = vsyncadd (%p13273_p7), [#allocation36], 4294966768 }
 0x2a5   : > { %14599 = dma.done.wait (%p13273_p7), [#allocation39], 6160  }
 0x2a6   : > { %14601 = vsyncadd (%p13273_p7), [#allocation39], 4294961136 }
 0x2a7   : > { %14603 = dma.done.wait (%p13273_p7), [#allocation42], 2064  }
 0x2a8   : > { %14605 = vsyncadd (%p13273_p7), [#allocation42], 4294965232 }
 0x2a9   : > { %14607 = dma.done.wait (%p13273_p7), [#allocation45], 32  }
 0x2aa   : > { %14609 = vsyncadd (%p13273_p7), [#allocation45], 4294967264 }
 0x2ab   : > { %14611 = dma.done.wait (%p13273_p7), [#allocation48], 3088  }
 0x2ac   : > { %14613 = vsyncadd (%p13273_p7), [#allocation48], 4294964208 }
 0x2ad   : > { %14615 = dma.done.wait (%p13273_p7), [#allocation51], 528  }
 0x2ae   : > { %14617 = vsyncadd (%p13273_p7), [#allocation51], 4294966768 }
 0x2af   : > { %14619 = dma.done.wait (%p13273_p7), [#allocation54], 3088  }
 0x2b0   : > { %14621 = vsyncadd (%p13273_p7), [#allocation54], 4294964208 }
 0x2b1   : > { %14623 = dma.done.wait (%p13273_p7), [#allocation57], 32  }
 0x2b2   : > { %14625 = vsyncadd (%p13273_p7), [#allocation57], 4294967264 }
 0x2b3   : > { %14627 = dma.done.wait (%p13273_p7), [#allocation60], 3088  }
 0x2b4   : > { %14629 = vsyncadd (%p13273_p7), [#allocation60], 4294964208 }
 0x2b5   : > { %14631 = dma.done.wait (%p13273_p7), [#allocation63], 528  }
 0x2b6   : > { %14633 = vsyncadd (%p13273_p7), [#allocation63], 4294966768 }
 0x2b7   : > { %14635 = dma.done.wait (%p13273_p7), [#allocation66], 4096  }
 0x2b8   : > { %14637 = vsyncadd (%p13273_p7), [#allocation66], 4294963200 }
 0x2b9   : > { %14639 = dma.done.wait (%p13273_p7), [#allocation69], 32  }
 0x2ba   : > { %14641 = vsyncadd (%p13273_p7), [#allocation69], 4294967264  ;;  %s16998_s3 = sld [smem:[#allocation94_spill]]  ;;  %p2291_p2 = scmp.lt.s32.totalorder %s15055_s7, 1  ;;  %vm2308_vm0 = vcmask 24576   ;;  %v14752_v0 = vmov 0.0  }
 0x2bb   : > { %2309 = vst.msk [vmem:[#allocation2] sm:$0x1] %vm2308_vm0, %v14752_v0  ;;  %2310 = vst.msk [vmem:[#allocation2 + $0x11] sm:$0x1] %vm2308_vm0, %v14752_v0  ;;  %vm2327_vm1 = vcmask 1043456   ;;  %vm2311_vm2 = vcmask 31744  }
 0x2bc   : > { %s17010_s7 = smov (!%p2291_p2, %s15055_s7), 1  ;;  %v2320_v1 = vld [vmem:[#allocation3 + $0x4] sm:$0xf]  ;;  %v2316_v4 = vld [vmem:[#allocation3] sm:$0xf]  ;;  %v2615_v16 = vld [vmem:[#allocation7 + $0x68] sm:$0xff] }
 0x2bd   : > { %s10297_s10 = sshll.u32 %s17010_s7, 4  ;;  %11206 = vmatprep.subr.msk.mxu1 %vm2327_vm1, %v2320_v1  ;;  %v2493_v5 = vld [vmem:[#allocation3 + $0x8] sm:$0xf]  ;;  %v2616_v14 = vld [vmem:[#allocation7 + $0x70] sm:$0xff]  ;;  %vm2591_vm3 = vcmask 516096   ;;  %v2604_v17 = vld [vmem:[#allocation7 + $0x28] sm:$0xff] }
 0x2be   : > { %11207 = vmatpush3.msk.msra.mxu1 %vm2327_vm1, %v2320_v1  ;;  %11216 = vmatprep.subr.msk.mxu0 %vm2327_vm1, %v2493_v5  ;;  %v2617_v12 = vld [vmem:[#allocation7 + $0x78] sm:$0xff]  ;;  %v2605_v15 = vld [vmem:[#allocation7 + $0x30] sm:$0xff]  ;;  %v2614_v18 = vld [vmem:[#allocation7 + $0x60] sm:$0xff]  ;;  %vm2594_vm4 = vcmask 523264   ;;  %s16999_s28 = sld [smem:[#allocation95_spill]]  ;;  %vm2889_vm5 = vcmask 261120  }
 0x2bf   : > { %11211 = vmatprep.subr.msk.mxu1 %vm2327_vm1, %v2316_v4  ;;  %11217 = vmatpush3.msk.msra.mxu0 %vm2327_vm1, %v2493_v5  ;;  %v2606_v13 = vld [vmem:[#allocation7 + $0x38] sm:$0xff]  ;;  %v2603_v19 = vld [vmem:[#allocation7 + $0x20] sm:$0xff]  ;;  %v2612_v22 = vld [vmem:[#allocation7 + $0x50] sm:$0xff]  ;;  %vm14753_vm6 = vmmov 0   ;;  %s17000_s23 = sld [smem:[#allocation104_spill]]  ;;  %vm7660_vm7 = vcmask 521221  }
 0x2c0   : > { %s2295_s16 = scalar_lea.vmem %s16998_s3, %s10297_s10  ;;  %11240 = vmatprep.subr.mxu0 %v2606_v13  ;;  %v2613_v20 = vld [vmem:[#allocation7 + $0x58] sm:$0xff]  ;;  %v2601_v23 = vld [vmem:[#allocation7 + $0x10] sm:$0xff]  ;;  %v2611_v24 = vld [vmem:[#allocation7 + $0x48] sm:$0xff]  ;;  %s17001_s18 = sld [smem:[#allocation106_spill]]  ;;  %vm7662_vm8 = vcmask 522246   ;;  %vm7664_vm9 = vcmask 523271  }
 0x2c1   : > { %v2304_v2 = vld [vmem:[%s2295_s16] sm:$0xff]  ;;  %v2305_v3 = vld [vmem:[%s2295_s16 + $0x8] sm:$0xff]  ;;  %v2789_v50 = vld [vmem:[#allocation7 + $0xb0] sm:$0xff]  ;;  %s17002_s2 = sld [smem:[#allocation109_spill]]  ;;  %vm7652_vm10 = vcmask 517121   ;;  %vm7654_vm11 = vcmask 518146   ;;  %s2303_s16 = scalar_lea.vmem %s15047_s29, %s10297_s10 }
 0x2c2   : > { %2312 = vst.msk [vmem:[#allocation2 + $0x1] sm:$0xff] %vm2311_vm2, %v2304_v2  ;;  %2313 = vst.msk [vmem:[#allocation2 + $0x9] sm:$0xff] %vm2311_vm2, %v2305_v3  ;;  %v2602_v21 = vld [vmem:[#allocation7 + $0x18] sm:$0xff]  ;;  %v2600_v25 = vld [vmem:[#allocation7 + $0x8] sm:$0xff]  ;;  %s17003_s1 = sld [smem:[#allocation111_spill]]  ;;  %vm7656_vm12 = vcmask 519171  }
 0x2c3   : > { %v2610_v26 = vld [vmem:[#allocation7 + $0x40] sm:$0xff]  ;;  %v2790_v28 = vld [vmem:[#allocation7 + $0xb8] sm:$0xff]  ;;  %v2788_v53 = vld [vmem:[#allocation7 + $0xa8] sm:$0xff]  ;;  %s17004_s26 = sld [smem:[#allocation116_spill]]  ;;  %vm7658_vm13 = vcmask 520196  }
 0x2c4   : > { %v2599_v27 = vld [vmem:[#allocation7] sm:$0xff]  ;;  %v9937_v34 = vld [vmem:[#allocation5] ss:$0 sm:$0xff]  ;;  %v2886_v52 = vld [vmem:[#allocation10 + $0x10] sm:$0xff]  ;;  %s15486_s11 = scalar_lea.vmem %s16999_s28, %s17010_s7  ;;  %s17005_s22 = sld [smem:[#allocation117_spill]] }
 0x2c5   : > { %v2887_v47 = vld [vmem:[#allocation10 + $0x18] sm:$0xff]  ;;  %v2885_v54 = vld [vmem:[#allocation10 + $0x8] sm:$0xff]  ;;  %v2884_v56 = vld [vmem:[#allocation10] sm:$0xff]  ;;  %s17006_s4 = sld [smem:[#allocation126_spill]] }
 0x2c6   : > { %v2787_v55 = vld [vmem:[#allocation7 + $0xa0] sm:$0xff]  ;;  %v2786_v57 = vld [vmem:[#allocation7 + $0x98] sm:$0xff]  ;;  %v2785_v59 = vld [vmem:[#allocation7 + $0x90] sm:$0xff]  ;;  %s17007_s15 = sld [smem:[#allocation124_spill]] }
 0x2c7   : > { %v2306_v58 = vld [vmem:[%s15486_s11] sm:$0x1]  ;;  %v2784_v60 = vld [vmem:[#allocation7 + $0x88] sm:$0xff]  ;;  %v2783_v61 = vld [vmem:[#allocation7 + $0x80] sm:$0xff]  ;;  %s17008_s3 = sld [smem:[#allocation128_spill]] }
 0x2c8   : > { %v2993_v62 = vld [vmem:[#allocation13 + $0x78] sm:$0xff]  ;;  %v2992_v1 = vld [vmem:[#allocation13 + $0x70] sm:$0xff]  ;;  %v2991_v3 = vld [vmem:[#allocation13 + $0x68] sm:$0xff] }
 0x2c9   : > { %v2314_v6 = vld [vmem:[#allocation2] sm:$0xff]  ;;  %v2318_v8 = vld [vmem:[#allocation2 + $0x9] sm:$0xff] }
 0x2ca   : > { %v2317_v7 = vld [vmem:[#allocation2 + $0x1] sm:$0xff]  ;;  %v2491_v10 = vld [vmem:[#allocation2 + $0xa] sm:$0xff]  ;;  %2592 = vst.msk [vmem:[#allocation2] sm:$0x1] %vm2591_vm3, %v14752_v0 }
 0x2cb   : > { %11208 = vmatprep.mubr.msk.f32.mxu1 %vm2311_vm2, %v2317_v7  ;;  %v2490_v9 = vld [vmem:[#allocation2 + $0x2] sm:$0xff]  ;;  %2593 = vst.msk [vmem:[#allocation2 + $0x11] sm:$0x1] %vm2591_vm3, %v14752_v0  ;;  %v2981_v2 = vld [vmem:[#allocation13 + $0x30] sm:$0xff]  ;;  %v2990_v5 = vld [vmem:[#allocation13 + $0x60] sm:$0xff] }
 0x2cc   : > { %11209 = vmatmul.mubr.msk.f32.vlgmr.msra.gmra.mxu1 %vm2311_vm2, %v2318_v8  ;;  %11218 = vmatprep.mubr.msk.f32.mxu0 %vm2311_vm2, %v2490_v9  ;;  %v2315_v11 = vld [vmem:[#allocation2 + $0x8] sm:$0xff]  ;;  %v2988_v9 = vld [vmem:[#allocation13 + $0x50] sm:$0xff] }
 0x2cd   : > { %11212 = vmatpush3.msk.msra.mxu1 %vm2327_vm1, %v2316_v4  ;;  %11213 = vmatprep.mubr.msk.f32.mxu1 %vm2311_vm2, %v2314_v6  ;;  %v2982_v63 = vld [vmem:[#allocation13 + $0x38] sm:$0xff]  ;;  %v2980_v4 = vld [vmem:[#allocation13 + $0x28] sm:$0xff]  ;;  %v2979_v6 = vld [vmem:[#allocation13 + $0x20] sm:$0xff] }
 0x2ce   : > { %11219 = vmatmul.mubr.msk.f32.vlgmr.msra.gmra.mxu0 %vm2311_vm2, %v2491_v10  ;;  %11221 = vmatprep.subr.mxu1 %v2617_v12  ;;  %v2989_v7 = vld [vmem:[#allocation13 + $0x58] sm:$0xff]  ;;  %v2977_v10 = vld [vmem:[#allocation13 + $0x10] sm:$0xff] }
 0x2cf   : > { %11241 = vmatpush3.msra.mxu0 %v2606_v13  ;;  %v2978_v8 = vld [vmem:[#allocation13 + $0x18] sm:$0xff]  ;;  %v2986_v13 = vld [vmem:[#allocation13 + $0x40] sm:$0xff] }
 0x2d0   : > { %11214 = vmatmul.mubr.msk.f32.vlgmr.msra.gmra.mxu1 %vm2311_vm2, %v2315_v11  ;;  %11242 = vmatprep.subr.mxu0 %v2605_v15  ;;  %v2987_v11 = vld [vmem:[#allocation13 + $0x48] sm:$0xff] }
 0x2d1   : > { %11222 = vmatpush3.msra.mxu1 %v2617_v12  ;;  %11243 = vmatpush3.msra.mxu0 %v2605_v15  ;;  %v2976_v12 = vld [vmem:[#allocation13 + $0x8] sm:$0xff]  ;;  %v3166_v15 = vld [vmem:[#allocation13 + $0xb8] sm:$0xff] }
 0x2d2   : > { %11223 = vmatprep.subr.mxu1 %v2616_v14  ;;  %11244 = vmatprep.subr.mxu0 %v2604_v17 }
 0x2d3   : > { %11224 = vmatpush3.msra.mxu1 %v2616_v14  ;;  %11245 = vmatpush3.msra.mxu0 %v2604_v17  ;;  %v2975_v14 = vld [vmem:[#allocation13] sm:$0xff] }
 0x2d4   : > { %11225 = vmatprep.subr.mxu1 %v2615_v16  ;;  %11246 = vmatprep.subr.mxu0 %v2603_v19 }
 0x2d5   : > { %11226 = vmatpush3.msra.mxu1 %v2615_v16  ;;  %11247 = vmatpush3.msra.mxu0 %v2603_v19 }
 0x2d6   : > { %11227 = vmatprep.subr.mxu1 %v2614_v18  ;;  %11248 = vmatprep.subr.mxu0 %v2602_v21 }
 0x2d7   : > { %11228 = vmatpush3.msra.mxu1 %v2614_v18  ;;  %11249 = vmatpush3.msra.mxu0 %v2602_v21  ;;  %v2963_v18 = vlaneseq }
 0x2d8   : > { %11229 = vmatprep.subr.mxu1 %v2613_v20  ;;  %11250 = vmatprep.subr.mxu0 %v2601_v23 }
 0x2d9   : > { %11230 = vmatpush3.msra.mxu1 %v2613_v20  ;;  %11251 = vmatpush3.msra.mxu0 %v2601_v23  ;;  %v2964_v21 = vshrl.u32 %v2963_v18, 7  ;;  %v2888_v23 = vld [vmem:[#allocation11] sm:$0x1] }
 0x2da   : > { %11231 = vmatprep.subr.mxu1 %v2612_v22  ;;  %11252 = vmatprep.subr.mxu0 %v2600_v25 }
 0x2db   : > { %11232 = vmatpush3.msra.mxu1 %v2612_v22  ;;  %11253 = vmatpush3.msra.mxu0 %v2600_v25 }
 0x2dc   : > { %11233 = vmatprep.subr.mxu1 %v2611_v24  ;;  %11254 = vmatprep.subr.mxu0 %v2599_v27 }
 0x2dd   : > { %11234 = vmatpush3.msra.mxu1 %v2611_v24  ;;  %11255 = vmatpush3.msra.mxu0 %v2599_v27  ;;  %v15495_v27 = vsub.s32 0, %v2964_v21 }
 0x2de   : > { %11235 = vmatprep.subr.mxu1 %v2610_v26  ;;  %11278 = vmatprep.subr.mxu0 %v14752_v0 }
 0x2df   : > { %11236 = vmatpush3.msra.mxu1 %v2610_v26 }
 0x2e0   : > { %11259 = vmatprep.subr.mxu1 %v2790_v28 }
 0x38c   : > { %v11210_v29 = vpop.f32.mrf.mxu1 }
 0x38e   : > { %v2397_v30 = vpop.f32.mrf.mxu1  ;;  %v11220_v32 = vpop.f32.mrf.mxu0 }
 0x390   : > { %v11215_v31 = vpop.f32.mrf.mxu1  ;;  %v2569_v38 = vpop.f32.mrf.mxu0 }
 0x391   : > { %v2487_v33 = vadd.f32 %v11215_v31, %v11210_v29 }
 0x392   : > { %v2481_v35 = vpop.f32.mrf.mxu1 }
 0x393   : > { %v2579_v36 = vadd.f32 %v11220_v32, %v2487_v33  ;;  %v2482_v37 = vadd.f32 %v2481_v35, %v2397_v30 }
 0x395   : > { %v2587_v39 = vadd.f32 %v9937_v34, %v2579_v36  ;;  %v2578_v40 = vadd.f32 %v2569_v38, %v2482_v37 }
 0x397   : > { %v2589_v41 = vmax.f32 %v2587_v39, 0.0  ;;  %v2586_v42 = vadd.f32 %v9937_v34, %v2578_v40 }
 0x399   : > { %2596 = vst.msk [vmem:[#allocation2 + $0x9] sm:$0xff] %vm2594_vm4, %v2589_v41  ;;  %v2588_v43 = vmax.f32 %v2586_v42, 0.0 }
 0x39b   : > { %2595 = vst.msk [vmem:[#allocation2 + $0x1] sm:$0xff] %vm2594_vm4, %v2588_v43 }
 0x3a0   : > { %v2781_v44 = vld [vmem:[#allocation2 + $0xa] sm:$0xff] }
 0x3a1   : > { %2970 = vst.msk [vmem:[#allocation2 + $0x11] sm:$0x1] %vm2591_vm3, %v14752_v0  ;;  %v2608_v49 = vld [vmem:[#allocation2 + $0x9] sm:$0xff] }
 0x3a2   : > { %v2597_v45 = vld [vmem:[#allocation2] sm:$0xff]  ;;  %v2598_v46 = vld [vmem:[#allocation2 + $0x8] sm:$0xff] }
 0x3a3   : > { %2969 = vst.msk [vmem:[#allocation2] sm:$0x1] %vm2591_vm3, %v14752_v0  ;;  %v2607_v48 = vld [vmem:[#allocation2 + $0x1] sm:$0xff]  ;;  %11256 = vmatprep.mubr.msk.f32.mxu0 %vm2594_vm4, %v2597_v45 }
 0x3a4   : > { %11237 = vmatprep.mubr.msk.f32.mxu1 %vm2594_vm4, %v2607_v48  ;;  %11257 = vmatmul.mubr.msk.f32.vlgmr.msra.gmra.mxu0 %vm2594_vm4, %v2598_v46  ;;  %v2780_v51 = vld [vmem:[#allocation2 + $0x2] sm:$0xff]  ;;  %v3165_v46 = vld [vmem:[#allocation13 + $0xb0] sm:$0xff]  ;;  %v3164_v48 = vld [vmem:[#allocation13 + $0xa8] sm:$0xff] }
 0x3a5   : > { %11238 = vmatmul.mubr.msk.f32.vlgmr.msra.gmra.mxu1 %vm2594_vm4, %v2608_v49  ;;  %11279 = vmatpush3.msra.mxu0 %v2887_v47  ;;  %v3163_v49 = vld [vmem:[#allocation13 + $0xa0] sm:$0xff] }
 0x3a6   : > { %11260 = vmatpush3.msra.mxu1 %v2790_v28  ;;  %11275 = vmatprep.mubr.msk.f32.mxu1 %vm2594_vm4, %v2780_v51  ;;  %v9944_v28 = vld [vmem:[#allocation8] ss:$0 sm:$0xff]  ;;  %v3161_v51 = vld [vmem:[#allocation13 + $0x90] sm:$0xff] }
 0x3a7   : > { %11261 = vmatprep.subr.mxu1 %v2789_v50  ;;  %11280 = vmatprep.subr.mxu0 %v14752_v0 }
 0x3a8   : > { %11262 = vmatpush3.msra.mxu1 %v2789_v50  ;;  %11281 = vmatpush3.msra.mxu0 %v2886_v52  ;;  %v3162_v50 = vld [vmem:[#allocation13 + $0x98] sm:$0xff]  ;;  %v3160_v52 = vld [vmem:[#allocation13 + $0x88] sm:$0xff] }
 0x3a9   : > { %11263 = vmatprep.subr.mxu1 %v2788_v53  ;;  %11282 = vmatprep.subr.mxu0 %v14752_v0 }
 0x3aa   : > { %11264 = vmatpush3.msra.mxu1 %v2788_v53  ;;  %11283 = vmatpush3.msra.mxu0 %v2885_v54  ;;  %v3159_v53 = vld [vmem:[#allocation13 + $0x80] sm:$0xff]  ;;  %v3271_v54 = vld [vmem:[#allocation14 + $0x38] sm:$0xff] }
 0x3ab   : > { %11265 = vmatprep.subr.mxu1 %v2787_v55  ;;  %11284 = vmatprep.subr.mxu0 %v14752_v0 }
 0x3ac   : > { %11266 = vmatpush3.msra.mxu1 %v2787_v55  ;;  %11285 = vmatpush3.msra.mxu0 %v2884_v56  ;;  %v3270_v55 = vld [vmem:[#allocation14 + $0x30] sm:$0xff]  ;;  %v3269_v56 = vld [vmem:[#allocation14 + $0x28] sm:$0xff] }
 0x3ad   : > { %11267 = vmatprep.subr.mxu1 %v2786_v57  ;;  %11286 = vmatprep.mubr.msk.f32.mxu0 %vm14753_vm6, %v14752_v0 }
 0x3ae   : > { %11268 = vmatpush3.msra.mxu1 %v2786_v57  ;;  %11287 = vmatmul.mubr.msk.f32.vlgmr.msra.gmra.mxu0 %vm2889_vm5, %v2306_v58  ;;  %v3268_v57 = vld [vmem:[#allocation14 + $0x20] sm:$0xff]  ;;  %v3267_v58 = vld [vmem:[#allocation14 + $0x18] sm:$0xff] }
 0x3af   : > { %11269 = vmatprep.subr.mxu1 %v2785_v59  ;;  %11289 = vmatprep.subr.mxu0 %v2993_v62 }
 0x3b0   : > { %11270 = vmatpush3.msra.mxu1 %v2785_v59  ;;  %11290 = vmatpush3.msra.mxu0 %v2993_v62  ;;  %v3266_v59 = vld [vmem:[#allocation14 + $0x10] sm:$0xff]  ;;  %v3382_v62 = vld [vmem:[#allocation17 + $0x78] sm:$0xff] }
 0x3b1   : > { %11271 = vmatprep.subr.mxu1 %v2784_v60  ;;  %11291 = vmatprep.subr.mxu0 %v2992_v1 }
 0x3b2   : > { %11272 = vmatpush3.msra.mxu1 %v2784_v60  ;;  %11292 = vmatpush3.msra.mxu0 %v2992_v1  ;;  %v3265_v60 = vld [vmem:[#allocation14 + $0x8] sm:$0xff] }
 0x3b3   : > { %11273 = vmatprep.subr.mxu1 %v2783_v61  ;;  %11293 = vmatprep.subr.mxu0 %v2991_v3 }
 0x3b4   : > { %11274 = vmatpush3.msra.mxu1 %v2783_v61  ;;  %11294 = vmatpush3.msra.mxu0 %v2991_v3  ;;  %v3264_v61 = vld [vmem:[#allocation14] sm:$0xff] }
 0x3b5   : > { %11276 = vmatmul.mubr.msk.f32.vlgmr.msra.gmra.mxu1 %vm2594_vm4, %v2781_v44  ;;  %11308 = vmatprep.subr.mxu1 %v2982_v63 }
 0x3b6   : > { %11309 = vmatpush3.msra.mxu1 %v2982_v63  ;;  %11295 = vmatprep.subr.mxu0 %v2990_v5  ;;  %v3381_v63 = vld [vmem:[#allocation17 + $0x70] sm:$0xff] }
 0x3b7   : > { %11310 = vmatprep.subr.mxu1 %v2981_v2  ;;  %11296 = vmatpush3.msra.mxu0 %v2990_v5 }
 0x3b8   : > { %11311 = vmatpush3.msra.mxu1 %v2981_v2  ;;  %11297 = vmatprep.subr.mxu0 %v2989_v7 }
 0x3b9   : > { %11312 = vmatprep.subr.mxu1 %v2980_v4  ;;  %11298 = vmatpush3.msra.mxu0 %v2989_v7 }
 0x3ba   : > { %11313 = vmatpush3.msra.mxu1 %v2980_v4  ;;  %11299 = vmatprep.subr.mxu0 %v2988_v9 }
 0x3bb   : > { %11314 = vmatprep.subr.mxu1 %v2979_v6  ;;  %11300 = vmatpush3.msra.mxu0 %v2988_v9 }
 0x3bc   : > { %11315 = vmatpush3.msra.mxu1 %v2979_v6  ;;  %11301 = vmatprep.subr.mxu0 %v2987_v11 }
 0x3bd   : > { %11316 = vmatprep.subr.mxu1 %v2978_v8  ;;  %11302 = vmatpush3.msra.mxu0 %v2987_v11 }
 0x3be   : > { %11317 = vmatpush3.msra.mxu1 %v2978_v8  ;;  %11303 = vmatprep.subr.mxu0 %v2986_v13 }
 0x3bf   : > { %11318 = vmatprep.subr.mxu1 %v2977_v10  ;;  %11304 = vmatpush3.msra.mxu0 %v2986_v13 }
 0x3c0   : > { %11319 = vmatpush3.msra.mxu1 %v2977_v10  ;;  %11327 = vmatprep.subr.mxu0 %v3166_v15 }
 0x3c1   : > { %11320 = vmatprep.subr.mxu1 %v2976_v12 }
 0x3c2   : > { %11321 = vmatpush3.msra.mxu1 %v2976_v12 }
 0x3c3   : > { %11322 = vmatprep.subr.mxu1 %v2975_v14 }
 0x3c4   : > { %11323 = vmatpush3.msra.mxu1 %v2975_v14 }
 0x3c5   : > { %11346 = vmatprep.subr.mxu1 %v3271_v54 }
 0x464   : > { %v11258_v16 = vpop.f32.mrf.mxu0 }
 0x465   : > { %v11239_v20 = vpop.f32.mrf.mxu1 }
 0x466   : > { %v2771_v17 = vpop.f32.mrf.mxu0  ;;  %v2777_v25 = vadd.f32 %v11258_v16, %v11239_v20 }
 0x467   : > { %v2690_v24 = vpop.f32.mrf.mxu1 }
 0x468   : > { %v2772_v30 = vadd.f32 %v2771_v17, %v2690_v24  ;;  %v3370_v24 = vld [vmem:[#allocation17 + $0x30] sm:$0xff] }
 0x46e   : > { %v2959_v19 = vpop.f32.mrf.mxu0 }
 0x46f   : > { %v2960_v26 = vadd.f32 %v2959_v19, %v2888_v23  ;;  %v3371_v23 = vld [vmem:[#allocation17 + $0x38] sm:$0xff] }
 0x470   : > { %v11288_v22 = vpop.f32.mrf.mxu0 }
 0x471   : > { %v2966_v35 = vrot.slane %v2960_v26, %v15495_v27  ;;  %v3369_v26 = vld [vmem:[#allocation17 + $0x28] sm:$0xff] }
 0x475   : > { %v11277_v29 = vpop.f32.mrf.mxu1 }
 0x476   : > { %v2873_v31 = vadd.f32 %v11277_v29, %v2777_v25  ;;  %v3380_v25 = vld [vmem:[#allocation17 + $0x68] sm:$0xff]  ;;  %v3368_v29 = vld [vmem:[#allocation17 + $0x20] sm:$0xff] }
 0x477   : > { %v2863_v32 = vpop.f32.mrf.mxu1 }
 0x478   : > { %v2881_v33 = vadd.f32 %v9944_v28, %v2873_v31  ;;  %v2872_v34 = vadd.f32 %v2863_v32, %v2772_v30  ;;  %v3378_v30 = vld [vmem:[#allocation17 + $0x58] sm:$0xff]  ;;  %v3377_v32 = vld [vmem:[#allocation17 + $0x50] sm:$0xff] }
 0x479   : > { %v3367_v31 = vld [vmem:[#allocation17 + $0x18] sm:$0xff] }
 0x47a   : > { %v2883_v36 = vmax.f32 %v2881_v33, 0.0  ;;  %v2880_v37 = vadd.f32 %v9944_v28, %v2872_v34  ;;  %v3379_v28 = vld [vmem:[#allocation17 + $0x60] sm:$0xff]  ;;  %v3366_v33 = vld [vmem:[#allocation17 + $0x10] sm:$0xff]  ;;  %v3376_v34 = vld [vmem:[#allocation17 + $0x48] sm:$0xff] }
 0x47c   : > { %v2882_v38 = vmax.f32 %v2880_v37, 0.0  ;;  %v15498_v39 = vadd.f32 %v2966_v35, %v2883_v36  ;;  %v3375_v36 = vld [vmem:[#allocation17 + $0x40] sm:$0xff] }
 0x47d   : > { %v3364_v37 = vld [vmem:[#allocation17] sm:$0xff] }
 0x47e   : > { %v15500_v40 = vadd.f32 %v2966_v35, %v2882_v38  ;;  %2972 = vst.msk [vmem:[#allocation2 + $0x9] sm:$0xff] %vm2594_vm4, %v15498_v39  ;;  %v3365_v35 = vld [vmem:[#allocation17 + $0x8] sm:$0xff]  ;;  %v9952_v38 = vld [vmem:[#allocation16] ss:$0 sm:$0xff] }
 0x480   : > { %2971 = vst.msk [vmem:[#allocation2 + $0x1] sm:$0xff] %vm2594_vm4, %v15500_v40 }
 0x485   : > { %v3157_v41 = vld [vmem:[#allocation2 + $0xa] sm:$0xff] }
 0x486   : > { %7843 = vst.msk [vmem:[#allocation2 + $0x11] sm:$0x1] %vm2591_vm3, %v14752_v0  ;;  %v2984_v45 = vld [vmem:[#allocation2 + $0x9] sm:$0xff] }
 0x487   : > { %v2973_v42 = vld [vmem:[#allocation2] sm:$0xff]  ;;  %v2974_v44 = vld [vmem:[#allocation2 + $0x8] sm:$0xff] }
 0x488   : > { %v2983_v43 = vld [vmem:[#allocation2 + $0x1] sm:$0xff]  ;;  %3360 = vst.msk [vmem:[#allocation2] sm:$0x1] %vm2591_vm3, %v14752_v0  ;;  %11324 = vmatprep.mubr.msk.f32.mxu1 %vm2594_vm4, %v2973_v42 }
 0x489   : > { %11305 = vmatprep.mubr.msk.f32.mxu0 %vm2594_vm4, %v2983_v43  ;;  %v3156_v47 = vld [vmem:[#allocation2 + $0x2] sm:$0xff]  ;;  %11325 = vmatmul.mubr.msk.f32.vlgmr.msra.gmra.mxu1 %vm2594_vm4, %v2974_v44 }
 0x48a   : > { %11306 = vmatmul.mubr.msk.f32.vlgmr.msra.gmra.mxu0 %vm2594_vm4, %v2984_v45  ;;  %11347 = vmatpush3.msra.mxu1 %v3271_v54  ;;  %v3539_v43 = vld [vmem:[#allocation17 + $0xb8] sm:$0xff] }
 0x48b   : > { %11328 = vmatpush3.msra.mxu0 %v3166_v15  ;;  %11343 = vmatprep.mubr.msk.f32.mxu0 %vm2594_vm4, %v3156_v47  ;;  %v3537_v47 = vld [vmem:[#allocation17 + $0xa8] sm:$0xff]  ;;  %v3644_v54 = vld [vmem:[#allocation20 + $0x78] sm:$0xff] }
 0x48c   : > { %11329 = vmatprep.subr.mxu0 %v3165_v46  ;;  %11348 = vmatprep.subr.mxu1 %v3270_v55 }
 0x48d   : > { %11330 = vmatpush3.msra.mxu0 %v3165_v46  ;;  %11349 = vmatpush3.msra.mxu1 %v3270_v55  ;;  %v3538_v46 = vld [vmem:[#allocation17 + $0xb0] sm:$0xff]  ;;  %v3634_v55 = vld [vmem:[#allocation20 + $0x38] sm:$0xff] }
 0x48e   : > { %11331 = vmatprep.subr.mxu0 %v3164_v48  ;;  %11350 = vmatprep.subr.mxu1 %v3269_v56 }
 0x48f   : > { %11332 = vmatpush3.msra.mxu0 %v3164_v48  ;;  %11351 = vmatpush3.msra.mxu1 %v3269_v56  ;;  %v3536_v48 = vld [vmem:[#allocation17 + $0xa0] sm:$0xff]  ;;  %v3643_v56 = vld [vmem:[#allocation20 + $0x70] sm:$0xff] }
 0x490   : > { %11333 = vmatprep.subr.mxu0 %v3163_v49  ;;  %11352 = vmatprep.subr.mxu1 %v3268_v57 }
 0x491   : > { %11334 = vmatpush3.msra.mxu0 %v3163_v49  ;;  %11353 = vmatpush3.msra.mxu1 %v3268_v57  ;;  %v3535_v49 = vld [vmem:[#allocation17 + $0x98] sm:$0xff] }
 0x492   : > { %11335 = vmatprep.subr.mxu0 %v3162_v50  ;;  %11354 = vmatprep.subr.mxu1 %v3267_v58  ;;  %v3633_v57 = vld [vmem:[#allocation20 + $0x30] sm:$0xff] }
 0x493   : > { %11336 = vmatpush3.msra.mxu0 %v3162_v50  ;;  %11355 = vmatpush3.msra.mxu1 %v3267_v58  ;;  %v3534_v50 = vld [vmem:[#allocation17 + $0x90] sm:$0xff] }
 0x494   : > { %11337 = vmatprep.subr.mxu0 %v3161_v51  ;;  %11356 = vmatprep.subr.mxu1 %v3266_v59  ;;  %v3642_v58 = vld [vmem:[#allocation20 + $0x68] sm:$0xff] }
 0x495   : > { %11338 = vmatpush3.msra.mxu0 %v3161_v51  ;;  %11357 = vmatpush3.msra.mxu1 %v3266_v59  ;;  %v3533_v51 = vld [vmem:[#allocation17 + $0x88] sm:$0xff] }
 0x496   : > { %11339 = vmatprep.subr.mxu0 %v3160_v52  ;;  %11358 = vmatprep.subr.mxu1 %v3265_v60  ;;  %v3632_v59 = vld [vmem:[#allocation20 + $0x28] sm:$0xff] }
 0x497   : > { %11340 = vmatpush3.msra.mxu0 %v3160_v52  ;;  %11359 = vmatpush3.msra.mxu1 %v3265_v60  ;;  %v3532_v52 = vld [vmem:[#allocation17 + $0x80] sm:$0xff] }
 0x498   : > { %11341 = vmatprep.subr.mxu0 %v3159_v53  ;;  %11360 = vmatprep.subr.mxu1 %v3264_v61  ;;  %v3641_v60 = vld [vmem:[#allocation20 + $0x60] sm:$0xff] }
 0x499   : > { %11342 = vmatpush3.msra.mxu0 %v3159_v53  ;;  %11361 = vmatpush3.msra.mxu1 %v3264_v61  ;;  %v3631_v61 = vld [vmem:[#allocation20 + $0x20] sm:$0xff] }
 0x49a   : > { %11344 = vmatmul.mubr.msk.f32.vlgmr.msra.gmra.mxu0 %vm2594_vm4, %v3157_v41  ;;  %11365 = vmatprep.subr.mxu0 %v14752_v0 }
 0x49b   : > { %11381 = vmatprep.mubr.msk.f32.mxu0 %vm14753_vm6, %v14752_v0  ;;  %11384 = vmatprep.subr.mxu1 %v14752_v0 }
 0x49c   : > { %11366 = vmatpush3.msra.mxu0 %v3382_v62  ;;  %v3640_v62 = vld [vmem:[#allocation20 + $0x58] sm:$0xff] }
 0x49d   : > { %11367 = vmatprep.subr.mxu0 %v14752_v0 }
 0x49e   : > { %11368 = vmatpush3.msra.mxu0 %v3381_v63  ;;  %v3630_v63 = vld [vmem:[#allocation20 + $0x18] sm:$0xff] }
 0x49f   : > { %11369 = vmatprep.subr.mxu0 %v14752_v0 }
 0x4a0   : > { %11370 = vmatpush3.msra.mxu0 %v3380_v25  ;;  %v3796_v25 = vld [vmem:[#allocation20 + $0x98] sm:$0xff] }
 0x4a1   : > { %11371 = vmatprep.subr.mxu0 %v14752_v0 }
 0x4a2   : > { %11372 = vmatpush3.msra.mxu0 %v3379_v28  ;;  %v3794_v28 = vld [vmem:[#allocation20 + $0x88] sm:$0xff] }
 0x4a3   : > { %11373 = vmatprep.subr.mxu0 %v14752_v0 }
 0x4a4   : > { %11374 = vmatpush3.msra.mxu0 %v3378_v30  ;;  %v3903_v30 = vld [vmem:[%s17000_s23 + $0x78] sm:$0xff] }
 0x4a5   : > { %11375 = vmatprep.subr.mxu0 %v14752_v0 }
 0x4a6   : > { %11376 = vmatpush3.msra.mxu0 %v3377_v32  ;;  %v9976_v32 = vld [vmem:[%s17000_s23 + $0xe8] sm:$0xff] }
 0x4a7   : > { %11377 = vmatprep.subr.mxu0 %v14752_v0 }
 0x4a8   : > { %11378 = vmatpush3.msra.mxu0 %v3376_v34  ;;  %v9974_v34 = vld [vmem:[%s17000_s23 + $0xd8] sm:$0xff] }
 0x4a9   : > { %11379 = vmatprep.subr.mxu0 %v14752_v0 }
 0x4aa   : > { %11380 = vmatpush3.msra.mxu0 %v3375_v36  ;;  %v3902_v36 = vld [vmem:[%s17000_s23 + $0x70] sm:$0xff] }
 0x4ab   : > { %11403 = vmatprep.subr.mxu0 %v14752_v0 }
 0x549   : > { %v11326_v2 = vpop.f32.mrf.mxu1 }
 0x54a   : > { %v11307_v1 = vpop.f32.mrf.mxu0 }
 0x54b   : > { %v3147_v4 = vpop.f32.mrf.mxu1  ;;  %v3153_v5 = vadd.f32 %v11326_v2, %v11307_v1  ;;  %v3639_v1 = vld [vmem:[#allocation20 + $0x50] sm:$0xff] }
 0x54c   : > { %v3066_v3 = vpop.f32.mrf.mxu0  ;;  %v3629_v2 = vld [vmem:[#allocation20 + $0x10] sm:$0xff] }
 0x54d   : > { %v3148_v7 = vadd.f32 %v3147_v4, %v3066_v3  ;;  %v3638_v3 = vld [vmem:[#allocation20 + $0x48] sm:$0xff] }
 0x54e   : > { %v3628_v4 = vld [vmem:[#allocation20 + $0x8] sm:$0xff] }
 0x55a   : > { %v11345_v6 = vpop.f32.mrf.mxu0 }
 0x55b   : > { %v3249_v8 = vadd.f32 %v11345_v6, %v3153_v5  ;;  %v3637_v5 = vld [vmem:[#allocation20 + $0x40] sm:$0xff] }
 0x55c   : > { %v3239_v9 = vpop.f32.mrf.mxu0  ;;  %v3627_v6 = vld [vmem:[#allocation20] sm:$0xff] }
 0x55d   : > { %v3251_v10 = vsub.f32 0.0, %v3249_v8  ;;  %v3248_v11 = vadd.f32 %v3239_v9, %v3148_v7 }
 0x55f   : > { %v3254_v12 = vmul.f32 1.442695, %v3251_v10  ;;  %v3250_v13 = vsub.f32 0.0, %v3248_v11 }
 0x561   : > { %13434 = vpow2.f32 %v3254_v12  ;;  %v3252_v14 = vmul.f32 1.442695, %v3250_v13  ;;  %v9958_v13 = vld [vmem:[#allocation19] ss:$0 sm:$0xff] }
 0x563   : > { %13436 = vpow2.f32 %v3252_v14 }
 0x56e   : > { %v13435_v15 = vpop.eup %13434 }
 0x56f   : > { %v3257_v16 = vadd.f32 1.0, %v13435_v15 }
 0x570   : > { %v13437_v17 = vpop.eup %13436 }
 0x571   : > { %v3256_v18 = vadd.f32 1.0, %v13437_v17  ;;  %13438 = vrcp.f32 %v3257_v16  ;;  %v3800_v17 = vld [vmem:[#allocation20 + $0xb8] sm:$0xff] }
 0x573   : > { %13440 = vrcp.f32 %v3256_v18  ;;  %v9978_v18 = vld [vmem:[%s17000_s23 + $0xf8] sm:$0xff] }
 0x57e   : > { %v13439_v19 = vpop.eup %13438 }
 0x57f   : > { %v3263_v22 = vmul.f32 %v13439_v19, %v15498_v39 }
 0x580   : > { %v13441_v20 = vpop.eup %13440 }
 0x581   : > { %v3262_v21 = vmul.f32 %v13441_v20, %v15500_v40 }
 0x583   : > { %11362 = vmatprep.mubr.msk.f32.mxu1 %vm2594_vm4, %v3262_v21 }
 0x584   : > { %11363 = vmatmul.mubr.msk.f32.vlgmr.msra.gmra.mxu1 %vm2594_vm4, %v3263_v22  ;;  %v3799_v22 = vld [vmem:[#allocation20 + $0xb0] sm:$0xff] }
 0x585   : > { %11385 = vmatpush3.msra.mxu1 %v3371_v23  ;;  %11400 = vmatprep.mubr.msk.f32.mxu1 %vm14753_vm6, %v14752_v0  ;;  %v3798_v23 = vld [vmem:[#allocation20 + $0xa8] sm:$0xff] }
 0x586   : > { %11386 = vmatprep.subr.mxu1 %v14752_v0 }
 0x587   : > { %11387 = vmatpush3.msra.mxu1 %v3370_v24  ;;  %v3797_v24 = vld [vmem:[#allocation20 + $0xa0] sm:$0xff] }
 0x588   : > { %11388 = vmatprep.subr.mxu1 %v14752_v0 }
 0x589   : > { %11389 = vmatpush3.msra.mxu1 %v3369_v26  ;;  %v3795_v26 = vld [vmem:[#allocation20 + $0x90] sm:$0xff] }
 0x58a   : > { %11390 = vmatprep.subr.mxu1 %v14752_v0 }
 0x58b   : > { %11391 = vmatpush3.msra.mxu1 %v3368_v29  ;;  %v3793_v29 = vld [vmem:[#allocation20 + $0x80] sm:$0xff] }
 0x58c   : > { %11392 = vmatprep.subr.mxu1 %v14752_v0 }
 0x58d   : > { %11393 = vmatpush3.msra.mxu1 %v3367_v31  ;;  %v9977_v31 = vld [vmem:[%s17000_s23 + $0xf0] sm:$0xff] }
 0x58e   : > { %11394 = vmatprep.subr.mxu1 %v14752_v0 }
 0x58f   : > { %11395 = vmatpush3.msra.mxu1 %v3366_v33  ;;  %v9975_v33 = vld [vmem:[%s17000_s23 + $0xe0] sm:$0xff] }
 0x590   : > { %11396 = vmatprep.subr.mxu1 %v14752_v0 }
 0x591   : > { %11397 = vmatpush3.msra.mxu1 %v3365_v35  ;;  %v9973_v35 = vld [vmem:[%s17000_s23 + $0xd0] sm:$0xff] }
 0x592   : > { %11398 = vmatprep.subr.mxu1 %v14752_v0 }
 0x593   : > { %11399 = vmatpush3.msra.mxu1 %v3364_v37  ;;  %v3901_v37 = vld [vmem:[%s17000_s23 + $0x68] sm:$0xff] }
 0x594   : > { %11422 = vmatprep.subr.mxu1 %v14752_v0 }
 0x644   : > { %v11364_v39 = vpop.f32.mrf.mxu1 }
 0x645   : > { %v15542_v40 = vadd.f32 %v11364_v39, %v9952_v38  ;;  %v9972_v39 = vld [vmem:[%s17000_s23 + $0xc8] sm:$0xff] }
 0x646   : > { %v3351_v41 = vpop.f32.mrf.mxu1 }
 0x647   : > { %3362 = vst.msk [vmem:[#allocation2 + $0x9] sm:$0xff] %vm2594_vm4, %v15542_v40  ;;  %v15546_v42 = vadd.f32 %v9952_v38, %v3351_v41  ;;  %v3900_v38 = vld [vmem:[%s17000_s23 + $0x60] sm:$0xff] }
 0x648   : > { %v9971_v41 = vld [vmem:[%s17000_s23 + $0xc0] sm:$0xff] }
 0x649   : > { %3361 = vst.msk [vmem:[#allocation2 + $0x1] sm:$0xff] %vm2594_vm4, %v15546_v42 }
 0x650   : > { %v3363_v44 = vld [vmem:[#allocation2] ss:$2 sm:$0xff]  ;;  %v3373_v45 = vld [vmem:[#allocation2 + $0x1] ss:$2 sm:$0xff] }
 0x651   : > { %3623 = vst.msk [vmem:[#allocation2] sm:$0x1] %vm2591_vm3, %v14752_v0  ;;  %3624 = vst.msk [vmem:[#allocation2 + $0x9] sm:$0x1] %vm2591_vm3, %v14752_v0  ;;  %11382 = vmatmul.mubr.msk.f32.vlgmr.msra.gmra.mxu0 %vm2594_vm4, %v3373_v45  ;;  %11401 = vmatmul.mubr.msk.f32.vlgmr.msra.gmra.mxu1 %vm2594_vm4, %v3363_v44  ;;  %v3530_v53 = vld [vmem:[#allocation2 + $0x2] ss:$2 sm:$0xff] }
 0x652   : > { %11404 = vmatpush3.msra.mxu0 %v3539_v43  ;;  %11419 = vmatprep.mubr.msk.f32.mxu0 %vm14753_vm6, %v14752_v0  ;;  %v3899_v43 = vld [vmem:[%s17000_s23 + $0x58] sm:$0xff]  ;;  %v3898_v45 = vld [vmem:[%s17000_s23 + $0x50] sm:$0xff] }
 0x653   : > { %11405 = vmatprep.subr.mxu0 %v14752_v0  ;;  %11438 = vmatprep.mubr.msk.f32.mxu1 %vm14753_vm6, %v14752_v0  ;;  %v9970_v44 = vld [vmem:[%s17000_s23 + $0xb8] sm:$0xff] }
 0x654   : > { %11406 = vmatpush3.msra.mxu0 %v3538_v46  ;;  %11423 = vmatpush3.msra.mxu1 %v3644_v54  ;;  %v9969_v46 = vld [vmem:[%s17000_s23 + $0xb0] sm:$0xff] }
 0x655   : > { %11407 = vmatprep.subr.mxu0 %v14752_v0  ;;  %11424 = vmatprep.subr.mxu1 %v14752_v0  ;;  %v3894_v54 = vld [vmem:[%s17000_s23 + $0x30] sm:$0xff] }
 0x656   : > { %11408 = vmatpush3.msra.mxu0 %v3537_v47  ;;  %11425 = vmatpush3.msra.mxu1 %v3643_v56  ;;  %v3897_v47 = vld [vmem:[%s17000_s23 + $0x48] sm:$0xff] }
 0x657   : > { %11409 = vmatprep.subr.mxu0 %v14752_v0  ;;  %11426 = vmatprep.subr.mxu1 %v14752_v0  ;;  %v3893_v56 = vld [vmem:[%s17000_s23 + $0x28] sm:$0xff] }
 0x658   : > { %11410 = vmatpush3.msra.mxu0 %v3536_v48  ;;  %11427 = vmatpush3.msra.mxu1 %v3642_v58  ;;  %v9968_v48 = vld [vmem:[%s17000_s23 + $0xa8] sm:$0xff]  ;;  %v3892_v58 = vld [vmem:[%s17000_s23 + $0x20] sm:$0xff] }
 0x659   : > { %11411 = vmatprep.subr.mxu0 %v14752_v0  ;;  %11428 = vmatprep.subr.mxu1 %v14752_v0 }
 0x65a   : > { %11412 = vmatpush3.msra.mxu0 %v3535_v49  ;;  %11429 = vmatpush3.msra.mxu1 %v3641_v60  ;;  %v3896_v49 = vld [vmem:[%s17000_s23 + $0x40] sm:$0xff]  ;;  %v3890_v60 = vld [vmem:[%s17000_s23 + $0x10] sm:$0xff] }
 0x65b   : > { %11413 = vmatprep.subr.mxu0 %v14752_v0  ;;  %11430 = vmatprep.subr.mxu1 %v14752_v0 }
 0x65c   : > { %11414 = vmatpush3.msra.mxu0 %v3534_v50  ;;  %11431 = vmatpush3.msra.mxu1 %v3640_v62  ;;  %v9967_v50 = vld [vmem:[%s17000_s23 + $0xa0] sm:$0xff] }
 0x65d   : > { %11415 = vmatprep.subr.mxu0 %v14752_v0  ;;  %11432 = vmatprep.subr.mxu1 %v14752_v0  ;;  %v3888_v62 = vld [vmem:[%s17000_s23] sm:$0xff] }
 0x65e   : > { %11416 = vmatpush3.msra.mxu0 %v3533_v51  ;;  %11433 = vmatpush3.msra.mxu1 %v3639_v1  ;;  %v9966_v51 = vld [vmem:[%s17000_s23 + $0x98] sm:$0xff] }
 0x65f   : > { %11417 = vmatprep.subr.mxu0 %v14752_v0  ;;  %11434 = vmatprep.subr.mxu1 %v14752_v0 }
 0x660   : > { %11418 = vmatpush3.msra.mxu0 %v3532_v52  ;;  %11435 = vmatpush3.msra.mxu1 %v3638_v3  ;;  %v3895_v52 = vld [vmem:[%s17000_s23 + $0x38] sm:$0xff] }
 0x661   : > { %11420 = vmatmul.mubr.msk.f32.vlgmr.msra.gmra.mxu0 %vm2594_vm4, %v3530_v53  ;;  %11441 = vmatprep.subr.mxu0 %v14752_v0  ;;  %v9965_v53 = vld [vmem:[%s17000_s23 + $0x90] sm:$0xff] }
 0x662   : > { %11457 = vmatprep.mubr.msk.f32.mxu0 %vm14753_vm6, %v14752_v0  ;;  %11442 = vmatpush3.msra.mxu0 %v3634_v55  ;;  %v9964_v55 = vld [vmem:[%s17000_s23 + $0x88] sm:$0xff] }
 0x663   : > { %11443 = vmatprep.subr.mxu0 %v14752_v0  ;;  %11436 = vmatprep.subr.mxu1 %v14752_v0 }
 0x664   : > { %11444 = vmatpush3.msra.mxu0 %v3633_v57  ;;  %11437 = vmatpush3.msra.mxu1 %v3637_v5  ;;  %v9963_v57 = vld [vmem:[%s17000_s23 + $0x80] sm:$0xff]  ;;  %v9962_v5 = vld [vmem:[#allocation22] ss:$0 sm:$0xff] }
 0x665   : > { %11445 = vmatprep.subr.mxu0 %v14752_v0  ;;  %11460 = vmatprep.subr.mxu1 %v14752_v0 }
 0x666   : > { %11446 = vmatpush3.msra.mxu0 %v3632_v59  ;;  %v3891_v59 = vld [vmem:[%s17000_s23 + $0x18] sm:$0xff] }
 0x667   : > { %11447 = vmatprep.subr.mxu0 %v14752_v0 }
 0x668   : > { %11448 = vmatpush3.msra.mxu0 %v3631_v61  ;;  %v3889_v61 = vld [vmem:[%s17000_s23 + $0x8] sm:$0xff] }
 0x669   : > { %11449 = vmatprep.subr.mxu0 %v14752_v0 }
 0x66a   : > { %11450 = vmatpush3.msra.mxu0 %v3630_v63 }
 0x66b   : > { %11451 = vmatprep.subr.mxu0 %v14752_v0 }
 0x66c   : > { %11452 = vmatpush3.msra.mxu0 %v3629_v2 }
 0x66d   : > { %11453 = vmatprep.subr.mxu0 %v14752_v0 }
 0x66e   : > { %11454 = vmatpush3.msra.mxu0 %v3628_v4 }
 0x66f   : > { %11455 = vmatprep.subr.mxu0 %v14752_v0 }
 0x670   : > { %11456 = vmatpush3.msra.mxu0 %v3627_v6 }
 0x671   : > { %11479 = vmatprep.subr.mxu0 %v14752_v0 }
 0x711   : > { %v3452_v7 = vpop.f32.mrf.mxu0  ;;  %v3525_v8 = vpop.f32.mrf.mxu1 }
 0x712   : > { %v3526_v11 = vadd.f32 %v3525_v8, %v3452_v7 }
 0x713   : > { %v11383_v9 = vpop.f32.mrf.mxu0  ;;  %v11402_v10 = vpop.f32.mrf.mxu1 }
 0x721   : > { %v3609_v12 = vpop.f32.mrf.mxu0 }
 0x722   : > { %v3613_v14 = vadd.f32 %v3609_v12, %v3526_v11  ;;  %v9994_v11 = vld [vmem:[%s17000_s23 + $0x178] sm:$0xff]  ;;  %v9993_v12 = vld [vmem:[%s17000_s23 + $0x170] sm:$0xff] }
 0x723   : > { %v11421_v15 = vpop.f32.mrf.mxu0 }
 0x724   : > { %v15587_v16 = vadd.f32 %v9958_v13, %v3613_v14  ;;  %v9992_v13 = vld [vmem:[%s17000_s23 + $0x168] sm:$0xff]  ;;  %v9991_v14 = vld [vmem:[%s17000_s23 + $0x160] sm:$0xff]  ;;  %v9990_v15 = vld [vmem:[%s17000_s23 + $0x158] sm:$0xff] }
 0x726   : > { %3625 = vst.msk [vmem:[#allocation2 + $0x1] sm:$0xff] %vm2594_vm4, %v15587_v16 }
 0x72d   : > { %v3626_v19 = vld [vmem:[#allocation2] sm:$0xff] }
 0x72e   : > { %v3635_v20 = vld [vmem:[#allocation2 + $0x1] sm:$0xff]  ;;  %3884 = vst [vmem:[#allocation2] sm:$0x1] %v14752_v0  ;;  %11458 = vmatmul.mubr.msk.f32.vlgmr.msra.gmra.mxu0 %vm2594_vm4, %v3626_v19 }
 0x72f   : > { %v3791_v21 = vld [vmem:[#allocation2 + $0x2] sm:$0xff]  ;;  %11439 = vmatmul.mubr.msk.f32.vlgmr.msra.gmra.mxu1 %vm2594_vm4, %v3635_v20  ;;  %11480 = vmatpush3.msra.mxu0 %v9978_v18  ;;  %v9989_v20 = vld [vmem:[%s17000_s23 + $0x150] sm:$0xff] }
 0x730   : > { %3885 = vst [vmem:[#allocation2 + $0x9] sm:$0x1] %v14752_v0  ;;  %11461 = vmatpush3.msra.mxu1 %v3800_v17  ;;  %11476 = vmatprep.mubr.msk.f32.mxu1 %vm14753_vm6, %v14752_v0  ;;  %v4162_v17 = vld [vmem:[#allocation25 + $0x18] sm:$0xff] }
 0x731   : > { %11462 = vmatprep.subr.mxu1 %v14752_v0  ;;  %11481 = vmatprep.subr.mxu0 %v14752_v0 }
 0x732   : > { %11463 = vmatpush3.msra.mxu1 %v3799_v22  ;;  %11511 = vmatprep.mubr.msk.f32.mxu0 %vm14753_vm6, %v14752_v0  ;;  %v9988_v22 = vld [vmem:[%s17000_s23 + $0x148] sm:$0xff] }
 0x733   : > { %11464 = vmatprep.subr.mxu1 %v14752_v0  ;;  %11482 = vmatpush3.msra.mxu0 %v9977_v31  ;;  %v9983_v31 = vld [vmem:[%s17000_s23 + $0x120] sm:$0xff] }
 0x734   : > { %11465 = vmatpush3.msra.mxu1 %v3798_v23  ;;  %11483 = vmatprep.subr.mxu0 %v14752_v0  ;;  %v4160_v23 = vld [vmem:[#allocation25 + $0x8] sm:$0xff] }
 0x735   : > { %11466 = vmatprep.subr.mxu1 %v14752_v0  ;;  %11484 = vmatpush3.msra.mxu0 %v9976_v32  ;;  %v9982_v32 = vld [vmem:[%s17000_s23 + $0x118] sm:$0xff] }
 0x736   : > { %11467 = vmatpush3.msra.mxu1 %v3797_v24  ;;  %11485 = vmatprep.subr.mxu0 %v14752_v0  ;;  %v9987_v24 = vld [vmem:[%s17000_s23 + $0x140] sm:$0xff] }
 0x737   : > { %11468 = vmatprep.subr.mxu1 %v14752_v0  ;;  %11486 = vmatpush3.msra.mxu0 %v9975_v33  ;;  %v9981_v33 = vld [vmem:[%s17000_s23 + $0x110] sm:$0xff] }
 0x738   : > { %11469 = vmatpush3.msra.mxu1 %v3796_v25  ;;  %11487 = vmatprep.subr.mxu0 %v14752_v0  ;;  %v4159_v25 = vld [vmem:[#allocation25] sm:$0xff] }
 0x739   : > { %11470 = vmatprep.subr.mxu1 %v14752_v0  ;;  %11488 = vmatpush3.msra.mxu0 %v9974_v34  ;;  %v9980_v34 = vld [vmem:[%s17000_s23 + $0x108] sm:$0xff] }
 0x73a   : > { %11471 = vmatpush3.msra.mxu1 %v3795_v26  ;;  %11489 = vmatprep.subr.mxu0 %v14752_v0  ;;  %v9986_v26 = vld [vmem:[%s17000_s23 + $0x138] sm:$0xff] }
 0x73b   : > { %11472 = vmatprep.subr.mxu1 %v14752_v0  ;;  %11490 = vmatpush3.msra.mxu0 %v9973_v35  ;;  %v9979_v35 = vld [vmem:[%s17000_s23 + $0x100] sm:$0xff] }
 0x73c   : > { %11473 = vmatpush3.msra.mxu1 %v3794_v28  ;;  %11491 = vmatprep.subr.mxu0 %v14752_v0  ;;  %v9985_v28 = vld [vmem:[%s17000_s23 + $0x130] sm:$0xff] }
 0x73d   : > { %11474 = vmatprep.subr.mxu1 %v14752_v0  ;;  %11492 = vmatpush3.msra.mxu0 %v9972_v39  ;;  %v4257_v39 = vld [vmem:[%s17001_s18 + $0x70] sm:$0xff] }
 0x73e   : > { %11475 = vmatpush3.msra.mxu1 %v3793_v29  ;;  %11493 = vmatprep.subr.mxu0 %v14752_v0  ;;  %v13462_v29 = vld [vmem:[%s15486_s11] sm:$0x1] }
 0x73f   : > { %11477 = vmatmul.mubr.msk.f32.vlgmr.msra.gmra.mxu1 %vm2594_vm4, %v3791_v21  ;;  %11514 = vmatprep.subr.mxu1 %v14752_v0  ;;  %v4161_v21 = vld [vmem:[#allocation25 + $0x10] sm:$0xff] }
 0x740   : > { %11515 = vmatpush3.msra.mxu1 %v3903_v30  ;;  %11546 = vmatprep.mubr.msk.f32.mxu1 %vm14753_vm6, %v14752_v0  ;;  %v9984_v30 = vld [vmem:[%s17000_s23 + $0x128] sm:$0xff] }
 0x741   : > { %11516 = vmatprep.subr.mxu1 %v14752_v0  ;;  %11494 = vmatpush3.msra.mxu0 %v9971_v41  ;;  %v10010_v41 = vld [vmem:[%s17001_s18 + $0xe8] sm:$0xff] }
 0x742   : > { %11517 = vmatpush3.msra.mxu1 %v3902_v36  ;;  %11495 = vmatprep.subr.mxu0 %v14752_v0  ;;  %v10012_v36 = vld [vmem:[%s17001_s18 + $0xf8] sm:$0xff] }
 0x743   : > { %11518 = vmatprep.subr.mxu1 %v14752_v0  ;;  %11496 = vmatpush3.msra.mxu0 %v9970_v44  ;;  %v10009_v44 = vld [vmem:[%s17001_s18 + $0xe0] sm:$0xff] }
 0x744   : > { %11519 = vmatpush3.msra.mxu1 %v3901_v37  ;;  %11497 = vmatprep.subr.mxu0 %v14752_v0  ;;  %v4258_v37 = vld [vmem:[%s17001_s18 + $0x78] sm:$0xff] }
 0x745   : > { %11520 = vmatprep.subr.mxu1 %v14752_v0  ;;  %11498 = vmatpush3.msra.mxu0 %v9969_v46  ;;  %v10008_v46 = vld [vmem:[%s17001_s18 + $0xd8] sm:$0xff] }
 0x746   : > { %11521 = vmatpush3.msra.mxu1 %v3900_v38  ;;  %11499 = vmatprep.subr.mxu0 %v14752_v0  ;;  %v10011_v38 = vld [vmem:[%s17001_s18 + $0xf0] sm:$0xff] }
 0x747   : > { %11522 = vmatprep.subr.mxu1 %v14752_v0  ;;  %11500 = vmatpush3.msra.mxu0 %v9968_v48  ;;  %v10007_v48 = vld [vmem:[%s17001_s18 + $0xd0] sm:$0xff] }
 0x748   : > { %11523 = vmatpush3.msra.mxu1 %v3899_v43  ;;  %11501 = vmatprep.subr.mxu0 %v14752_v0  ;;  %v4256_v43 = vld [vmem:[%s17001_s18 + $0x68] sm:$0xff] }
 0x749   : > { %11524 = vmatprep.subr.mxu1 %v14752_v0  ;;  %11502 = vmatpush3.msra.mxu0 %v9967_v50  ;;  %v10006_v50 = vld [vmem:[%s17001_s18 + $0xc8] sm:$0xff] }
 0x74a   : > { %11525 = vmatpush3.msra.mxu1 %v3898_v45  ;;  %11503 = vmatprep.subr.mxu0 %v14752_v0  ;;  %v4255_v45 = vld [vmem:[%s17001_s18 + $0x60] sm:$0xff] }
 0x74b   : > { %11526 = vmatprep.subr.mxu1 %v14752_v0  ;;  %11504 = vmatpush3.msra.mxu0 %v9966_v51  ;;  %v4252_v51 = vld [vmem:[%s17001_s18 + $0x48] sm:$0xff] }
 0x74c   : > { %11527 = vmatpush3.msra.mxu1 %v3897_v47  ;;  %11505 = vmatprep.subr.mxu0 %v14752_v0  ;;  %v4254_v47 = vld [vmem:[%s17001_s18 + $0x58] sm:$0xff] }
 0x74d   : > { %11528 = vmatprep.subr.mxu1 %v14752_v0  ;;  %11506 = vmatpush3.msra.mxu0 %v9965_v53  ;;  %v10004_v53 = vld [vmem:[%s17001_s18 + $0xb8] sm:$0xff] }
 0x74e   : > { %11529 = vmatpush3.msra.mxu1 %v3896_v49  ;;  %11507 = vmatprep.subr.mxu0 %v14752_v0  ;;  %v4253_v49 = vld [vmem:[%s17001_s18 + $0x50] sm:$0xff] }
 0x74f   : > { %11530 = vmatprep.subr.mxu1 %v14752_v0  ;;  %11508 = vmatpush3.msra.mxu0 %v9964_v55  ;;  %v10002_v55 = vld [vmem:[%s17001_s18 + $0xa8] sm:$0xff] }
 0x750   : > { %11531 = vmatpush3.msra.mxu1 %v3895_v52  ;;  %11509 = vmatprep.subr.mxu0 %v14752_v0  ;;  %v10005_v52 = vld [vmem:[%s17001_s18 + $0xc0] sm:$0xff] }
 0x751   : > { %11532 = vmatprep.subr.mxu1 %v14752_v0  ;;  %11510 = vmatpush3.msra.mxu0 %v9963_v57  ;;  %v4251_v57 = vld [vmem:[%s17001_s18 + $0x40] sm:$0xff] }
 0x752   : > { %11533 = vmatpush3.msra.mxu1 %v3894_v54  ;;  %11549 = vmatprep.subr.mxu0 %v14752_v0  ;;  %v10003_v54 = vld [vmem:[%s17001_s18 + $0xb0] sm:$0xff] }
 0x753   : > { %11534 = vmatprep.subr.mxu1 %v14752_v0 }
 0x754   : > { %11535 = vmatpush3.msra.mxu1 %v3893_v56  ;;  %v10001_v56 = vld [vmem:[%s17001_s18 + $0xa0] sm:$0xff] }
 0x755   : > { %11536 = vmatprep.subr.mxu1 %v14752_v0 }
 0x756   : > { %11537 = vmatpush3.msra.mxu1 %v3892_v58  ;;  %v10000_v58 = vld [vmem:[%s17001_s18 + $0x98] sm:$0xff] }
 0x757   : > { %11538 = vmatprep.subr.mxu1 %v14752_v0 }
 0x758   : > { %11539 = vmatpush3.msra.mxu1 %v3891_v59  ;;  %v4250_v59 = vld [vmem:[%s17001_s18 + $0x38] sm:$0xff] }
 0x759   : > { %11540 = vmatprep.subr.mxu1 %v14752_v0 }
 0x75a   : > { %11541 = vmatpush3.msra.mxu1 %v3890_v60  ;;  %v9999_v60 = vld [vmem:[%s17001_s18 + $0x90] sm:$0xff] }
 0x75b   : > { %11542 = vmatprep.subr.mxu1 %v14752_v0 }
 0x75c   : > { %11543 = vmatpush3.msra.mxu1 %v3889_v61  ;;  %v4249_v61 = vld [vmem:[%s17001_s18 + $0x30] sm:$0xff] }
 0x75d   : > { %11544 = vmatprep.subr.mxu1 %v14752_v0 }
 0x75e   : > { %11545 = vmatpush3.msra.mxu1 %v3888_v62  ;;  %v9998_v62 = vld [vmem:[%s17001_s18 + $0x88] sm:$0xff] }
 0x75f   : > { %11584 = vmatprep.subr.mxu1 %v14752_v0 }
 0x7ee   : > { %v3787_v1 = vpop.f32.mrf.mxu0 }
 0x7ef   : > { %v3714_v63 = vpop.f32.mrf.mxu1 }
 0x7f0   : > { %v11459_v3 = vpop.f32.mrf.mxu0  ;;  %v3788_v4 = vadd.f32 %v3787_v1, %v3714_v63  ;;  %v4248_v63 = vld [vmem:[%s17001_s18 + $0x28] sm:$0xff]  ;;  %v9997_v1 = vld [vmem:[%s17001_s18 + $0x80] sm:$0xff] }
 0x7f1   : > { %v11440_v2 = vpop.f32.mrf.mxu1  ;;  %v4246_v3 = vld [vmem:[%s17001_s18 + $0x18] sm:$0xff] }
 0x7f2   : > { %v4247_v2 = vld [vmem:[%s17001_s18 + $0x20] sm:$0xff] }
 0x7ff   : > { %v3870_v6 = vpop.f32.mrf.mxu1 }
 0x800   : > { %v3874_v7 = vadd.f32 %v3870_v6, %v3788_v4  ;;  %v4245_v4 = vld [vmem:[%s17001_s18 + $0x10] sm:$0xff]  ;;  %v4243_v6 = vld [vmem:[%s17001_s18] sm:$0xff] }
 0x801   : > { %v11478_v8 = vpop.f32.mrf.mxu1 }
 0x802   : > { %v3881_v9 = vadd.f32 %v9962_v5, %v3874_v7  ;;  %v4244_v5 = vld [vmem:[%s17001_s18 + $0x8] sm:$0xff] }
 0x804   : > { %v3882_v10 = vmax.f32 %v3881_v9, 0.0 }
 0x806   : > { %3886 = vst [vmem:[#allocation2 + $0x1] sm:$0xff] %v3882_v10  ;;  %11512 = vmatmul.mubr.f32.vlgmr.msra.gmra.mxu0 %v3882_v10 }
 0x807   : > { %11550 = vmatpush3.msra.mxu0 %v9994_v11  ;;  %11581 = vmatprep.mubr.msk.f32.mxu0 %vm14753_vm6, %v14752_v0 }
 0x808   : > { %11551 = vmatprep.subr.mxu0 %v14752_v0 }
 0x809   : > { %11552 = vmatpush3.msra.mxu0 %v9993_v12 }
 0x80a   : > { %11553 = vmatprep.subr.mxu0 %v14752_v0 }
 0x80b   : > { %11554 = vmatpush3.msra.mxu0 %v9992_v13  ;;  %v4163_v13 = vld [vmem:[#allocation26] sm:$0x1] }
 0x80c   : > { %11555 = vmatprep.subr.mxu0 %v14752_v0 }
 0x80d   : > { %v3887_v18 = vld [vmem:[#allocation2] sm:$0xff]  ;;  %11556 = vmatpush3.msra.mxu0 %v9991_v14 }
 0x80e   : > { %v4062_v19 = vld [vmem:[#allocation2 + $0x2] sm:$0xff]  ;;  %4239 = vst [vmem:[#allocation2] sm:$0x1] %v14752_v0  ;;  %11547 = vmatmul.mubr.f32.vlgmr.msra.gmra.mxu1 %v3887_v18  ;;  %11557 = vmatprep.subr.mxu0 %v14752_v0 }
 0x80f   : > { %4240 = vst [vmem:[#allocation2 + $0x9] sm:$0x1] %v14752_v0  ;;  %11558 = vmatpush3.msra.mxu0 %v9990_v15  ;;  %11585 = vmatpush3.msra.mxu1 %v4162_v17  ;;  %v9995_v17 = vld [vmem:[#allocation23] ss:$0 sm:$0xff] }
 0x810   : > { %11559 = vmatprep.subr.mxu0 %v14752_v0  ;;  %11586 = vmatprep.subr.mxu1 %v14752_v0 }
 0x811   : > { %11560 = vmatpush3.msra.mxu0 %v9989_v20  ;;  %11587 = vmatpush3.msra.mxu1 %v4161_v21 }
 0x812   : > { %11561 = vmatprep.subr.mxu0 %v14752_v0  ;;  %11588 = vmatprep.subr.mxu1 %v14752_v0 }
 0x813   : > { %11562 = vmatpush3.msra.mxu0 %v9988_v22  ;;  %11589 = vmatpush3.msra.mxu1 %v4160_v23 }
 0x814   : > { %11563 = vmatprep.subr.mxu0 %v14752_v0  ;;  %11590 = vmatprep.subr.mxu1 %v14752_v0 }
 0x815   : > { %11564 = vmatpush3.msra.mxu0 %v9987_v24  ;;  %11591 = vmatpush3.msra.mxu1 %v4159_v25  ;;  %v10028_v25 = vld [vmem:[%s17001_s18 + $0x178] sm:$0xff] }
 0x816   : > { %11565 = vmatprep.subr.mxu0 %v14752_v0  ;;  %11592 = vmatprep.mubr.msk.f32.mxu1 %vm14753_vm6, %v14752_v0 }
 0x817   : > { %11566 = vmatpush3.msra.mxu0 %v9986_v26  ;;  %11593 = vmatmul.mubr.msk.f32.vlgmr.msra.gmra.mxu1 %vm2889_vm5, %v13462_v29  ;;  %v10027_v26 = vld [vmem:[%s17001_s18 + $0x170] sm:$0xff]  ;;  %v10025_v29 = vld [vmem:[%s17001_s18 + $0x160] sm:$0xff] }
 0x818   : > { %11567 = vmatprep.subr.mxu0 %v14752_v0  ;;  %11595 = vmatprep.subr.mxu1 %v14752_v0 }
 0x819   : > { %11568 = vmatpush3.msra.mxu0 %v9985_v28  ;;  %11627 = vmatprep.mubr.msk.f32.mxu1 %vm14753_vm6, %v14752_v0  ;;  %v10026_v28 = vld [vmem:[%s17001_s18 + $0x168] sm:$0xff] }
 0x81a   : > { %11569 = vmatprep.subr.mxu0 %v14752_v0  ;;  %11596 = vmatpush3.msra.mxu1 %v10012_v36  ;;  %v10020_v36 = vld [vmem:[%s17001_s18 + $0x138] sm:$0xff] }
 0x81b   : > { %11570 = vmatpush3.msra.mxu0 %v9984_v30  ;;  %11597 = vmatprep.subr.mxu1 %v14752_v0  ;;  %v10024_v30 = vld [vmem:[%s17001_s18 + $0x158] sm:$0xff] }
 0x81c   : > { %11571 = vmatprep.subr.mxu0 %v14752_v0  ;;  %11598 = vmatpush3.msra.mxu1 %v10011_v38  ;;  %v10018_v38 = vld [vmem:[%s17001_s18 + $0x128] sm:$0xff] }
 0x81d   : > { %11572 = vmatpush3.msra.mxu0 %v9983_v31  ;;  %11599 = vmatprep.subr.mxu1 %v14752_v0 }
 0x81e   : > { %11573 = vmatprep.subr.mxu0 %v14752_v0  ;;  %11600 = vmatpush3.msra.mxu1 %v10010_v41  ;;  %v10016_v41 = vld [vmem:[%s17001_s18 + $0x118] sm:$0xff] }
 0x81f   : > { %11574 = vmatpush3.msra.mxu0 %v9982_v32  ;;  %11601 = vmatprep.subr.mxu1 %v14752_v0 }
 0x820   : > { %11575 = vmatprep.subr.mxu0 %v14752_v0  ;;  %11602 = vmatpush3.msra.mxu1 %v10009_v44  ;;  %v10014_v44 = vld [vmem:[%s17001_s18 + $0x108] sm:$0xff] }
 0x821   : > { %11576 = vmatpush3.msra.mxu0 %v9981_v33  ;;  %11603 = vmatprep.subr.mxu1 %v14752_v0  ;;  %v10023_v33 = vld [vmem:[%s17001_s18 + $0x150] sm:$0xff] }
 0x822   : > { %11577 = vmatprep.subr.mxu0 %v14752_v0  ;;  %11604 = vmatpush3.msra.mxu1 %v10008_v46  ;;  %v4528_v46 = vld [vmem:[#allocation28 + $0x78] sm:$0xff] }
 0x823   : > { %11578 = vmatpush3.msra.mxu0 %v9980_v34  ;;  %11605 = vmatprep.subr.mxu1 %v14752_v0  ;;  %v10022_v34 = vld [vmem:[%s17001_s18 + $0x148] sm:$0xff] }
 0x824   : > { %11579 = vmatprep.subr.mxu0 %v14752_v0  ;;  %11606 = vmatpush3.msra.mxu1 %v10007_v48  ;;  %v4526_v48 = vld [vmem:[#allocation28 + $0x68] sm:$0xff] }
 0x825   : > { %11580 = vmatpush3.msra.mxu0 %v9979_v35  ;;  %11607 = vmatprep.subr.mxu1 %v14752_v0  ;;  %v10021_v35 = vld [vmem:[%s17001_s18 + $0x140] sm:$0xff] }
 0x826   : > { %11582 = vmatmul.mubr.f32.vlgmr.msra.gmra.mxu0 %v4062_v19  ;;  %11630 = vmatprep.subr.mxu0 %v14752_v0 }
 0x827   : > { %11662 = vmatprep.mubr.msk.f32.mxu0 %vm14753_vm6, %v14752_v0  ;;  %11631 = vmatpush3.msra.mxu0 %v4258_v37  ;;  %v10019_v37 = vld [vmem:[%s17001_s18 + $0x130] sm:$0xff] }
 0x828   : > { %11632 = vmatprep.subr.mxu0 %v14752_v0  ;;  %11608 = vmatpush3.msra.mxu1 %v10006_v50  ;;  %v4524_v50 = vld [vmem:[#allocation28 + $0x58] sm:$0xff] }
 0x829   : > { %11633 = vmatpush3.msra.mxu0 %v4257_v39  ;;  %11609 = vmatprep.subr.mxu1 %v14752_v0  ;;  %v10017_v39 = vld [vmem:[%s17001_s18 + $0x120] sm:$0xff] }
 0x82a   : > { %11634 = vmatprep.subr.mxu0 %v14752_v0  ;;  %11610 = vmatpush3.msra.mxu1 %v10005_v52  ;;  %v4522_v52 = vld [vmem:[#allocation28 + $0x48] sm:$0xff] }
 0x82b   : > { %11635 = vmatpush3.msra.mxu0 %v4256_v43  ;;  %11611 = vmatprep.subr.mxu1 %v14752_v0  ;;  %v10015_v43 = vld [vmem:[%s17001_s18 + $0x110] sm:$0xff] }
 0x82c   : > { %11636 = vmatprep.subr.mxu0 %v14752_v0  ;;  %11612 = vmatpush3.msra.mxu1 %v10004_v53  ;;  %v4521_v53 = vld [vmem:[#allocation28 + $0x40] sm:$0xff] }
 0x82d   : > { %11637 = vmatpush3.msra.mxu0 %v4255_v45  ;;  %11613 = vmatprep.subr.mxu1 %v14752_v0  ;;  %v10013_v45 = vld [vmem:[%s17001_s18 + $0x100] sm:$0xff] }
 0x82e   : > { %11638 = vmatprep.subr.mxu0 %v14752_v0  ;;  %11614 = vmatpush3.msra.mxu1 %v10003_v54  ;;  %v4520_v54 = vld [vmem:[#allocation28 + $0x38] sm:$0xff] }
 0x82f   : > { %11639 = vmatpush3.msra.mxu0 %v4254_v47  ;;  %11615 = vmatprep.subr.mxu1 %v14752_v0  ;;  %v4527_v47 = vld [vmem:[#allocation28 + $0x70] sm:$0xff] }
 0x830   : > { %11640 = vmatprep.subr.mxu0 %v14752_v0  ;;  %11616 = vmatpush3.msra.mxu1 %v10002_v55  ;;  %v4519_v55 = vld [vmem:[#allocation28 + $0x30] sm:$0xff] }
 0x831   : > { %11641 = vmatpush3.msra.mxu0 %v4253_v49  ;;  %11617 = vmatprep.subr.mxu1 %v14752_v0  ;;  %v4525_v49 = vld [vmem:[#allocation28 + $0x60] sm:$0xff] }
 0x832   : > { %11642 = vmatprep.subr.mxu0 %v14752_v0  ;;  %11618 = vmatpush3.msra.mxu1 %v10001_v56  ;;  %v4518_v56 = vld [vmem:[#allocation28 + $0x28] sm:$0xff] }
 0x833   : > { %11643 = vmatpush3.msra.mxu0 %v4252_v51  ;;  %11619 = vmatprep.subr.mxu1 %v14752_v0  ;;  %v4523_v51 = vld [vmem:[#allocation28 + $0x50] sm:$0xff] }
 0x834   : > { %11644 = vmatprep.subr.mxu0 %v14752_v0  ;;  %11620 = vmatpush3.msra.mxu1 %v10000_v58  ;;  %v4516_v58 = vld [vmem:[#allocation28 + $0x18] sm:$0xff] }
 0x835   : > { %11645 = vmatpush3.msra.mxu0 %v4251_v57  ;;  %11621 = vmatprep.subr.mxu1 %v14752_v0  ;;  %v4517_v57 = vld [vmem:[#allocation28 + $0x20] sm:$0xff] }
 0x836   : > { %11646 = vmatprep.subr.mxu0 %v14752_v0  ;;  %11622 = vmatpush3.msra.mxu1 %v9999_v60  ;;  %v4514_v60 = vld [vmem:[#allocation28 + $0x8] sm:$0xff] }
 0x837   : > { %11647 = vmatpush3.msra.mxu0 %v4250_v59  ;;  %11623 = vmatprep.subr.mxu1 %v14752_v0  ;;  %v4515_v59 = vld [vmem:[#allocation28 + $0x10] sm:$0xff] }
 0x838   : > { %11648 = vmatprep.subr.mxu0 %v14752_v0  ;;  %11624 = vmatpush3.msra.mxu1 %v9998_v62  ;;  %v10045_v62 = vld [vmem:[%s17002_s2 + $0xf8] sm:$0xff] }
 0x839   : > { %11649 = vmatpush3.msra.mxu0 %v4249_v61  ;;  %11625 = vmatprep.subr.mxu1 %v14752_v0  ;;  %v4513_v61 = vld [vmem:[#allocation28] sm:$0xff] }
 0x83a   : > { %11650 = vmatprep.subr.mxu0 %v14752_v0  ;;  %11626 = vmatpush3.msra.mxu1 %v9997_v1  ;;  %v10043_v1 = vld [vmem:[%s17002_s2 + $0xe8] sm:$0xff] }
 0x83b   : > { %11651 = vmatpush3.msra.mxu0 %v4248_v63  ;;  %11665 = vmatprep.subr.mxu1 %v14752_v0  ;;  %v10044_v63 = vld [vmem:[%s17002_s2 + $0xf0] sm:$0xff] }
 0x83c   : > { %11652 = vmatprep.subr.mxu0 %v14752_v0 }
 0x83d   : > { %11653 = vmatpush3.msra.mxu0 %v4247_v2  ;;  %v10042_v2 = vld [vmem:[%s17002_s2 + $0xe0] sm:$0xff] }
 0x83e   : > { %11654 = vmatprep.subr.mxu0 %v14752_v0 }
 0x83f   : > { %11655 = vmatpush3.msra.mxu0 %v4246_v3  ;;  %v10041_v3 = vld [vmem:[%s17002_s2 + $0xd8] sm:$0xff] }
 0x840   : > { %11656 = vmatprep.subr.mxu0 %v14752_v0 }
 0x841   : > { %11657 = vmatpush3.msra.mxu0 %v4245_v4  ;;  %v10040_v4 = vld [vmem:[%s17002_s2 + $0xd0] sm:$0xff] }
 0x842   : > { %11658 = vmatprep.subr.mxu0 %v14752_v0 }
 0x843   : > { %11659 = vmatpush3.msra.mxu0 %v4244_v5  ;;  %v10039_v5 = vld [vmem:[%s17002_s2 + $0xc8] sm:$0xff] }
 0x844   : > { %11660 = vmatprep.subr.mxu0 %v14752_v0 }
 0x845   : > { %11661 = vmatpush3.msra.mxu0 %v4243_v6  ;;  %v10038_v6 = vld [vmem:[%s17002_s2 + $0xc0] sm:$0xff] }
 0x846   : > { %11700 = vmatprep.subr.mxu0 %v14752_v0 }
 0x8c6   : > { %v3988_v7 = vpop.f32.mrf.mxu0 }
 0x8c8   : > { %v11513_v8 = vpop.f32.mrf.mxu0 }
 0x8c9   : > { %v10036_v8 = vld [vmem:[%s17002_s2 + $0xb0] sm:$0xff] }
 0x8ce   : > { %v4058_v9 = vpop.f32.mrf.mxu1 }
 0x8cf   : > { %v4059_v14 = vadd.f32 %v4058_v9, %v3988_v7  ;;  %v10037_v7 = vld [vmem:[%s17002_s2 + $0xb8] sm:$0xff]  ;;  %v10035_v9 = vld [vmem:[%s17002_s2 + $0xa8] sm:$0xff] }
 0x8d0   : > { %v11548_v10 = vpop.f32.mrf.mxu1 }
 0x8d7   : > { %v4230_v11 = vpop.f32.mrf.mxu1 }
 0x8d8   : > { %v4231_v15 = vadd.f32 %v4230_v11, %v4163_v13 }
 0x8d9   : > { %v11594_v12 = vpop.f32.mrf.mxu1 }
 0x8da   : > { %v4237_v22 = vrot.slane %v4231_v15, %v15495_v27 }
 0x8e6   : > { %v4146_v18 = vpop.f32.mrf.mxu0 }
 0x8e7   : > { %v4150_v19 = vadd.f32 %v4146_v18, %v4059_v14 }
 0x8e8   : > { %v11583_v20 = vpop.f32.mrf.mxu0 }
 0x8e9   : > { %v4157_v21 = vadd.f32 %v9995_v17, %v4150_v19 }
 0x8eb   : > { %v4158_v23 = vmax.f32 %v4157_v21, 0.0 }
 0x8ed   : > { %v15787_v24 = vadd.f32 %v4237_v22, %v4158_v23 }
 0x8ef   : > { %4241 = vst [vmem:[#allocation2 + $0x1] sm:$0xff] %v15787_v24  ;;  %11628 = vmatmul.mubr.f32.vlgmr.msra.gmra.mxu1 %v15787_v24 }
 0x8f0   : > { %11666 = vmatpush3.msra.mxu1 %v10028_v25  ;;  %11697 = vmatprep.mubr.msk.f32.mxu1 %vm14753_vm6, %v14752_v0 }
 0x8f1   : > { %11667 = vmatprep.subr.mxu1 %v14752_v0 }
 0x8f2   : > { %11668 = vmatpush3.msra.mxu1 %v10027_v26  ;;  %v4624_v26 = vld [vmem:[%s17002_s2 + $0x78] sm:$0xff] }
 0x8f3   : > { %11669 = vmatprep.subr.mxu1 %v14752_v0 }
 0x8f4   : > { %11670 = vmatpush3.msra.mxu1 %v10026_v28  ;;  %v4623_v28 = vld [vmem:[%s17002_s2 + $0x70] sm:$0xff] }
 0x8f5   : > { %11671 = vmatprep.subr.mxu1 %v14752_v0 }
 0x8f6   : > { %v4242_v31 = vld [vmem:[#allocation2] sm:$0xff]  ;;  %11672 = vmatpush3.msra.mxu1 %v10025_v29  ;;  %v4622_v29 = vld [vmem:[%s17002_s2 + $0x68] sm:$0xff] }
 0x8f7   : > { %v4417_v32 = vld [vmem:[#allocation2 + $0x2] sm:$0xff]  ;;  %4606 = vst [vmem:[#allocation2] sm:$0x1] %v14752_v0  ;;  %11663 = vmatmul.mubr.f32.vlgmr.msra.gmra.mxu0 %v4242_v31  ;;  %11673 = vmatprep.subr.mxu1 %v14752_v0  ;;  %v4619_v31 = vld [vmem:[%s17002_s2 + $0x50] sm:$0xff] }
 0x8f8   : > { %6252 = vst [vmem:[#allocation2 + $0x9] sm:$0x1] %v14752_v0  ;;  %11674 = vmatpush3.msra.mxu1 %v10024_v30  ;;  %11732 = vmatprep.mubr.msk.f32.mxu0 %vm14753_vm6, %v14752_v0  ;;  %v4621_v30 = vld [vmem:[%s17002_s2 + $0x60] sm:$0xff] }
 0x8f9   : > { %11675 = vmatprep.subr.mxu1 %v14752_v0  ;;  %11701 = vmatpush3.msra.mxu0 %v4528_v46  ;;  %v4610_v46 = vld [vmem:[%s17002_s2 + $0x8] sm:$0xff] }
 0x8fa   : > { %11676 = vmatpush3.msra.mxu1 %v10023_v33  ;;  %11702 = vmatprep.subr.mxu0 %v14752_v0  ;;  %v4617_v33 = vld [vmem:[%s17002_s2 + $0x40] sm:$0xff] }
 0x8fb   : > { %11677 = vmatprep.subr.mxu1 %v14752_v0  ;;  %11703 = vmatpush3.msra.mxu0 %v4527_v47  ;;  %v10030_v47 = vld [vmem:[%s17002_s2 + $0x80] sm:$0xff] }
 0x8fc   : > { %11678 = vmatpush3.msra.mxu1 %v10022_v34  ;;  %11704 = vmatprep.subr.mxu0 %v14752_v0  ;;  %v4616_v34 = vld [vmem:[%s17002_s2 + $0x38] sm:$0xff] }
 0x8fd   : > { %11679 = vmatprep.subr.mxu1 %v14752_v0  ;;  %11705 = vmatpush3.msra.mxu0 %v4526_v48  ;;  %v4609_v48 = vld [vmem:[%s17002_s2] sm:$0xff] }
 0x8fe   : > { %11680 = vmatpush3.msra.mxu1 %v10021_v35  ;;  %11706 = vmatprep.subr.mxu0 %v14752_v0  ;;  %v4615_v35 = vld [vmem:[%s17002_s2 + $0x30] sm:$0xff] }
 0x8ff   : > { %11681 = vmatprep.subr.mxu1 %v14752_v0  ;;  %11707 = vmatpush3.msra.mxu0 %v4525_v49  ;;  %v10029_v49 = vld [vmem:[#allocation29] ss:$0 sm:$0xff] }
 0x900   : > { %11682 = vmatpush3.msra.mxu1 %v10020_v36  ;;  %11708 = vmatprep.subr.mxu0 %v14752_v0  ;;  %v4614_v36 = vld [vmem:[%s17002_s2 + $0x28] sm:$0xff] }
 0x901   : > { %11683 = vmatprep.subr.mxu1 %v14752_v0  ;;  %11709 = vmatpush3.msra.mxu0 %v4524_v50 }
 0x902   : > { %11684 = vmatpush3.msra.mxu1 %v10019_v37  ;;  %11710 = vmatprep.subr.mxu0 %v14752_v0  ;;  %v10034_v37 = vld [vmem:[%s17002_s2 + $0xa0] sm:$0xff] }
 0x903   : > { %11685 = vmatprep.subr.mxu1 %v14752_v0  ;;  %11711 = vmatpush3.msra.mxu0 %v4523_v51 }
 0x904   : > { %11686 = vmatpush3.msra.mxu1 %v10018_v38  ;;  %11712 = vmatprep.subr.mxu0 %v14752_v0  ;;  %v4613_v38 = vld [vmem:[%s17002_s2 + $0x20] sm:$0xff] }
 0x905   : > { %11687 = vmatprep.subr.mxu1 %v14752_v0  ;;  %11713 = vmatpush3.msra.mxu0 %v4522_v52 }
 0x906   : > { %11688 = vmatpush3.msra.mxu1 %v10017_v39  ;;  %11714 = vmatprep.subr.mxu0 %v14752_v0  ;;  %v10033_v39 = vld [vmem:[%s17002_s2 + $0x98] sm:$0xff] }
 0x907   : > { %11689 = vmatprep.subr.mxu1 %v14752_v0  ;;  %11715 = vmatpush3.msra.mxu0 %v4521_v53  ;;  %v10061_v53 = vld [vmem:[%s17002_s2 + $0x178] sm:$0xff] }
 0x908   : > { %11690 = vmatpush3.msra.mxu1 %v10016_v41  ;;  %11716 = vmatprep.subr.mxu0 %v14752_v0  ;;  %v4612_v41 = vld [vmem:[%s17002_s2 + $0x18] sm:$0xff] }
 0x909   : > { %11691 = vmatprep.subr.mxu1 %v14752_v0  ;;  %11717 = vmatpush3.msra.mxu0 %v4520_v54 }
 0x90a   : > { %11692 = vmatpush3.msra.mxu1 %v10015_v43  ;;  %11718 = vmatprep.subr.mxu0 %v14752_v0  ;;  %v10032_v43 = vld [vmem:[%s17002_s2 + $0x90] sm:$0xff] }
 0x90b   : > { %11693 = vmatprep.subr.mxu1 %v14752_v0  ;;  %11719 = vmatpush3.msra.mxu0 %v4519_v55 }
 0x90c   : > { %11694 = vmatpush3.msra.mxu1 %v10014_v44  ;;  %11720 = vmatprep.subr.mxu0 %v14752_v0  ;;  %v4611_v44 = vld [vmem:[%s17002_s2 + $0x10] sm:$0xff] }
 0x90d   : > { %11695 = vmatprep.subr.mxu1 %v14752_v0  ;;  %11721 = vmatpush3.msra.mxu0 %v4518_v56  ;;  %v10060_v56 = vld [vmem:[%s17002_s2 + $0x170] sm:$0xff] }
 0x90e   : > { %11696 = vmatpush3.msra.mxu1 %v10013_v45  ;;  %11722 = vmatprep.subr.mxu0 %v14752_v0  ;;  %v10031_v45 = vld [vmem:[%s17002_s2 + $0x88] sm:$0xff] }
 0x90f   : > { %11698 = vmatmul.mubr.f32.vlgmr.msra.gmra.mxu1 %v4417_v32  ;;  %11735 = vmatprep.subr.mxu1 %v14752_v0  ;;  %v4618_v32 = vld [vmem:[%s17002_s2 + $0x48] sm:$0xff] }
 0x910   : > { %11767 = vmatprep.mubr.msk.f32.mxu1 %vm14753_vm6, %v14752_v0  ;;  %11723 = vmatpush3.msra.mxu0 %v4517_v57  ;;  %v10059_v57 = vld [vmem:[%s17002_s2 + $0x168] sm:$0xff] }
 0x911   : > { %11724 = vmatprep.subr.mxu0 %v14752_v0  ;;  %11736 = vmatpush3.msra.mxu1 %v10045_v62  ;;  %v10054_v62 = vld [vmem:[%s17002_s2 + $0x140] sm:$0xff] }
 0x912   : > { %11725 = vmatpush3.msra.mxu0 %v4516_v58  ;;  %11737 = vmatprep.subr.mxu1 %v14752_v0  ;;  %v10058_v58 = vld [vmem:[%s17002_s2 + $0x160] sm:$0xff] }
 0x913   : > { %11726 = vmatprep.subr.mxu0 %v14752_v0  ;;  %11738 = vmatpush3.msra.mxu1 %v10044_v63  ;;  %v10053_v63 = vld [vmem:[%s17002_s2 + $0x138] sm:$0xff] }
 0x914   : > { %11727 = vmatpush3.msra.mxu0 %v4515_v59  ;;  %11739 = vmatprep.subr.mxu1 %v14752_v0  ;;  %v10057_v59 = vld [vmem:[%s17002_s2 + $0x158] sm:$0xff] }
 0x915   : > { %11728 = vmatprep.subr.mxu0 %v14752_v0  ;;  %11740 = vmatpush3.msra.mxu1 %v10043_v1  ;;  %v10052_v1 = vld [vmem:[%s17002_s2 + $0x130] sm:$0xff] }
 0x916   : > { %11729 = vmatpush3.msra.mxu0 %v4514_v60  ;;  %11741 = vmatprep.subr.mxu1 %v14752_v0  ;;  %v10056_v60 = vld [vmem:[%s17002_s2 + $0x150] sm:$0xff] }
 0x917   : > { %11730 = vmatprep.subr.mxu0 %v14752_v0  ;;  %11742 = vmatpush3.msra.mxu1 %v10042_v2  ;;  %v10051_v2 = vld [vmem:[%s17002_s2 + $0x128] sm:$0xff] }
 0x918   : > { %11731 = vmatpush3.msra.mxu0 %v4513_v61  ;;  %11743 = vmatprep.subr.mxu1 %v14752_v0  ;;  %v10055_v61 = vld [vmem:[%s17002_s2 + $0x148] sm:$0xff] }
 0x919   : > { %11770 = vmatprep.subr.mxu0 %v14752_v0  ;;  %11744 = vmatpush3.msra.mxu1 %v10041_v3  ;;  %v10050_v3 = vld [vmem:[%s17002_s2 + $0x120] sm:$0xff] }
 0x91a   : > { %11745 = vmatprep.subr.mxu1 %v14752_v0 }
 0x91b   : > { %11746 = vmatpush3.msra.mxu1 %v10040_v4  ;;  %v10049_v4 = vld [vmem:[%s17002_s2 + $0x118] sm:$0xff] }
 0x91c   : > { %11747 = vmatprep.subr.mxu1 %v14752_v0 }
 0x91d   : > { %11748 = vmatpush3.msra.mxu1 %v10039_v5  ;;  %v10048_v5 = vld [vmem:[%s17002_s2 + $0x110] sm:$0xff] }
 0x91e   : > { %11749 = vmatprep.subr.mxu1 %v14752_v0 }
 0x91f   : > { %11750 = vmatpush3.msra.mxu1 %v10038_v6  ;;  %v10047_v6 = vld [vmem:[%s17002_s2 + $0x108] sm:$0xff] }
 0x920   : > { %11751 = vmatprep.subr.mxu1 %v14752_v0 }
 0x921   : > { %11752 = vmatpush3.msra.mxu1 %v10037_v7  ;;  %v10046_v7 = vld [vmem:[%s17002_s2 + $0x100] sm:$0xff] }
 0x922   : > { %11753 = vmatprep.subr.mxu1 %v14752_v0 }
 0x923   : > { %11754 = vmatpush3.msra.mxu1 %v10036_v8 }
 0x924   : > { %11755 = vmatprep.subr.mxu1 %v14752_v0 }
 0x925   : > { %11756 = vmatpush3.msra.mxu1 %v10035_v9  ;;  %v10078_v9 = vld [vmem:[%s17003_s1 + $0xf8] sm:$0xff] }
 0x926   : > { %11757 = vmatprep.subr.mxu1 %v14752_v0 }
 0x927   : > { %11758 = vmatpush3.msra.mxu1 %v10034_v37  ;;  %v10065_v37 = vld [vmem:[%s17003_s1 + $0x90] sm:$0xff] }
 0x928   : > { %11759 = vmatprep.subr.mxu1 %v14752_v0 }
 0x929   : > { %11760 = vmatpush3.msra.mxu1 %v10033_v39  ;;  %v10064_v39 = vld [vmem:[%s17003_s1 + $0x88] sm:$0xff] }
 0x92a   : > { %11761 = vmatprep.subr.mxu1 %v14752_v0 }
 0x92b   : > { %11762 = vmatpush3.msra.mxu1 %v10032_v43  ;;  %v10063_v43 = vld [vmem:[%s17003_s1 + $0x80] sm:$0xff] }
 0x92c   : > { %11763 = vmatprep.subr.mxu1 %v14752_v0 }
 0x92d   : > { %11764 = vmatpush3.msra.mxu1 %v10031_v45 }
 0x92e   : > { %11765 = vmatprep.subr.mxu1 %v14752_v0 }
 0x92f   : > { %11766 = vmatpush3.msra.mxu1 %v10030_v47 }
 0x930   : > { %11805 = vmatprep.subr.mxu1 %v14752_v0 }
 0x9af   : > { %v4343_v10 = vpop.f32.mrf.mxu1 }
 0x9b1   : > { %v11629_v11 = vpop.f32.mrf.mxu1 }
 0x9b2   : > { %v10077_v11 = vld [vmem:[%s17003_s1 + $0xf0] sm:$0xff] }
 0x9b7   : > { %v4413_v12 = vpop.f32.mrf.mxu0 }
 0x9b8   : > { %v4414_v14 = vadd.f32 %v4413_v12, %v4343_v10  ;;  %v4901_v10 = vld [vmem:[%s17003_s1 + $0x78] sm:$0xff]  ;;  %v4900_v12 = vld [vmem:[%s17003_s1 + $0x70] sm:$0xff] }
 0x9b9   : > { %v11664_v13 = vpop.f32.mrf.mxu0 }
 0x9ba   : > { %v10076_v13 = vld [vmem:[%s17003_s1 + $0xe8] sm:$0xff] }
 0x9cf   : > { %v4501_v15 = vpop.f32.mrf.mxu1 }
 0x9d0   : > { %v4505_v17 = vadd.f32 %v4501_v15, %v4414_v14  ;;  %v4899_v14 = vld [vmem:[%s17003_s1 + $0x68] sm:$0xff]  ;;  %v10075_v15 = vld [vmem:[%s17003_s1 + $0xe0] sm:$0xff] }
 0x9d1   : > { %v11699_v18 = vpop.f32.mrf.mxu1 }
 0x9d2   : > { %v4506_v19 = vsub.f32 0.0, %v4505_v17  ;;  %v4898_v17 = vld [vmem:[%s17003_s1 + $0x60] sm:$0xff]  ;;  %v10074_v18 = vld [vmem:[%s17003_s1 + $0xd8] sm:$0xff] }
 0x9d4   : > { %v4507_v20 = vmul.f32 1.442695, %v4506_v19  ;;  %v4897_v19 = vld [vmem:[%s17003_s1 + $0x58] sm:$0xff] }
 0x9d6   : > { %13442 = vpow2.f32 %v4507_v20  ;;  %v10073_v20 = vld [vmem:[%s17003_s1 + $0xd0] sm:$0xff] }
 0x9e3   : > { %v13443_v21 = vpop.eup %13442 }
 0x9e4   : > { %v4509_v22 = vadd.f32 1.0, %v13443_v21  ;;  %v4896_v21 = vld [vmem:[%s17003_s1 + $0x50] sm:$0xff] }
 0x9e6   : > { %13444 = vrcp.f32 %v4509_v22  ;;  %v10072_v22 = vld [vmem:[%s17003_s1 + $0xc8] sm:$0xff] }
 0x9f3   : > { %v13445_v23 = vpop.eup %13444 }
 0x9f4   : > { %v4512_v25 = vmul.f32 %v13445_v23, %v15787_v24  ;;  %v4620_v24 = vld [vmem:[%s17002_s2 + $0x58] sm:$0xff]  ;;  %v4895_v23 = vld [vmem:[%s17003_s1 + $0x48] sm:$0xff] }
 0x9f6   : > { %11733 = vmatmul.mubr.f32.vlgmr.msra.gmra.mxu0 %v4512_v25  ;;  %v10071_v25 = vld [vmem:[%s17003_s1 + $0xc0] sm:$0xff] }
 0x9f7   : > { %11771 = vmatpush3.msra.mxu0 %v4624_v26  ;;  %11802 = vmatprep.mubr.msk.f32.mxu0 %vm14753_vm6, %v14752_v0  ;;  %v4894_v26 = vld [vmem:[%s17003_s1 + $0x40] sm:$0xff] }
 0x9f8   : > { %11772 = vmatprep.subr.mxu0 %v14752_v0 }
 0x9f9   : > { %11773 = vmatpush3.msra.mxu0 %v4623_v28  ;;  %v10070_v28 = vld [vmem:[%s17003_s1 + $0xb8] sm:$0xff] }
 0x9fa   : > { %11774 = vmatprep.subr.mxu0 %v14752_v0 }
 0x9fb   : > { %11775 = vmatpush3.msra.mxu0 %v4622_v29  ;;  %v4893_v29 = vld [vmem:[%s17003_s1 + $0x38] sm:$0xff] }
 0x9fc   : > { %11776 = vmatprep.subr.mxu0 %v14752_v0 }
 0x9fd   : > { %11777 = vmatpush3.msra.mxu0 %v4621_v30  ;;  %v10069_v30 = vld [vmem:[%s17003_s1 + $0xb0] sm:$0xff] }
 0x9fe   : > { %11778 = vmatprep.subr.mxu0 %v14752_v0 }
 0x9ff   : > { %11779 = vmatpush3.msra.mxu0 %v4620_v24  ;;  %v4892_v24 = vld [vmem:[%s17003_s1 + $0x30] sm:$0xff] }
 0xa00   : > { %11780 = vmatprep.subr.mxu0 %v14752_v0 }
 0xa01   : > { %11781 = vmatpush3.msra.mxu0 %v4619_v31  ;;  %v10068_v31 = vld [vmem:[%s17003_s1 + $0xa8] sm:$0xff] }
 0xa02   : > { %11782 = vmatprep.subr.mxu0 %v14752_v0 }
 0xa03   : > { %11783 = vmatpush3.msra.mxu0 %v4618_v32  ;;  %v4891_v32 = vld [vmem:[%s17003_s1 + $0x28] sm:$0xff] }
 0xa04   : > { %11784 = vmatprep.subr.mxu0 %v14752_v0 }
 0xa05   : > { %11785 = vmatpush3.msra.mxu0 %v4617_v33  ;;  %v10067_v33 = vld [vmem:[%s17003_s1 + $0xa0] sm:$0xff] }
 0xa06   : > { %11786 = vmatprep.subr.mxu0 %v14752_v0 }
 0xa07   : > { %11787 = vmatpush3.msra.mxu0 %v4616_v34  ;;  %v4890_v34 = vld [vmem:[%s17003_s1 + $0x20] sm:$0xff] }
 0xa08   : > { %11788 = vmatprep.subr.mxu0 %v14752_v0 }
 0xa09   : > { %11789 = vmatpush3.msra.mxu0 %v4615_v35  ;;  %v10066_v35 = vld [vmem:[%s17003_s1 + $0x98] sm:$0xff] }
 0xa0a   : > { %11790 = vmatprep.subr.mxu0 %v14752_v0 }
 0xa0b   : > { %11791 = vmatpush3.msra.mxu0 %v4614_v36  ;;  %v4889_v36 = vld [vmem:[%s17003_s1 + $0x18] sm:$0xff] }
 0xa0c   : > { %11792 = vmatprep.subr.mxu0 %v14752_v0 }
 0xa0d   : > { %11793 = vmatpush3.msra.mxu0 %v4613_v38  ;;  %v4888_v38 = vld [vmem:[%s17003_s1 + $0x10] sm:$0xff] }
 0xa0e   : > { %11794 = vmatprep.subr.mxu0 %v14752_v0 }
 0xa0f   : > { %11795 = vmatpush3.msra.mxu0 %v4612_v41  ;;  %v4887_v41 = vld [vmem:[%s17003_s1 + $0x8] sm:$0xff] }
 0xa10   : > { %11796 = vmatprep.subr.mxu0 %v14752_v0 }
 0xa11   : > { %11797 = vmatpush3.msra.mxu0 %v4611_v44  ;;  %v4886_v44 = vld [vmem:[%s17003_s1] sm:$0xff] }
 0xa12   : > { %11798 = vmatprep.subr.mxu0 %v14752_v0 }
 0xa13   : > { %11799 = vmatpush3.msra.mxu0 %v4610_v46 }
 0xa14   : > { %11800 = vmatprep.subr.mxu0 %v14752_v0 }
 0xa15   : > { %11801 = vmatpush3.msra.mxu0 %v4609_v48 }
 0xa16   : > { %11840 = vmatprep.subr.mxu0 %v14752_v0 }
 0xab6   : > { %v4602_v50 = vpop.f32.mrf.mxu0 }
 0xab7   : > { %v15914_v51 = vadd.f32 %v10029_v49, %v4602_v50 }
 0xab8   : > { %v11734_v52 = vpop.f32.mrf.mxu0 }
 0xab9   : > { %4607 = vst [vmem:[#allocation2 + $0x1] sm:$0xff] %v15914_v51  ;;  %v10062_v52 = vld [vmem:[#allocation31] ss:$0 sm:$0xff] }
 0xac0   : > { %v4608_v54 = vld [vmem:[#allocation2] ss:$2 sm:$0xf]  ;;  %v4625_v55 = vld [vmem:[#allocation2 + $0x1] ss:$2 sm:$0xf] }
 0xac1   : > { %11768 = vmatmul.mubr.f32.vlgmr.msra.gmra.mxu1 %v4625_v55  ;;  %4882 = vst [vmem:[#allocation2] sm:$0x1] %v14752_v0  ;;  %4883 = vst [vmem:[#allocation2 + $0x5] sm:$0x1] %v14752_v0  ;;  %11803 = vmatmul.mubr.f32.vlgmr.msra.gmra.mxu0 %v4608_v54 }
 0xac2   : > { %11806 = vmatpush3.msra.mxu1 %v10061_v53  ;;  %11837 = vmatprep.mubr.msk.f32.mxu1 %vm14753_vm6, %v14752_v0  ;;  %v4784_v8 = vld [vmem:[#allocation2 + $0x2] ss:$2 sm:$0xf] }
 0xac3   : > { %11807 = vmatprep.subr.mxu1 %v14752_v0  ;;  %11872 = vmatprep.mubr.msk.f32.mxu0 %vm14753_vm6, %v14752_v0 }
 0xac4   : > { %11808 = vmatpush3.msra.mxu1 %v10060_v56  ;;  %11841 = vmatpush3.msra.mxu0 %v10078_v9  ;;  %v10094_v56 = vld [vmem:[%s17003_s1 + $0x178] sm:$0xff]  ;;  %v10081_v9 = vld [vmem:[%s17003_s1 + $0x110] sm:$0xff] }
 0xac5   : > { %11809 = vmatprep.subr.mxu1 %v14752_v0  ;;  %11842 = vmatprep.subr.mxu0 %v14752_v0 }
 0xac6   : > { %11810 = vmatpush3.msra.mxu1 %v10059_v57  ;;  %11843 = vmatpush3.msra.mxu0 %v10077_v11  ;;  %v10079_v11 = vld [vmem:[%s17003_s1 + $0x100] sm:$0xff] }
 0xac7   : > { %11811 = vmatprep.subr.mxu1 %v14752_v0  ;;  %11844 = vmatprep.subr.mxu0 %v14752_v0 }
 0xac8   : > { %11812 = vmatpush3.msra.mxu1 %v10058_v58  ;;  %11845 = vmatpush3.msra.mxu0 %v10076_v13  ;;  %v5177_v13 = vld [vmem:[#allocation34 + $0x78] sm:$0xff] }
 0xac9   : > { %11813 = vmatprep.subr.mxu1 %v14752_v0  ;;  %11846 = vmatprep.subr.mxu0 %v14752_v0 }
 0xaca   : > { %11814 = vmatpush3.msra.mxu1 %v10057_v59  ;;  %11847 = vmatpush3.msra.mxu0 %v10075_v15  ;;  %v5176_v15 = vld [vmem:[#allocation34 + $0x70] sm:$0xff] }
 0xacb   : > { %11815 = vmatprep.subr.mxu1 %v14752_v0  ;;  %11848 = vmatprep.subr.mxu0 %v14752_v0 }
 0xacc   : > { %11816 = vmatpush3.msra.mxu1 %v10056_v60  ;;  %11849 = vmatpush3.msra.mxu0 %v10074_v18  ;;  %v10093_v60 = vld [vmem:[%s17003_s1 + $0x170] sm:$0xff]  ;;  %v5175_v18 = vld [vmem:[#allocation34 + $0x68] sm:$0xff] }
 0xacd   : > { %11817 = vmatprep.subr.mxu1 %v14752_v0  ;;  %11850 = vmatprep.subr.mxu0 %v14752_v0 }
 0xace   : > { %11818 = vmatpush3.msra.mxu1 %v10055_v61  ;;  %11851 = vmatpush3.msra.mxu0 %v10073_v20  ;;  %v10092_v61 = vld [vmem:[%s17003_s1 + $0x168] sm:$0xff]  ;;  %v5174_v20 = vld [vmem:[#allocation34 + $0x60] sm:$0xff] }
 0xacf   : > { %11819 = vmatprep.subr.mxu1 %v14752_v0  ;;  %11852 = vmatprep.subr.mxu0 %v14752_v0 }
 0xad0   : > { %11820 = vmatpush3.msra.mxu1 %v10054_v62  ;;  %11853 = vmatpush3.msra.mxu0 %v10072_v22  ;;  %v10091_v62 = vld [vmem:[%s17003_s1 + $0x160] sm:$0xff]  ;;  %v5173_v22 = vld [vmem:[#allocation34 + $0x58] sm:$0xff] }
 0xad1   : > { %11821 = vmatprep.subr.mxu1 %v14752_v0  ;;  %11854 = vmatprep.subr.mxu0 %v14752_v0 }
 0xad2   : > { %11822 = vmatpush3.msra.mxu1 %v10053_v63  ;;  %11855 = vmatpush3.msra.mxu0 %v10071_v25  ;;  %v10090_v63 = vld [vmem:[%s17003_s1 + $0x158] sm:$0xff]  ;;  %v5172_v25 = vld [vmem:[#allocation34 + $0x50] sm:$0xff] }
 0xad3   : > { %11823 = vmatprep.subr.mxu1 %v14752_v0  ;;  %11856 = vmatprep.subr.mxu0 %v14752_v0 }
 0xad4   : > { %11824 = vmatpush3.msra.mxu1 %v10052_v1  ;;  %11857 = vmatpush3.msra.mxu0 %v10070_v28  ;;  %v10089_v1 = vld [vmem:[%s17003_s1 + $0x150] sm:$0xff]  ;;  %v5171_v28 = vld [vmem:[#allocation34 + $0x48] sm:$0xff] }
 0xad5   : > { %11825 = vmatprep.subr.mxu1 %v14752_v0  ;;  %11858 = vmatprep.subr.mxu0 %v14752_v0 }
 0xad6   : > { %11826 = vmatpush3.msra.mxu1 %v10051_v2  ;;  %11859 = vmatpush3.msra.mxu0 %v10069_v30  ;;  %v10088_v2 = vld [vmem:[%s17003_s1 + $0x148] sm:$0xff]  ;;  %v5170_v30 = vld [vmem:[#allocation34 + $0x40] sm:$0xff] }
 0xad7   : > { %11827 = vmatprep.subr.mxu1 %v14752_v0  ;;  %11860 = vmatprep.subr.mxu0 %v14752_v0 }
 0xad8   : > { %11828 = vmatpush3.msra.mxu1 %v10050_v3  ;;  %11861 = vmatpush3.msra.mxu0 %v10068_v31  ;;  %v10087_v3 = vld [vmem:[%s17003_s1 + $0x140] sm:$0xff]  ;;  %v5169_v31 = vld [vmem:[#allocation34 + $0x38] sm:$0xff] }
 0xad9   : > { %11829 = vmatprep.subr.mxu1 %v14752_v0  ;;  %11862 = vmatprep.subr.mxu0 %v14752_v0 }
 0xada   : > { %11830 = vmatpush3.msra.mxu1 %v10049_v4  ;;  %11863 = vmatpush3.msra.mxu0 %v10067_v33  ;;  %v10086_v4 = vld [vmem:[%s17003_s1 + $0x138] sm:$0xff]  ;;  %v5168_v33 = vld [vmem:[#allocation34 + $0x30] sm:$0xff] }
 0xadb   : > { %11831 = vmatprep.subr.mxu1 %v14752_v0  ;;  %11864 = vmatprep.subr.mxu0 %v14752_v0 }
 0xadc   : > { %11832 = vmatpush3.msra.mxu1 %v10048_v5  ;;  %11865 = vmatpush3.msra.mxu0 %v10066_v35  ;;  %v10085_v5 = vld [vmem:[%s17003_s1 + $0x130] sm:$0xff]  ;;  %v5167_v35 = vld [vmem:[#allocation34 + $0x28] sm:$0xff] }
 0xadd   : > { %11833 = vmatprep.subr.mxu1 %v14752_v0  ;;  %11866 = vmatprep.subr.mxu0 %v14752_v0 }
 0xade   : > { %11834 = vmatpush3.msra.mxu1 %v10047_v6  ;;  %11867 = vmatpush3.msra.mxu0 %v10065_v37  ;;  %v10084_v6 = vld [vmem:[%s17003_s1 + $0x128] sm:$0xff]  ;;  %v5166_v37 = vld [vmem:[#allocation34 + $0x20] sm:$0xff] }
 0xadf   : > { %11835 = vmatprep.subr.mxu1 %v14752_v0  ;;  %11868 = vmatprep.subr.mxu0 %v14752_v0 }
 0xae0   : > { %11836 = vmatpush3.msra.mxu1 %v10046_v7  ;;  %11869 = vmatpush3.msra.mxu0 %v10064_v39  ;;  %v10083_v7 = vld [vmem:[%s17003_s1 + $0x120] sm:$0xff]  ;;  %v5165_v39 = vld [vmem:[#allocation34 + $0x18] sm:$0xff] }
 0xae1   : > { %11838 = vmatmul.mubr.f32.vlgmr.msra.gmra.mxu1 %v4784_v8  ;;  %11875 = vmatprep.subr.mxu1 %v14752_v0  ;;  %v10082_v8 = vld [vmem:[%s17003_s1 + $0x118] sm:$0xff] }
 0xae2   : > { %11907 = vmatprep.mubr.msk.f32.mxu1 %vm14753_vm6, %v14752_v0  ;;  %11876 = vmatpush3.msra.mxu1 %v4901_v10  ;;  %v10080_v10 = vld [vmem:[%s17003_s1 + $0x108] sm:$0xff] }
 0xae3   : > { %11877 = vmatprep.subr.mxu1 %v14752_v0  ;;  %11870 = vmatprep.subr.mxu0 %v14752_v0 }
 0xae4   : > { %11878 = vmatpush3.msra.mxu1 %v4900_v12  ;;  %11871 = vmatpush3.msra.mxu0 %v10063_v43  ;;  %v5195_v12 = vld [vmem:[#allocation34 + $0xf8] sm:$0xff]  ;;  %v5164_v43 = vld [vmem:[#allocation34 + $0x10] sm:$0xff] }
 0xae5   : > { %11879 = vmatprep.subr.mxu1 %v14752_v0  ;;  %11910 = vmatprep.subr.mxu0 %v14752_v0 }
 0xae6   : > { %11880 = vmatpush3.msra.mxu1 %v4899_v14  ;;  %v5194_v14 = vld [vmem:[#allocation34 + $0xf0] sm:$0xff] }
 0xae7   : > { %11881 = vmatprep.subr.mxu1 %v14752_v0 }
 0xae8   : > { %11882 = vmatpush3.msra.mxu1 %v4898_v17  ;;  %v5193_v17 = vld [vmem:[#allocation34 + $0xe8] sm:$0xff] }
 0xae9   : > { %11883 = vmatprep.subr.mxu1 %v14752_v0 }
 0xaea   : > { %11884 = vmatpush3.msra.mxu1 %v4897_v19  ;;  %v5192_v19 = vld [vmem:[#allocation34 + $0xe0] sm:$0xff] }
 0xaeb   : > { %11885 = vmatprep.subr.mxu1 %v14752_v0 }
 0xaec   : > { %11886 = vmatpush3.msra.mxu1 %v4896_v21  ;;  %v5191_v21 = vld [vmem:[#allocation34 + $0xd8] sm:$0xff] }
 0xaed   : > { %11887 = vmatprep.subr.mxu1 %v14752_v0 }
 0xaee   : > { %11888 = vmatpush3.msra.mxu1 %v4895_v23  ;;  %v5190_v23 = vld [vmem:[#allocation34 + $0xd0] sm:$0xff] }
 0xaef   : > { %11889 = vmatprep.subr.mxu1 %v14752_v0 }
 0xaf0   : > { %11890 = vmatpush3.msra.mxu1 %v4894_v26  ;;  %v5189_v26 = vld [vmem:[#allocation34 + $0xc8] sm:$0xff] }
 0xaf1   : > { %11891 = vmatprep.subr.mxu1 %v14752_v0 }
 0xaf2   : > { %11892 = vmatpush3.msra.mxu1 %v4893_v29  ;;  %v5188_v29 = vld [vmem:[#allocation34 + $0xc0] sm:$0xff] }
 0xaf3   : > { %11893 = vmatprep.subr.mxu1 %v14752_v0 }
 0xaf4   : > { %11894 = vmatpush3.msra.mxu1 %v4892_v24  ;;  %v5187_v24 = vld [vmem:[#allocation34 + $0xb8] sm:$0xff] }
 0xaf5   : > { %11895 = vmatprep.subr.mxu1 %v14752_v0 }
 0xaf6   : > { %11896 = vmatpush3.msra.mxu1 %v4891_v32  ;;  %v5186_v32 = vld [vmem:[#allocation34 + $0xb0] sm:$0xff] }
 0xaf7   : > { %11897 = vmatprep.subr.mxu1 %v14752_v0 }
 0xaf8   : > { %11898 = vmatpush3.msra.mxu1 %v4890_v34  ;;  %v5185_v34 = vld [vmem:[#allocation34 + $0xa8] sm:$0xff] }
 0xaf9   : > { %11899 = vmatprep.subr.mxu1 %v14752_v0 }
 0xafa   : > { %11900 = vmatpush3.msra.mxu1 %v4889_v36  ;;  %v5184_v36 = vld [vmem:[#allocation34 + $0xa0] sm:$0xff] }
 0xafb   : > { %11901 = vmatprep.subr.mxu1 %v14752_v0 }
 0xafc   : > { %11902 = vmatpush3.msra.mxu1 %v4888_v38  ;;  %v5183_v38 = vld [vmem:[#allocation34 + $0x98] sm:$0xff] }
 0xafd   : > { %11903 = vmatprep.subr.mxu1 %v14752_v0 }
 0xafe   : > { %11904 = vmatpush3.msra.mxu1 %v4887_v41  ;;  %v5182_v41 = vld [vmem:[#allocation34 + $0x90] sm:$0xff] }
 0xaff   : > { %11905 = vmatprep.subr.mxu1 %v14752_v0 }
 0xb00   : > { %11906 = vmatpush3.msra.mxu1 %v4886_v44  ;;  %v5181_v44 = vld [vmem:[#allocation34 + $0x88] sm:$0xff] }
 0xb01   : > { %11945 = vmatprep.subr.mxu1 %v14752_v0 }
 0xb81   : > { %v4709_v45 = vpop.f32.mrf.mxu1  ;;  %v4779_v46 = vpop.f32.mrf.mxu0 }
 0xb82   : > { %v4780_v49 = vadd.f32 %v4779_v46, %v4709_v45  ;;  %v5163_v45 = vld [vmem:[#allocation34 + $0x8] sm:$0xff]  ;;  %v5180_v46 = vld [vmem:[#allocation34 + $0x80] sm:$0xff] }
 0xb83   : > { %v11769_v47 = vpop.f32.mrf.mxu1  ;;  %v11804_v48 = vpop.f32.mrf.mxu0 }
 0xb84   : > { %v5162_v47 = vld [vmem:[#allocation34] sm:$0xff] }
 0xba1   : > { %v4868_v50 = vpop.f32.mrf.mxu1 }
 0xba2   : > { %v4872_v53 = vadd.f32 %v4868_v50, %v4780_v49 }
 0xba3   : > { %v11839_v54 = vpop.f32.mrf.mxu1 }
 0xba4   : > { %v16021_v55 = vadd.f32 %v10062_v52, %v4872_v53  ;;  %v10095_v54 = vld [vmem:[#allocation32] ss:$0 sm:$0xff] }
 0xba6   : > { %4884 = vst [vmem:[#allocation2 + $0x1] sm:$0xf] %v16021_v55 }
 0xbad   : > { %v4885_v57 = vld [vmem:[#allocation2] sm:$0xf] }
 0xbae   : > { %v4902_v58 = vld [vmem:[#allocation2 + $0x1] sm:$0xf]  ;;  %5158 = vst [vmem:[#allocation2] sm:$0x1] %v14752_v0  ;;  %11908 = vmatmul.mubr.f32.vlgmr.msra.gmra.mxu1 %v4885_v57 }
 0xbaf   : > { %v5060_v59 = vld [vmem:[#allocation2 + $0x2] sm:$0xf]  ;;  %11873 = vmatmul.mubr.f32.vlgmr.msra.gmra.mxu0 %v4902_v58  ;;  %11977 = vmatprep.mubr.msk.f32.mxu1 %vm14753_vm6, %v14752_v0 }
 0xbb0   : > { %5159 = vst [vmem:[#allocation2 + $0x5] sm:$0x1] %v14752_v0  ;;  %11911 = vmatpush3.msra.mxu0 %v10094_v56  ;;  %11942 = vmatprep.mubr.msk.f32.mxu0 %vm14753_vm6, %v14752_v0 }
 0xbb1   : > { %11912 = vmatprep.subr.mxu0 %v14752_v0  ;;  %11946 = vmatpush3.msra.mxu1 %v5195_v12  ;;  %v13463_v12 = vld [vmem:[%s15486_s11] sm:$0x1] }
 0xbb2   : > { %11913 = vmatpush3.msra.mxu0 %v10093_v60  ;;  %11947 = vmatprep.subr.mxu1 %v14752_v0 }
 0xbb3   : > { %11914 = vmatprep.subr.mxu0 %v14752_v0  ;;  %11948 = vmatpush3.msra.mxu1 %v5194_v14  ;;  %v5345_v14 = vld [vmem:[#allocation34 + $0x138] sm:$0xff] }
 0xbb4   : > { %11915 = vmatpush3.msra.mxu0 %v10092_v61  ;;  %11949 = vmatprep.subr.mxu1 %v14752_v0  ;;  %v5353_v61 = vld [vmem:[#allocation34 + $0x178] sm:$0xff] }
 0xbb5   : > { %11916 = vmatprep.subr.mxu0 %v14752_v0  ;;  %11950 = vmatpush3.msra.mxu1 %v5193_v17  ;;  %v5343_v17 = vld [vmem:[#allocation34 + $0x128] sm:$0xff] }
 0xbb6   : > { %11917 = vmatpush3.msra.mxu0 %v10091_v62  ;;  %11951 = vmatprep.subr.mxu1 %v14752_v0  ;;  %v5436_v62 = vld [vmem:[#allocation37 + $0x18] sm:$0xff] }
 0xbb7   : > { %11918 = vmatprep.subr.mxu0 %v14752_v0  ;;  %11952 = vmatpush3.msra.mxu1 %v5192_v19  ;;  %v5341_v19 = vld [vmem:[#allocation34 + $0x118] sm:$0xff] }
 0xbb8   : > { %11919 = vmatpush3.msra.mxu0 %v10090_v63  ;;  %11953 = vmatprep.subr.mxu1 %v14752_v0 }
 0xbb9   : > { %11920 = vmatprep.subr.mxu0 %v14752_v0  ;;  %11954 = vmatpush3.msra.mxu1 %v5191_v21  ;;  %v5339_v21 = vld [vmem:[#allocation34 + $0x108] sm:$0xff] }
 0xbba   : > { %11921 = vmatpush3.msra.mxu0 %v10089_v1  ;;  %11955 = vmatprep.subr.mxu1 %v14752_v0 }
 0xbbb   : > { %11922 = vmatprep.subr.mxu0 %v14752_v0  ;;  %11956 = vmatpush3.msra.mxu1 %v5190_v23  ;;  %v5550_v23 = vld [vmem:[#allocation40 + $0xf8] sm:$0xff] }
 0xbbc   : > { %11923 = vmatpush3.msra.mxu0 %v10088_v2  ;;  %11957 = vmatprep.subr.mxu1 %v14752_v0 }
 0xbbd   : > { %11924 = vmatprep.subr.mxu0 %v14752_v0  ;;  %11958 = vmatpush3.msra.mxu1 %v5189_v26  ;;  %v5549_v26 = vld [vmem:[#allocation40 + $0xf0] sm:$0xff] }
 0xbbe   : > { %11925 = vmatpush3.msra.mxu0 %v10087_v3  ;;  %11959 = vmatprep.subr.mxu1 %v14752_v0  ;;  %v5352_v3 = vld [vmem:[#allocation34 + $0x170] sm:$0xff] }
 0xbbf   : > { %11926 = vmatprep.subr.mxu0 %v14752_v0  ;;  %11960 = vmatpush3.msra.mxu1 %v5188_v29  ;;  %v5548_v29 = vld [vmem:[#allocation40 + $0xe8] sm:$0xff] }
 0xbc0   : > { %11927 = vmatpush3.msra.mxu0 %v10086_v4  ;;  %11961 = vmatprep.subr.mxu1 %v14752_v0  ;;  %v5435_v4 = vld [vmem:[#allocation37 + $0x10] sm:$0xff] }
 0xbc1   : > { %11928 = vmatprep.subr.mxu0 %v14752_v0  ;;  %11962 = vmatpush3.msra.mxu1 %v5187_v24  ;;  %v5547_v24 = vld [vmem:[#allocation40 + $0xe0] sm:$0xff] }
 0xbc2   : > { %11929 = vmatpush3.msra.mxu0 %v10085_v5  ;;  %11963 = vmatprep.subr.mxu1 %v14752_v0  ;;  %v5351_v5 = vld [vmem:[#allocation34 + $0x168] sm:$0xff] }
 0xbc3   : > { %11930 = vmatprep.subr.mxu0 %v14752_v0  ;;  %11964 = vmatpush3.msra.mxu1 %v5186_v32  ;;  %v5546_v32 = vld [vmem:[#allocation40 + $0xd8] sm:$0xff] }
 0xbc4   : > { %11931 = vmatpush3.msra.mxu0 %v10084_v6  ;;  %11965 = vmatprep.subr.mxu1 %v14752_v0  ;;  %v5434_v6 = vld [vmem:[#allocation37 + $0x8] sm:$0xff] }
 0xbc5   : > { %11932 = vmatprep.subr.mxu0 %v14752_v0  ;;  %11966 = vmatpush3.msra.mxu1 %v5185_v34  ;;  %v5545_v34 = vld [vmem:[#allocation40 + $0xd0] sm:$0xff] }
 0xbc6   : > { %11933 = vmatpush3.msra.mxu0 %v10083_v7  ;;  %11967 = vmatprep.subr.mxu1 %v14752_v0  ;;  %v5350_v7 = vld [vmem:[#allocation34 + $0x160] sm:$0xff] }
 0xbc7   : > { %11934 = vmatprep.subr.mxu0 %v14752_v0  ;;  %11968 = vmatpush3.msra.mxu1 %v5184_v36  ;;  %v5544_v36 = vld [vmem:[#allocation40 + $0xc8] sm:$0xff] }
 0xbc8   : > { %11935 = vmatpush3.msra.mxu0 %v10082_v8  ;;  %11969 = vmatprep.subr.mxu1 %v14752_v0  ;;  %v5433_v8 = vld [vmem:[#allocation37] sm:$0xff] }
 0xbc9   : > { %11936 = vmatprep.subr.mxu0 %v14752_v0  ;;  %11970 = vmatpush3.msra.mxu1 %v5183_v38  ;;  %v5543_v38 = vld [vmem:[#allocation40 + $0xc0] sm:$0xff] }
 0xbca   : > { %11937 = vmatpush3.msra.mxu0 %v10081_v9  ;;  %11971 = vmatprep.subr.mxu1 %v14752_v0  ;;  %v5349_v9 = vld [vmem:[#allocation34 + $0x158] sm:$0xff] }
 0xbcb   : > { %11938 = vmatprep.subr.mxu0 %v14752_v0  ;;  %11972 = vmatpush3.msra.mxu1 %v5182_v41  ;;  %v5542_v41 = vld [vmem:[#allocation40 + $0xb8] sm:$0xff] }
 0xbcc   : > { %11939 = vmatpush3.msra.mxu0 %v10080_v10  ;;  %11973 = vmatprep.subr.mxu1 %v14752_v0  ;;  %v5348_v10 = vld [vmem:[#allocation34 + $0x150] sm:$0xff] }
 0xbcd   : > { %11940 = vmatprep.subr.mxu0 %v14752_v0  ;;  %11974 = vmatpush3.msra.mxu1 %v5181_v44  ;;  %v5541_v44 = vld [vmem:[#allocation40 + $0xb0] sm:$0xff] }
 0xbce   : > { %11941 = vmatpush3.msra.mxu0 %v10079_v11  ;;  %11975 = vmatprep.subr.mxu1 %v14752_v0  ;;  %v5347_v11 = vld [vmem:[#allocation34 + $0x148] sm:$0xff] }
 0xbcf   : > { %11943 = vmatmul.mubr.f32.vlgmr.msra.gmra.mxu0 %v5060_v59  ;;  %11980 = vmatprep.subr.mxu0 %v14752_v0 }
 0xbd0   : > { %12012 = vmatprep.mubr.msk.f32.mxu0 %vm14753_vm6, %v14752_v0  ;;  %11981 = vmatpush3.msra.mxu0 %v5177_v13  ;;  %v5346_v13 = vld [vmem:[#allocation34 + $0x140] sm:$0xff] }
 0xbd1   : > { %11982 = vmatprep.subr.mxu0 %v14752_v0  ;;  %11976 = vmatpush3.msra.mxu1 %v5180_v46  ;;  %v5540_v46 = vld [vmem:[#allocation40 + $0xa8] sm:$0xff] }
 0xbd2   : > { %11983 = vmatpush3.msra.mxu0 %v5176_v15  ;;  %12015 = vmatprep.subr.mxu1 %v14752_v0  ;;  %v5344_v15 = vld [vmem:[#allocation34 + $0x130] sm:$0xff] }
 0xbd3   : > { %11984 = vmatprep.subr.mxu0 %v14752_v0 }
 0xbd4   : > { %11985 = vmatpush3.msra.mxu0 %v5175_v18  ;;  %v5342_v18 = vld [vmem:[#allocation34 + $0x120] sm:$0xff] }
 0xbd5   : > { %11986 = vmatprep.subr.mxu0 %v14752_v0 }
 0xbd6   : > { %11987 = vmatpush3.msra.mxu0 %v5174_v20  ;;  %v5340_v20 = vld [vmem:[#allocation34 + $0x110] sm:$0xff] }
 0xbd7   : > { %11988 = vmatprep.subr.mxu0 %v14752_v0 }
 0xbd8   : > { %11989 = vmatpush3.msra.mxu0 %v5173_v22  ;;  %v5338_v22 = vld [vmem:[#allocation34 + $0x100] sm:$0xff] }
 0xbd9   : > { %11990 = vmatprep.subr.mxu0 %v14752_v0 }
 0xbda   : > { %11991 = vmatpush3.msra.mxu0 %v5172_v25  ;;  %v5532_v25 = vld [vmem:[#allocation40 + $0x78] sm:$0xff] }
 0xbdb   : > { %11992 = vmatprep.subr.mxu0 %v14752_v0 }
 0xbdc   : > { %11993 = vmatpush3.msra.mxu0 %v5171_v28  ;;  %v5531_v28 = vld [vmem:[#allocation40 + $0x70] sm:$0xff] }
 0xbdd   : > { %11994 = vmatprep.subr.mxu0 %v14752_v0 }
 0xbde   : > { %11995 = vmatpush3.msra.mxu0 %v5170_v30  ;;  %v5530_v30 = vld [vmem:[#allocation40 + $0x68] sm:$0xff] }
 0xbdf   : > { %11996 = vmatprep.subr.mxu0 %v14752_v0 }
 0xbe0   : > { %11997 = vmatpush3.msra.mxu0 %v5169_v31  ;;  %v5529_v31 = vld [vmem:[#allocation40 + $0x60] sm:$0xff] }
 0xbe1   : > { %11998 = vmatprep.subr.mxu0 %v14752_v0 }
 0xbe2   : > { %11999 = vmatpush3.msra.mxu0 %v5168_v33  ;;  %v5528_v33 = vld [vmem:[#allocation40 + $0x58] sm:$0xff] }
 0xbe3   : > { %12000 = vmatprep.subr.mxu0 %v14752_v0 }
 0xbe4   : > { %12001 = vmatpush3.msra.mxu0 %v5167_v35  ;;  %v5527_v35 = vld [vmem:[#allocation40 + $0x50] sm:$0xff] }
 0xbe5   : > { %12002 = vmatprep.subr.mxu0 %v14752_v0 }
 0xbe6   : > { %12003 = vmatpush3.msra.mxu0 %v5166_v37  ;;  %v5526_v37 = vld [vmem:[#allocation40 + $0x48] sm:$0xff] }
 0xbe7   : > { %12004 = vmatprep.subr.mxu0 %v14752_v0 }
 0xbe8   : > { %12005 = vmatpush3.msra.mxu0 %v5165_v39  ;;  %v5525_v39 = vld [vmem:[#allocation40 + $0x40] sm:$0xff] }
 0xbe9   : > { %12006 = vmatprep.subr.mxu0 %v14752_v0 }
 0xbea   : > { %12007 = vmatpush3.msra.mxu0 %v5164_v43  ;;  %v5524_v43 = vld [vmem:[#allocation40 + $0x38] sm:$0xff] }
 0xbeb   : > { %12008 = vmatprep.subr.mxu0 %v14752_v0 }
 0xbec   : > { %12009 = vmatpush3.msra.mxu0 %v5163_v45  ;;  %v5523_v45 = vld [vmem:[#allocation40 + $0x30] sm:$0xff] }
 0xbed   : > { %12010 = vmatprep.subr.mxu0 %v14752_v0 }
 0xbee   : > { %12011 = vmatpush3.msra.mxu0 %v5162_v47  ;;  %v5522_v47 = vld [vmem:[#allocation40 + $0x28] sm:$0xff] }
 0xbef   : > { %12050 = vmatprep.subr.mxu0 %v14752_v0 }
 0xc6e   : > { %v5056_v49 = vpop.f32.mrf.mxu1 }
 0xc6f   : > { %v4986_v48 = vpop.f32.mrf.mxu0 }
 0xc70   : > { %v11909_v52 = vpop.f32.mrf.mxu1  ;;  %v5057_v53 = vadd.f32 %v5056_v49, %v4986_v48  ;;  %v5539_v48 = vld [vmem:[#allocation40 + $0xa0] sm:$0xff] }
 0xc71   : > { %v11874_v50 = vpop.f32.mrf.mxu0  ;;  %v5521_v49 = vld [vmem:[#allocation40 + $0x20] sm:$0xff]  ;;  %v5520_v52 = vld [vmem:[#allocation40 + $0x18] sm:$0xff] }
 0xc72   : > { %v5538_v50 = vld [vmem:[#allocation40 + $0x98] sm:$0xff] }
 0xc8f   : > { %v5144_v56 = vpop.f32.mrf.mxu0 }
 0xc90   : > { %v5148_v57 = vadd.f32 %v5144_v56, %v5057_v53  ;;  %v5537_v53 = vld [vmem:[#allocation40 + $0x90] sm:$0xff]  ;;  %v5536_v56 = vld [vmem:[#allocation40 + $0x88] sm:$0xff] }
 0xc91   : > { %v11944_v58 = vpop.f32.mrf.mxu0 }
 0xc92   : > { %v5155_v59 = vadd.f32 %v10095_v54, %v5148_v57  ;;  %v5519_v54 = vld [vmem:[#allocation40 + $0x10] sm:$0xff]  ;;  %v5518_v57 = vld [vmem:[#allocation40 + $0x8] sm:$0xff]  ;;  %v5535_v58 = vld [vmem:[#allocation40 + $0x80] sm:$0xff] }
 0xc94   : > { %v5156_v60 = vmax.f32 %v5155_v59, 0.0  ;;  %v5517_v59 = vld [vmem:[#allocation40] sm:$0xff] }
 0xc96   : > { %5160 = vst [vmem:[#allocation2 + $0x1] sm:$0xf] %v5156_v60 }
 0xc9d   : > { %v5161_v63 = vld [vmem:[#allocation2] sm:$0xf] }
 0xc9e   : > { %v5178_v1 = vld [vmem:[#allocation2 + $0x1] sm:$0xf]  ;;  %5513 = vst [vmem:[#allocation2] sm:$0x1] %v14752_v0  ;;  %12013 = vmatmul.mubr.f32.vlgmr.msra.gmra.mxu0 %v5161_v63 }
 0xc9f   : > { %v16096_v2 = vld [vmem:[#allocation2 + $0x2] sm:$0xf]  ;;  %11978 = vmatmul.mubr.f32.vlgmr.msra.gmra.mxu1 %v5178_v1  ;;  %12051 = vmatpush3.msra.mxu0 %v5436_v62 }
 0xca0   : > { %5514 = vst [vmem:[#allocation2 + $0x5] sm:$0x1] %v14752_v0  ;;  %12016 = vmatpush3.msra.mxu1 %v5353_v61  ;;  %12052 = vmatprep.subr.mxu0 %v14752_v0 }
 0xca1   : > { %12017 = vmatprep.subr.mxu1 %v14752_v0  ;;  %12053 = vmatpush3.msra.mxu0 %v5435_v4 }
 0xca2   : > { %12018 = vmatpush3.msra.mxu1 %v5352_v3  ;;  %12054 = vmatprep.subr.mxu0 %v14752_v0  ;;  %v5437_v3 = vld [vmem:[#allocation38] sm:$0x1] }
 0xca3   : > { %12019 = vmatprep.subr.mxu1 %v14752_v0  ;;  %12055 = vmatpush3.msra.mxu0 %v5434_v6  ;;  %v10096_v6 = vld [vmem:[#allocation35] ss:$0 sm:$0xff] }
 0xca4   : > { %12020 = vmatpush3.msra.mxu1 %v5351_v5  ;;  %12056 = vmatprep.subr.mxu0 %v14752_v0 }
 0xca5   : > { %12021 = vmatprep.subr.mxu1 %v14752_v0  ;;  %12047 = vmatprep.mubr.msk.f32.mxu1 %vm14753_vm6, %v14752_v0 }
 0xca6   : > { %12022 = vmatpush3.msra.mxu1 %v5350_v7  ;;  %12057 = vmatpush3.msra.mxu0 %v5433_v8 }
 0xca7   : > { %12023 = vmatprep.subr.mxu1 %v14752_v0  ;;  %12058 = vmatprep.mubr.msk.f32.mxu0 %vm14753_vm6, %v14752_v0 }
 0xca8   : > { %12024 = vmatpush3.msra.mxu1 %v5349_v9  ;;  %12059 = vmatmul.mubr.msk.f32.vlgmr.msra.gmra.mxu0 %vm2889_vm5, %v13463_v12 }
 0xca9   : > { %12025 = vmatprep.subr.mxu1 %v14752_v0  ;;  %12061 = vmatprep.subr.mxu0 %v14752_v0 }
 0xcaa   : > { %12026 = vmatpush3.msra.mxu1 %v5348_v10  ;;  %12093 = vmatprep.mubr.msk.f32.mxu0 %vm14753_vm6, %v14752_v0 }
 0xcab   : > { %12027 = vmatprep.subr.mxu1 %v14752_v0  ;;  %12062 = vmatpush3.msra.mxu0 %v5550_v23  ;;  %v5702_v23 = vld [vmem:[#allocation40 + $0x148] sm:$0xff] }
 0xcac   : > { %12028 = vmatpush3.msra.mxu1 %v5347_v11  ;;  %12063 = vmatprep.subr.mxu0 %v14752_v0 }
 0xcad   : > { %12029 = vmatprep.subr.mxu1 %v14752_v0  ;;  %12064 = vmatpush3.msra.mxu0 %v5549_v26  ;;  %v5700_v26 = vld [vmem:[#allocation40 + $0x138] sm:$0xff] }
 0xcae   : > { %12030 = vmatpush3.msra.mxu1 %v5346_v13  ;;  %12065 = vmatprep.subr.mxu0 %v14752_v0 }
 0xcaf   : > { %12031 = vmatprep.subr.mxu1 %v14752_v0  ;;  %12066 = vmatpush3.msra.mxu0 %v5548_v29  ;;  %v5698_v29 = vld [vmem:[#allocation40 + $0x128] sm:$0xff] }
 0xcb0   : > { %12032 = vmatpush3.msra.mxu1 %v5345_v14  ;;  %12067 = vmatprep.subr.mxu0 %v14752_v0  ;;  %v5708_v14 = vld [vmem:[#allocation40 + $0x178] sm:$0xff] }
 0xcb1   : > { %12033 = vmatprep.subr.mxu1 %v14752_v0  ;;  %12068 = vmatpush3.msra.mxu0 %v5547_v24  ;;  %v5696_v24 = vld [vmem:[#allocation40 + $0x118] sm:$0xff] }
 0xcb2   : > { %12034 = vmatpush3.msra.mxu1 %v5344_v15  ;;  %12069 = vmatprep.subr.mxu0 %v14752_v0 }
 0xcb3   : > { %12035 = vmatprep.subr.mxu1 %v14752_v0  ;;  %12070 = vmatpush3.msra.mxu0 %v5546_v32  ;;  %v5694_v32 = vld [vmem:[#allocation40 + $0x108] sm:$0xff] }
 0xcb4   : > { %12036 = vmatpush3.msra.mxu1 %v5343_v17  ;;  %12071 = vmatprep.subr.mxu0 %v14752_v0 }
 0xcb5   : > { %12037 = vmatprep.subr.mxu1 %v14752_v0  ;;  %12072 = vmatpush3.msra.mxu0 %v5545_v34  ;;  %v5911_v34 = vld [vmem:[%s17004_s26 + $0xf8] sm:$0xff] }
 0xcb6   : > { %12038 = vmatpush3.msra.mxu1 %v5342_v18  ;;  %12073 = vmatprep.subr.mxu0 %v14752_v0  ;;  %v5707_v18 = vld [vmem:[#allocation40 + $0x170] sm:$0xff] }
 0xcb7   : > { %12039 = vmatprep.subr.mxu1 %v14752_v0  ;;  %12074 = vmatpush3.msra.mxu0 %v5544_v36  ;;  %v5910_v36 = vld [vmem:[%s17004_s26 + $0xf0] sm:$0xff] }
 0xcb8   : > { %12040 = vmatpush3.msra.mxu1 %v5341_v19  ;;  %12075 = vmatprep.subr.mxu0 %v14752_v0  ;;  %v5706_v19 = vld [vmem:[#allocation40 + $0x168] sm:$0xff] }
 0xcb9   : > { %12041 = vmatprep.subr.mxu1 %v14752_v0  ;;  %12076 = vmatpush3.msra.mxu0 %v5543_v38  ;;  %v5908_v38 = vld [vmem:[%s17004_s26 + $0xe0] sm:$0xff] }
 0xcba   : > { %12042 = vmatpush3.msra.mxu1 %v5340_v20  ;;  %12077 = vmatprep.subr.mxu0 %v14752_v0  ;;  %v5705_v20 = vld [vmem:[#allocation40 + $0x160] sm:$0xff] }
 0xcbb   : > { %12043 = vmatprep.subr.mxu1 %v14752_v0  ;;  %12078 = vmatpush3.msra.mxu0 %v5542_v41  ;;  %v5906_v41 = vld [vmem:[%s17004_s26 + $0xd0] sm:$0xff] }
 0xcbc   : > { %12044 = vmatpush3.msra.mxu1 %v5339_v21  ;;  %12079 = vmatprep.subr.mxu0 %v14752_v0  ;;  %v5704_v21 = vld [vmem:[#allocation40 + $0x158] sm:$0xff] }
 0xcbd   : > { %12045 = vmatprep.subr.mxu1 %v14752_v0  ;;  %12080 = vmatpush3.msra.mxu0 %v5541_v44  ;;  %v5904_v44 = vld [vmem:[%s17004_s26 + $0xc0] sm:$0xff] }
 0xcbe   : > { %12046 = vmatpush3.msra.mxu1 %v5338_v22  ;;  %12081 = vmatprep.subr.mxu0 %v14752_v0  ;;  %v5703_v22 = vld [vmem:[#allocation40 + $0x150] sm:$0xff] }
 0xcbf   : > { %12048 = vmatmul.mubr.f32.vlgmr.msra.gmra.mxu1 %v16096_v2  ;;  %12096 = vmatprep.subr.mxu1 %v14752_v0 }
 0xcc0   : > { %12128 = vmatprep.mubr.msk.f32.mxu1 %vm14753_vm6, %v14752_v0  ;;  %12097 = vmatpush3.msra.mxu1 %v5532_v25  ;;  %v5701_v25 = vld [vmem:[#allocation40 + $0x140] sm:$0xff] }
 0xcc1   : > { %12098 = vmatprep.subr.mxu1 %v14752_v0  ;;  %12082 = vmatpush3.msra.mxu0 %v5540_v46  ;;  %v5902_v46 = vld [vmem:[%s17004_s26 + $0xb0] sm:$0xff] }
 0xcc2   : > { %12099 = vmatpush3.msra.mxu1 %v5531_v28  ;;  %12083 = vmatprep.subr.mxu0 %v14752_v0  ;;  %v5699_v28 = vld [vmem:[#allocation40 + $0x130] sm:$0xff] }
 0xcc3   : > { %12100 = vmatprep.subr.mxu1 %v14752_v0  ;;  %12084 = vmatpush3.msra.mxu0 %v5539_v48  ;;  %v5900_v48 = vld [vmem:[%s17004_s26 + $0xa0] sm:$0xff] }
 0xcc4   : > { %12101 = vmatpush3.msra.mxu1 %v5530_v30  ;;  %12085 = vmatprep.subr.mxu0 %v14752_v0  ;;  %v5697_v30 = vld [vmem:[#allocation40 + $0x120] sm:$0xff] }
 0xcc5   : > { %12102 = vmatprep.subr.mxu1 %v14752_v0  ;;  %12086 = vmatpush3.msra.mxu0 %v5538_v50  ;;  %v5898_v50 = vld [vmem:[%s17004_s26 + $0x90] sm:$0xff] }
 0xcc6   : > { %12103 = vmatpush3.msra.mxu1 %v5529_v31  ;;  %12087 = vmatprep.subr.mxu0 %v14752_v0  ;;  %v5695_v31 = vld [vmem:[#allocation40 + $0x110] sm:$0xff] }
 0xcc7   : > { %12104 = vmatprep.subr.mxu1 %v14752_v0  ;;  %12088 = vmatpush3.msra.mxu0 %v5537_v53  ;;  %v5896_v53 = vld [vmem:[%s17004_s26 + $0x80] sm:$0xff] }
 0xcc8   : > { %12105 = vmatpush3.msra.mxu1 %v5528_v33  ;;  %12089 = vmatprep.subr.mxu0 %v14752_v0  ;;  %v5693_v33 = vld [vmem:[#allocation40 + $0x100] sm:$0xff] }
 0xcc9   : > { %12106 = vmatprep.subr.mxu1 %v14752_v0  ;;  %12090 = vmatpush3.msra.mxu0 %v5536_v56  ;;  %v10130_v56 = vld [vmem:[%s17004_s26 + $0x1f0] sm:$0xff] }
 0xcca   : > { %12107 = vmatpush3.msra.mxu1 %v5527_v35  ;;  %12091 = vmatprep.subr.mxu0 %v14752_v0 }
 0xccb   : > { %12108 = vmatprep.subr.mxu1 %v14752_v0  ;;  %12092 = vmatpush3.msra.mxu0 %v5535_v58  ;;  %v10128_v58 = vld [vmem:[%s17004_s26 + $0x1e0] sm:$0xff] }
 0xccc   : > { %12109 = vmatpush3.msra.mxu1 %v5526_v37  ;;  %12131 = vmatprep.subr.mxu0 %v14752_v0  ;;  %v5909_v37 = vld [vmem:[%s17004_s26 + $0xe8] sm:$0xff] }
 0xccd   : > { %12110 = vmatprep.subr.mxu1 %v14752_v0 }
 0xcce   : > { %12111 = vmatpush3.msra.mxu1 %v5525_v39  ;;  %v5907_v39 = vld [vmem:[%s17004_s26 + $0xd8] sm:$0xff] }
 0xccf   : > { %12112 = vmatprep.subr.mxu1 %v14752_v0 }
 0xcd0   : > { %12113 = vmatpush3.msra.mxu1 %v5524_v43  ;;  %v5905_v43 = vld [vmem:[%s17004_s26 + $0xc8] sm:$0xff] }
 0xcd1   : > { %12114 = vmatprep.subr.mxu1 %v14752_v0 }
 0xcd2   : > { %12115 = vmatpush3.msra.mxu1 %v5523_v45  ;;  %v5903_v45 = vld [vmem:[%s17004_s26 + $0xb8] sm:$0xff] }
 0xcd3   : > { %12116 = vmatprep.subr.mxu1 %v14752_v0 }
 0xcd4   : > { %12117 = vmatpush3.msra.mxu1 %v5522_v47  ;;  %v5901_v47 = vld [vmem:[%s17004_s26 + $0xa8] sm:$0xff] }
 0xcd5   : > { %12118 = vmatprep.subr.mxu1 %v14752_v0 }
 0xcd6   : > { %12119 = vmatpush3.msra.mxu1 %v5521_v49  ;;  %v5899_v49 = vld [vmem:[%s17004_s26 + $0x98] sm:$0xff] }
 0xcd7   : > { %12120 = vmatprep.subr.mxu1 %v14752_v0 }
 0xcd8   : > { %12121 = vmatpush3.msra.mxu1 %v5520_v52  ;;  %v5897_v52 = vld [vmem:[%s17004_s26 + $0x88] sm:$0xff] }
 0xcd9   : > { %12122 = vmatprep.subr.mxu1 %v14752_v0 }
 0xcda   : > { %12123 = vmatpush3.msra.mxu1 %v5519_v54  ;;  %v10131_v54 = vld [vmem:[%s17004_s26 + $0x1f8] sm:$0xff] }
 0xcdb   : > { %12124 = vmatprep.subr.mxu1 %v14752_v0 }
 0xcdc   : > { %12125 = vmatpush3.msra.mxu1 %v5518_v57  ;;  %v10129_v57 = vld [vmem:[%s17004_s26 + $0x1e8] sm:$0xff] }
 0xcdd   : > { %12126 = vmatprep.subr.mxu1 %v14752_v0 }
 0xcde   : > { %12127 = vmatpush3.msra.mxu1 %v5517_v59  ;;  %v10127_v59 = vld [vmem:[%s17004_s26 + $0x1d8] sm:$0xff] }
 0xcdf   : > { %12166 = vmatprep.subr.mxu1 %v14752_v0 }
 0xd5e   : > { %v5332_v61 = vpop.f32.mrf.mxu0 }
 0xd5f   : > { %v5262_v60 = vpop.f32.mrf.mxu1 }
 0xd60   : > { %v12014_v63 = vpop.f32.mrf.mxu0  ;;  %v5333_v4 = vadd.f32 %v5332_v61, %v5262_v60  ;;  %v10126_v60 = vld [vmem:[%s17004_s26 + $0x1d0] sm:$0xff]  ;;  %v10125_v61 = vld [vmem:[%s17004_s26 + $0x1c8] sm:$0xff] }
 0xd61   : > { %v11979_v62 = vpop.f32.mrf.mxu1  ;;  %v10123_v63 = vld [vmem:[%s17004_s26 + $0x1b8] sm:$0xff] }
 0xd62   : > { %v10124_v62 = vld [vmem:[%s17004_s26 + $0x1c0] sm:$0xff] }
 0xd68   : > { %v5504_v1 = vpop.f32.mrf.mxu0 }
 0xd69   : > { %v5505_v5 = vadd.f32 %v5504_v1, %v5437_v3  ;;  %v10122_v1 = vld [vmem:[%s17004_s26 + $0x1b0] sm:$0xff]  ;;  %v10120_v3 = vld [vmem:[%s17004_s26 + $0x1a0] sm:$0xff] }
 0xd6a   : > { %v12060_v2 = vpop.f32.mrf.mxu0 }
 0xd6b   : > { %v5511_v11 = vrot.slane %v5505_v5, %v15495_v27  ;;  %v10121_v2 = vld [vmem:[%s17004_s26 + $0x1a8] sm:$0xff]  ;;  %v10118_v5 = vld [vmem:[%s17004_s26 + $0x190] sm:$0xff] }
 0xd7f   : > { %v5420_v7 = vpop.f32.mrf.mxu1 }
 0xd80   : > { %v5424_v8 = vadd.f32 %v5420_v7, %v5333_v4  ;;  %v10119_v4 = vld [vmem:[%s17004_s26 + $0x198] sm:$0xff]  ;;  %v10116_v7 = vld [vmem:[%s17004_s26 + $0x180] sm:$0xff] }
 0xd81   : > { %v12049_v9 = vpop.f32.mrf.mxu1 }
 0xd82   : > { %v5431_v10 = vadd.f32 %v10096_v6, %v5424_v8  ;;  %v10117_v6 = vld [vmem:[%s17004_s26 + $0x188] sm:$0xff]  ;;  %v5802_v8 = vld [vmem:[#allocation41 + $0x78] sm:$0xff] }
 0xd83   : > { %v5801_v9 = vld [vmem:[#allocation41 + $0x70] sm:$0xff] }
 0xd84   : > { %v5432_v12 = vmax.f32 %v5431_v10, 0.0  ;;  %v5800_v10 = vld [vmem:[#allocation41 + $0x68] sm:$0xff] }
 0xd86   : > { %v16164_v13 = vadd.f32 %v5511_v11, %v5432_v12  ;;  %v5799_v11 = vld [vmem:[#allocation41 + $0x60] sm:$0xff]  ;;  %v5797_v12 = vld [vmem:[#allocation41 + $0x50] sm:$0xff] }
 0xd88   : > { %5515 = vst [vmem:[#allocation2 + $0x1] sm:$0xf] %v16164_v13 }
 0xd8f   : > { %v5516_v15 = vld [vmem:[#allocation2] sm:$0xf] }
 0xd90   : > { %v5533_v17 = vld [vmem:[#allocation2 + $0x1] sm:$0xf]  ;;  %12129 = vmatmul.mubr.f32.vlgmr.msra.gmra.mxu1 %v5516_v15 }
 0xd91   : > { %12094 = vmatmul.mubr.f32.vlgmr.msra.gmra.mxu0 %v5533_v17  ;;  %12198 = vmatprep.mubr.msk.f32.mxu1 %vm14753_vm6, %v14752_v0  ;;  %v5691_v35 = vld [vmem:[#allocation2 + $0x2] sm:$0xf]  ;;  %v5794_v17 = vld [vmem:[#allocation41 + $0x38] sm:$0xff] }
 0xd92   : > { %12132 = vmatpush3.msra.mxu0 %v5708_v14  ;;  %12163 = vmatprep.mubr.msk.f32.mxu0 %vm14753_vm6, %v14752_v0  ;;  %v5796_v14 = vld [vmem:[#allocation41 + $0x48] sm:$0xff]  ;;  %v5795_v15 = vld [vmem:[#allocation41 + $0x40] sm:$0xff] }
 0xd93   : > { %12133 = vmatprep.subr.mxu0 %v14752_v0  ;;  %12167 = vmatpush3.msra.mxu1 %v5802_v8  ;;  %v10111_v8 = vld [vmem:[%s17004_s26 + $0x158] sm:$0xff] }
 0xd94   : > { %12134 = vmatpush3.msra.mxu0 %v5707_v18  ;;  %12168 = vmatprep.subr.mxu1 %v14752_v0  ;;  %v5793_v18 = vld [vmem:[#allocation41 + $0x30] sm:$0xff] }
 0xd95   : > { %12135 = vmatprep.subr.mxu0 %v14752_v0  ;;  %12169 = vmatpush3.msra.mxu1 %v5801_v9  ;;  %v10110_v9 = vld [vmem:[%s17004_s26 + $0x150] sm:$0xff] }
 0xd96   : > { %12136 = vmatpush3.msra.mxu0 %v5706_v19  ;;  %12170 = vmatprep.subr.mxu1 %v14752_v0  ;;  %v5792_v19 = vld [vmem:[#allocation41 + $0x28] sm:$0xff] }
 0xd97   : > { %12137 = vmatprep.subr.mxu0 %v14752_v0  ;;  %12171 = vmatpush3.msra.mxu1 %v5800_v10  ;;  %v10109_v10 = vld [vmem:[%s17004_s26 + $0x148] sm:$0xff] }
 0xd98   : > { %12138 = vmatpush3.msra.mxu0 %v5705_v20  ;;  %12172 = vmatprep.subr.mxu1 %v14752_v0  ;;  %v5791_v20 = vld [vmem:[#allocation41 + $0x20] sm:$0xff] }
 0xd99   : > { %12139 = vmatprep.subr.mxu0 %v14752_v0  ;;  %12173 = vmatpush3.msra.mxu1 %v5799_v11  ;;  %v10108_v11 = vld [vmem:[%s17004_s26 + $0x140] sm:$0xff] }
 0xd9a   : > { %12140 = vmatpush3.msra.mxu0 %v5704_v21  ;;  %12174 = vmatprep.subr.mxu1 %v14752_v0  ;;  %v5790_v21 = vld [vmem:[#allocation41 + $0x18] sm:$0xff] }
 0xd9b   : > { %12141 = vmatprep.subr.mxu0 %v14752_v0 }
 0xd9c   : > { %12142 = vmatpush3.msra.mxu0 %v5703_v22  ;;  %v5789_v22 = vld [vmem:[#allocation41 + $0x10] sm:$0xff] }
 0xd9d   : > { %12143 = vmatprep.subr.mxu0 %v14752_v0 }
 0xd9e   : > { %12144 = vmatpush3.msra.mxu0 %v5702_v23  ;;  %v5788_v23 = vld [vmem:[#allocation41 + $0x8] sm:$0xff] }
 0xd9f   : > { %12145 = vmatprep.subr.mxu0 %v14752_v0 }
 0xda0   : > { %12146 = vmatpush3.msra.mxu0 %v5701_v25  ;;  %v5787_v25 = vld [vmem:[#allocation41] sm:$0xff] }
 0xda1   : > { %12147 = vmatprep.subr.mxu0 %v14752_v0 }
 0xda2   : > { %12148 = vmatpush3.msra.mxu0 %v5700_v26 }
 0xda3   : > { %12149 = vmatprep.subr.mxu0 %v14752_v0 }
 0xda4   : > { %12150 = vmatpush3.msra.mxu0 %v5699_v28 }
 0xda5   : > { %12151 = vmatprep.subr.mxu0 %v14752_v0 }
 0xda6   : > { %12152 = vmatpush3.msra.mxu0 %v5698_v29 }
 0xda7   : > { %12153 = vmatprep.subr.mxu0 %v14752_v0 }
 0xda8   : > { %12154 = vmatpush3.msra.mxu0 %v5697_v30 }
 0xda9   : > { %12155 = vmatprep.subr.mxu0 %v14752_v0 }
 0xdaa   : > { %12156 = vmatpush3.msra.mxu0 %v5696_v24 }
 0xdab   : > { %12157 = vmatprep.subr.mxu0 %v14752_v0 }
 0xdac   : > { %12158 = vmatpush3.msra.mxu0 %v5695_v31 }
 0xdad   : > { %12159 = vmatprep.subr.mxu0 %v14752_v0 }
 0xdae   : > { %12160 = vmatpush3.msra.mxu0 %v5694_v32 }
 0xdaf   : > { %12161 = vmatprep.subr.mxu0 %v14752_v0 }
 0xdb0   : > { %12162 = vmatpush3.msra.mxu0 %v5693_v33 }
 0xdb1   : > { %12164 = vmatmul.mubr.f32.vlgmr.msra.gmra.mxu0 %v5691_v35  ;;  %12201 = vmatprep.subr.mxu0 %v14752_v0 }
 0xdb2   : > { %12202 = vmatpush3.msra.mxu0 %v5911_v34  ;;  %12233 = vmatprep.mubr.msk.f32.mxu0 %vm14753_vm6, %v14752_v0 }
 0xdb3   : > { %12203 = vmatprep.subr.mxu0 %v14752_v0 }
 0xdb4   : > { %12204 = vmatpush3.msra.mxu0 %v5910_v36 }
 0xdb5   : > { %12205 = vmatprep.subr.mxu0 %v14752_v0 }
 0xdb6   : > { %12206 = vmatpush3.msra.mxu0 %v5909_v37 }
 0xdb7   : > { %12207 = vmatprep.subr.mxu0 %v14752_v0 }
 0xdb8   : > { %12208 = vmatpush3.msra.mxu0 %v5908_v38 }
 0xdb9   : > { %12209 = vmatprep.subr.mxu0 %v14752_v0 }
 0xdba   : > { %12210 = vmatpush3.msra.mxu0 %v5907_v39 }
 0xdbb   : > { %12211 = vmatprep.subr.mxu0 %v14752_v0 }
 0xdbc   : > { %12212 = vmatpush3.msra.mxu0 %v5906_v41 }
 0xdbd   : > { %12213 = vmatprep.subr.mxu0 %v14752_v0 }
 0xdbe   : > { %12214 = vmatpush3.msra.mxu0 %v5905_v43 }
 0xdbf   : > { %12215 = vmatprep.subr.mxu0 %v14752_v0 }
 0xdc0   : > { %12216 = vmatpush3.msra.mxu0 %v5904_v44  ;;  %v5895_v44 = vld [vmem:[%s17004_s26 + $0x78] sm:$0xff] }
 0xdc1   : > { %12217 = vmatprep.subr.mxu0 %v14752_v0 }
 0xdc2   : > { %12218 = vmatpush3.msra.mxu0 %v5903_v45  ;;  %v5894_v45 = vld [vmem:[%s17004_s26 + $0x70] sm:$0xff] }
 0xdc3   : > { %12219 = vmatprep.subr.mxu0 %v14752_v0 }
 0xdc4   : > { %12220 = vmatpush3.msra.mxu0 %v5902_v46  ;;  %v5893_v46 = vld [vmem:[%s17004_s26 + $0x68] sm:$0xff] }
 0xdc5   : > { %12221 = vmatprep.subr.mxu0 %v14752_v0 }
 0xdc6   : > { %12222 = vmatpush3.msra.mxu0 %v5901_v47  ;;  %v5892_v47 = vld [vmem:[%s17004_s26 + $0x60] sm:$0xff] }
 0xdc7   : > { %12223 = vmatprep.subr.mxu0 %v14752_v0 }
 0xdc8   : > { %12224 = vmatpush3.msra.mxu0 %v5900_v48  ;;  %v5890_v48 = vld [vmem:[%s17004_s26 + $0x50] sm:$0xff] }
 0xdc9   : > { %12225 = vmatprep.subr.mxu0 %v14752_v0 }
 0xdca   : > { %12226 = vmatpush3.msra.mxu0 %v5899_v49  ;;  %v5889_v49 = vld [vmem:[%s17004_s26 + $0x48] sm:$0xff] }
 0xdcb   : > { %12227 = vmatprep.subr.mxu0 %v14752_v0 }
 0xdcc   : > { %12228 = vmatpush3.msra.mxu0 %v5898_v50  ;;  %v5888_v50 = vld [vmem:[%s17004_s26 + $0x40] sm:$0xff] }
 0xdcd   : > { %12229 = vmatprep.subr.mxu0 %v14752_v0 }
 0xdce   : > { %12230 = vmatpush3.msra.mxu0 %v5897_v52  ;;  %v5887_v52 = vld [vmem:[%s17004_s26 + $0x38] sm:$0xff] }
 0xdcf   : > { %12231 = vmatprep.subr.mxu0 %v14752_v0 }
 0xdd0   : > { %12232 = vmatpush3.msra.mxu0 %v5896_v53  ;;  %v5886_v53 = vld [vmem:[%s17004_s26 + $0x30] sm:$0xff] }
 0xdd1   : > { %12234 = vmatmul.mubr.f32.vlgmr.msra.gmra.mxu0 %v16021_v55  ;;  %12271 = vmatprep.subr.mxu0 %v14752_v0 }
 0xdd2   : > { %12272 = vmatpush3.msra.mxu0 %v10131_v54  ;;  %12303 = vmatprep.mubr.msk.f32.mxu0 %vm14753_vm6, %v14752_v0  ;;  %v5885_v54 = vld [vmem:[%s17004_s26 + $0x28] sm:$0xff] }
 0xdd3   : > { %12273 = vmatprep.subr.mxu0 %v14752_v0 }
 0xdd4   : > { %12274 = vmatpush3.msra.mxu0 %v10130_v56  ;;  %v5884_v56 = vld [vmem:[%s17004_s26 + $0x20] sm:$0xff] }
 0xdd5   : > { %12275 = vmatprep.subr.mxu0 %v14752_v0 }
 0xdd6   : > { %12276 = vmatpush3.msra.mxu0 %v10129_v57  ;;  %v5883_v57 = vld [vmem:[%s17004_s26 + $0x18] sm:$0xff] }
 0xdd7   : > { %12277 = vmatprep.subr.mxu0 %v14752_v0 }
 0xdd8   : > { %12278 = vmatpush3.msra.mxu0 %v10128_v58  ;;  %v5882_v58 = vld [vmem:[%s17004_s26 + $0x10] sm:$0xff] }
 0xdd9   : > { %12279 = vmatprep.subr.mxu0 %v14752_v0 }
 0xdda   : > { %12280 = vmatpush3.msra.mxu0 %v10127_v59 }
 0xddb   : > { %12281 = vmatprep.subr.mxu0 %v14752_v0 }
 0xddc   : > { %12282 = vmatpush3.msra.mxu0 %v10126_v60  ;;  %v5881_v60 = vld [vmem:[%s17004_s26 + $0x8] sm:$0xff] }
 0xddd   : > { %12283 = vmatprep.subr.mxu0 %v14752_v0 }
 0xdde   : > { %12284 = vmatpush3.msra.mxu0 %v10125_v61 }
 0xddf   : > { %12285 = vmatprep.subr.mxu0 %v14752_v0 }
 0xde0   : > { %12286 = vmatpush3.msra.mxu0 %v10124_v62  ;;  %v5880_v62 = vld [vmem:[%s17004_s26] sm:$0xff] }
 0xde1   : > { %12287 = vmatprep.subr.mxu0 %v14752_v0 }
 0xde2   : > { %12288 = vmatpush3.msra.mxu0 %v10123_v63  ;;  %v10098_v63 = vld [vmem:[#allocation43] ss:$0 sm:$0xff] }
 0xde3   : > { %12289 = vmatprep.subr.mxu0 %v14752_v0 }
 0xde4   : > { %12290 = vmatpush3.msra.mxu0 %v10122_v1 }
 0xde5   : > { %12291 = vmatprep.subr.mxu0 %v14752_v0 }
 0xde6   : > { %12292 = vmatpush3.msra.mxu0 %v10121_v2 }
 0xde7   : > { %12293 = vmatprep.subr.mxu0 %v14752_v0 }
 0xde8   : > { %12294 = vmatpush3.msra.mxu0 %v10120_v3  ;;  %v10115_v3 = vld [vmem:[%s17004_s26 + $0x178] sm:$0xff] }
 0xde9   : > { %12295 = vmatprep.subr.mxu0 %v14752_v0 }
 0xdea   : > { %12296 = vmatpush3.msra.mxu0 %v10119_v4 }
 0xdeb   : > { %12297 = vmatprep.subr.mxu0 %v14752_v0 }
 0xdec   : > { %12298 = vmatpush3.msra.mxu0 %v10118_v5  ;;  %v10114_v5 = vld [vmem:[%s17004_s26 + $0x170] sm:$0xff] }
 0xded   : > { %12299 = vmatprep.subr.mxu0 %v14752_v0 }
 0xdee   : > { %12300 = vmatpush3.msra.mxu0 %v10117_v6  ;;  %v10113_v6 = vld [vmem:[%s17004_s26 + $0x168] sm:$0xff] }
 0xdef   : > { %12301 = vmatprep.subr.mxu0 %v14752_v0 }
 0xdf0   : > { %12302 = vmatpush3.msra.mxu0 %v10116_v7  ;;  %v10112_v7 = vld [vmem:[%s17004_s26 + $0x160] sm:$0xff] }
 0xdf1   : > { %12304 = vmatmul.mubr.f32.vlgmr.msra.gmra.mxu0 %v16021_v55  ;;  %12341 = vmatprep.subr.mxu0 %v14752_v0  ;;  %v5798_v55 = vld [vmem:[#allocation41 + $0x58] sm:$0xff] }
 0xdf2   : > { %12373 = vmatprep.mubr.msk.f32.mxu0 %vm14753_vm6, %v14752_v0  ;;  %12175 = vmatpush3.msra.mxu1 %v5798_v55  ;;  %v10107_v55 = vld [vmem:[%s17004_s26 + $0x138] sm:$0xff] }
 0xdf3   : > { %12176 = vmatprep.subr.mxu1 %v14752_v0 }
 0xdf4   : > { %12177 = vmatpush3.msra.mxu1 %v5797_v12  ;;  %v10106_v12 = vld [vmem:[%s17004_s26 + $0x130] sm:$0xff] }
 0xdf5   : > { %12178 = vmatprep.subr.mxu1 %v14752_v0 }
 0xdf6   : > { %12179 = vmatpush3.msra.mxu1 %v5796_v14  ;;  %v10105_v14 = vld [vmem:[%s17004_s26 + $0x128] sm:$0xff] }
 0xdf7   : > { %12180 = vmatprep.subr.mxu1 %v14752_v0 }
 0xdf8   : > { %12181 = vmatpush3.msra.mxu1 %v5795_v15  ;;  %v10104_v15 = vld [vmem:[%s17004_s26 + $0x120] sm:$0xff] }
 0xdf9   : > { %12182 = vmatprep.subr.mxu1 %v14752_v0 }
 0xdfa   : > { %12183 = vmatpush3.msra.mxu1 %v5794_v17  ;;  %v10103_v17 = vld [vmem:[%s17004_s26 + $0x118] sm:$0xff] }
 0xdfb   : > { %12184 = vmatprep.subr.mxu1 %v14752_v0 }
 0xdfc   : > { %12185 = vmatpush3.msra.mxu1 %v5793_v18  ;;  %v10102_v18 = vld [vmem:[%s17004_s26 + $0x110] sm:$0xff] }
 0xdfd   : > { %12186 = vmatprep.subr.mxu1 %v14752_v0 }
 0xdfe   : > { %12187 = vmatpush3.msra.mxu1 %v5792_v19  ;;  %v10101_v19 = vld [vmem:[%s17004_s26 + $0x108] sm:$0xff] }
 0xdff   : > { %12188 = vmatprep.subr.mxu1 %v14752_v0 }
 0xe00   : > { %12189 = vmatpush3.msra.mxu1 %v5791_v20  ;;  %v10100_v20 = vld [vmem:[%s17004_s26 + $0x100] sm:$0xff] }
 0xe01   : > { %12190 = vmatprep.subr.mxu1 %v14752_v0 }
 0xe02   : > { %12191 = vmatpush3.msra.mxu1 %v5790_v21  ;;  %v10148_v21 = vld [vmem:[%s17005_s22 + $0x178] sm:$0xff] }
 0xe03   : > { %12192 = vmatprep.subr.mxu1 %v14752_v0  ;;  %12342 = vmatpush3.msra.mxu0 %v10148_v21 }
 0xe04   : > { %12193 = vmatpush3.msra.mxu1 %v5789_v22  ;;  %v6270_v22 = vld [vmem:[%s17005_s22 + $0x78] sm:$0xff]  ;;  %12343 = vmatprep.subr.mxu0 %v14752_v0 }
 0xe05   : > { %12194 = vmatprep.subr.mxu1 %v14752_v0 }
 0xe06   : > { %12195 = vmatpush3.msra.mxu1 %v5788_v23  ;;  %v10147_v23 = vld [vmem:[%s17005_s22 + $0x170] sm:$0xff] }
 0xe07   : > { %12196 = vmatprep.subr.mxu1 %v14752_v0  ;;  %12344 = vmatpush3.msra.mxu0 %v10147_v23  ;;  %v6532_v23 = vld [vmem:[%s17005_s22 + $0xd0] sm:$0xff] }
 0xe08   : > { %12197 = vmatpush3.msra.mxu1 %v5787_v25  ;;  %v6269_v25 = vld [vmem:[%s17005_s22 + $0x70] sm:$0xff]  ;;  %12345 = vmatprep.subr.mxu0 %v14752_v0 }
 0xe09   : > { %12236 = vmatprep.subr.mxu1 %v14752_v0 }
 0xe50   : > { %v5687_v28 = vpop.f32.mrf.mxu1 }
 0xe51   : > { %v5617_v26 = vpop.f32.mrf.mxu0 }
 0xe52   : > { %v12130_v30 = vpop.f32.mrf.mxu1  ;;  %v5688_v24 = vadd.f32 %v5687_v28, %v5617_v26  ;;  %v10146_v26 = vld [vmem:[%s17005_s22 + $0x168] sm:$0xff] }
 0xe53   : > { %v12095_v29 = vpop.f32.mrf.mxu0  ;;  %v6268_v28 = vld [vmem:[%s17005_s22 + $0x68] sm:$0xff]  ;;  %v6267_v30 = vld [vmem:[%s17005_s22 + $0x60] sm:$0xff]  ;;  %12346 = vmatpush3.msra.mxu0 %v10146_v26 }
 0xe54   : > { %v10145_v29 = vld [vmem:[%s17005_s22 + $0x160] sm:$0xff]  ;;  %12347 = vmatprep.subr.mxu0 %v14752_v0  ;;  %v6531_v26 = vld [vmem:[%s17005_s22 + $0xc8] sm:$0xff] }
 0xe55   : > { %12348 = vmatpush3.msra.mxu0 %v10145_v29  ;;  %v6530_v29 = vld [vmem:[%s17005_s22 + $0xc0] sm:$0xff] }
 0xe56   : > { %12349 = vmatprep.subr.mxu0 %v14752_v0 }
 0xe71   : > { %v5775_v31 = vpop.f32.mrf.mxu0 }
 0xe72   : > { %v5779_v32 = vadd.f32 %v5775_v31, %v5688_v24  ;;  %v10144_v24 = vld [vmem:[%s17005_s22 + $0x158] sm:$0xff] }
 0xe73   : > { %v12165_v33 = vpop.f32.mrf.mxu0  ;;  %v6266_v31 = vld [vmem:[%s17005_s22 + $0x58] sm:$0xff]  ;;  %12350 = vmatpush3.msra.mxu0 %v10144_v24 }
 0xe74   : > { %v5780_v34 = vsub.f32 0.0, %v5779_v32  ;;  %v10143_v32 = vld [vmem:[%s17005_s22 + $0x150] sm:$0xff]  ;;  %12351 = vmatprep.subr.mxu0 %v14752_v0  ;;  %v6529_v24 = vld [vmem:[%s17005_s22 + $0xb8] sm:$0xff] }
 0xe75   : > { %v6265_v33 = vld [vmem:[%s17005_s22 + $0x50] sm:$0xff]  ;;  %12352 = vmatpush3.msra.mxu0 %v10143_v32 }
 0xe76   : > { %v5781_v35 = vmul.f32 1.442695, %v5780_v34  ;;  %12353 = vmatprep.subr.mxu0 %v14752_v0  ;;  %v10142_v34 = vld [vmem:[%s17005_s22 + $0x148] sm:$0xff]  ;;  %v6528_v32 = vld [vmem:[%s17005_s22 + $0xb0] sm:$0xff] }
 0xe77   : > { %12354 = vmatpush3.msra.mxu0 %v10142_v34  ;;  %v6527_v34 = vld [vmem:[%s17005_s22 + $0xa8] sm:$0xff] }
 0xe78   : > { %13446 = vpow2.f32 %v5781_v35  ;;  %12355 = vmatprep.subr.mxu0 %v14752_v0  ;;  %v10141_v35 = vld [vmem:[%s17005_s22 + $0x140] sm:$0xff] }
 0xe79   : > { %12356 = vmatpush3.msra.mxu0 %v10141_v35  ;;  %v10150_v35 = vld [vmem:[%s17005_s22 + $0x208] sm:$0xff] }
 0xe7a   : > { %12357 = vmatprep.subr.mxu0 %v14752_v0 }
 0xe85   : > { %v13447_v36 = vpop.eup %13446 }
 0xe86   : > { %v5783_v37 = vadd.f32 1.0, %v13447_v36  ;;  %v10140_v36 = vld [vmem:[%s17005_s22 + $0x138] sm:$0xff] }
 0xe87   : > { %12358 = vmatpush3.msra.mxu0 %v10140_v36  ;;  %v6526_v36 = vld [vmem:[%s17005_s22 + $0xa0] sm:$0xff] }
 0xe88   : > { %13448 = vrcp.f32 %v5783_v37  ;;  %12359 = vmatprep.subr.mxu0 %v14752_v0  ;;  %v10139_v37 = vld [vmem:[%s17005_s22 + $0x130] sm:$0xff] }
 0xe89   : > { %12360 = vmatpush3.msra.mxu0 %v10139_v37  ;;  %v10149_v37 = vld [vmem:[%s17005_s22 + $0x200] sm:$0xff] }
 0xe8a   : > { %12361 = vmatprep.subr.mxu0 %v14752_v0 }
 0xe91   : > { %v16275_v38 = vpop.f32.mrf.mxu0 }
 0xe93   : > { %v12235_v39 = vpop.f32.mrf.mxu0 }
 0xe94   : > { %v6264_v39 = vld [vmem:[%s17005_s22 + $0x48] sm:$0xff] }
 0xe95   : > { %v13449_v41 = vpop.eup %13448 }
 0xe96   : > { %v5786_v43 = vmul.f32 %v13449_v41, %v16164_v13  ;;  %v5891_v13 = vld [vmem:[%s17004_s26 + $0x58] sm:$0xff]  ;;  %v10138_v41 = vld [vmem:[%s17005_s22 + $0x128] sm:$0xff] }
 0xe97   : > { %12362 = vmatpush3.msra.mxu0 %v10138_v41  ;;  %v6524_v41 = vld [vmem:[%s17005_s22 + $0x90] sm:$0xff] }
 0xe98   : > { %12199 = vmatmul.mubr.f32.vlgmr.msra.gmra.mxu1 %v5786_v43  ;;  %v6263_v43 = vld [vmem:[%s17005_s22 + $0x40] sm:$0xff]  ;;  %12363 = vmatprep.subr.mxu0 %v14752_v0 }
 0xe99   : > { %12237 = vmatpush3.msra.mxu1 %v5895_v44  ;;  %12268 = vmatprep.mubr.msk.f32.mxu1 %vm14753_vm6, %v14752_v0  ;;  %v10137_v44 = vld [vmem:[%s17005_s22 + $0x120] sm:$0xff] }
 0xe9a   : > { %12238 = vmatprep.subr.mxu1 %v14752_v0  ;;  %12364 = vmatpush3.msra.mxu0 %v10137_v44  ;;  %v6523_v44 = vld [vmem:[%s17005_s22 + $0x88] sm:$0xff] }
 0xe9b   : > { %12239 = vmatpush3.msra.mxu1 %v5894_v45  ;;  %v6262_v45 = vld [vmem:[%s17005_s22 + $0x38] sm:$0xff]  ;;  %12365 = vmatprep.subr.mxu0 %v14752_v0 }
 0xe9c   : > { %12240 = vmatprep.subr.mxu1 %v14752_v0 }
 0xe9d   : > { %12241 = vmatpush3.msra.mxu1 %v5893_v46  ;;  %v10136_v46 = vld [vmem:[%s17005_s22 + $0x118] sm:$0xff] }
 0xe9e   : > { %12242 = vmatprep.subr.mxu1 %v14752_v0  ;;  %12366 = vmatpush3.msra.mxu0 %v10136_v46  ;;  %v6522_v46 = vld [vmem:[%s17005_s22 + $0x80] sm:$0xff] }
 0xe9f   : > { %12243 = vmatpush3.msra.mxu1 %v5892_v47  ;;  %v6261_v47 = vld [vmem:[%s17005_s22 + $0x30] sm:$0xff]  ;;  %12367 = vmatprep.subr.mxu0 %v14752_v0 }
 0xea0   : > { %12244 = vmatprep.subr.mxu1 %v14752_v0 }
 0xea1   : > { %12245 = vmatpush3.msra.mxu1 %v5891_v13  ;;  %v10135_v13 = vld [vmem:[%s17005_s22 + $0x110] sm:$0xff] }
 0xea2   : > { %12246 = vmatprep.subr.mxu1 %v14752_v0  ;;  %12368 = vmatpush3.msra.mxu0 %v10135_v13  ;;  %v10196_v13 = vld [vmem:[%s17005_s22 + $0x2f8] sm:$0xff] }
 0xea3   : > { %12247 = vmatpush3.msra.mxu1 %v5890_v48  ;;  %v6260_v48 = vld [vmem:[%s17005_s22 + $0x28] sm:$0xff]  ;;  %12369 = vmatprep.subr.mxu0 %v14752_v0 }
 0xea4   : > { %12248 = vmatprep.subr.mxu1 %v14752_v0 }
 0xea5   : > { %12249 = vmatpush3.msra.mxu1 %v5889_v49  ;;  %v10134_v49 = vld [vmem:[%s17005_s22 + $0x108] sm:$0xff] }
 0xea6   : > { %12250 = vmatprep.subr.mxu1 %v14752_v0  ;;  %12370 = vmatpush3.msra.mxu0 %v10134_v49  ;;  %v10195_v49 = vld [vmem:[%s17005_s22 + $0x2f0] sm:$0xff] }
 0xea7   : > { %12251 = vmatpush3.msra.mxu1 %v5888_v50  ;;  %v6259_v50 = vld [vmem:[%s17005_s22 + $0x20] sm:$0xff]  ;;  %12371 = vmatprep.subr.mxu0 %v14752_v0 }
 0xea8   : > { %12252 = vmatprep.subr.mxu1 %v14752_v0 }
 0xea9   : > { %12253 = vmatpush3.msra.mxu1 %v5887_v52  ;;  %v10133_v52 = vld [vmem:[%s17005_s22 + $0x100] sm:$0xff] }
 0xeaa   : > { %12254 = vmatprep.subr.mxu1 %v14752_v0  ;;  %12372 = vmatpush3.msra.mxu0 %v10133_v52  ;;  %v10194_v52 = vld [vmem:[%s17005_s22 + $0x2e8] sm:$0xff] }
 0xeab   : > { %12255 = vmatpush3.msra.mxu1 %v5886_v53  ;;  %v6258_v53 = vld [vmem:[%s17005_s22 + $0x18] sm:$0xff]  ;;  %12411 = vmatprep.subr.mxu0 %v14752_v0 }
 0xeac   : > { %12256 = vmatprep.subr.mxu1 %v14752_v0 }
 0xead   : > { %12257 = vmatpush3.msra.mxu1 %v5885_v54  ;;  %v6257_v54 = vld [vmem:[%s17005_s22 + $0x10] sm:$0xff] }
 0xeae   : > { %12258 = vmatprep.subr.mxu1 %v14752_v0 }
 0xeaf   : > { %12259 = vmatpush3.msra.mxu1 %v5884_v56  ;;  %v6256_v56 = vld [vmem:[%s17005_s22 + $0x8] sm:$0xff] }
 0xeb0   : > { %12260 = vmatprep.subr.mxu1 %v14752_v0 }
 0xeb1   : > { %v16306_v59 = vpop.f32.mrf.mxu0  ;;  %12261 = vmatpush3.msra.mxu1 %v5883_v57  ;;  %v6255_v57 = vld [vmem:[%s17005_s22] sm:$0xff] }
 0xeb2   : > { %12262 = vmatprep.subr.mxu1 %v14752_v0 }
 0xeb3   : > { %v12305_v61 = vpop.f32.mrf.mxu0  ;;  %12263 = vmatpush3.msra.mxu1 %v5882_v58 }
 0xeb4   : > { %12264 = vmatprep.subr.mxu1 %v14752_v0 }
 0xeb5   : > { %12265 = vmatpush3.msra.mxu1 %v5881_v60  ;;  %v10099_v60 = vld [vmem:[#allocation44] ss:$0 sm:$0xff] }
 0xeb6   : > { %12266 = vmatprep.subr.mxu1 %v14752_v0 }
 0xeb7   : > { %12267 = vmatpush3.msra.mxu1 %v5880_v62 }
 0xeb8   : > { %12306 = vmatprep.subr.mxu1 %v14752_v0 }
 0xf58   : > { %v5876_v1 = vpop.f32.mrf.mxu1 }
 0xf59   : > { %v5877_v2 = vadd.f32 %v10098_v63, %v5876_v1 }
 0xf5a   : > { %v12200_v4 = vpop.f32.mrf.mxu1 }
 0xf5b   : > { %12269 = vmatmul.mubr.f32.vlgmr.msra.gmra.mxu1 %v5877_v2 }
 0xf5c   : > { %12307 = vmatpush3.msra.mxu1 %v10115_v3  ;;  %12338 = vmatprep.mubr.msk.f32.mxu1 %vm14753_vm6, %v14752_v0 }
 0xf5d   : > { %12308 = vmatprep.subr.mxu1 %v14752_v0 }
 0xf5e   : > { %12309 = vmatpush3.msra.mxu1 %v10114_v5 }
 0xf5f   : > { %12310 = vmatprep.subr.mxu1 %v14752_v0 }
 0xf60   : > { %12311 = vmatpush3.msra.mxu1 %v10113_v6  ;;  %v10163_v6 = vld [vmem:[%s17005_s22 + $0x270] sm:$0xff] }
 0xf61   : > { %12312 = vmatprep.subr.mxu1 %v14752_v0 }
 0xf62   : > { %12313 = vmatpush3.msra.mxu1 %v10112_v7  ;;  %v10161_v7 = vld [vmem:[%s17005_s22 + $0x260] sm:$0xff] }
 0xf63   : > { %12314 = vmatprep.subr.mxu1 %v14752_v0 }
 0xf64   : > { %12315 = vmatpush3.msra.mxu1 %v10111_v8  ;;  %v6537_v8 = vld [vmem:[%s17005_s22 + $0xf8] sm:$0xff] }
 0xf65   : > { %12316 = vmatprep.subr.mxu1 %v14752_v0 }
 0xf66   : > { %12317 = vmatpush3.msra.mxu1 %v10110_v9  ;;  %v10160_v9 = vld [vmem:[%s17005_s22 + $0x258] sm:$0xff] }
 0xf67   : > { %12318 = vmatprep.subr.mxu1 %v14752_v0 }
 0xf68   : > { %12319 = vmatpush3.msra.mxu1 %v10109_v10 }
 0xf69   : > { %12320 = vmatprep.subr.mxu1 %v14752_v0 }
 0xf6a   : > { %12321 = vmatpush3.msra.mxu1 %v10108_v11 }
 0xf6b   : > { %12322 = vmatprep.subr.mxu1 %v14752_v0 }
 0xf6c   : > { %12323 = vmatpush3.msra.mxu1 %v10107_v55  ;;  %v6536_v55 = vld [vmem:[%s17005_s22 + $0xf0] sm:$0xff] }
 0xf6d   : > { %12324 = vmatprep.subr.mxu1 %v14752_v0 }
 0xf6e   : > { %12325 = vmatpush3.msra.mxu1 %v10106_v12  ;;  %v10159_v12 = vld [vmem:[%s17005_s22 + $0x250] sm:$0xff] }
 0xf6f   : > { %12326 = vmatprep.subr.mxu1 %v14752_v0 }
 0xf70   : > { %12327 = vmatpush3.msra.mxu1 %v10105_v14  ;;  %v6535_v14 = vld [vmem:[%s17005_s22 + $0xe8] sm:$0xff] }
 0xf71   : > { %12328 = vmatprep.subr.mxu1 %v14752_v0 }
 0xf72   : > { %12329 = vmatpush3.msra.mxu1 %v10104_v15  ;;  %v10158_v15 = vld [vmem:[%s17005_s22 + $0x248] sm:$0xff] }
 0xf73   : > { %12330 = vmatprep.subr.mxu1 %v14752_v0 }
 0xf74   : > { %12331 = vmatpush3.msra.mxu1 %v10103_v17  ;;  %v6534_v17 = vld [vmem:[%s17005_s22 + $0xe0] sm:$0xff] }
 0xf75   : > { %12332 = vmatprep.subr.mxu1 %v14752_v0 }
 0xf76   : > { %12333 = vmatpush3.msra.mxu1 %v10102_v18  ;;  %v10157_v18 = vld [vmem:[%s17005_s22 + $0x240] sm:$0xff] }
 0xf77   : > { %12334 = vmatprep.subr.mxu1 %v14752_v0 }
 0xf78   : > { %12335 = vmatpush3.msra.mxu1 %v10101_v19  ;;  %v6533_v19 = vld [vmem:[%s17005_s22 + $0xd8] sm:$0xff] }
 0xf79   : > { %12336 = vmatprep.subr.mxu1 %v14752_v0 }
 0xf7a   : > { %12337 = vmatpush3.msra.mxu1 %v10100_v20  ;;  %v10156_v20 = vld [vmem:[%s17005_s22 + $0x238] sm:$0xff] }
 0xf7b   : > { %12339 = vmatmul.mubr.f32.vlgmr.msra.gmra.mxu1 %v5877_v2  ;;  %12376 = vmatprep.subr.mxu1 %v14752_v0 }
 0xf7c   : > { %12408 = vmatprep.mubr.msk.f32.mxu1 %vm14753_vm6, %v14752_v0  ;;  %12377 = vmatpush3.msra.mxu1 %v6270_v22 }
 0xf7d   : > { %12378 = vmatprep.subr.mxu1 %v14752_v0 }
 0xf7e   : > { %12379 = vmatpush3.msra.mxu1 %v6269_v25  ;;  %v10155_v25 = vld [vmem:[%s17005_s22 + $0x230] sm:$0xff] }
 0xf7f   : > { %12380 = vmatprep.subr.mxu1 %v14752_v0 }
 0xf80   : > { %12381 = vmatpush3.msra.mxu1 %v6268_v28  ;;  %v10154_v28 = vld [vmem:[%s17005_s22 + $0x228] sm:$0xff] }
 0xf81   : > { %12382 = vmatprep.subr.mxu1 %v14752_v0 }
 0xf82   : > { %12383 = vmatpush3.msra.mxu1 %v6267_v30  ;;  %v10153_v30 = vld [vmem:[%s17005_s22 + $0x220] sm:$0xff] }
 0xf83   : > { %12384 = vmatprep.subr.mxu1 %v14752_v0 }
 0xf84   : > { %12385 = vmatpush3.msra.mxu1 %v6266_v31  ;;  %v10152_v31 = vld [vmem:[%s17005_s22 + $0x218] sm:$0xff] }
 0xf85   : > { %12386 = vmatprep.subr.mxu1 %v14752_v0 }
 0xf86   : > { %12387 = vmatpush3.msra.mxu1 %v6265_v33  ;;  %v10151_v33 = vld [vmem:[%s17005_s22 + $0x210] sm:$0xff] }
 0xf87   : > { %12388 = vmatprep.subr.mxu1 %v14752_v0 }
 0xf88   : > { %12389 = vmatpush3.msra.mxu1 %v6264_v39  ;;  %v6525_v39 = vld [vmem:[%s17005_s22 + $0x98] sm:$0xff] }
 0xf89   : > { %12390 = vmatprep.subr.mxu1 %v14752_v0 }
 0xf8a   : > { %12391 = vmatpush3.msra.mxu1 %v6263_v43  ;;  %v10180_v43 = vld [vmem:[%s17005_s22 + $0x1f8] sm:$0xff] }
 0xf8b   : > { %12392 = vmatprep.subr.mxu1 %v14752_v0 }
 0xf8c   : > { %12393 = vmatpush3.msra.mxu1 %v6262_v45  ;;  %v10179_v45 = vld [vmem:[%s17005_s22 + $0x1f0] sm:$0xff] }
 0xf8d   : > { %12394 = vmatprep.subr.mxu1 %v14752_v0 }
 0xf8e   : > { %12395 = vmatpush3.msra.mxu1 %v6261_v47  ;;  %v10178_v47 = vld [vmem:[%s17005_s22 + $0x1e8] sm:$0xff] }
 0xf8f   : > { %12396 = vmatprep.subr.mxu1 %v14752_v0 }
 0xf90   : > { %12397 = vmatpush3.msra.mxu1 %v6260_v48  ;;  %v10177_v48 = vld [vmem:[%s17005_s22 + $0x1e0] sm:$0xff] }
 0xf91   : > { %12398 = vmatprep.subr.mxu1 %v14752_v0 }
 0xf92   : > { %12399 = vmatpush3.msra.mxu1 %v6259_v50  ;;  %v10176_v50 = vld [vmem:[%s17005_s22 + $0x1d8] sm:$0xff] }
 0xf93   : > { %12400 = vmatprep.subr.mxu1 %v14752_v0 }
 0xf94   : > { %12401 = vmatpush3.msra.mxu1 %v6258_v53  ;;  %v10175_v53 = vld [vmem:[%s17005_s22 + $0x1d0] sm:$0xff] }
 0xf95   : > { %12402 = vmatprep.subr.mxu1 %v14752_v0 }
 0xf96   : > { %12403 = vmatpush3.msra.mxu1 %v6257_v54  ;;  %v10193_v54 = vld [vmem:[%s17005_s22 + $0x2e0] sm:$0xff] }
 0xf97   : > { %12404 = vmatprep.subr.mxu1 %v14752_v0 }
 0xf98   : > { %12405 = vmatpush3.msra.mxu1 %v6256_v56  ;;  %v10174_v56 = vld [vmem:[%s17005_s22 + $0x1c8] sm:$0xff] }
 0xf99   : > { %12406 = vmatprep.subr.mxu1 %v14752_v0 }
 0xf9a   : > { %12407 = vmatpush3.msra.mxu1 %v6255_v57  ;;  %v10192_v57 = vld [vmem:[%s17005_s22 + $0x2d8] sm:$0xff] }
 0xf9b   : > { %12446 = vmatprep.subr.mxu1 %v14752_v0 }
0x101b   : > { %v6048_v58 = vpop.f32.mrf.mxu1 }
0x101c   : > { %v6049_v61 = vadd.f32 %v6048_v58, %v16275_v38  ;;  %v10164_v38 = vld [vmem:[%s17005_s22 + $0x278] sm:$0xff]  ;;  %v10173_v58 = vld [vmem:[%s17005_s22 + $0x1c0] sm:$0xff] }
0x101d   : > { %v12270_v62 = vpop.f32.mrf.mxu1 }
0x101e   : > { %v6059_v63 = vadd.f32 %v10099_v60, %v6049_v61  ;;  %v10172_v61 = vld [vmem:[%s17005_s22 + $0x1b8] sm:$0xff]  ;;  %v10190_v62 = vld [vmem:[%s17005_s22 + $0x2c8] sm:$0xff] }
0x1020   : > { %6060 = vst [vmem:[#allocation2] sm:$0x1] %v6059_v63  ;;  %6061 = vst [vmem:[#allocation2 + $0x1] sm:$0x2] %v6059_v63 }
0x1021   : > { %6062 = vst [vmem:[#allocation2 + $0x2] sm:$0x4] %v6059_v63  ;;  %6063 = vst [vmem:[#allocation2 + $0x3] sm:$0x8] %v6059_v63  ;;  %v10171_v63 = vld [vmem:[%s17005_s22 + $0x1b0] sm:$0xff] }
0x103b   : > { %v6233_v1 = vpop.f32.mrf.mxu1 }
0x103c   : > { %v6234_v2 = vadd.f32 %v6233_v1, %v16306_v59  ;;  %v10162_v59 = vld [vmem:[%s17005_s22 + $0x268] sm:$0xff]  ;;  %v10189_v1 = vld [vmem:[%s17005_s22 + $0x2c0] sm:$0xff] }
0x103d   : > { %v12340_v3 = vpop.f32.mrf.mxu1 }
0x103e   : > { %v6244_v4 = vadd.f32 %v10099_v60, %v6234_v2  ;;  %v10191_v60 = vld [vmem:[%s17005_s22 + $0x2d0] sm:$0xff]  ;;  %v10170_v2 = vld [vmem:[%s17005_s22 + $0x1a8] sm:$0xff]  ;;  %v10188_v3 = vld [vmem:[%s17005_s22 + $0x2b8] sm:$0xff] }
0x1040   : > { %6245 = vst [vmem:[#allocation2 + $0x1] sm:$0x1] %v6244_v4  ;;  %6246 = vst [vmem:[#allocation2 + $0x2] sm:$0x2] %v6244_v4 }
0x1041   : > { %6247 = vst [vmem:[#allocation2 + $0x3] sm:$0x4] %v6244_v4  ;;  %6248 = vst [vmem:[#allocation2 + $0x4] sm:$0x8] %v6244_v4  ;;  %v10169_v4 = vld [vmem:[%s17005_s22 + $0x1a0] sm:$0xff] }
0x1048   : > { %v6249_v5 = vld [vmem:[#allocation2] sm:$0xff] }
0x1049   : > { %6251 = vst [vmem:[#allocation2] sm:$0x1] %v14752_v0  ;;  %6253 = vst [vmem:[#allocation2 + $0x1] sm:$0xff] %v6249_v5  ;;  %12374 = vmatmul.mubr.f32.vlgmr.msra.gmra.mxu0 %v6249_v5  ;;  %v10168_v5 = vld [vmem:[%s17005_s22 + $0x198] sm:$0xff] }
0x104a   : > { %12412 = vmatpush3.msra.mxu0 %v10164_v38  ;;  %12443 = vmatprep.mubr.msk.f32.mxu0 %vm14753_vm6, %v14752_v0  ;;  %v10187_v38 = vld [vmem:[%s17005_s22 + $0x2b0] sm:$0xff] }
0x104b   : > { %12413 = vmatprep.subr.mxu0 %v14752_v0 }
0x104c   : > { %12414 = vmatpush3.msra.mxu0 %v10163_v6  ;;  %v10186_v6 = vld [vmem:[%s17005_s22 + $0x2a8] sm:$0xff] }
0x104d   : > { %12415 = vmatprep.subr.mxu0 %v14752_v0 }
0x104e   : > { %12416 = vmatpush3.msra.mxu0 %v10162_v59  ;;  %v10167_v59 = vld [vmem:[%s17005_s22 + $0x190] sm:$0xff] }
0x104f   : > { %12417 = vmatprep.subr.mxu0 %v14752_v0 }
0x1050   : > { %v6254_v10 = vld [vmem:[#allocation2] sm:$0xff]  ;;  %12418 = vmatpush3.msra.mxu0 %v10161_v7 }
0x1051   : > { %v16428_v11 = vld [vmem:[#allocation2 + $0x2] sm:$0xff]  ;;  %6518 = vst [vmem:[#allocation2] sm:$0x1] %v14752_v0  ;;  %12409 = vmatmul.mubr.f32.vlgmr.msra.gmra.mxu1 %v6254_v10  ;;  %12419 = vmatprep.subr.mxu0 %v14752_v0 }
0x1052   : > { %6519 = vst [vmem:[#allocation2 + $0x9] sm:$0x1] %v14752_v0  ;;  %6520 = vst [vmem:[#allocation2 + $0x1] sm:$0xff] %v15914_v51  ;;  %12447 = vmatpush3.msra.mxu1 %v6537_v8  ;;  %12420 = vmatpush3.msra.mxu0 %v10160_v9  ;;  %v10185_v7 = vld [vmem:[%s17005_s22 + $0x2a0] sm:$0xff]  ;;  %v10166_v8 = vld [vmem:[%s17005_s22 + $0x188] sm:$0xff] }
0x1053   : > { %12448 = vmatprep.subr.mxu1 %v14752_v0  ;;  %12421 = vmatprep.subr.mxu0 %v14752_v0  ;;  %v10184_v9 = vld [vmem:[%s17005_s22 + $0x298] sm:$0xff]  ;;  %v10165_v10 = vld [vmem:[%s17005_s22 + $0x180] sm:$0xff] }
0x1054   : > { %12449 = vmatpush3.msra.mxu1 %v6536_v55  ;;  %12422 = vmatpush3.msra.mxu0 %v10159_v12  ;;  %v10182_v55 = vld [vmem:[%s17005_s22 + $0x288] sm:$0xff]  ;;  %v10181_v12 = vld [vmem:[%s17005_s22 + $0x280] sm:$0xff] }
0x1055   : > { %12450 = vmatprep.subr.mxu1 %v14752_v0  ;;  %12423 = vmatprep.subr.mxu0 %v14752_v0 }
0x1056   : > { %12451 = vmatpush3.msra.mxu1 %v6535_v14  ;;  %12424 = vmatpush3.msra.mxu0 %v10158_v15  ;;  %v6815_v14 = vld [vmem:[#allocation47 + $0x78] sm:$0xff] }
0x1057   : > { %12452 = vmatprep.subr.mxu1 %v14752_v0  ;;  %12425 = vmatprep.subr.mxu0 %v14752_v0  ;;  %v6805_v15 = vld [vmem:[#allocation47 + $0x38] sm:$0xff] }
0x1058   : > { %12453 = vmatpush3.msra.mxu1 %v6534_v17  ;;  %12426 = vmatpush3.msra.mxu0 %v10157_v18  ;;  %v6804_v17 = vld [vmem:[#allocation47 + $0x30] sm:$0xff]  ;;  %v6813_v18 = vld [vmem:[#allocation47 + $0x68] sm:$0xff] }
0x1059   : > { %v16448_v21 = vld [vmem:[#allocation2] sm:$0xff]  ;;  %12454 = vmatprep.subr.mxu1 %v14752_v0  ;;  %12427 = vmatprep.subr.mxu0 %v14752_v0 }
0x105a   : > { %v16450_v22 = vld [vmem:[#allocation2 + $0x2] sm:$0xff]  ;;  %6794 = vst.msk [vmem:[#allocation2] sm:$0x1] %vm2591_vm3, %v14752_v0  ;;  %12455 = vmatpush3.msra.mxu1 %v6533_v19  ;;  %12428 = vmatpush3.msra.mxu0 %v10156_v20  ;;  %v6803_v19 = vld [vmem:[#allocation47 + $0x28] sm:$0xff] }
0x105b   : > { %6795 = vst.msk [vmem:[#allocation2 + $0x9] sm:$0x1] %vm2591_vm3, %v14752_v0  ;;  %12456 = vmatprep.subr.mxu1 %v14752_v0  ;;  %12429 = vmatprep.subr.mxu0 %v14752_v0  ;;  %v6812_v20 = vld [vmem:[#allocation47 + $0x60] sm:$0xff] }
0x105c   : > { %12457 = vmatpush3.msra.mxu1 %v6532_v23  ;;  %12430 = vmatpush3.msra.mxu0 %v10155_v25  ;;  %v6801_v23 = vld [vmem:[#allocation47 + $0x18] sm:$0xff]  ;;  %v6810_v25 = vld [vmem:[#allocation47 + $0x50] sm:$0xff] }
0x105d   : > { %12458 = vmatprep.subr.mxu1 %v14752_v0  ;;  %12431 = vmatprep.subr.mxu0 %v14752_v0 }
0x105e   : > { %12459 = vmatpush3.msra.mxu1 %v6531_v26  ;;  %12432 = vmatpush3.msra.mxu0 %v10154_v28  ;;  %v6800_v26 = vld [vmem:[#allocation47 + $0x10] sm:$0xff]  ;;  %v6809_v28 = vld [vmem:[#allocation47 + $0x48] sm:$0xff] }
0x105f   : > { %12460 = vmatprep.subr.mxu1 %v14752_v0  ;;  %12433 = vmatprep.subr.mxu0 %v14752_v0 }
0x1060   : > { %12461 = vmatpush3.msra.mxu1 %v6530_v29  ;;  %12434 = vmatpush3.msra.mxu0 %v10153_v30  ;;  %v6799_v29 = vld [vmem:[#allocation47 + $0x8] sm:$0xff]  ;;  %v6808_v30 = vld [vmem:[#allocation47 + $0x40] sm:$0xff] }
0x1061   : > { %12462 = vmatprep.subr.mxu1 %v14752_v0  ;;  %12435 = vmatprep.subr.mxu0 %v14752_v0 }
0x1062   : > { %12463 = vmatpush3.msra.mxu1 %v6529_v24  ;;  %12436 = vmatpush3.msra.mxu0 %v10152_v31  ;;  %v6798_v24 = vld [vmem:[#allocation47] sm:$0xff] }
0x1063   : > { %12464 = vmatprep.subr.mxu1 %v14752_v0  ;;  %12437 = vmatprep.subr.mxu0 %v14752_v0 }
0x1064   : > { %12465 = vmatpush3.msra.mxu1 %v6528_v32  ;;  %12438 = vmatpush3.msra.mxu0 %v10151_v33 }
0x1065   : > { %12466 = vmatprep.subr.mxu1 %v14752_v0  ;;  %12439 = vmatprep.subr.mxu0 %v14752_v0 }
0x1066   : > { %12467 = vmatpush3.msra.mxu1 %v6527_v34  ;;  %12440 = vmatpush3.msra.mxu0 %v10150_v35 }
0x1067   : > { %12468 = vmatprep.subr.mxu1 %v14752_v0  ;;  %12441 = vmatprep.subr.mxu0 %v14752_v0 }
0x1068   : > { %12469 = vmatpush3.msra.mxu1 %v6526_v36  ;;  %12442 = vmatpush3.msra.mxu0 %v10149_v37 }
0x1069   : > { %12470 = vmatprep.subr.mxu1 %v14752_v0  ;;  %12478 = vmatprep.mubr.msk.f32.mxu1 %vm14753_vm6, %v14752_v0 }
0x106a   : > { %12471 = vmatpush3.msra.mxu1 %v6525_v39  ;;  %12444 = vmatmul.mubr.f32.vlgmr.msra.gmra.mxu0 %v16428_v11  ;;  %v10183_v11 = vld [vmem:[%s17005_s22 + $0x290] sm:$0xff] }
0x106b   : > { %12472 = vmatprep.subr.mxu1 %v14752_v0  ;;  %12481 = vmatprep.subr.mxu0 %v14752_v0 }
0x106c   : > { %12473 = vmatpush3.msra.mxu1 %v6524_v41  ;;  %12482 = vmatpush3.msra.mxu0 %v10180_v43 }
0x106d   : > { %12474 = vmatprep.subr.mxu1 %v14752_v0  ;;  %12483 = vmatprep.subr.mxu0 %v14752_v0 }
0x106e   : > { %12475 = vmatpush3.msra.mxu1 %v6523_v44  ;;  %12484 = vmatpush3.msra.mxu0 %v10179_v45 }
0x106f   : > { %12476 = vmatprep.subr.mxu1 %v14752_v0  ;;  %12485 = vmatprep.subr.mxu0 %v14752_v0 }
0x1070   : > { %12477 = vmatpush3.msra.mxu1 %v6522_v46  ;;  %12486 = vmatpush3.msra.mxu0 %v10178_v47 }
0x1071   : > { %12479 = vmatmul.mubr.f32.vlgmr.msra.gmra.mxu1 %v16448_v21  ;;  %12516 = vmatprep.subr.mxu1 %v14752_v0  ;;  %v6802_v21 = vld [vmem:[#allocation47 + $0x20] sm:$0xff] }
0x1072   : > { %12517 = vmatpush3.msra.mxu1 %v10196_v13  ;;  %12487 = vmatprep.subr.mxu0 %v14752_v0  ;;  %v10197_v13 = vld [vmem:[#allocation46] ss:$0 sm:$0xff] }
0x1073   : > { %12518 = vmatprep.subr.mxu1 %v14752_v0  ;;  %12488 = vmatpush3.msra.mxu0 %v10177_v48 }
0x1074   : > { %12519 = vmatpush3.msra.mxu1 %v10195_v49  ;;  %12489 = vmatprep.subr.mxu0 %v14752_v0 }
0x1075   : > { %12520 = vmatprep.subr.mxu1 %v14752_v0  ;;  %12490 = vmatpush3.msra.mxu0 %v10176_v50 }
0x1076   : > { %12521 = vmatpush3.msra.mxu1 %v10194_v52  ;;  %12491 = vmatprep.subr.mxu0 %v14752_v0 }
0x1077   : > { %12522 = vmatprep.subr.mxu1 %v14752_v0  ;;  %12492 = vmatpush3.msra.mxu0 %v10175_v53 }
0x1078   : > { %12523 = vmatpush3.msra.mxu1 %v10193_v54  ;;  %12493 = vmatprep.subr.mxu0 %v14752_v0  ;;  %v6971_v54 = vld [vmem:[#allocation47 + $0xb8] sm:$0xff] }
0x1079   : > { %12524 = vmatprep.subr.mxu1 %v14752_v0  ;;  %12494 = vmatpush3.msra.mxu0 %v10174_v56  ;;  %v7057_v56 = vld [vmem:[#allocation50 + $0x18] sm:$0xff] }
0x107a   : > { %12525 = vmatpush3.msra.mxu1 %v10192_v57  ;;  %12495 = vmatprep.subr.mxu0 %v14752_v0 }
0x107b   : > { %12526 = vmatprep.subr.mxu1 %v14752_v0  ;;  %12496 = vmatpush3.msra.mxu0 %v10173_v58 }
0x107c   : > { %12527 = vmatpush3.msra.mxu1 %v10191_v60  ;;  %12497 = vmatprep.subr.mxu0 %v14752_v0 }
0x107d   : > { %12528 = vmatprep.subr.mxu1 %v14752_v0  ;;  %12498 = vmatpush3.msra.mxu0 %v10172_v61  ;;  %v6970_v61 = vld [vmem:[#allocation47 + $0xb0] sm:$0xff] }
0x107e   : > { %12529 = vmatpush3.msra.mxu1 %v10190_v62  ;;  %12499 = vmatprep.subr.mxu0 %v14752_v0  ;;  %v7056_v62 = vld [vmem:[#allocation50 + $0x10] sm:$0xff] }
0x107f   : > { %12530 = vmatprep.subr.mxu1 %v14752_v0  ;;  %12500 = vmatpush3.msra.mxu0 %v10171_v63  ;;  %v6969_v63 = vld [vmem:[#allocation47 + $0xa8] sm:$0xff] }
0x1080   : > { %12531 = vmatpush3.msra.mxu1 %v10189_v1  ;;  %12501 = vmatprep.subr.mxu0 %v14752_v0  ;;  %v7055_v1 = vld [vmem:[#allocation50 + $0x8] sm:$0xff] }
0x1081   : > { %12532 = vmatprep.subr.mxu1 %v14752_v0  ;;  %12502 = vmatpush3.msra.mxu0 %v10170_v2  ;;  %v6968_v2 = vld [vmem:[#allocation47 + $0xa0] sm:$0xff] }
0x1082   : > { %12533 = vmatpush3.msra.mxu1 %v10188_v3  ;;  %12503 = vmatprep.subr.mxu0 %v14752_v0  ;;  %v7054_v3 = vld [vmem:[#allocation50] sm:$0xff] }
0x1083   : > { %12534 = vmatprep.subr.mxu1 %v14752_v0  ;;  %12504 = vmatpush3.msra.mxu0 %v10169_v4  ;;  %v6967_v4 = vld [vmem:[#allocation47 + $0x98] sm:$0xff] }
0x1084   : > { %12535 = vmatpush3.msra.mxu1 %v10187_v38  ;;  %12505 = vmatprep.subr.mxu0 %v14752_v0  ;;  %v6966_v38 = vld [vmem:[#allocation47 + $0x90] sm:$0xff] }
0x1085   : > { %12536 = vmatprep.subr.mxu1 %v14752_v0  ;;  %12506 = vmatpush3.msra.mxu0 %v10168_v5  ;;  %v6965_v5 = vld [vmem:[#allocation47 + $0x88] sm:$0xff] }
0x1086   : > { %12537 = vmatpush3.msra.mxu1 %v10186_v6  ;;  %12507 = vmatprep.subr.mxu0 %v14752_v0  ;;  %v13464_v6 = vld [vmem:[%s15486_s11] sm:$0x1] }
0x1087   : > { %12538 = vmatprep.subr.mxu1 %v14752_v0  ;;  %12508 = vmatpush3.msra.mxu0 %v10167_v59  ;;  %v6964_v59 = vld [vmem:[#allocation47 + $0x80] sm:$0xff] }
0x1088   : > { %12539 = vmatpush3.msra.mxu1 %v10185_v7  ;;  %12509 = vmatprep.subr.mxu0 %v14752_v0  ;;  %v7155_v7 = vld [vmem:[#allocation53 + $0x78] sm:$0xff] }
0x1089   : > { %12540 = vmatprep.subr.mxu1 %v14752_v0  ;;  %12510 = vmatpush3.msra.mxu0 %v10166_v8  ;;  %v7145_v8 = vld [vmem:[#allocation53 + $0x38] sm:$0xff] }
0x108a   : > { %12541 = vmatpush3.msra.mxu1 %v10184_v9  ;;  %12511 = vmatprep.subr.mxu0 %v14752_v0  ;;  %v7154_v9 = vld [vmem:[#allocation53 + $0x70] sm:$0xff] }
0x108b   : > { %12542 = vmatprep.subr.mxu1 %v14752_v0  ;;  %12512 = vmatpush3.msra.mxu0 %v10165_v10  ;;  %v7144_v10 = vld [vmem:[#allocation53 + $0x30] sm:$0xff] }
0x108c   : > { %12543 = vmatpush3.msra.mxu1 %v10183_v11  ;;  %12513 = vmatprep.mubr.msk.f32.mxu0 %vm14753_vm6, %v14752_v0  ;;  %v7153_v11 = vld [vmem:[#allocation53 + $0x68] sm:$0xff] }
0x108d   : > { %12544 = vmatprep.subr.mxu1 %v14752_v0  ;;  %12548 = vmatprep.mubr.msk.f32.mxu1 %vm14753_vm6, %v14752_v0 }
0x108e   : > { %12545 = vmatpush3.msra.mxu1 %v10182_v55  ;;  %12514 = vmatmul.mubr.f32.vlgmr.msra.gmra.mxu0 %v15914_v51  ;;  %v6814_v51 = vld [vmem:[#allocation47 + $0x70] sm:$0xff] }
0x108f   : > { %12546 = vmatprep.subr.mxu1 %v14752_v0  ;;  %12551 = vmatprep.subr.mxu0 %v14752_v0  ;;  %v7143_v55 = vld [vmem:[#allocation53 + $0x28] sm:$0xff] }
0x1090   : > { %12547 = vmatpush3.msra.mxu1 %v10181_v12  ;;  %12567 = vmatprep.mubr.msk.f32.mxu0 %vm14753_vm6, %v14752_v0  ;;  %v7152_v12 = vld [vmem:[#allocation53 + $0x60] sm:$0xff] }
0x1091   : > { %12549 = vmatmul.mubr.f32.vlgmr.msra.gmra.mxu1 %v16450_v22  ;;  %12570 = vmatprep.subr.mxu1 %v14752_v0  ;;  %v6811_v22 = vld [vmem:[#allocation47 + $0x58] sm:$0xff] }
0x1092   : > { %12586 = vmatprep.mubr.msk.f32.mxu1 %vm14753_vm6, %v14752_v0  ;;  %12552 = vmatpush3.msra.mxu0 %v6815_v14  ;;  %v7142_v14 = vld [vmem:[#allocation53 + $0x20] sm:$0xff] }
0x1093   : > { %12553 = vmatprep.subr.mxu0 %v14752_v0  ;;  %12571 = vmatpush3.msra.mxu1 %v6805_v15  ;;  %v7151_v15 = vld [vmem:[#allocation53 + $0x58] sm:$0xff] }
0x1094   : > { %12554 = vmatpush3.msra.mxu0 %v6814_v51  ;;  %12572 = vmatprep.subr.mxu1 %v14752_v0  ;;  %v7141_v51 = vld [vmem:[#allocation53 + $0x18] sm:$0xff] }
0x1095   : > { %12555 = vmatprep.subr.mxu0 %v14752_v0  ;;  %12573 = vmatpush3.msra.mxu1 %v6804_v17  ;;  %v7150_v17 = vld [vmem:[#allocation53 + $0x50] sm:$0xff] }
0x1096   : > { %12556 = vmatpush3.msra.mxu0 %v6813_v18  ;;  %12574 = vmatprep.subr.mxu1 %v14752_v0  ;;  %v7140_v18 = vld [vmem:[#allocation53 + $0x10] sm:$0xff] }
0x1097   : > { %12557 = vmatprep.subr.mxu0 %v14752_v0  ;;  %12575 = vmatpush3.msra.mxu1 %v6803_v19  ;;  %v7149_v19 = vld [vmem:[#allocation53 + $0x48] sm:$0xff] }
0x1098   : > { %12558 = vmatpush3.msra.mxu0 %v6812_v20  ;;  %12576 = vmatprep.subr.mxu1 %v14752_v0  ;;  %v7139_v20 = vld [vmem:[#allocation53 + $0x8] sm:$0xff] }
0x1099   : > { %12559 = vmatprep.subr.mxu0 %v14752_v0  ;;  %12577 = vmatpush3.msra.mxu1 %v6802_v21  ;;  %v7148_v21 = vld [vmem:[#allocation53 + $0x40] sm:$0xff] }
0x109a   : > { %12560 = vmatpush3.msra.mxu0 %v6811_v22  ;;  %12578 = vmatprep.subr.mxu1 %v14752_v0  ;;  %v7138_v22 = vld [vmem:[#allocation53] sm:$0xff] }
0x109b   : > { %12561 = vmatprep.subr.mxu0 %v14752_v0  ;;  %12579 = vmatpush3.msra.mxu1 %v6801_v23 }
0x109c   : > { %12562 = vmatpush3.msra.mxu0 %v6810_v25  ;;  %12580 = vmatprep.subr.mxu1 %v14752_v0 }
0x109d   : > { %12563 = vmatprep.subr.mxu0 %v14752_v0  ;;  %12581 = vmatpush3.msra.mxu1 %v6800_v26 }
0x109e   : > { %12564 = vmatpush3.msra.mxu0 %v6809_v28  ;;  %12582 = vmatprep.subr.mxu1 %v14752_v0 }
0x109f   : > { %12565 = vmatprep.subr.mxu0 %v14752_v0  ;;  %12583 = vmatpush3.msra.mxu1 %v6799_v29 }
0x10a0   : > { %12566 = vmatpush3.msra.mxu0 %v6808_v30  ;;  %12584 = vmatprep.subr.mxu1 %v14752_v0  ;;  %v7058_v30 = vld [vmem:[#allocation52] sm:$0x1] }
0x10a1   : > { %12585 = vmatpush3.msra.mxu1 %v6798_v24  ;;  %12589 = vmatprep.subr.mxu0 %v14752_v0 }
0x10a2   : > { %12608 = vmatprep.subr.mxu1 %v14752_v0 }
0x1109   : > { %v6355_v31 = vpop.f32.mrf.mxu0 }
0x110b   : > { %v12375_v32 = vpop.f32.mrf.mxu0 }
0x1111   : > { %v6425_v33 = vpop.f32.mrf.mxu1 }
0x1112   : > { %v6426_v41 = vadd.f32 %v6425_v33, %v6355_v31  ;;  %v10201_v33 = vld [vmem:[#allocation49] ss:$0 sm:$0xff] }
0x1113   : > { %v12410_v34 = vpop.f32.mrf.mxu1 }
0x112a   : > { %v6513_v35 = vpop.f32.mrf.mxu0 }
0x112b   : > { %v6517_v43 = vadd.f32 %v6513_v35, %v6426_v41 }
0x112c   : > { %v12445_v36 = vpop.f32.mrf.mxu0 }
0x1131   : > { %v6604_v37 = vpop.f32.mrf.mxu1 }
0x1132   : > { %v6608_v44 = vadd.f32 %v6604_v37, %v6517_v43 }
0x1133   : > { %v12480_v39 = vpop.f32.mrf.mxu1 }
0x114e   : > { %v6692_v45 = vpop.f32.mrf.mxu0 }
0x114f   : > { %v6696_v46 = vadd.f32 %v6692_v45, %v6608_v44  ;;  %v7311_v44 = vld [vmem:[#allocation53 + $0xb8] sm:$0xff] }
0x1150   : > { %v12515_v47 = vpop.f32.mrf.mxu0 }
0x1151   : > { %v6780_v48 = vpop.f32.mrf.mxu1  ;;  %v7310_v47 = vld [vmem:[#allocation53 + $0xb0] sm:$0xff] }
0x1152   : > { %v6784_v49 = vadd.f32 %v6780_v48, %v6696_v46  ;;  %v7308_v48 = vld [vmem:[#allocation53 + $0xa0] sm:$0xff] }
0x1153   : > { %v12550_v50 = vpop.f32.mrf.mxu1 }
0x1154   : > { %v6791_v52 = vadd.f32 %v10197_v13, %v6784_v49  ;;  %v7309_v13 = vld [vmem:[#allocation53 + $0xa8] sm:$0xff]  ;;  %v7307_v49 = vld [vmem:[#allocation53 + $0x98] sm:$0xff]  ;;  %v7306_v50 = vld [vmem:[#allocation53 + $0x90] sm:$0xff] }
0x1156   : > { %v6792_v53 = vmax.f32 %v6791_v52, 0.0  ;;  %v7305_v52 = vld [vmem:[#allocation53 + $0x88] sm:$0xff] }
0x1158   : > { %6796 = vst.msk [vmem:[#allocation2 + $0x1] sm:$0xff] %vm2594_vm4, %v6792_v53  ;;  %v7304_v53 = vld [vmem:[#allocation53 + $0x80] sm:$0xff] }
0x115f   : > { %v6806_v57 = vld [vmem:[#allocation2 + $0x1] sm:$0xff] }
0x1160   : > { %v6797_v58 = vld [vmem:[#allocation2] sm:$0xff]  ;;  %12568 = vmatmul.mubr.msk.f32.vlgmr.msra.gmra.mxu0 %vm2594_vm4, %v6806_v57  ;;  %v7495_v57 = vld [vmem:[%s17006_s4 + $0x70] sm:$0xff] }
0x1161   : > { %v6962_v60 = vld [vmem:[#allocation2 + $0x2] sm:$0xff]  ;;  %12587 = vmatmul.mubr.msk.f32.vlgmr.msra.gmra.mxu1 %vm2594_vm4, %v6797_v58  ;;  %7134 = vst.msk [vmem:[#allocation2] sm:$0x1] %vm2591_vm3, %v14752_v0  ;;  %12590 = vmatpush3.msra.mxu0 %v6971_v54  ;;  %v7496_v54 = vld [vmem:[%s17006_s4 + $0x78] sm:$0xff] }
0x1162   : > { %7135 = vst.msk [vmem:[#allocation2 + $0x9] sm:$0x1] %vm2591_vm3, %v14752_v0  ;;  %12609 = vmatpush3.msra.mxu1 %v7057_v56  ;;  %12591 = vmatprep.subr.mxu0 %v14752_v0  ;;  %v7494_v58 = vld [vmem:[%s17006_s4 + $0x68] sm:$0xff] }
0x1163   : > { %12610 = vmatprep.subr.mxu1 %v14752_v0  ;;  %12592 = vmatpush3.msra.mxu0 %v6970_v61  ;;  %v7492_v61 = vld [vmem:[%s17006_s4 + $0x58] sm:$0xff] }
0x1164   : > { %12611 = vmatpush3.msra.mxu1 %v7056_v62  ;;  %12593 = vmatprep.subr.mxu0 %v14752_v0  ;;  %v7491_v62 = vld [vmem:[%s17006_s4 + $0x50] sm:$0xff] }
0x1165   : > { %12612 = vmatprep.subr.mxu1 %v14752_v0  ;;  %12594 = vmatpush3.msra.mxu0 %v6969_v63  ;;  %v7490_v63 = vld [vmem:[%s17006_s4 + $0x48] sm:$0xff] }
0x1166   : > { %12613 = vmatpush3.msra.mxu1 %v7055_v1  ;;  %12595 = vmatprep.subr.mxu0 %v14752_v0  ;;  %v7489_v1 = vld [vmem:[%s17006_s4 + $0x40] sm:$0xff] }
0x1167   : > { %12614 = vmatprep.subr.mxu1 %v14752_v0  ;;  %12596 = vmatpush3.msra.mxu0 %v6968_v2  ;;  %v10226_v2 = vld [vmem:[%s17006_s4 + $0xf8] sm:$0xff] }
0x1168   : > { %12605 = vmatprep.mubr.msk.f32.mxu0 %vm14753_vm6, %v14752_v0  ;;  %12597 = vmatprep.subr.mxu0 %v14752_v0 }
0x1169   : > { %12615 = vmatpush3.msra.mxu1 %v7054_v3  ;;  %12598 = vmatpush3.msra.mxu0 %v6967_v4  ;;  %v10225_v3 = vld [vmem:[%s17006_s4 + $0xf0] sm:$0xff]  ;;  %v10224_v4 = vld [vmem:[%s17006_s4 + $0xe8] sm:$0xff] }
0x116a   : > { %12616 = vmatprep.mubr.msk.f32.mxu1 %vm14753_vm6, %v14752_v0  ;;  %12599 = vmatprep.subr.mxu0 %v14752_v0 }
0x116b   : > { %12617 = vmatmul.mubr.msk.f32.vlgmr.msra.gmra.mxu1 %vm2889_vm5, %v13464_v6  ;;  %12600 = vmatpush3.msra.mxu0 %v6966_v38  ;;  %v10223_v38 = vld [vmem:[%s17006_s4 + $0xe0] sm:$0xff]  ;;  %v10221_v6 = vld [vmem:[%s17006_s4 + $0xd0] sm:$0xff] }
0x116c   : > { %12619 = vmatprep.subr.mxu1 %v14752_v0  ;;  %12601 = vmatprep.subr.mxu0 %v14752_v0 }
0x116d   : > { %12635 = vmatprep.mubr.msk.f32.mxu1 %vm14753_vm6, %v14752_v0  ;;  %12602 = vmatpush3.msra.mxu0 %v6965_v5  ;;  %v10222_v5 = vld [vmem:[%s17006_s4 + $0xd8] sm:$0xff] }
0x116e   : > { %12603 = vmatprep.subr.mxu0 %v14752_v0  ;;  %12620 = vmatpush3.msra.mxu1 %v7155_v7  ;;  %v10219_v7 = vld [vmem:[%s17006_s4 + $0xc0] sm:$0xff] }
0x116f   : > { %12604 = vmatpush3.msra.mxu0 %v6964_v59  ;;  %12621 = vmatprep.subr.mxu1 %v14752_v0  ;;  %v10220_v59 = vld [vmem:[%s17006_s4 + $0xc8] sm:$0xff] }
0x1170   : > { %12606 = vmatmul.mubr.msk.f32.vlgmr.msra.gmra.mxu0 %vm2594_vm4, %v6962_v60  ;;  %12638 = vmatprep.subr.mxu0 %v14752_v0  ;;  %v7493_v60 = vld [vmem:[%s17006_s4 + $0x60] sm:$0xff] }
0x1171   : > { %12654 = vmatprep.mubr.msk.f32.mxu0 %vm14753_vm6, %v14752_v0  ;;  %12639 = vmatpush3.msra.mxu0 %v7145_v8  ;;  %v7400_v8 = vld [vmem:[%s17007_s15 + $0x38] sm:$0xff] }
0x1172   : > { %12622 = vmatpush3.msra.mxu1 %v7154_v9  ;;  %12640 = vmatprep.subr.mxu0 %v14752_v0  ;;  %v7399_v9 = vld [vmem:[%s17007_s15 + $0x30] sm:$0xff] }
0x1173   : > { %12623 = vmatprep.subr.mxu1 %v14752_v0  ;;  %12641 = vmatpush3.msra.mxu0 %v7144_v10  ;;  %v7398_v10 = vld [vmem:[%s17007_s15 + $0x28] sm:$0xff] }
0x1174   : > { %12624 = vmatpush3.msra.mxu1 %v7153_v11  ;;  %12642 = vmatprep.subr.mxu0 %v14752_v0  ;;  %v7397_v11 = vld [vmem:[%s17007_s15 + $0x20] sm:$0xff] }
0x1175   : > { %12625 = vmatprep.subr.mxu1 %v14752_v0  ;;  %12643 = vmatpush3.msra.mxu0 %v7143_v55  ;;  %v7396_v55 = vld [vmem:[%s17007_s15 + $0x18] sm:$0xff] }
0x1176   : > { %12626 = vmatpush3.msra.mxu1 %v7152_v12  ;;  %12644 = vmatprep.subr.mxu0 %v14752_v0  ;;  %v7394_v12 = vld [vmem:[%s17007_s15 + $0x8] sm:$0xff] }
0x1177   : > { %12627 = vmatprep.subr.mxu1 %v14752_v0  ;;  %12645 = vmatpush3.msra.mxu0 %v7142_v14  ;;  %v7393_v14 = vld [vmem:[%s17007_s15] sm:$0xff] }
0x1178   : > { %12628 = vmatpush3.msra.mxu1 %v7151_v15  ;;  %12646 = vmatprep.subr.mxu0 %v14752_v0 }
0x1179   : > { %12629 = vmatprep.subr.mxu1 %v14752_v0  ;;  %12647 = vmatpush3.msra.mxu0 %v7141_v51 }
0x117a   : > { %12630 = vmatpush3.msra.mxu1 %v7150_v17  ;;  %12648 = vmatprep.subr.mxu0 %v14752_v0 }
0x117b   : > { %12631 = vmatprep.subr.mxu1 %v14752_v0  ;;  %12649 = vmatpush3.msra.mxu0 %v7140_v18 }
0x117c   : > { %12632 = vmatpush3.msra.mxu1 %v7149_v19  ;;  %12650 = vmatprep.subr.mxu0 %v14752_v0 }
0x117d   : > { %12633 = vmatprep.subr.mxu1 %v14752_v0  ;;  %12651 = vmatpush3.msra.mxu0 %v7139_v20 }
0x117e   : > { %12634 = vmatpush3.msra.mxu1 %v7148_v21  ;;  %12652 = vmatprep.subr.mxu0 %v14752_v0 }
0x117f   : > { %12653 = vmatpush3.msra.mxu0 %v7138_v22  ;;  %12657 = vmatprep.subr.mxu1 %v14752_v0 }
0x1180   : > { %12676 = vmatprep.subr.mxu0 %v14752_v0 }
0x1220   : > { %v6885_v23 = vpop.f32.mrf.mxu0 }
0x1221   : > { %v6958_v25 = vpop.f32.mrf.mxu1 }
0x1222   : > { %v12569_v26 = vpop.f32.mrf.mxu0  ;;  %v6959_v31 = vadd.f32 %v6958_v25, %v6885_v23 }
0x1223   : > { %v12588_v28 = vpop.f32.mrf.mxu1 }
0x122b   : > { %v7125_v29 = vpop.f32.mrf.mxu1 }
0x122c   : > { %v7126_v32 = vadd.f32 %v7125_v29, %v7058_v30 }
0x122d   : > { %v12618_v24 = vpop.f32.mrf.mxu1 }
0x122e   : > { %v7132_v39 = vrot.slane %v7126_v32, %v15495_v27 }
0x1230   : > { %v7041_v34 = vpop.f32.mrf.mxu0 }
0x1231   : > { %v7045_v35 = vadd.f32 %v7041_v34, %v6959_v31  ;;  %v7488_v34 = vld [vmem:[%s17006_s4 + $0x38] sm:$0xff] }
0x1232   : > { %v12607_v36 = vpop.f32.mrf.mxu0 }
0x1233   : > { %v7052_v37 = vadd.f32 %v10201_v33, %v7045_v35  ;;  %v7487_v35 = vld [vmem:[%s17006_s4 + $0x30] sm:$0xff]  ;;  %v7486_v36 = vld [vmem:[%s17006_s4 + $0x28] sm:$0xff] }
0x1235   : > { %v7053_v41 = vmax.f32 %v7052_v37, 0.0  ;;  %v7485_v37 = vld [vmem:[%s17006_s4 + $0x20] sm:$0xff] }
0x1237   : > { %v16637_v43 = vadd.f32 %v7132_v39, %v7053_v41  ;;  %v7484_v39 = vld [vmem:[%s17006_s4 + $0x18] sm:$0xff]  ;;  %v7483_v41 = vld [vmem:[%s17006_s4 + $0x10] sm:$0xff] }
0x1239   : > { %7136 = vst.msk [vmem:[#allocation2 + $0x1] sm:$0xff] %vm2594_vm4, %v16637_v43 }
0x1240   : > { %v7146_v45 = vld [vmem:[#allocation2 + $0x1] sm:$0xff] }
0x1241   : > { %v7137_v46 = vld [vmem:[#allocation2] sm:$0xff]  ;;  %12636 = vmatmul.mubr.msk.f32.vlgmr.msra.gmra.mxu1 %vm2594_vm4, %v7146_v45  ;;  %v10206_v45 = vld [vmem:[#allocation55] ss:$0 sm:$0xff] }
0x1242   : > { %12655 = vmatmul.mubr.msk.f32.vlgmr.msra.gmra.mxu0 %vm2594_vm4, %v7137_v46  ;;  %12658 = vmatpush3.msra.mxu1 %v7311_v44  ;;  %v7302_v56 = vld [vmem:[#allocation2 + $0x2] sm:$0xff] }
0x1243   : > { %12673 = vmatprep.mubr.msk.f32.mxu1 %vm14753_vm6, %v14752_v0  ;;  %12659 = vmatprep.subr.mxu1 %v14752_v0  ;;  %v7481_v44 = vld [vmem:[%s17006_s4] sm:$0xff] }
0x1244   : > { %12692 = vmatprep.mubr.msk.f32.mxu0 %vm14753_vm6, %v14752_v0  ;;  %12660 = vmatpush3.msra.mxu1 %v7310_v47 }
0x1245   : > { %12661 = vmatprep.subr.mxu1 %v14752_v0  ;;  %12677 = vmatpush3.msra.mxu0 %v7400_v8  ;;  %v10230_v8 = vld [vmem:[%s17008_s3 + $0x80] sm:$0xff] }
0x1246   : > { %12662 = vmatpush3.msra.mxu1 %v7309_v13  ;;  %12678 = vmatprep.subr.mxu0 %v14752_v0  ;;  %v10218_v13 = vld [vmem:[%s17006_s4 + $0xb8] sm:$0xff] }
0x1247   : > { %12663 = vmatprep.subr.mxu1 %v14752_v0  ;;  %12679 = vmatpush3.msra.mxu0 %v7399_v9  ;;  %v7848_v9 = vld [vmem:[%s17008_s3] sm:$0xff] }
0x1248   : > { %12664 = vmatpush3.msra.mxu1 %v7308_v48  ;;  %12680 = vmatprep.subr.mxu0 %v14752_v0 }
0x1249   : > { %12665 = vmatprep.subr.mxu1 %v14752_v0  ;;  %12681 = vmatpush3.msra.mxu0 %v7398_v10  ;;  %v10249_v10 = vld [vmem:[%s17008_s3 + $0x138] sm:$0xff] }
0x124a   : > { %12666 = vmatpush3.msra.mxu1 %v7307_v49  ;;  %12682 = vmatprep.subr.mxu0 %v14752_v0  ;;  %v10217_v49 = vld [vmem:[%s17006_s4 + $0xb0] sm:$0xff] }
0x124b   : > { %12667 = vmatprep.subr.mxu1 %v14752_v0  ;;  %12683 = vmatpush3.msra.mxu0 %v7397_v11  ;;  %v8136_v11 = vld [vmem:[%s17008_s3 + $0x78] sm:$0xff] }
0x124c   : > { %12668 = vmatpush3.msra.mxu1 %v7306_v50  ;;  %12684 = vmatprep.subr.mxu0 %v14752_v0  ;;  %v10216_v50 = vld [vmem:[%s17006_s4 + $0xa8] sm:$0xff] }
0x124d   : > { %12669 = vmatprep.subr.mxu1 %v14752_v0  ;;  %12685 = vmatpush3.msra.mxu0 %v7396_v55 }
0x124e   : > { %12670 = vmatpush3.msra.mxu1 %v7305_v52  ;;  %12686 = vmatprep.subr.mxu0 %v14752_v0  ;;  %v10215_v52 = vld [vmem:[%s17006_s4 + $0xa0] sm:$0xff] }
0x124f   : > { %12671 = vmatprep.subr.mxu1 %v14752_v0 }
0x1250   : > { %12672 = vmatpush3.msra.mxu1 %v7304_v53  ;;  %v10214_v53 = vld [vmem:[%s17006_s4 + $0x98] sm:$0xff] }
0x1251   : > { %12674 = vmatmul.mubr.msk.f32.vlgmr.msra.gmra.mxu1 %vm2594_vm4, %v7302_v56  ;;  %12695 = vmatprep.subr.mxu1 %v14752_v0  ;;  %v10212_v56 = vld [vmem:[%s17006_s4 + $0x88] sm:$0xff] }
0x1252   : > { %12696 = vmatpush3.msra.mxu1 %v7496_v54  ;;  %12711 = vmatprep.mubr.msk.f32.mxu1 %vm14753_vm6, %v14752_v0  ;;  %v10213_v54 = vld [vmem:[%s17006_s4 + $0x90] sm:$0xff] }
0x1253   : > { %12697 = vmatprep.subr.mxu1 %v14752_v0 }
0x1254   : > { %12698 = vmatpush3.msra.mxu1 %v7495_v57  ;;  %v10211_v57 = vld [vmem:[%s17006_s4 + $0x80] sm:$0xff] }
0x1255   : > { %12699 = vmatprep.subr.mxu1 %v14752_v0 }
0x1256   : > { %12700 = vmatpush3.msra.mxu1 %v7494_v58  ;;  %v10237_v58 = vld [vmem:[%s17008_s3 + $0xb8] sm:$0xff] }
0x1257   : > { %12701 = vmatprep.subr.mxu1 %v14752_v0 }
0x1258   : > { %12702 = vmatpush3.msra.mxu1 %v7493_v60  ;;  %v7855_v60 = vld [vmem:[%s17008_s3 + $0x38] sm:$0xff] }
0x1259   : > { %12703 = vmatprep.subr.mxu1 %v14752_v0 }
0x125a   : > { %12704 = vmatpush3.msra.mxu1 %v7492_v61  ;;  %v10236_v61 = vld [vmem:[%s17008_s3 + $0xb0] sm:$0xff] }
0x125b   : > { %12705 = vmatprep.subr.mxu1 %v14752_v0 }
0x125c   : > { %12706 = vmatpush3.msra.mxu1 %v7491_v62  ;;  %v7854_v62 = vld [vmem:[%s17008_s3 + $0x30] sm:$0xff] }
0x125d   : > { %12707 = vmatprep.subr.mxu1 %v14752_v0 }
0x125e   : > { %12708 = vmatpush3.msra.mxu1 %v7490_v63  ;;  %v10235_v63 = vld [vmem:[%s17008_s3 + $0xa8] sm:$0xff] }
0x125f   : > { %12709 = vmatprep.subr.mxu1 %v14752_v0 }
0x1260   : > { %12710 = vmatpush3.msra.mxu1 %v7489_v1  ;;  %v7853_v1 = vld [vmem:[%s17008_s3 + $0x28] sm:$0xff] }
0x1261   : > { %12712 = vmatmul.mubr.msk.f32.vlgmr.msra.gmra.mxu1 %vm2594_vm4, %v15587_v16  ;;  %12733 = vmatprep.subr.mxu1 %v14752_v0 }
0x1262   : > { %12734 = vmatpush3.msra.mxu1 %v10226_v2  ;;  %12749 = vmatprep.mubr.msk.f32.mxu1 %vm14753_vm6, %v14752_v0  ;;  %v10234_v2 = vld [vmem:[%s17008_s3 + $0xa0] sm:$0xff] }
0x1263   : > { %12735 = vmatprep.subr.mxu1 %v14752_v0 }
0x1264   : > { %12736 = vmatpush3.msra.mxu1 %v10225_v3  ;;  %v7852_v3 = vld [vmem:[%s17008_s3 + $0x20] sm:$0xff] }
0x1265   : > { %12737 = vmatprep.subr.mxu1 %v14752_v0 }
0x1266   : > { %12738 = vmatpush3.msra.mxu1 %v10224_v4  ;;  %v10233_v4 = vld [vmem:[%s17008_s3 + $0x98] sm:$0xff] }
0x1267   : > { %12739 = vmatprep.subr.mxu1 %v14752_v0 }
0x1268   : > { %12740 = vmatpush3.msra.mxu1 %v10223_v38  ;;  %v7851_v38 = vld [vmem:[%s17008_s3 + $0x18] sm:$0xff] }
0x1269   : > { %12741 = vmatprep.subr.mxu1 %v14752_v0 }
0x126a   : > { %12742 = vmatpush3.msra.mxu1 %v10222_v5  ;;  %v10232_v5 = vld [vmem:[%s17008_s3 + $0x90] sm:$0xff] }
0x126b   : > { %12743 = vmatprep.subr.mxu1 %v14752_v0 }
0x126c   : > { %12744 = vmatpush3.msra.mxu1 %v10221_v6  ;;  %v7850_v6 = vld [vmem:[%s17008_s3 + $0x10] sm:$0xff] }
0x126d   : > { %12745 = vmatprep.subr.mxu1 %v14752_v0 }
0x126e   : > { %12746 = vmatpush3.msra.mxu1 %v10220_v59  ;;  %v10231_v59 = vld [vmem:[%s17008_s3 + $0x88] sm:$0xff] }
0x126f   : > { %12747 = vmatprep.subr.mxu1 %v14752_v0 }
0x1270   : > { %12748 = vmatpush3.msra.mxu1 %v10219_v7  ;;  %v7849_v7 = vld [vmem:[%s17008_s3 + $0x8] sm:$0xff] }
0x1271   : > { %12750 = vmatmul.mubr.msk.f32.vlgmr.msra.gmra.mxu1 %vm2594_vm4, %v15587_v16  ;;  %v7395_v16 = vld [vmem:[%s17007_s15 + $0x10] sm:$0xff]  ;;  %12771 = vmatprep.subr.mxu1 %v10237_v58 }
0x1272   : > { %12687 = vmatpush3.msra.mxu0 %v7395_v16  ;;  %12772 = vmatpush3.msra.mxu1 %v10237_v58  ;;  %v10210_v16 = vld [vmem:[#allocation56] ss:$0 sm:$0xff]  ;;  %v10257_v58 = vld [vmem:[%s17008_s3 + $0xd8] sm:$0xff] }
0x1273   : > { %12688 = vmatprep.subr.mxu0 %v14752_v0  ;;  %12773 = vmatprep.subr.mxu1 %v10236_v61 }
0x1274   : > { %12689 = vmatpush3.msra.mxu0 %v7394_v12  ;;  %12774 = vmatpush3.msra.mxu1 %v10236_v61  ;;  %v10256_v61 = vld [vmem:[%s17008_s3 + $0xd0] sm:$0xff] }
0x1275   : > { %12690 = vmatprep.subr.mxu0 %v14752_v0  ;;  %12775 = vmatprep.subr.mxu1 %v10235_v63 }
0x1276   : > { %12691 = vmatpush3.msra.mxu0 %v7393_v14  ;;  %12776 = vmatpush3.msra.mxu1 %v10235_v63  ;;  %v10255_v63 = vld [vmem:[%s17008_s3 + $0xc8] sm:$0xff] }
0x1277   : > { %12714 = vmatprep.subr.mxu0 %v14752_v0  ;;  %12777 = vmatprep.subr.mxu1 %v10234_v2 }
0x1278   : > { %12778 = vmatpush3.msra.mxu1 %v10234_v2  ;;  %v10254_v2 = vld [vmem:[%s17008_s3 + $0xc0] sm:$0xff] }
0x1279   : > { %12779 = vmatprep.subr.mxu1 %v10233_v4 }
0x127a   : > { %12780 = vmatpush3.msra.mxu1 %v10233_v4 }
0x127b   : > { %12781 = vmatprep.subr.mxu1 %v10232_v5 }
0x127c   : > { %12782 = vmatpush3.msra.mxu1 %v10232_v5  ;;  %v8430_v5 = vld [vmem:[#allocation59 + $0x38] sm:$0xff] }
0x127d   : > { %12783 = vmatprep.subr.mxu1 %v10231_v59 }
0x127e   : > { %12784 = vmatpush3.msra.mxu1 %v10231_v59  ;;  %v8429_v59 = vld [vmem:[#allocation59 + $0x30] sm:$0xff] }
0x127f   : > { %12785 = vmatprep.subr.mxu1 %v10230_v8 }
0x1280   : > { %12786 = vmatpush3.msra.mxu1 %v10230_v8  ;;  %v8428_v8 = vld [vmem:[#allocation59 + $0x28] sm:$0xff] }
0x1281   : > { %12809 = vmatprep.subr.mxu1 %v10249_v10 }
0x1301   : > { %v7225_v15 = vpop.f32.mrf.mxu1 }
0x1302   : > { %v7298_v51 = vpop.f32.mrf.mxu0 }
0x1303   : > { %v12637_v17 = vpop.f32.mrf.mxu1  ;;  %v7299_v19 = vadd.f32 %v7298_v51, %v7225_v15 }
0x1304   : > { %v12656_v18 = vpop.f32.mrf.mxu0 }
0x1311   : > { %v7381_v20 = vpop.f32.mrf.mxu1 }
0x1312   : > { %v7385_v21 = vadd.f32 %v7381_v20, %v7299_v19 }
0x1313   : > { %v12675_v22 = vpop.f32.mrf.mxu1 }
0x1314   : > { %v7386_v23 = vsub.f32 0.0, %v7385_v21  ;;  %v10248_v22 = vld [vmem:[%s17008_s3 + $0x130] sm:$0xff] }
0x1316   : > { %v7387_v25 = vmul.f32 1.442695, %v7386_v23 }
0x1318   : > { %13450 = vpow2.f32 %v7387_v25 }
0x1321   : > { %v16711_v26 = vpop.f32.mrf.mxu1 }
0x1323   : > { %v12713_v28 = vpop.f32.mrf.mxu1 }
0x1325   : > { %v13451_v29 = vpop.eup %13450 }
0x1326   : > { %v7389_v30 = vadd.f32 1.0, %v13451_v29 }
0x1328   : > { %13452 = vrcp.f32 %v7389_v30 }
0x1331   : > { %v16713_v24 = vpop.f32.mrf.mxu1 }
0x1333   : > { %v12751_v31 = vpop.f32.mrf.mxu1 }
0x1334   : > { %v10247_v31 = vld [vmem:[%s17008_s3 + $0x128] sm:$0xff] }
0x1335   : > { %v13453_v32 = vpop.eup %13452 }
0x1336   : > { %v7392_v33 = vmul.f32 %v13453_v32, %v16637_v43  ;;  %v7482_v43 = vld [vmem:[%s17006_s4 + $0x8] sm:$0xff] }
0x1337   : > { %v8134_v32 = vld [vmem:[%s17008_s3 + $0x68] sm:$0xff] }
0x1338   : > { %12693 = vmatmul.mubr.msk.f32.vlgmr.msra.gmra.mxu0 %vm2594_vm4, %v7392_v33  ;;  %v10246_v33 = vld [vmem:[%s17008_s3 + $0x120] sm:$0xff] }
0x1339   : > { %12715 = vmatpush3.msra.mxu0 %v7488_v34  ;;  %12730 = vmatprep.mubr.msk.f32.mxu0 %vm14753_vm6, %v14752_v0  ;;  %v10245_v34 = vld [vmem:[%s17008_s3 + $0x118] sm:$0xff] }
0x133a   : > { %12716 = vmatprep.subr.mxu0 %v14752_v0 }
0x133b   : > { %12717 = vmatpush3.msra.mxu0 %v7487_v35 }
0x133c   : > { %12718 = vmatprep.subr.mxu0 %v14752_v0 }
0x133d   : > { %12719 = vmatpush3.msra.mxu0 %v7486_v36  ;;  %v10244_v36 = vld [vmem:[%s17008_s3 + $0x110] sm:$0xff] }
0x133e   : > { %12720 = vmatprep.subr.mxu0 %v14752_v0 }
0x133f   : > { %12721 = vmatpush3.msra.mxu0 %v7485_v37  ;;  %v8131_v37 = vld [vmem:[%s17008_s3 + $0x50] sm:$0xff] }
0x1340   : > { %12722 = vmatprep.subr.mxu0 %v14752_v0 }
0x1341   : > { %12723 = vmatpush3.msra.mxu0 %v7484_v39 }
0x1342   : > { %12724 = vmatprep.subr.mxu0 %v14752_v0 }
0x1343   : > { %12725 = vmatpush3.msra.mxu0 %v7483_v41  ;;  %v10243_v41 = vld [vmem:[%s17008_s3 + $0x108] sm:$0xff] }
0x1344   : > { %12726 = vmatprep.subr.mxu0 %v14752_v0 }
0x1345   : > { %12727 = vmatpush3.msra.mxu0 %v7482_v43  ;;  %v8130_v43 = vld [vmem:[%s17008_s3 + $0x48] sm:$0xff] }
0x1346   : > { %12728 = vmatprep.subr.mxu0 %v14752_v0 }
0x1347   : > { %12729 = vmatpush3.msra.mxu0 %v7481_v44  ;;  %v10242_v44 = vld [vmem:[%s17008_s3 + $0x100] sm:$0xff] }
0x1348   : > { %12752 = vmatprep.subr.mxu0 %v14752_v0 }
0x13f8   : > { %v7477_v46 = vpop.f32.mrf.mxu0 }
0x13f9   : > { %v7478_v47 = vadd.f32 %v10206_v45, %v7477_v46  ;;  %v8129_v45 = vld [vmem:[%s17008_s3 + $0x40] sm:$0xff]  ;;  %v10261_v46 = vld [vmem:[%s17008_s3 + $0xf8] sm:$0xff] }
0x13fa   : > { %v12694_v48 = vpop.f32.mrf.mxu0 }
0x13fb   : > { %12731 = vmatmul.mubr.msk.f32.vlgmr.msra.gmra.mxu0 %vm2594_vm4, %v7478_v47 }
0x13fc   : > { %12753 = vmatpush3.msra.mxu0 %v10218_v13  ;;  %12768 = vmatprep.mubr.msk.f32.mxu0 %vm14753_vm6, %v14752_v0 }
0x13fd   : > { %12754 = vmatprep.subr.mxu0 %v14752_v0 }
0x13fe   : > { %12755 = vmatpush3.msra.mxu0 %v10217_v49  ;;  %v10260_v49 = vld [vmem:[%s17008_s3 + $0xf0] sm:$0xff] }
0x13ff   : > { %12756 = vmatprep.subr.mxu0 %v14752_v0 }
0x1400   : > { %12757 = vmatpush3.msra.mxu0 %v10216_v50  ;;  %v10270_v50 = vld [vmem:[%s17008_s3 + $0x170] sm:$0xff] }
0x1401   : > { %12758 = vmatprep.subr.mxu0 %v14752_v0 }
0x1402   : > { %12759 = vmatpush3.msra.mxu0 %v10215_v52 }
0x1403   : > { %12760 = vmatprep.subr.mxu0 %v14752_v0 }
0x1404   : > { %12761 = vmatpush3.msra.mxu0 %v10214_v53  ;;  %v10259_v53 = vld [vmem:[%s17008_s3 + $0xe8] sm:$0xff] }
0x1405   : > { %12762 = vmatprep.subr.mxu0 %v14752_v0 }
0x1406   : > { %12763 = vmatpush3.msra.mxu0 %v10213_v54  ;;  %v10269_v54 = vld [vmem:[%s17008_s3 + $0x168] sm:$0xff] }
0x1407   : > { %12764 = vmatprep.subr.mxu0 %v14752_v0 }
0x1408   : > { %12765 = vmatpush3.msra.mxu0 %v10212_v56  ;;  %v10258_v56 = vld [vmem:[%s17008_s3 + $0xe0] sm:$0xff] }
0x1409   : > { %12766 = vmatprep.subr.mxu0 %v14752_v0 }
0x140a   : > { %12767 = vmatpush3.msra.mxu0 %v10211_v57  ;;  %v10268_v57 = vld [vmem:[%s17008_s3 + $0x160] sm:$0xff] }
0x140b   : > { %12769 = vmatmul.mubr.msk.f32.vlgmr.msra.gmra.mxu0 %vm2594_vm4, %v7478_v47  ;;  %12790 = vmatprep.subr.mxu0 %v7855_v60  ;;  %v10271_v47 = vld [vmem:[%s17008_s3 + $0x178] sm:$0xff] }
0x140c   : > { %12791 = vmatpush3.msra.mxu0 %v7855_v60  ;;  %v10267_v60 = vld [vmem:[%s17008_s3 + $0x158] sm:$0xff] }
0x140d   : > { %12792 = vmatprep.subr.mxu0 %v7854_v62 }
0x140e   : > { %12793 = vmatpush3.msra.mxu0 %v7854_v62  ;;  %v10266_v62 = vld [vmem:[%s17008_s3 + $0x150] sm:$0xff] }
0x140f   : > { %12794 = vmatprep.subr.mxu0 %v7853_v1 }
0x1410   : > { %12795 = vmatpush3.msra.mxu0 %v7853_v1  ;;  %v10265_v1 = vld [vmem:[%s17008_s3 + $0x148] sm:$0xff] }
0x1411   : > { %12796 = vmatprep.subr.mxu0 %v7852_v3 }
0x1412   : > { %12797 = vmatpush3.msra.mxu0 %v7852_v3  ;;  %v10264_v3 = vld [vmem:[%s17008_s3 + $0x140] sm:$0xff] }
0x1413   : > { %12798 = vmatprep.subr.mxu0 %v7851_v38 }
0x1414   : > { %12799 = vmatpush3.msra.mxu0 %v7851_v38  ;;  %v8441_v38 = vld [vmem:[#allocation59 + $0x78] sm:$0xff] }
0x1415   : > { %12800 = vmatprep.subr.mxu0 %v7850_v6 }
0x1416   : > { %12801 = vmatpush3.msra.mxu0 %v7850_v6  ;;  %v8440_v6 = vld [vmem:[#allocation59 + $0x70] sm:$0xff] }
0x1417   : > { %12802 = vmatprep.subr.mxu0 %v7849_v7 }
0x1418   : > { %12803 = vmatpush3.msra.mxu0 %v7849_v7  ;;  %v8439_v7 = vld [vmem:[#allocation59 + $0x68] sm:$0xff] }
0x1419   : > { %12804 = vmatprep.subr.mxu0 %v7848_v9 }
0x141a   : > { %12805 = vmatpush3.msra.mxu0 %v7848_v9  ;;  %v8438_v9 = vld [vmem:[#allocation59 + $0x60] sm:$0xff] }
0x141b   : > { %12828 = vmatprep.subr.mxu0 %v8136_v11 }
0x14bb   : > { %v7639_v55 = vpop.f32.mrf.mxu0 }
0x14bc   : > { %v7640_v12 = vadd.f32 %v7639_v55, %v16711_v26  ;;  %v8426_v55 = vld [vmem:[#allocation59 + $0x18] sm:$0xff] }
0x14bd   : > { %v12732_v14 = vpop.f32.mrf.mxu0 }
0x14be   : > { %v7650_v15 = vadd.f32 %v10210_v16, %v7640_v12  ;;  %v8425_v12 = vld [vmem:[#allocation59 + $0x10] sm:$0xff]  ;;  %v8435_v14 = vld [vmem:[#allocation59 + $0x48] sm:$0xff] }
0x14c0   : > { %7651 = vst.msk [vmem:[#allocation2] sm:$0x1] %vm2591_vm3, %v7650_v15 }
0x14c1   : > { %7661 = vst.msk [vmem:[#allocation2 + $0x5] sm:$0x20] %vm7660_vm7, %v7650_v15 }
0x14c2   : > { %7663 = vst.msk [vmem:[#allocation2 + $0x6] sm:$0x40] %vm7662_vm8, %v7650_v15 }
0x14c3   : > { %7665 = vst.msk [vmem:[#allocation2 + $0x7] sm:$0x80] %vm7664_vm9, %v7650_v15 }
0x14c4   : > { %7653 = vst.msk [vmem:[#allocation2 + $0x1] sm:$0x2] %vm7652_vm10, %v7650_v15 }
0x14c5   : > { %7655 = vst.msk [vmem:[#allocation2 + $0x2] sm:$0x4] %vm7654_vm11, %v7650_v15 }
0x14c6   : > { %7657 = vst.msk [vmem:[#allocation2 + $0x3] sm:$0x8] %vm7656_vm12, %v7650_v15 }
0x14c7   : > { %7659 = vst.msk [vmem:[#allocation2 + $0x4] sm:$0x10] %vm7658_vm13, %v7650_v15  ;;  %v8424_v15 = vld [vmem:[#allocation59 + $0x8] sm:$0xff] }
0x14cb   : > { %v7819_v51 = vpop.f32.mrf.mxu0 }
0x14cc   : > { %v7820_v17 = vadd.f32 %v7819_v51, %v16713_v24  ;;  %v8135_v24 = vld [vmem:[%s17008_s3 + $0x70] sm:$0xff] }
0x14cd   : > { %v12770_v18 = vpop.f32.mrf.mxu0  ;;  %v8434_v51 = vld [vmem:[#allocation59 + $0x40] sm:$0xff] }
0x14ce   : > { %v7830_v19 = vadd.f32 %v10210_v16, %v7820_v17  ;;  %v8436_v16 = vld [vmem:[#allocation59 + $0x50] sm:$0xff]  ;;  %v8423_v17 = vld [vmem:[#allocation59] sm:$0xff]  ;;  %v8614_v18 = vld [vmem:[#allocation59 + $0xb8] sm:$0xff] }
0x14d0   : > { %7831 = vst.msk [vmem:[#allocation2 + $0x1] sm:$0x1] %vm2591_vm3, %v7830_v19 }
0x14d1   : > { %7832 = vst.msk [vmem:[#allocation2 + $0x2] sm:$0x2] %vm7652_vm10, %v7830_v19 }
0x14d2   : > { %7833 = vst.msk [vmem:[#allocation2 + $0x3] sm:$0x4] %vm7654_vm11, %v7830_v19 }
0x14d3   : > { %7834 = vst.msk [vmem:[#allocation2 + $0x4] sm:$0x8] %vm7656_vm12, %v7830_v19 }
0x14d4   : > { %7835 = vst.msk [vmem:[#allocation2 + $0x5] sm:$0x10] %vm7658_vm13, %v7830_v19 }
0x14d5   : > { %7836 = vst.msk [vmem:[#allocation2 + $0x6] sm:$0x20] %vm7660_vm7, %v7830_v19 }
0x14d6   : > { %7837 = vst.msk [vmem:[#allocation2 + $0x7] sm:$0x40] %vm7662_vm8, %v7830_v19 }
0x14d7   : > { %7838 = vst.msk [vmem:[#allocation2 + $0x8] sm:$0x80] %vm7664_vm9, %v7830_v19 }
0x14da   : > { %v7839_v20 = vld [vmem:[#allocation2] sm:$0xff] }
0x14db   : > { %7842 = vst.msk [vmem:[#allocation2] sm:$0x1] %vm2591_vm3, %v14752_v0 }
0x14de   : > { %v7840_v21 = vld [vmem:[#allocation2 + $0x8] sm:$0xff] }
0x14df   : > { %7844 = vst.msk [vmem:[#allocation2 + $0x1] sm:$0xff] %vm2594_vm4, %v7839_v20  ;;  %7845 = vst.msk [vmem:[#allocation2 + $0x9] sm:$0xff] %vm2594_vm4, %v7840_v21 }
0x14e6   : > { %v7856_v23 = vld [vmem:[#allocation2 + $0x1] sm:$0xff]  ;;  %v7857_v26 = vld [vmem:[#allocation2 + $0x9] sm:$0xff] }
0x14e7   : > { %v7846_v25 = vld [vmem:[#allocation2] sm:$0xff]  ;;  %12787 = vmatprep.mubr.msk.f32.mxu1 %vm2594_vm4, %v7856_v23  ;;  %v7847_v28 = vld [vmem:[#allocation2 + $0x8] sm:$0xff] }
0x14e8   : > { %12806 = vmatprep.mubr.msk.f32.mxu0 %vm2594_vm4, %v7846_v25  ;;  %8123 = vst.msk [vmem:[#allocation2] sm:$0x1] %vm2591_vm3, %v14752_v0  ;;  %v8029_v29 = vld [vmem:[#allocation2 + $0x2] sm:$0xff]  ;;  %v8030_v30 = vld [vmem:[#allocation2 + $0xa] sm:$0xff]  ;;  %12788 = vmatmul.mubr.msk.f32.vlgmr.msra.gmra.mxu1 %vm2594_vm4, %v7857_v26 }
0x14e9   : > { %12807 = vmatmul.mubr.msk.f32.vlgmr.msra.gmra.mxu0 %vm2594_vm4, %v7847_v28  ;;  %8125 = vst.msk [vmem:[#allocation2 + $0x1] sm:$0xff] %vm2594_vm4, %v15546_v42  ;;  %8126 = vst.msk [vmem:[#allocation2 + $0x9] sm:$0xff] %vm2594_vm4, %v15542_v40  ;;  %12810 = vmatpush3.msra.mxu1 %v10249_v10  ;;  %v8133_v42 = vld [vmem:[%s17008_s3 + $0x60] sm:$0xff]  ;;  %v8132_v40 = vld [vmem:[%s17008_s3 + $0x58] sm:$0xff] }
0x14ea   : > { %8124 = vst.msk [vmem:[#allocation2 + $0x11] sm:$0x1] %vm2591_vm3, %v14752_v0  ;;  %12829 = vmatpush3.msra.mxu0 %v8136_v11  ;;  %12811 = vmatprep.subr.mxu1 %v10248_v22  ;;  %v8427_v10 = vld [vmem:[#allocation59 + $0x20] sm:$0xff]  ;;  %v8437_v11 = vld [vmem:[#allocation59 + $0x58] sm:$0xff] }
0x14eb   : > { %12825 = vmatprep.mubr.msk.f32.mxu1 %vm2594_vm4, %v8029_v29  ;;  %12830 = vmatprep.subr.mxu0 %v8135_v24 }
0x14ec   : > { %12812 = vmatpush3.msra.mxu1 %v10248_v22  ;;  %12831 = vmatpush3.msra.mxu0 %v8135_v24 }
0x14ed   : > { %12813 = vmatprep.subr.mxu1 %v10247_v31  ;;  %12832 = vmatprep.subr.mxu0 %v8134_v32 }
0x14ee   : > { %12814 = vmatpush3.msra.mxu1 %v10247_v31  ;;  %12833 = vmatpush3.msra.mxu0 %v8134_v32 }
0x14ef   : > { %12815 = vmatprep.subr.mxu1 %v10246_v33  ;;  %12834 = vmatprep.subr.mxu0 %v8133_v42 }
0x14f0   : > { %12816 = vmatpush3.msra.mxu1 %v10246_v33  ;;  %v8127_v35 = vld [vmem:[#allocation2] sm:$0xff]  ;;  %12835 = vmatpush3.msra.mxu0 %v8133_v42  ;;  %v8128_v13 = vld [vmem:[#allocation2 + $0x8] sm:$0xff] }
0x14f1   : > { %12817 = vmatprep.subr.mxu1 %v10245_v34  ;;  %8417 = vst.msk [vmem:[#allocation2] sm:$0x1] %vm2591_vm3, %v14752_v0  ;;  %v16819_v39 = vld [vmem:[#allocation2 + $0xa] sm:$0xff]  ;;  %12836 = vmatprep.subr.mxu0 %v8132_v40  ;;  %v8220_v48 = vld [vmem:[#allocation2 + $0x1] sm:$0xff] }
0x14f2   : > { %12844 = vmatprep.mubr.msk.f32.mxu0 %vm2594_vm4, %v8127_v35  ;;  %8418 = vst.msk [vmem:[#allocation2 + $0x11] sm:$0x1] %vm2591_vm3, %v14752_v0  ;;  %12818 = vmatpush3.msra.mxu1 %v10245_v34  ;;  %v8313_v52 = vld [vmem:[#allocation2 + $0x2] sm:$0xff]  ;;  %v10274_v35 = vld [vmem:[#allocation58] ss:$0 sm:$0xff] }
0x14f3   : > { %12837 = vmatpush3.msra.mxu0 %v8132_v40  ;;  %12819 = vmatprep.subr.mxu1 %v10244_v36  ;;  %v8221_v4 = vld [vmem:[#allocation2 + $0x9] sm:$0xff] }
0x14f4   : > { %12838 = vmatprep.subr.mxu0 %v8131_v37  ;;  %12820 = vmatpush3.msra.mxu1 %v10244_v36 }
0x14f5   : > { %12839 = vmatpush3.msra.mxu0 %v8131_v37  ;;  %12821 = vmatprep.subr.mxu1 %v10243_v41 }
0x14f6   : > { %12840 = vmatprep.subr.mxu0 %v8130_v43  ;;  %12822 = vmatpush3.msra.mxu1 %v10243_v41 }
0x14f7   : > { %12841 = vmatpush3.msra.mxu0 %v8130_v43  ;;  %12823 = vmatprep.subr.mxu1 %v10242_v44 }
0x14f8   : > { %12842 = vmatprep.subr.mxu0 %v8129_v45  ;;  %12824 = vmatpush3.msra.mxu1 %v10242_v44 }
0x14f9   : > { %12843 = vmatpush3.msra.mxu0 %v8129_v45  ;;  %12826 = vmatmul.mubr.msk.f32.vlgmr.msra.gmra.mxu1 %vm2594_vm4, %v8030_v30 }
0x14fa   : > { %12845 = vmatmul.mubr.msk.f32.vlgmr.msra.gmra.mxu0 %vm2594_vm4, %v8128_v13  ;;  %12847 = vmatprep.subr.mxu1 %v10261_v46 }
0x14fb   : > { %12866 = vmatprep.subr.mxu0 %v10271_v47  ;;  %12848 = vmatpush3.msra.mxu1 %v10261_v46 }
0x14fc   : > { %12863 = vmatprep.mubr.msk.f32.mxu1 %vm2594_vm4, %v8220_v48  ;;  %12867 = vmatpush3.msra.mxu0 %v10271_v47 }
0x14fd   : > { %12882 = vmatprep.mubr.msk.f32.mxu0 %vm2594_vm4, %v8313_v52  ;;  %12849 = vmatprep.subr.mxu1 %v10260_v49 }
0x14fe   : > { %12868 = vmatprep.subr.mxu0 %v10270_v50  ;;  %12850 = vmatpush3.msra.mxu1 %v10260_v49 }
0x14ff   : > { %12869 = vmatpush3.msra.mxu0 %v10270_v50  ;;  %12851 = vmatprep.subr.mxu1 %v10259_v53 }
0x1500   : > { %12870 = vmatprep.subr.mxu0 %v10269_v54  ;;  %12852 = vmatpush3.msra.mxu1 %v10259_v53  ;;  %v8613_v53 = vld [vmem:[#allocation59 + $0xb0] sm:$0xff] }
0x1501   : > { %12871 = vmatpush3.msra.mxu0 %v10269_v54  ;;  %12853 = vmatprep.subr.mxu1 %v10258_v56  ;;  %v8711_v54 = vld [vmem:[#allocation62 + $0x18] sm:$0xff] }
0x1502   : > { %12872 = vmatprep.subr.mxu0 %v10268_v57  ;;  %12854 = vmatpush3.msra.mxu1 %v10258_v56 }
0x1503   : > { %12873 = vmatpush3.msra.mxu0 %v10268_v57  ;;  %12855 = vmatprep.subr.mxu1 %v10257_v58  ;;  %v8612_v57 = vld [vmem:[#allocation59 + $0xa8] sm:$0xff] }
0x1504   : > { %12874 = vmatprep.subr.mxu0 %v10267_v60  ;;  %12856 = vmatpush3.msra.mxu1 %v10257_v58  ;;  %v8710_v58 = vld [vmem:[#allocation62 + $0x10] sm:$0xff] }
0x1505   : > { %12875 = vmatpush3.msra.mxu0 %v10267_v60  ;;  %12857 = vmatprep.subr.mxu1 %v10256_v61  ;;  %v8611_v60 = vld [vmem:[#allocation59 + $0xa0] sm:$0xff] }
0x1506   : > { %12876 = vmatprep.subr.mxu0 %v10266_v62  ;;  %12858 = vmatpush3.msra.mxu1 %v10256_v61  ;;  %v8709_v61 = vld [vmem:[#allocation62 + $0x8] sm:$0xff] }
0x1507   : > { %12877 = vmatpush3.msra.mxu0 %v10266_v62  ;;  %12859 = vmatprep.subr.mxu1 %v10255_v63  ;;  %v8610_v62 = vld [vmem:[#allocation59 + $0x98] sm:$0xff] }
0x1508   : > { %12878 = vmatprep.subr.mxu0 %v10265_v1  ;;  %12860 = vmatpush3.msra.mxu1 %v10255_v63  ;;  %v8708_v63 = vld [vmem:[#allocation62] sm:$0xff] }
0x1509   : > { %12879 = vmatpush3.msra.mxu0 %v10265_v1  ;;  %12861 = vmatprep.subr.mxu1 %v10254_v2  ;;  %v8609_v1 = vld [vmem:[#allocation59 + $0x90] sm:$0xff] }
0x150a   : > { %12880 = vmatprep.subr.mxu0 %v10264_v3  ;;  %12862 = vmatpush3.msra.mxu1 %v10254_v2  ;;  %v8608_v2 = vld [vmem:[#allocation59 + $0x88] sm:$0xff] }
0x150b   : > { %12881 = vmatpush3.msra.mxu0 %v10264_v3  ;;  %12864 = vmatmul.mubr.msk.f32.vlgmr.msra.gmra.mxu1 %vm2594_vm4, %v8221_v4  ;;  %v13465_v3 = vld [vmem:[%s15486_s11] sm:$0x1]  ;;  %v8607_v4 = vld [vmem:[#allocation59 + $0x80] sm:$0xff] }
0x150c   : > { %12883 = vmatmul.mubr.msk.f32.vlgmr.msra.gmra.mxu0 %vm2594_vm4, %v16819_v39  ;;  %12885 = vmatprep.subr.mxu1 %v8441_v38 }
0x150d   : > { %12886 = vmatpush3.msra.mxu1 %v8441_v38  ;;  %12904 = vmatprep.subr.mxu0 %v8430_v5  ;;  %v8813_v38 = vld [vmem:[#allocation65 + $0x78] sm:$0xff] }
0x150e   : > { %12887 = vmatprep.subr.mxu1 %v8440_v6  ;;  %12905 = vmatpush3.msra.mxu0 %v8430_v5  ;;  %v8802_v5 = vld [vmem:[#allocation65 + $0x38] sm:$0xff] }
0x150f   : > { %12888 = vmatpush3.msra.mxu1 %v8440_v6  ;;  %12906 = vmatprep.subr.mxu0 %v8429_v59  ;;  %v8812_v6 = vld [vmem:[#allocation65 + $0x70] sm:$0xff] }
0x1510   : > { %12889 = vmatprep.subr.mxu1 %v8439_v7  ;;  %12907 = vmatpush3.msra.mxu0 %v8429_v59  ;;  %v8811_v59 = vld [vmem:[#allocation65 + $0x68] sm:$0xff] }
0x1511   : > { %12890 = vmatpush3.msra.mxu1 %v8439_v7  ;;  %12908 = vmatprep.subr.mxu0 %v8428_v8  ;;  %v8800_v7 = vld [vmem:[#allocation65 + $0x28] sm:$0xff] }
0x1512   : > { %12891 = vmatprep.subr.mxu1 %v8438_v9  ;;  %12909 = vmatpush3.msra.mxu0 %v8428_v8  ;;  %v8810_v8 = vld [vmem:[#allocation65 + $0x60] sm:$0xff] }
0x1513   : > { %12892 = vmatpush3.msra.mxu1 %v8438_v9  ;;  %12910 = vmatprep.subr.mxu0 %v8427_v10  ;;  %v8799_v9 = vld [vmem:[#allocation65 + $0x20] sm:$0xff] }
0x1514   : > { %12893 = vmatprep.subr.mxu1 %v8437_v11  ;;  %12911 = vmatpush3.msra.mxu0 %v8427_v10  ;;  %v8809_v10 = vld [vmem:[#allocation65 + $0x58] sm:$0xff] }
0x1515   : > { %12894 = vmatpush3.msra.mxu1 %v8437_v11  ;;  %12912 = vmatprep.subr.mxu0 %v8426_v55  ;;  %v8798_v11 = vld [vmem:[#allocation65 + $0x18] sm:$0xff] }
0x1516   : > { %12895 = vmatprep.subr.mxu1 %v8436_v16  ;;  %12913 = vmatpush3.msra.mxu0 %v8426_v55  ;;  %v8808_v55 = vld [vmem:[#allocation65 + $0x50] sm:$0xff] }
0x1517   : > { %12896 = vmatpush3.msra.mxu1 %v8436_v16  ;;  %12914 = vmatprep.subr.mxu0 %v8425_v12  ;;  %v8797_v16 = vld [vmem:[#allocation65 + $0x10] sm:$0xff] }
0x1518   : > { %12897 = vmatprep.subr.mxu1 %v8435_v14  ;;  %12915 = vmatpush3.msra.mxu0 %v8425_v12  ;;  %v8807_v12 = vld [vmem:[#allocation65 + $0x48] sm:$0xff] }
0x1519   : > { %12898 = vmatpush3.msra.mxu1 %v8435_v14  ;;  %12916 = vmatprep.subr.mxu0 %v8424_v15  ;;  %v8796_v14 = vld [vmem:[#allocation65 + $0x8] sm:$0xff] }
0x151a   : > { %12899 = vmatprep.subr.mxu1 %v8434_v51  ;;  %12917 = vmatpush3.msra.mxu0 %v8424_v15  ;;  %v8806_v15 = vld [vmem:[#allocation65 + $0x40] sm:$0xff] }
0x151b   : > { %12900 = vmatpush3.msra.mxu1 %v8434_v51  ;;  %12918 = vmatprep.subr.mxu0 %v8423_v17  ;;  %v8795_v51 = vld [vmem:[#allocation65] sm:$0xff] }
0x151c   : > { %12919 = vmatpush3.msra.mxu0 %v8423_v17  ;;  %12923 = vmatprep.subr.mxu1 %v8614_v18  ;;  %v8986_v17 = vld [vmem:[#allocation65 + $0xb8] sm:$0xff] }
0x151d   : > { %12942 = vmatprep.subr.mxu0 %v14752_v0 }
0x15a8   : > { %v12789_v19 = vpop.f32.mrf.mxu1 }
0x15a9   : > { %v12808_v20 = vpop.f32.mrf.mxu0 }
0x15aa   : > { %v7939_v21 = vpop.f32.mrf.mxu1  ;;  %v8026_v25 = vadd.f32 %v12808_v20, %v12789_v19 }
0x15ab   : > { %v8020_v23 = vpop.f32.mrf.mxu0 }
0x15ac   : > { %v8021_v29 = vadd.f32 %v8020_v23, %v7939_v21 }
0x15b9   : > { %v12827_v22 = vpop.f32.mrf.mxu1 }
0x15ba   : > { %v12846_v26 = vpop.f32.mrf.mxu0  ;;  %v8122_v30 = vadd.f32 %v12827_v22, %v8026_v25  ;;  %v8712_v22 = vld [vmem:[#allocation64] sm:$0x1] }
0x15bb   : > { %v8112_v28 = vpop.f32.mrf.mxu1 }
0x15bc   : > { %v8121_v24 = vadd.f32 %v8112_v28, %v8021_v29  ;;  %v8209_v31 = vpop.f32.mrf.mxu0  ;;  %v8219_v32 = vadd.f32 %v12846_v26, %v8122_v30  ;;  %v10281_v29 = vld [vmem:[#allocation61] ss:$0 sm:$0xff] }
0x15be   : > { %v8218_v34 = vadd.f32 %v8209_v31, %v8121_v24 }
0x15cb   : > { %v12865_v33 = vpop.f32.mrf.mxu1 }
0x15cc   : > { %v12884_v42 = vpop.f32.mrf.mxu0  ;;  %v8312_v40 = vadd.f32 %v12865_v33, %v8219_v32 }
0x15cd   : > { %v8302_v36 = vpop.f32.mrf.mxu1 }
0x15ce   : > { %v8405_v37 = vadd.f32 %v12884_v42, %v8312_v40  ;;  %v8311_v39 = vadd.f32 %v8302_v36, %v8218_v34  ;;  %v8395_v41 = vpop.f32.mrf.mxu0 }
0x15d0   : > { %v8413_v43 = vadd.f32 %v10274_v35, %v8405_v37  ;;  %v8404_v44 = vadd.f32 %v8395_v41, %v8311_v39 }
0x15d2   : > { %v8415_v45 = vmax.f32 %v8413_v43, 0.0  ;;  %v8412_v46 = vadd.f32 %v10274_v35, %v8404_v44 }
0x15d4   : > { %8420 = vst.msk [vmem:[#allocation2 + $0x9] sm:$0xff] %vm2594_vm4, %v8415_v45  ;;  %v8414_v47 = vmax.f32 %v8412_v46, 0.0  ;;  %v8985_v45 = vld [vmem:[#allocation65 + $0xb0] sm:$0xff] }
0x15d6   : > { %8419 = vst.msk [vmem:[#allocation2 + $0x1] sm:$0xff] %vm2594_vm4, %v8414_v47  ;;  %v8984_v47 = vld [vmem:[#allocation65 + $0xa8] sm:$0xff] }
0x15db   : > { %v8605_v13 = vld [vmem:[#allocation2 + $0xa] sm:$0xff] }
0x15dc   : > { %8790 = vst.msk [vmem:[#allocation2 + $0x11] sm:$0x1] %vm2591_vm3, %v14752_v0  ;;  %v8432_v52 = vld [vmem:[#allocation2 + $0x9] sm:$0xff] }
0x15dd   : > { %v8431_v48 = vld [vmem:[#allocation2 + $0x1] sm:$0xff] }
0x15de   : > { %v8421_v49 = vld [vmem:[#allocation2] sm:$0xff]  ;;  %v8422_v50 = vld [vmem:[#allocation2 + $0x8] sm:$0xff]  ;;  %12901 = vmatprep.mubr.msk.f32.mxu1 %vm2594_vm4, %v8431_v48 }
0x15df   : > { %12920 = vmatprep.mubr.msk.f32.mxu0 %vm2594_vm4, %v8421_v49  ;;  %8789 = vst.msk [vmem:[#allocation2] sm:$0x1] %vm2591_vm3, %v14752_v0  ;;  %12902 = vmatmul.mubr.msk.f32.vlgmr.msra.gmra.mxu1 %vm2594_vm4, %v8432_v52  ;;  %v8604_v56 = vld [vmem:[#allocation2 + $0x2] sm:$0xff]  ;;  %v8982_v48 = vld [vmem:[#allocation65 + $0x98] sm:$0xff]  ;;  %v8979_v52 = vld [vmem:[#allocation65 + $0x80] sm:$0xff] }
0x15e0   : > { %12921 = vmatmul.mubr.msk.f32.vlgmr.msra.gmra.mxu0 %vm2594_vm4, %v8422_v50  ;;  %12924 = vmatpush3.msra.mxu1 %v8614_v18  ;;  %v8981_v49 = vld [vmem:[#allocation65 + $0x90] sm:$0xff]  ;;  %v8980_v50 = vld [vmem:[#allocation65 + $0x88] sm:$0xff] }
0x15e1   : > { %12939 = vmatprep.mubr.msk.f32.mxu1 %vm2594_vm4, %v8604_v56  ;;  %12925 = vmatprep.subr.mxu1 %v8613_v53  ;;  %v9090_v56 = vld [vmem:[#allocation67 + $0x30] sm:$0xff] }
0x15e2   : > { %12943 = vmatpush3.msra.mxu0 %v8711_v54  ;;  %12926 = vmatpush3.msra.mxu1 %v8613_v53  ;;  %v9091_v54 = vld [vmem:[#allocation67 + $0x38] sm:$0xff] }
0x15e3   : > { %12944 = vmatprep.subr.mxu0 %v14752_v0  ;;  %12927 = vmatprep.subr.mxu1 %v8612_v57 }
0x15e4   : > { %12945 = vmatpush3.msra.mxu0 %v8710_v58  ;;  %12928 = vmatpush3.msra.mxu1 %v8612_v57  ;;  %v9089_v57 = vld [vmem:[#allocation67 + $0x28] sm:$0xff]  ;;  %v9088_v58 = vld [vmem:[#allocation67 + $0x20] sm:$0xff] }
0x15e5   : > { %12946 = vmatprep.subr.mxu0 %v14752_v0  ;;  %12929 = vmatprep.subr.mxu1 %v8611_v60 }
0x15e6   : > { %12947 = vmatpush3.msra.mxu0 %v8709_v61  ;;  %12930 = vmatpush3.msra.mxu1 %v8611_v60  ;;  %v9087_v60 = vld [vmem:[#allocation67 + $0x18] sm:$0xff]  ;;  %v9086_v61 = vld [vmem:[#allocation67 + $0x10] sm:$0xff] }
0x15e7   : > { %12948 = vmatprep.subr.mxu0 %v14752_v0  ;;  %12931 = vmatprep.subr.mxu1 %v8610_v62 }
0x15e8   : > { %12949 = vmatpush3.msra.mxu0 %v8708_v63  ;;  %12932 = vmatpush3.msra.mxu1 %v8610_v62  ;;  %v9085_v62 = vld [vmem:[#allocation67 + $0x8] sm:$0xff]  ;;  %v9084_v63 = vld [vmem:[#allocation67] sm:$0xff] }
0x15e9   : > { %12950 = vmatprep.mubr.msk.f32.mxu0 %vm14753_vm6, %v14752_v0  ;;  %12933 = vmatprep.subr.mxu1 %v8609_v1  ;;  %v8801_v0 = vld [vmem:[#allocation65 + $0x30] sm:$0xff] }
0x15ea   : > { %12951 = vmatmul.mubr.msk.f32.vlgmr.msra.gmra.mxu0 %vm2889_vm5, %v13465_v3  ;;  %12934 = vmatpush3.msra.mxu1 %v8609_v1  ;;  %v9187_v1 = vld [vmem:[%s15037_s21 + $0x38] sm:$0xff]  ;;  %v9185_v3 = vld [vmem:[%s15037_s21 + $0x28] sm:$0xff] }
0x15eb   : > { %12935 = vmatprep.subr.mxu1 %v8608_v2  ;;  %12953 = vmatprep.subr.mxu0 %v8813_v38 }
0x15ec   : > { %12936 = vmatpush3.msra.mxu1 %v8608_v2  ;;  %12954 = vmatpush3.msra.mxu0 %v8813_v38  ;;  %v9186_v2 = vld [vmem:[%s15037_s21 + $0x30] sm:$0xff]  ;;  %v9183_v38 = vld [vmem:[%s15037_s21 + $0x18] sm:$0xff] }
0x15ed   : > { %12937 = vmatprep.subr.mxu1 %v8607_v4  ;;  %12955 = vmatprep.subr.mxu0 %v8812_v6 }
0x15ee   : > { %12938 = vmatpush3.msra.mxu1 %v8607_v4  ;;  %12956 = vmatpush3.msra.mxu0 %v8812_v6  ;;  %v9184_v4 = vld [vmem:[%s15037_s21 + $0x20] sm:$0xff] }
0x15ef   : > { %12940 = vmatmul.mubr.msk.f32.vlgmr.msra.gmra.mxu1 %vm2594_vm4, %v8605_v13  ;;  %12972 = vmatprep.subr.mxu1 %v8802_v5  ;;  %v8983_v13 = vld [vmem:[#allocation65 + $0xa0] sm:$0xff] }
0x15f0   : > { %12973 = vmatpush3.msra.mxu1 %v8802_v5  ;;  %12957 = vmatprep.subr.mxu0 %v8811_v59 }
0x15f1   : > { %12974 = vmatprep.subr.mxu1 %v8801_v0  ;;  %12958 = vmatpush3.msra.mxu0 %v8811_v59 }
0x15f2   : > { %12975 = vmatpush3.msra.mxu1 %v8801_v0  ;;  %12959 = vmatprep.subr.mxu0 %v8810_v8 }
0x15f3   : > { %12976 = vmatprep.subr.mxu1 %v8800_v7  ;;  %12960 = vmatpush3.msra.mxu0 %v8810_v8 }
0x15f4   : > { %12977 = vmatpush3.msra.mxu1 %v8800_v7  ;;  %12961 = vmatprep.subr.mxu0 %v8809_v10 }
0x15f5   : > { %12978 = vmatprep.subr.mxu1 %v8799_v9  ;;  %12962 = vmatpush3.msra.mxu0 %v8809_v10 }
0x15f6   : > { %12979 = vmatpush3.msra.mxu1 %v8799_v9  ;;  %12963 = vmatprep.subr.mxu0 %v8808_v55 }
0x15f7   : > { %12980 = vmatprep.subr.mxu1 %v8798_v11  ;;  %12964 = vmatpush3.msra.mxu0 %v8808_v55 }
0x15f8   : > { %12981 = vmatpush3.msra.mxu1 %v8798_v11  ;;  %12965 = vmatprep.subr.mxu0 %v8807_v12 }
0x15f9   : > { %12982 = vmatprep.subr.mxu1 %v8797_v16  ;;  %12966 = vmatpush3.msra.mxu0 %v8807_v12 }
0x15fa   : > { %12983 = vmatpush3.msra.mxu1 %v8797_v16  ;;  %12967 = vmatprep.subr.mxu0 %v8806_v15 }
0x15fb   : > { %12984 = vmatprep.subr.mxu1 %v8796_v14  ;;  %12968 = vmatpush3.msra.mxu0 %v8806_v15 }
0x15fc   : > { %12985 = vmatpush3.msra.mxu1 %v8796_v14  ;;  %12991 = vmatprep.subr.mxu0 %v8986_v17 }
0x15fd   : > { %12986 = vmatprep.subr.mxu1 %v8795_v51 }
0x15fe   : > { %12987 = vmatpush3.msra.mxu1 %v8795_v51 }
0x15ff   : > { %13010 = vmatprep.subr.mxu1 %v9091_v54 }
0x169f   : > { %v12903_v20 = vpop.f32.mrf.mxu1 }
0x16a0   : > { %v12922_v18 = vpop.f32.mrf.mxu0 }
0x16a1   : > { %v8514_v25 = vpop.f32.mrf.mxu1  ;;  %v8601_v26 = vadd.f32 %v12922_v18, %v12903_v20 }
0x16a2   : > { %v8595_v19 = vpop.f32.mrf.mxu0 }
0x16a3   : > { %v8596_v24 = vadd.f32 %v8595_v19, %v8514_v25  ;;  %v9182_v25 = vld [vmem:[%s15037_s21 + $0x10] sm:$0xff] }
0x16aa   : > { %v8779_v21 = vpop.f32.mrf.mxu0 }
0x16ab   : > { %v8780_v28 = vadd.f32 %v8779_v21, %v8712_v22 }
0x16ac   : > { %v12952_v23 = vpop.f32.mrf.mxu0 }
0x16ad   : > { %v8786_v34 = vrot.slane %v8780_v28, %v15495_v27  ;;  %v9180_v28 = vld [vmem:[%s15037_s21] sm:$0xff] }
0x16af   : > { %v12941_v30 = vpop.f32.mrf.mxu1 }
0x16b0   : > { %v8697_v31 = vadd.f32 %v12941_v30, %v8601_v26  ;;  %v9181_v26 = vld [vmem:[%s15037_s21 + $0x8] sm:$0xff]  ;;  %v10289_v30 = vld [vmem:[#allocation68] ss:$0 sm:$0xff] }
0x16b1   : > { %v8687_v32 = vpop.f32.mrf.mxu1 }
0x16b2   : > { %v8705_v33 = vadd.f32 %v10281_v29, %v8697_v31  ;;  %v8696_v42 = vadd.f32 %v8687_v32, %v8596_v24 }
0x16b4   : > { %v8707_v40 = vmax.f32 %v8705_v33, 0.0  ;;  %v8704_v35 = vadd.f32 %v10281_v29, %v8696_v42  ;;  %v10292_v33 = vld [vmem:[#allocation70] ss:$0 sm:$0xff] }
0x16b6   : > { %v8706_v36 = vmax.f32 %v8704_v35, 0.0  ;;  %v16872_v37 = vadd.f32 %v8786_v34, %v8707_v40 }
0x16b8   : > { %v16874_v39 = vadd.f32 %v8786_v34, %v8706_v36  ;;  %8792 = vst.msk [vmem:[#allocation2 + $0x9] sm:$0xff] %vm2594_vm4, %v16872_v37 }
0x16ba   : > { %8791 = vst.msk [vmem:[#allocation2 + $0x1] sm:$0xff] %vm2594_vm4, %v16874_v39 }
0x16bf   : > { %v8804_v27 = vld [vmem:[#allocation2 + $0x9] sm:$0xff] }
0x16c0   : > { %v8977_v53 = vld [vmem:[#allocation2 + $0xa] sm:$0xff] }
0x16c1   : > { %v8803_v41 = vld [vmem:[#allocation2 + $0x1] sm:$0xff] }
0x16c2   : > { %v8793_v43 = vld [vmem:[#allocation2] sm:$0xff]  ;;  %v8794_v44 = vld [vmem:[#allocation2 + $0x8] sm:$0xff]  ;;  %12969 = vmatprep.mubr.msk.f32.mxu0 %vm2594_vm4, %v8803_v41 }
0x16c3   : > { %12988 = vmatprep.mubr.msk.f32.mxu1 %vm2594_vm4, %v8793_v43  ;;  %12970 = vmatmul.mubr.msk.f32.vlgmr.msra.gmra.mxu0 %vm2594_vm4, %v8804_v27  ;;  %v8976_v46 = vld [vmem:[#allocation2 + $0x2] sm:$0xff] }
0x16c4   : > { %12989 = vmatmul.mubr.msk.f32.vlgmr.msra.gmra.mxu1 %vm2594_vm4, %v8794_v44  ;;  %12992 = vmatpush3.msra.mxu0 %v8986_v17 }
0x16c5   : > { %13007 = vmatprep.mubr.msk.f32.mxu0 %vm2594_vm4, %v8976_v46  ;;  %12993 = vmatprep.subr.mxu0 %v8985_v45 }
0x16c6   : > { %12994 = vmatpush3.msra.mxu0 %v8985_v45  ;;  %13011 = vmatpush3.msra.mxu1 %v9091_v54 }
0x16c7   : > { %12995 = vmatprep.subr.mxu0 %v8984_v47  ;;  %13012 = vmatprep.subr.mxu1 %v9090_v56 }
0x16c8   : > { %12996 = vmatpush3.msra.mxu0 %v8984_v47  ;;  %13013 = vmatpush3.msra.mxu1 %v9090_v56 }
0x16c9   : > { %12997 = vmatprep.subr.mxu0 %v8983_v13  ;;  %13014 = vmatprep.subr.mxu1 %v9089_v57 }
0x16ca   : > { %12998 = vmatpush3.msra.mxu0 %v8983_v13  ;;  %13015 = vmatpush3.msra.mxu1 %v9089_v57 }
0x16cb   : > { %12999 = vmatprep.subr.mxu0 %v8982_v48  ;;  %13016 = vmatprep.subr.mxu1 %v9088_v58 }
0x16cc   : > { %13000 = vmatpush3.msra.mxu0 %v8982_v48  ;;  %13017 = vmatpush3.msra.mxu1 %v9088_v58 }
0x16cd   : > { %13001 = vmatprep.subr.mxu0 %v8981_v49  ;;  %13018 = vmatprep.subr.mxu1 %v9087_v60 }
0x16ce   : > { %13002 = vmatpush3.msra.mxu0 %v8981_v49  ;;  %13019 = vmatpush3.msra.mxu1 %v9087_v60 }
0x16cf   : > { %13003 = vmatprep.subr.mxu0 %v8980_v50  ;;  %13020 = vmatprep.subr.mxu1 %v9086_v61 }
0x16d0   : > { %13004 = vmatpush3.msra.mxu0 %v8980_v50  ;;  %13021 = vmatpush3.msra.mxu1 %v9086_v61 }
0x16d1   : > { %13005 = vmatprep.subr.mxu0 %v8979_v52  ;;  %13022 = vmatprep.subr.mxu1 %v9085_v62 }
0x16d2   : > { %13006 = vmatpush3.msra.mxu0 %v8979_v52  ;;  %13023 = vmatpush3.msra.mxu1 %v9085_v62 }
0x16d3   : > { %13008 = vmatmul.mubr.msk.f32.vlgmr.msra.gmra.mxu0 %vm2594_vm4, %v8977_v53  ;;  %13024 = vmatprep.subr.mxu1 %v9084_v63 }
0x16d4   : > { %13025 = vmatpush3.msra.mxu1 %v9084_v63  ;;  %13029 = vmatprep.subr.mxu0 %v9187_v1 }
0x16d5   : > { %13030 = vmatpush3.msra.mxu0 %v9187_v1 }
0x16d6   : > { %13031 = vmatprep.subr.mxu0 %v9186_v2 }
0x16d7   : > { %13032 = vmatpush3.msra.mxu0 %v9186_v2 }
0x16d8   : > { %13033 = vmatprep.subr.mxu0 %v9185_v3 }
0x16d9   : > { %13034 = vmatpush3.msra.mxu0 %v9185_v3 }
0x16da   : > { %13035 = vmatprep.subr.mxu0 %v9184_v4 }
0x16db   : > { %13036 = vmatpush3.msra.mxu0 %v9184_v4 }
0x16dc   : > { %13037 = vmatprep.subr.mxu0 %v9183_v38 }
0x16dd   : > { %13038 = vmatpush3.msra.mxu0 %v9183_v38 }
0x16de   : > { %13039 = vmatprep.subr.mxu0 %v9182_v25 }
0x16df   : > { %13040 = vmatpush3.msra.mxu0 %v9182_v25 }
0x16e0   : > { %13041 = vmatprep.subr.mxu0 %v9181_v26 }
0x16e1   : > { %13042 = vmatpush3.msra.mxu0 %v9181_v26 }
0x16e2   : > { %13043 = vmatprep.subr.mxu0 %v9180_v28 }
0x16e3   : > { %13044 = vmatpush3.msra.mxu0 %v9180_v28 }
0x1783   : > { %v12971_v5 = vpop.f32.mrf.mxu0 }
0x1784   : > { %v12990_v6 = vpop.f32.mrf.mxu1 }
0x1785   : > { %v8886_v0 = vpop.f32.mrf.mxu0  ;;  %v8973_v7 = vadd.f32 %v12990_v6, %v12971_v5 }
0x1786   : > { %v8967_v59 = vpop.f32.mrf.mxu1 }
0x1787   : > { %v8968_v9 = vadd.f32 %v8967_v59, %v8886_v0 }
0x1793   : > { %v13009_v8 = vpop.f32.mrf.mxu0 }
0x1794   : > { %v9069_v10 = vadd.f32 %v13009_v8, %v8973_v7 }
0x1795   : > { %v9059_v11 = vpop.f32.mrf.mxu0 }
0x1796   : > { %v9071_v55 = vsub.f32 0.0, %v9069_v10  ;;  %v9068_v16 = vadd.f32 %v9059_v11, %v8968_v9 }
0x1798   : > { %v9074_v12 = vmul.f32 1.442695, %v9071_v55  ;;  %v9070_v14 = vsub.f32 0.0, %v9068_v16 }
0x179a   : > { %13454 = vpow2.f32 %v9074_v12  ;;  %v9072_v15 = vmul.f32 1.442695, %v9070_v14 }
0x179c   : > { %13456 = vpow2.f32 %v9072_v15 }
0x17a7   : > { %v13455_v51 = vpop.eup %13454 }
0x17a8   : > { %v9077_v17 = vadd.f32 1.0, %v13455_v51 }
0x17a9   : > { %v13457_v18 = vpop.eup %13456 }
0x17aa   : > { %v9076_v19 = vadd.f32 1.0, %v13457_v18  ;;  %13458 = vrcp.f32 %v9077_v17 }
0x17ac   : > { %13460 = vrcp.f32 %v9076_v19 }
0x17b7   : > { %v13459_v20 = vpop.eup %13458 }
0x17b8   : > { %v9083_v23 = vmul.f32 %v13459_v20, %v16872_v37 }
0x17b9   : > { %v13461_v21 = vpop.eup %13460 }
0x17ba   : > { %v9082_v22 = vmul.f32 %v13461_v21, %v16874_v39 }
0x17bc   : > { %13026 = vmatprep.mubr.msk.f32.mxu1 %vm2594_vm4, %v9082_v22 }
0x17bd   : > { %13027 = vmatmul.mubr.msk.f32.vlgmr.msra.gmra.mxu1 %vm2594_vm4, %v9083_v23 }
0x187d   : > { %v13028_v29 = vpop.f32.mrf.mxu1 }
0x187e   : > { %v9177_v32 = vadd.f32 %v13028_v29, %v10289_v30 }
0x187f   : > { %v9171_v24 = vpop.f32.mrf.mxu1 }
0x1880   : > { %v9172_v31 = vadd.f32 %v10289_v30, %v9171_v24 }
0x1882   : > { %13045 = vmatprep.mubr.msk.f32.mxu0 %vm2594_vm4, %v9172_v31 }
0x1883   : > { %13046 = vmatmul.mubr.msk.f32.vlgmr.msra.gmra.mxu0 %vm2594_vm4, %v9177_v32 }
0x1943   : > { %v13047_v42 = vpop.f32.mrf.mxu0 }
0x1944   : > { %v9273_v34 = vadd.f32 %v13047_v42, %v10292_v33 }
0x1945   : > { %v9267_v40 = vpop.f32.mrf.mxu0 }
0x1946   : > { %9277 = vst.msk [vmem:[%s2303_s16 + $0x8] sm:$0xff] %vm2311_vm2, %v9273_v34  ;;  %v9268_v35 = vadd.f32 %v10292_v33, %v9267_v40 }
0x1948   : > { %9276 = vst.msk [vmem:[%s2303_s16] sm:$0xff] %vm2311_vm2, %v9268_v35 }
0x1949 PF: > { %s148_s0 = sadd.s32 1, %s14644_s0  }
0x194a   : > { %p145_p3 = scmp.ge.s32.totalorder %s148_s0, 4  }
0x194c   :  { %147 = sbr.rel (!%p145_p3) target bundleno = 130 (0x82), region = 558 }
0x1951   :  { %9299 = vsyncpa [#allocation4], 1 }
0x1952   :  { %9301 = vsyncpa [#allocation4 + $0x1], 1 }
0x1953   :  { %9302 = vsyncpa [#allocation6], 1 }
0x1954   :  { %9303 = vsyncpa [#allocation9], 1 }
0x1955   :  { %9304 = vsyncpa [#allocation12], 1 }
0x1956   :  { %9305 = vsyncpa [#allocation15], 1 }
0x1957   :  { %9306 = vsyncpa [#allocation18], 1 }
0x1958   :  { %9307 = vsyncpa [#allocation21], 1 }
0x1959   :  { %9308 = vsyncpa [#allocation24], 1 }
0x195a   :  { %9309 = vsyncpa [#allocation27], 1 }
0x195b   :  { %9310 = vsyncpa [#allocation30], 1 }
0x195c   :  { %9311 = vsyncpa [#allocation33], 1 }
0x195d   :  { %9312 = vsyncpa [#allocation36], 1 }
0x195e   :  { %9313 = vsyncpa [#allocation39], 1 }
0x195f   :  { %9314 = vsyncpa [#allocation42], 1 }
0x1960   :  { %9315 = vsyncpa [#allocation45], 1 }
0x1961   :  { %9316 = vsyncpa [#allocation48], 1 }
0x1962   :  { %9317 = vsyncpa [#allocation51], 1 }
0x1963   :  { %9318 = vsyncpa [#allocation54], 1 }
0x1964   :  { %9319 = vsyncpa [#allocation57], 1 }
0x1965   :  { %9320 = vsyncpa [#allocation60], 1 }
0x1966   :  { %9321 = vsyncpa [#allocation63], 1 }
0x1967   :  { %9322 = vsyncpa [#allocation66], 1 }
0x1968   :  { %9323 = vsyncpa [#allocation69], 1 }

</bundles_post_ra>
